<compile_context>
chip_gen: v6e
topology: v6e:2x2x1
jax: 0.10.0
libtpu: 0.0.40
codegen_flags: <defaults>
</compile_context>

<pallas_src>
import functools

import jax
import jax.numpy as jnp
from jax import lax
from jax.experimental import pallas as pl
from jax.experimental.pallas import tpu as pltpu

FC1_PAD = 128   # fc1 width (100) padded to lane-dense 128
OUT_PAD = 128   # fc2 output width (1) padded to lane-dense 128


def _lstm_head_kernel(
    xproj_ref,    # (T, B, 4H)  precomputed x @ W_ih1^T + (b_ih1 + b_hh1), time-major
    whh1_ref,     # (H, 4H)     W_hh1^T
    wcat2_ref,    # (2H, 4H)    [W_ih2^T ; W_hh2^T]
    b2_ref,       # (1, 4H)     b_ih2 + b_hh2
    wfc1_ref,     # (H, FC1_PAD)
    bfc1_ref,     # (1, FC1_PAD)
    wfc2_ref,     # (FC1_PAD, OUT_PAD)
    bfc2_ref,     # (1, OUT_PAD)
    out_ref,      # (B, OUT_PAD)
    *, hidden_size: int, seq_len: int, batch: int,
):
    H = hidden_size
    B = batch

    # Hoist weight loads / bias broadcast out of the time loop (no CSE of
    # broadcast_in_dim inside the loop otherwise).
    whh1 = whh1_ref[...]
    wcat2 = wcat2_ref[...]
    b2 = jnp.broadcast_to(b2_ref[...], (B, 4 * H))

    def gates_to_hc(gates, c):
        i = jax.nn.sigmoid(gates[:, 0:H])
        f = jax.nn.sigmoid(gates[:, H:2 * H])
        g = jnp.tanh(gates[:, 2 * H:3 * H])
        o = jax.nn.sigmoid(gates[:, 3 * H:4 * H])
        c_new = f * c + i * g
        h_new = o * jnp.tanh(c_new)
        return h_new, c_new

    def step(t, carry):
        h1, c1, h2, c2 = carry
        # Layer 1: x-projection is precomputed; only the recurrent matmul remains.
        g1 = xproj_ref[t] + jnp.dot(h1, whh1, preferred_element_type=jnp.float32)
        h1, c1 = gates_to_hc(g1, c1)
        # Layer 2: fused [h1, h2] @ [W_ih2^T ; W_hh2^T] -> single K=2H matmul.
        hcat = jnp.concatenate([h1, h2], axis=-1)
        g2 = jnp.dot(hcat, wcat2, preferred_element_type=jnp.float32) + b2
        h2, c2 = gates_to_hc(g2, c2)
        return h1, c1, h2, c2

    zeros = jnp.zeros((B, H), jnp.float32)
    _, _, h2, _ = lax.fori_loop(
        0, seq_len, step, (zeros, zeros, zeros, zeros), unroll=True)

    # FC head on the top layer's last hidden state (lane-dense padded shapes).
    z1 = jnp.dot(h2, wfc1_ref[...], preferred_element_type=jnp.float32) + bfc1_ref[...]
    z1 = jnp.maximum(z1, 0.0)                                     # ReLU
    z2 = jnp.dot(z1, wfc2_ref[...], preferred_element_type=jnp.float32) + bfc2_ref[...]
    out_ref[...] = jax.nn.sigmoid(z2)                             # Sigmoid


def lstm_model_forward(x, kp):
    """x: (B, T, F) float32 (batch_first, like nn.LSTM(batch_first=True))."""
    B, T, F = x.shape
    H = kp["whh1_t"].shape[0]

    # Layer-1 input projection for all timesteps at once (no recurrent
    # dependency); emitted time-major so the kernel indexes the leading axis.
    xproj = jnp.einsum(
        "btf,fg->tbg", x, kp["wih1_t"], precision=lax.Precision.HIGHEST
    ) + kp["b1"][None, None, :]

    kernel = functools.partial(
        _lstm_head_kernel, hidden_size=H, seq_len=T, batch=B)
    vmem = lambda: pl.BlockSpec(memory_space=pltpu.MemorySpace.VMEM)

    out = pl.pallas_call(
        kernel,
        out_shape=jax.ShapeDtypeStruct((B, OUT_PAD), jnp.float32),
        in_specs=[vmem() for _ in range(8)],
        out_specs=vmem(),
    )(
        xproj,
        kp["whh1_t"], kp["wcat2"], kp["b2"],
        kp["wfc1_p"], kp["bfc1_p"], kp["wfc2_p"], kp["bfc2_p"],
    )
    return out[:, :1]


def init_params(key, input_size, hidden_size):
    """Deterministic init mimicking PyTorch's U(-1/sqrt(H), 1/sqrt(H))."""
    H = hidden_size
    ks = jax.random.split(key, 12)
    s = 1.0 / jnp.sqrt(jnp.float32(H))
    u = lambda k, shape: jax.random.uniform(k, shape, jnp.float32, -s, s)

    # PyTorch layout: weight_ih_l* is (4H, in), weight_hh_l* is (4H, H);
    # we store transposes so matmuls are plain row-major x @ W^T.
    wih1 = u(ks[0], (4 * H, input_size))
    whh1 = u(ks[1], (4 * H, H))
    bih1 = u(ks[2], (4 * H,))
    bhh1 = u(ks[3], (4 * H,))
    wih2 = u(ks[4], (4 * H, H))
    whh2 = u(ks[5], (4 * H, H))
    bih2 = u(ks[6], (4 * H,))
    bhh2 = u(ks[7], (4 * H,))
    wfc1 = u(ks[8], (100, H))
    bfc1 = u(ks[9], (100,))
    wfc2 = u(ks[10], (1, 100))
    bfc2 = u(ks[11], (1,))

    return {
        "wih1_t": wih1.T, "whh1_t": whh1.T, "b1": bih1 + bhh1,
        "wih2_t": wih2.T, "whh2_t": whh2.T, "b2": bih2 + bhh2,
        "wfc1_t": wfc1.T, "bfc1": bfc1,
        "wfc2_t": wfc2.T, "bfc2": bfc2,
    }


def prepare_kernel_params(raw):
    """Fuse / pad raw (PyTorch-layout) params into kernel-friendly layouts."""
    H = raw["whh1_t"].shape[0]
    wcat2 = jnp.concatenate([raw["wih2_t"], raw["whh2_t"]], axis=0)   # (2H, 4H)
    wfc1_p = jnp.zeros((H, FC1_PAD), jnp.float32).at[:, :100].set(raw["wfc1_t"])
    bfc1_p = jnp.zeros((1, FC1_PAD), jnp.float32).at[0, :100].set(raw["bfc1"])
    wfc2_p = jnp.zeros((FC1_PAD, OUT_PAD), jnp.float32).at[:100, :1].set(raw["wfc2_t"])
    bfc2_p = jnp.zeros((1, OUT_PAD), jnp.float32).at[0, 0].set(raw["bfc2"][0])
    return {
        "wih1_t": raw["wih1_t"],
        "whh1_t": raw["whh1_t"],
        "b1": raw["b1"],
        "wcat2": wcat2,
        "b2": raw["b2"][None, :],
        "wfc1_p": wfc1_p, "bfc1_p": bfc1_p,
        "wfc2_p": wfc2_p, "bfc2_p": bfc2_p,
    }


def reference_forward(x, raw):
    """Pure-JAX reference matching nn.LSTM + fc head semantics."""
    B, T, F = x.shape
    H = raw["whh1_t"].shape[0]
    hp = lax.Precision.HIGHEST

    def cell(x_in, h, c, wih_t, whh_t, b):
        g = (jnp.dot(x_in, wih_t, precision=hp)
             + jnp.dot(h, whh_t, precision=hp) + b)
        i = jax.nn.sigmoid(g[:, 0:H])
        f = jax.nn.sigmoid(g[:, H:2 * H])
        gg = jnp.tanh(g[:, 2 * H:3 * H])
        o = jax.nn.sigmoid(g[:, 3 * H:4 * H])
        c_new = f * c + i * gg
        return o * jnp.tanh(c_new), c_new

    h1 = c1 = h2 = c2 = jnp.zeros((B, H), jnp.float32)
    for t in range(T):
        x_t = x[:, t, :]
        h1, c1 = cell(x_t, h1, c1, raw["wih1_t"], raw["whh1_t"], raw["b1"])
        h2, c2 = cell(h1, h2, c2, raw["wih2_t"], raw["whh2_t"], raw["b2"])
    z1 = jnp.maximum(jnp.dot(h2, raw["wfc1_t"], precision=hp) + raw["bfc1"], 0.0)
    return jax.nn.sigmoid(jnp.dot(z1, raw["wfc2_t"], precision=hp) + raw["bfc2"])


if __name__ == "__main__":
    B, T, F, H = 8, 8, 16, 128   # batch, seq, input_size, hidden_size

    key = jax.random.PRNGKey(0)
    k_x, k_p = jax.random.split(key)
    x = jax.random.normal(k_x, (B, T, F), dtype=jnp.float32)

    raw = init_params(k_p, F, H)
    kp = prepare_kernel_params(raw)

    fwd = jax.jit(lstm_model_forward)
    out = jax.block_until_ready(fwd(x, kp))

    ref = reference_forward(x, raw)
    assert out.shape == (B, 1)
    assert jnp.allclose(out, ref, atol=1e-5, rtol=1e-5), (
        f"mismatch: max abs err {jnp.max(jnp.abs(out - ref))}"
    )
    print("KERNEL_OK")
</pallas_src>

<mosaic_0001>
module attributes {stable_mosaic.version = 11 : i64} {
  func.func @_lstm_head_kernel(%arg0: memref<8x8x512xf32, #tpu.memory_space<vmem>>, %arg1: memref<128x512xf32, #tpu.memory_space<vmem>>, %arg2: memref<256x512xf32, #tpu.memory_space<vmem>>, %arg3: memref<1x512xf32, #tpu.memory_space<vmem>>, %arg4: memref<128x128xf32, #tpu.memory_space<vmem>>, %arg5: memref<1x128xf32, #tpu.memory_space<vmem>>, %arg6: memref<128x128xf32, #tpu.memory_space<vmem>>, %arg7: memref<1x128xf32, #tpu.memory_space<vmem>>, %arg8: memref<8x128xf32, #tpu.memory_space<vmem>>) attributes {dimension_semantics = [], scalar_prefetch = 0 : i64, scratch_operands = 0 : i64, tpu.core_type = #tpu.core_type<tc>} {
    %c0 = arith.constant 0 : index
    %c0_0 = arith.constant 0 : index
    %0 = vector.load %arg1[%c0, %c0_0] : memref<128x512xf32, #tpu.memory_space<vmem>>, vector<128x512xf32>
    %c0_1 = arith.constant 0 : index
    %c0_2 = arith.constant 0 : index
    %1 = vector.load %arg2[%c0_1, %c0_2] : memref<256x512xf32, #tpu.memory_space<vmem>>, vector<256x512xf32>
    %c0_3 = arith.constant 0 : index
    %c0_4 = arith.constant 0 : index
    %2 = vector.load %arg3[%c0_3, %c0_4] : memref<1x512xf32, #tpu.memory_space<vmem>>, vector<1x512xf32>
    %3 = vector.shape_cast %2 : vector<1x512xf32> to vector<1x512xf32>
    %4 = vector.broadcast %3 : vector<1x512xf32> to vector<8x512xf32>
    %cst = arith.constant 0.000000e+00 : f32
    %5 = vector.broadcast %cst : f32 to vector<8x128xf32>
    %c0_i32 = arith.constant 0 : i32
    %6 = arith.index_cast %c0_i32 : i32 to index
    %c0_5 = arith.constant 0 : index
    %c0_6 = arith.constant 0 : index
    %7 = vector.load %arg0[%6, %c0_5, %c0_6] : memref<8x8x512xf32, #tpu.memory_space<vmem>>, vector<1x8x512xf32>
    %8 = vector.shape_cast %7 : vector<1x8x512xf32> to vector<8x512xf32>
    %cst_7 = arith.constant dense<0.000000e+00> : vector<8x512xf32>
    %9 = tpu.matmul %5, %0, %cst_7 {dimension_numbers = #tpu.dot_dimension_numbers<[1], [0], [0], [1], [0, 0, 1, 1], [], []>} : vector<8x128xf32>, vector<128x512xf32>, vector<8x512xf32> -> vector<8x512xf32>
    %10 = arith.addf %8, %9 : vector<8x512xf32>
    %11 = vector.extract_strided_slice %10 {offsets = [0, 0], sizes = [8, 128], strides = [1, 1]} : vector<8x512xf32> to vector<8x128xf32>
    %12 = arith.negf %11 : vector<8x128xf32>
    %13 = math.exp %12 : vector<8x128xf32>
    %cst_8 = arith.constant 1.000000e+00 : f32
    %14 = vector.broadcast %cst_8 : f32 to vector<8x128xf32>
    %15 = arith.addf %14, %13 : vector<8x128xf32>
    %16 = arith.divf %14, %15 : vector<8x128xf32>
    %17 = vector.extract_strided_slice %10 {offsets = [0, 128], sizes = [8, 128], strides = [1, 1]} : vector<8x512xf32> to vector<8x128xf32>
    %18 = arith.negf %17 : vector<8x128xf32>
    %19 = math.exp %18 : vector<8x128xf32>
    %cst_9 = arith.constant 1.000000e+00 : f32
    %20 = vector.broadcast %cst_9 : f32 to vector<8x128xf32>
    %21 = arith.addf %20, %19 : vector<8x128xf32>
    %22 = arith.divf %20, %21 : vector<8x128xf32>
    %23 = vector.extract_strided_slice %10 {offsets = [0, 256], sizes = [8, 128], strides = [1, 1]} : vector<8x512xf32> to vector<8x128xf32>
    %24 = math.tanh %23 : vector<8x128xf32>
    %25 = vector.extract_strided_slice %10 {offsets = [0, 384], sizes = [8, 128], strides = [1, 1]} : vector<8x512xf32> to vector<8x128xf32>
    %26 = arith.negf %25 : vector<8x128xf32>
    %27 = math.exp %26 : vector<8x128xf32>
    %cst_10 = arith.constant 1.000000e+00 : f32
    %28 = vector.broadcast %cst_10 : f32 to vector<8x128xf32>
    %29 = arith.addf %28, %27 : vector<8x128xf32>
    %30 = arith.divf %28, %29 : vector<8x128xf32>
    %31 = arith.mulf %22, %5 : vector<8x128xf32>
    %32 = arith.mulf %16, %24 : vector<8x128xf32>
    %33 = arith.addf %31, %32 : vector<8x128xf32>
    %34 = math.tanh %33 : vector<8x128xf32>
    %35 = arith.mulf %30, %34 : vector<8x128xf32>
    %36 = tpu.concatenate %35, %5 in 1 : vector<8x128xf32>, vector<8x128xf32> -> vector<8x256xf32>
    %cst_11 = arith.constant dense<0.000000e+00> : vector<8x512xf32>
    %37 = tpu.matmul %36, %1, %cst_11 {dimension_numbers = #tpu.dot_dimension_numbers<[1], [0], [0], [1], [0, 0, 1, 1], [], []>} : vector<8x256xf32>, vector<256x512xf32>, vector<8x512xf32> -> vector<8x512xf32>
    %38 = arith.addf %37, %4 : vector<8x512xf32>
    %39 = vector.extract_strided_slice %38 {offsets = [0, 0], sizes = [8, 128], strides = [1, 1]} : vector<8x512xf32> to vector<8x128xf32>
    %40 = arith.negf %39 : vector<8x128xf32>
    %41 = math.exp %40 : vector<8x128xf32>
    %cst_12 = arith.constant 1.000000e+00 : f32
    %42 = vector.broadcast %cst_12 : f32 to vector<8x128xf32>
    %43 = arith.addf %42, %41 : vector<8x128xf32>
    %44 = arith.divf %42, %43 : vector<8x128xf32>
    %45 = vector.extract_strided_slice %38 {offsets = [0, 128], sizes = [8, 128], strides = [1, 1]} : vector<8x512xf32> to vector<8x128xf32>
    %46 = arith.negf %45 : vector<8x128xf32>
    %47 = math.exp %46 : vector<8x128xf32>
    %cst_13 = arith.constant 1.000000e+00 : f32
    %48 = vector.broadcast %cst_13 : f32 to vector<8x128xf32>
    %49 = arith.addf %48, %47 : vector<8x128xf32>
    %50 = arith.divf %48, %49 : vector<8x128xf32>
    %51 = vector.extract_strided_slice %38 {offsets = [0, 256], sizes = [8, 128], strides = [1, 1]} : vector<8x512xf32> to vector<8x128xf32>
    %52 = math.tanh %51 : vector<8x128xf32>
    %53 = vector.extract_strided_slice %38 {offsets = [0, 384], sizes = [8, 128], strides = [1, 1]} : vector<8x512xf32> to vector<8x128xf32>
    %54 = arith.negf %53 : vector<8x128xf32>
    %55 = math.exp %54 : vector<8x128xf32>
    %cst_14 = arith.constant 1.000000e+00 : f32
    %56 = vector.broadcast %cst_14 : f32 to vector<8x128xf32>
    %57 = arith.addf %56, %55 : vector<8x128xf32>
    %58 = arith.divf %56, %57 : vector<8x128xf32>
    %59 = arith.mulf %50, %5 : vector<8x128xf32>
    %60 = arith.mulf %44, %52 : vector<8x128xf32>
    %61 = arith.addf %59, %60 : vector<8x128xf32>
    %62 = math.tanh %61 : vector<8x128xf32>
    %63 = arith.mulf %58, %62 : vector<8x128xf32>
    %c1_i32 = arith.constant 1 : i32
    %64 = arith.index_cast %c1_i32 : i32 to index
    %c0_15 = arith.constant 0 : index
    %c0_16 = arith.constant 0 : index
    %65 = vector.load %arg0[%64, %c0_15, %c0_16] : memref<8x8x512xf32, #tpu.memory_space<vmem>>, vector<1x8x512xf32>
    %66 = vector.shape_cast %65 : vector<1x8x512xf32> to vector<8x512xf32>
    %cst_17 = arith.constant dense<0.000000e+00> : vector<8x512xf32>
    %67 = tpu.matmul %35, %0, %cst_17 {dimension_numbers = #tpu.dot_dimension_numbers<[1], [0], [0], [1], [0, 0, 1, 1], [], []>} : vector<8x128xf32>, vector<128x512xf32>, vector<8x512xf32> -> vector<8x512xf32>
    %68 = arith.addf %66, %67 : vector<8x512xf32>
    %69 = vector.extract_strided_slice %68 {offsets = [0, 0], sizes = [8, 128], strides = [1, 1]} : vector<8x512xf32> to vector<8x128xf32>
    %70 = arith.negf %69 : vector<8x128xf32>
    %71 = math.exp %70 : vector<8x128xf32>
    %cst_18 = arith.constant 1.000000e+00 : f32
    %72 = vector.broadcast %cst_18 : f32 to vector<8x128xf32>
    %73 = arith.addf %72, %71 : vector<8x128xf32>
    %74 = arith.divf %72, %73 : vector<8x128xf32>
    %75 = vector.extract_strided_slice %68 {offsets = [0, 128], sizes = [8, 128], strides = [1, 1]} : vector<8x512xf32> to vector<8x128xf32>
    %76 = arith.negf %75 : vector<8x128xf32>
    %77 = math.exp %76 : vector<8x128xf32>
    %cst_19 = arith.constant 1.000000e+00 : f32
    %78 = vector.broadcast %cst_19 : f32 to vector<8x128xf32>
    %79 = arith.addf %78, %77 : vector<8x128xf32>
    %80 = arith.divf %78, %79 : vector<8x128xf32>
    %81 = vector.extract_strided_slice %68 {offsets = [0, 256], sizes = [8, 128], strides = [1, 1]} : vector<8x512xf32> to vector<8x128xf32>
    %82 = math.tanh %81 : vector<8x128xf32>
    %83 = vector.extract_strided_slice %68 {offsets = [0, 384], sizes = [8, 128], strides = [1, 1]} : vector<8x512xf32> to vector<8x128xf32>
    %84 = arith.negf %83 : vector<8x128xf32>
    %85 = math.exp %84 : vector<8x128xf32>
    %cst_20 = arith.constant 1.000000e+00 : f32
    %86 = vector.broadcast %cst_20 : f32 to vector<8x128xf32>
    %87 = arith.addf %86, %85 : vector<8x128xf32>
    %88 = arith.divf %86, %87 : vector<8x128xf32>
    %89 = arith.mulf %80, %33 : vector<8x128xf32>
    %90 = arith.mulf %74, %82 : vector<8x128xf32>
    %91 = arith.addf %89, %90 : vector<8x128xf32>
    %92 = math.tanh %91 : vector<8x128xf32>
    %93 = arith.mulf %88, %92 : vector<8x128xf32>
    %94 = tpu.concatenate %93, %63 in 1 : vector<8x128xf32>, vector<8x128xf32> -> vector<8x256xf32>
    %cst_21 = arith.constant dense<0.000000e+00> : vector<8x512xf32>
    %95 = tpu.matmul %94, %1, %cst_21 {dimension_numbers = #tpu.dot_dimension_numbers<[1], [0], [0], [1], [0, 0, 1, 1], [], []>} : vector<8x256xf32>, vector<256x512xf32>, vector<8x512xf32> -> vector<8x512xf32>
    %96 = arith.addf %95, %4 : vector<8x512xf32>
    %97 = vector.extract_strided_slice %96 {offsets = [0, 0], sizes = [8, 128], strides = [1, 1]} : vector<8x512xf32> to vector<8x128xf32>
    %98 = arith.negf %97 : vector<8x128xf32>
    %99 = math.exp %98 : vector<8x128xf32>
    %cst_22 = arith.constant 1.000000e+00 : f32
    %100 = vector.broadcast %cst_22 : f32 to vector<8x128xf32>
    %101 = arith.addf %100, %99 : vector<8x128xf32>
    %102 = arith.divf %100, %101 : vector<8x128xf32>
    %103 = vector.extract_strided_slice %96 {offsets = [0, 128], sizes = [8, 128], strides = [1, 1]} : vector<8x512xf32> to vector<8x128xf32>
    %104 = arith.negf %103 : vector<8x128xf32>
    %105 = math.exp %104 : vector<8x128xf32>
    %cst_23 = arith.constant 1.000000e+00 : f32
    %106 = vector.broadcast %cst_23 : f32 to vector<8x128xf32>
    %107 = arith.addf %106, %105 : vector<8x128xf32>
    %108 = arith.divf %106, %107 : vector<8x128xf32>
    %109 = vector.extract_strided_slice %96 {offsets = [0, 256], sizes = [8, 128], strides = [1, 1]} : vector<8x512xf32> to vector<8x128xf32>
    %110 = math.tanh %109 : vector<8x128xf32>
    %111 = vector.extract_strided_slice %96 {offsets = [0, 384], sizes = [8, 128], strides = [1, 1]} : vector<8x512xf32> to vector<8x128xf32>
    %112 = arith.negf %111 : vector<8x128xf32>
    %113 = math.exp %112 : vector<8x128xf32>
    %cst_24 = arith.constant 1.000000e+00 : f32
    %114 = vector.broadcast %cst_24 : f32 to vector<8x128xf32>
    %115 = arith.addf %114, %113 : vector<8x128xf32>
    %116 = arith.divf %114, %115 : vector<8x128xf32>
    %117 = arith.mulf %108, %61 : vector<8x128xf32>
    %118 = arith.mulf %102, %110 : vector<8x128xf32>
    %119 = arith.addf %117, %118 : vector<8x128xf32>
    %120 = math.tanh %119 : vector<8x128xf32>
    %121 = arith.mulf %116, %120 : vector<8x128xf32>
    %c2_i32 = arith.constant 2 : i32
    %122 = arith.index_cast %c2_i32 : i32 to index
    %c0_25 = arith.constant 0 : index
    %c0_26 = arith.constant 0 : index
    %123 = vector.load %arg0[%122, %c0_25, %c0_26] : memref<8x8x512xf32, #tpu.memory_space<vmem>>, vector<1x8x512xf32>
    %124 = vector.shape_cast %123 : vector<1x8x512xf32> to vector<8x512xf32>
    %cst_27 = arith.constant dense<0.000000e+00> : vector<8x512xf32>
    %125 = tpu.matmul %93, %0, %cst_27 {dimension_numbers = #tpu.dot_dimension_numbers<[1], [0], [0], [1], [0, 0, 1, 1], [], []>} : vector<8x128xf32>, vector<128x512xf32>, vector<8x512xf32> -> vector<8x512xf32>
    %126 = arith.addf %124, %125 : vector<8x512xf32>
    %127 = vector.extract_strided_slice %126 {offsets = [0, 0], sizes = [8, 128], strides = [1, 1]} : vector<8x512xf32> to vector<8x128xf32>
    %128 = arith.negf %127 : vector<8x128xf32>
    %129 = math.exp %128 : vector<8x128xf32>
    %cst_28 = arith.constant 1.000000e+00 : f32
    %130 = vector.broadcast %cst_28 : f32 to vector<8x128xf32>
    %131 = arith.addf %130, %129 : vector<8x128xf32>
    %132 = arith.divf %130, %131 : vector<8x128xf32>
    %133 = vector.extract_strided_slice %126 {offsets = [0, 128], sizes = [8, 128], strides = [1, 1]} : vector<8x512xf32> to vector<8x128xf32>
    %134 = arith.negf %133 : vector<8x128xf32>
    %135 = math.exp %134 : vector<8x128xf32>
    %cst_29 = arith.constant 1.000000e+00 : f32
    %136 = vector.broadcast %cst_29 : f32 to vector<8x128xf32>
    %137 = arith.addf %136, %135 : vector<8x128xf32>
    %138 = arith.divf %136, %137 : vector<8x128xf32>
    %139 = vector.extract_strided_slice %126 {offsets = [0, 256], sizes = [8, 128], strides = [1, 1]} : vector<8x512xf32> to vector<8x128xf32>
    %140 = math.tanh %139 : vector<8x128xf32>
    %141 = vector.extract_strided_slice %126 {offsets = [0, 384], sizes = [8, 128], strides = [1, 1]} : vector<8x512xf32> to vector<8x128xf32>
    %142 = arith.negf %141 : vector<8x128xf32>
    %143 = math.exp %142 : vector<8x128xf32>
    %cst_30 = arith.constant 1.000000e+00 : f32
    %144 = vector.broadcast %cst_30 : f32 to vector<8x128xf32>
    %145 = arith.addf %144, %143 : vector<8x128xf32>
    %146 = arith.divf %144, %145 : vector<8x128xf32>
    %147 = arith.mulf %138, %91 : vector<8x128xf32>
    %148 = arith.mulf %132, %140 : vector<8x128xf32>
    %149 = arith.addf %147, %148 : vector<8x128xf32>
    %150 = math.tanh %149 : vector<8x128xf32>
    %151 = arith.mulf %146, %150 : vector<8x128xf32>
    %152 = tpu.concatenate %151, %121 in 1 : vector<8x128xf32>, vector<8x128xf32> -> vector<8x256xf32>
    %cst_31 = arith.constant dense<0.000000e+00> : vector<8x512xf32>
    %153 = tpu.matmul %152, %1, %cst_31 {dimension_numbers = #tpu.dot_dimension_numbers<[1], [0], [0], [1], [0, 0, 1, 1], [], []>} : vector<8x256xf32>, vector<256x512xf32>, vector<8x512xf32> -> vector<8x512xf32>
    %154 = arith.addf %153, %4 : vector<8x512xf32>
    %155 = vector.extract_strided_slice %154 {offsets = [0, 0], sizes = [8, 128], strides = [1, 1]} : vector<8x512xf32> to vector<8x128xf32>
    %156 = arith.negf %155 : vector<8x128xf32>
    %157 = math.exp %156 : vector<8x128xf32>
    %cst_32 = arith.constant 1.000000e+00 : f32
    %158 = vector.broadcast %cst_32 : f32 to vector<8x128xf32>
    %159 = arith.addf %158, %157 : vector<8x128xf32>
    %160 = arith.divf %158, %159 : vector<8x128xf32>
    %161 = vector.extract_strided_slice %154 {offsets = [0, 128], sizes = [8, 128], strides = [1, 1]} : vector<8x512xf32> to vector<8x128xf32>
    %162 = arith.negf %161 : vector<8x128xf32>
    %163 = math.exp %162 : vector<8x128xf32>
    %cst_33 = arith.constant 1.000000e+00 : f32
    %164 = vector.broadcast %cst_33 : f32 to vector<8x128xf32>
    %165 = arith.addf %164, %163 : vector<8x128xf32>
    %166 = arith.divf %164, %165 : vector<8x128xf32>
    %167 = vector.extract_strided_slice %154 {offsets = [0, 256], sizes = [8, 128], strides = [1, 1]} : vector<8x512xf32> to vector<8x128xf32>
    %168 = math.tanh %167 : vector<8x128xf32>
    %169 = vector.extract_strided_slice %154 {offsets = [0, 384], sizes = [8, 128], strides = [1, 1]} : vector<8x512xf32> to vector<8x128xf32>
    %170 = arith.negf %169 : vector<8x128xf32>
    %171 = math.exp %170 : vector<8x128xf32>
    %cst_34 = arith.constant 1.000000e+00 : f32
    %172 = vector.broadcast %cst_34 : f32 to vector<8x128xf32>
    %173 = arith.addf %172, %171 : vector<8x128xf32>
    %174 = arith.divf %172, %173 : vector<8x128xf32>
    %175 = arith.mulf %166, %119 : vector<8x128xf32>
    %176 = arith.mulf %160, %168 : vector<8x128xf32>
    %177 = arith.addf %175, %176 : vector<8x128xf32>
    %178 = math.tanh %177 : vector<8x128xf32>
    %179 = arith.mulf %174, %178 : vector<8x128xf32>
    %c3_i32 = arith.constant 3 : i32
    %180 = arith.index_cast %c3_i32 : i32 to index
    %c0_35 = arith.constant 0 : index
    %c0_36 = arith.constant 0 : index
    %181 = vector.load %arg0[%180, %c0_35, %c0_36] : memref<8x8x512xf32, #tpu.memory_space<vmem>>, vector<1x8x512xf32>
    %182 = vector.shape_cast %181 : vector<1x8x512xf32> to vector<8x512xf32>
    %cst_37 = arith.constant dense<0.000000e+00> : vector<8x512xf32>
    %183 = tpu.matmul %151, %0, %cst_37 {dimension_numbers = #tpu.dot_dimension_numbers<[1], [0], [0], [1], [0, 0, 1, 1], [], []>} : vector<8x128xf32>, vector<128x512xf32>, vector<8x512xf32> -> vector<8x512xf32>
    %184 = arith.addf %182, %183 : vector<8x512xf32>
    %185 = vector.extract_strided_slice %184 {offsets = [0, 0], sizes = [8, 128], strides = [1, 1]} : vector<8x512xf32> to vector<8x128xf32>
    %186 = arith.negf %185 : vector<8x128xf32>
    %187 = math.exp %186 : vector<8x128xf32>
    %cst_38 = arith.constant 1.000000e+00 : f32
    %188 = vector.broadcast %cst_38 : f32 to vector<8x128xf32>
    %189 = arith.addf %188, %187 : vector<8x128xf32>
    %190 = arith.divf %188, %189 : vector<8x128xf32>
    %191 = vector.extract_strided_slice %184 {offsets = [0, 128], sizes = [8, 128], strides = [1, 1]} : vector<8x512xf32> to vector<8x128xf32>
    %192 = arith.negf %191 : vector<8x128xf32>
    %193 = math.exp %192 : vector<8x128xf32>
    %cst_39 = arith.constant 1.000000e+00 : f32
    %194 = vector.broadcast %cst_39 : f32 to vector<8x128xf32>
    %195 = arith.addf %194, %193 : vector<8x128xf32>
    %196 = arith.divf %194, %195 : vector<8x128xf32>
    %197 = vector.extract_strided_slice %184 {offsets = [0, 256], sizes = [8, 128], strides = [1, 1]} : vector<8x512xf32> to vector<8x128xf32>
    %198 = math.tanh %197 : vector<8x128xf32>
    %199 = vector.extract_strided_slice %184 {offsets = [0, 384], sizes = [8, 128], strides = [1, 1]} : vector<8x512xf32> to vector<8x128xf32>
    %200 = arith.negf %199 : vector<8x128xf32>
    %201 = math.exp %200 : vector<8x128xf32>
    %cst_40 = arith.constant 1.000000e+00 : f32
    %202 = vector.broadcast %cst_40 : f32 to vector<8x128xf32>
    %203 = arith.addf %202, %201 : vector<8x128xf32>
    %204 = arith.divf %202, %203 : vector<8x128xf32>
    %205 = arith.mulf %196, %149 : vector<8x128xf32>
    %206 = arith.mulf %190, %198 : vector<8x128xf32>
    %207 = arith.addf %205, %206 : vector<8x128xf32>
    %208 = math.tanh %207 : vector<8x128xf32>
    %209 = arith.mulf %204, %208 : vector<8x128xf32>
    %210 = tpu.concatenate %209, %179 in 1 : vector<8x128xf32>, vector<8x128xf32> -> vector<8x256xf32>
    %cst_41 = arith.constant dense<0.000000e+00> : vector<8x512xf32>
    %211 = tpu.matmul %210, %1, %cst_41 {dimension_numbers = #tpu.dot_dimension_numbers<[1], [0], [0], [1], [0, 0, 1, 1], [], []>} : vector<8x256xf32>, vector<256x512xf32>, vector<8x512xf32> -> vector<8x512xf32>
    %212 = arith.addf %211, %4 : vector<8x512xf32>
    %213 = vector.extract_strided_slice %212 {offsets = [0, 0], sizes = [8, 128], strides = [1, 1]} : vector<8x512xf32> to vector<8x128xf32>
    %214 = arith.negf %213 : vector<8x128xf32>
    %215 = math.exp %214 : vector<8x128xf32>
    %cst_42 = arith.constant 1.000000e+00 : f32
    %216 = vector.broadcast %cst_42 : f32 to vector<8x128xf32>
    %217 = arith.addf %216, %215 : vector<8x128xf32>
    %218 = arith.divf %216, %217 : vector<8x128xf32>
    %219 = vector.extract_strided_slice %212 {offsets = [0, 128], sizes = [8, 128], strides = [1, 1]} : vector<8x512xf32> to vector<8x128xf32>
    %220 = arith.negf %219 : vector<8x128xf32>
    %221 = math.exp %220 : vector<8x128xf32>
    %cst_43 = arith.constant 1.000000e+00 : f32
    %222 = vector.broadcast %cst_43 : f32 to vector<8x128xf32>
    %223 = arith.addf %222, %221 : vector<8x128xf32>
    %224 = arith.divf %222, %223 : vector<8x128xf32>
    %225 = vector.extract_strided_slice %212 {offsets = [0, 256], sizes = [8, 128], strides = [1, 1]} : vector<8x512xf32> to vector<8x128xf32>
    %226 = math.tanh %225 : vector<8x128xf32>
    %227 = vector.extract_strided_slice %212 {offsets = [0, 384], sizes = [8, 128], strides = [1, 1]} : vector<8x512xf32> to vector<8x128xf32>
    %228 = arith.negf %227 : vector<8x128xf32>
    %229 = math.exp %228 : vector<8x128xf32>
    %cst_44 = arith.constant 1.000000e+00 : f32
    %230 = vector.broadcast %cst_44 : f32 to vector<8x128xf32>
    %231 = arith.addf %230, %229 : vector<8x128xf32>
    %232 = arith.divf %230, %231 : vector<8x128xf32>
    %233 = arith.mulf %224, %177 : vector<8x128xf32>
    %234 = arith.mulf %218, %226 : vector<8x128xf32>
    %235 = arith.addf %233, %234 : vector<8x128xf32>
    %236 = math.tanh %235 : vector<8x128xf32>
    %237 = arith.mulf %232, %236 : vector<8x128xf32>
    %c4_i32 = arith.constant 4 : i32
    %238 = arith.index_cast %c4_i32 : i32 to index
    %c0_45 = arith.constant 0 : index
    %c0_46 = arith.constant 0 : index
    %239 = vector.load %arg0[%238, %c0_45, %c0_46] : memref<8x8x512xf32, #tpu.memory_space<vmem>>, vector<1x8x512xf32>
    %240 = vector.shape_cast %239 : vector<1x8x512xf32> to vector<8x512xf32>
    %cst_47 = arith.constant dense<0.000000e+00> : vector<8x512xf32>
    %241 = tpu.matmul %209, %0, %cst_47 {dimension_numbers = #tpu.dot_dimension_numbers<[1], [0], [0], [1], [0, 0, 1, 1], [], []>} : vector<8x128xf32>, vector<128x512xf32>, vector<8x512xf32> -> vector<8x512xf32>
    %242 = arith.addf %240, %241 : vector<8x512xf32>
    %243 = vector.extract_strided_slice %242 {offsets = [0, 0], sizes = [8, 128], strides = [1, 1]} : vector<8x512xf32> to vector<8x128xf32>
    %244 = arith.negf %243 : vector<8x128xf32>
    %245 = math.exp %244 : vector<8x128xf32>
    %cst_48 = arith.constant 1.000000e+00 : f32
    %246 = vector.broadcast %cst_48 : f32 to vector<8x128xf32>
    %247 = arith.addf %246, %245 : vector<8x128xf32>
    %248 = arith.divf %246, %247 : vector<8x128xf32>
    %249 = vector.extract_strided_slice %242 {offsets = [0, 128], sizes = [8, 128], strides = [1, 1]} : vector<8x512xf32> to vector<8x128xf32>
    %250 = arith.negf %249 : vector<8x128xf32>
    %251 = math.exp %250 : vector<8x128xf32>
    %cst_49 = arith.constant 1.000000e+00 : f32
    %252 = vector.broadcast %cst_49 : f32 to vector<8x128xf32>
    %253 = arith.addf %252, %251 : vector<8x128xf32>
    %254 = arith.divf %252, %253 : vector<8x128xf32>
    %255 = vector.extract_strided_slice %242 {offsets = [0, 256], sizes = [8, 128], strides = [1, 1]} : vector<8x512xf32> to vector<8x128xf32>
    %256 = math.tanh %255 : vector<8x128xf32>
    %257 = vector.extract_strided_slice %242 {offsets = [0, 384], sizes = [8, 128], strides = [1, 1]} : vector<8x512xf32> to vector<8x128xf32>
    %258 = arith.negf %257 : vector<8x128xf32>
    %259 = math.exp %258 : vector<8x128xf32>
    %cst_50 = arith.constant 1.000000e+00 : f32
    %260 = vector.broadcast %cst_50 : f32 to vector<8x128xf32>
    %261 = arith.addf %260, %259 : vector<8x128xf32>
    %262 = arith.divf %260, %261 : vector<8x128xf32>
    %263 = arith.mulf %254, %207 : vector<8x128xf32>
    %264 = arith.mulf %248, %256 : vector<8x128xf32>
    %265 = arith.addf %263, %264 : vector<8x128xf32>
    %266 = math.tanh %265 : vector<8x128xf32>
    %267 = arith.mulf %262, %266 : vector<8x128xf32>
    %268 = tpu.concatenate %267, %237 in 1 : vector<8x128xf32>, vector<8x128xf32> -> vector<8x256xf32>
    %cst_51 = arith.constant dense<0.000000e+00> : vector<8x512xf32>
    %269 = tpu.matmul %268, %1, %cst_51 {dimension_numbers = #tpu.dot_dimension_numbers<[1], [0], [0], [1], [0, 0, 1, 1], [], []>} : vector<8x256xf32>, vector<256x512xf32>, vector<8x512xf32> -> vector<8x512xf32>
    %270 = arith.addf %269, %4 : vector<8x512xf32>
    %271 = vector.extract_strided_slice %270 {offsets = [0, 0], sizes = [8, 128], strides = [1, 1]} : vector<8x512xf32> to vector<8x128xf32>
    %272 = arith.negf %271 : vector<8x128xf32>
    %273 = math.exp %272 : vector<8x128xf32>
    %cst_52 = arith.constant 1.000000e+00 : f32
    %274 = vector.broadcast %cst_52 : f32 to vector<8x128xf32>
    %275 = arith.addf %274, %273 : vector<8x128xf32>
    %276 = arith.divf %274, %275 : vector<8x128xf32>
    %277 = vector.extract_strided_slice %270 {offsets = [0, 128], sizes = [8, 128], strides = [1, 1]} : vector<8x512xf32> to vector<8x128xf32>
    %278 = arith.negf %277 : vector<8x128xf32>
    %279 = math.exp %278 : vector<8x128xf32>
    %cst_53 = arith.constant 1.000000e+00 : f32
    %280 = vector.broadcast %cst_53 : f32 to vector<8x128xf32>
    %281 = arith.addf %280, %279 : vector<8x128xf32>
    %282 = arith.divf %280, %281 : vector<8x128xf32>
    %283 = vector.extract_strided_slice %270 {offsets = [0, 256], sizes = [8, 128], strides = [1, 1]} : vector<8x512xf32> to vector<8x128xf32>
    %284 = math.tanh %283 : vector<8x128xf32>
    %285 = vector.extract_strided_slice %270 {offsets = [0, 384], sizes = [8, 128], strides = [1, 1]} : vector<8x512xf32> to vector<8x128xf32>
    %286 = arith.negf %285 : vector<8x128xf32>
    %287 = math.exp %286 : vector<8x128xf32>
    %cst_54 = arith.constant 1.000000e+00 : f32
    %288 = vector.broadcast %cst_54 : f32 to vector<8x128xf32>
    %289 = arith.addf %288, %287 : vector<8x128xf32>
    %290 = arith.divf %288, %289 : vector<8x128xf32>
    %291 = arith.mulf %282, %235 : vector<8x128xf32>
    %292 = arith.mulf %276, %284 : vector<8x128xf32>
    %293 = arith.addf %291, %292 : vector<8x128xf32>
    %294 = math.tanh %293 : vector<8x128xf32>
    %295 = arith.mulf %290, %294 : vector<8x128xf32>
    %c5_i32 = arith.constant 5 : i32
    %296 = arith.index_cast %c5_i32 : i32 to index
    %c0_55 = arith.constant 0 : index
    %c0_56 = arith.constant 0 : index
    %297 = vector.load %arg0[%296, %c0_55, %c0_56] : memref<8x8x512xf32, #tpu.memory_space<vmem>>, vector<1x8x512xf32>
    %298 = vector.shape_cast %297 : vector<1x8x512xf32> to vector<8x512xf32>
    %cst_57 = arith.constant dense<0.000000e+00> : vector<8x512xf32>
    %299 = tpu.matmul %267, %0, %cst_57 {dimension_numbers = #tpu.dot_dimension_numbers<[1], [0], [0], [1], [0, 0, 1, 1], [], []>} : vector<8x128xf32>, vector<128x512xf32>, vector<8x512xf32> -> vector<8x512xf32>
    %300 = arith.addf %298, %299 : vector<8x512xf32>
    %301 = vector.extract_strided_slice %300 {offsets = [0, 0], sizes = [8, 128], strides = [1, 1]} : vector<8x512xf32> to vector<8x128xf32>
    %302 = arith.negf %301 : vector<8x128xf32>
    %303 = math.exp %302 : vector<8x128xf32>
    %cst_58 = arith.constant 1.000000e+00 : f32
    %304 = vector.broadcast %cst_58 : f32 to vector<8x128xf32>
    %305 = arith.addf %304, %303 : vector<8x128xf32>
    %306 = arith.divf %304, %305 : vector<8x128xf32>
    %307 = vector.extract_strided_slice %300 {offsets = [0, 128], sizes = [8, 128], strides = [1, 1]} : vector<8x512xf32> to vector<8x128xf32>
    %308 = arith.negf %307 : vector<8x128xf32>
    %309 = math.exp %308 : vector<8x128xf32>
    %cst_59 = arith.constant 1.000000e+00 : f32
    %310 = vector.broadcast %cst_59 : f32 to vector<8x128xf32>
    %311 = arith.addf %310, %309 : vector<8x128xf32>
    %312 = arith.divf %310, %311 : vector<8x128xf32>
    %313 = vector.extract_strided_slice %300 {offsets = [0, 256], sizes = [8, 128], strides = [1, 1]} : vector<8x512xf32> to vector<8x128xf32>
    %314 = math.tanh %313 : vector<8x128xf32>
    %315 = vector.extract_strided_slice %300 {offsets = [0, 384], sizes = [8, 128], strides = [1, 1]} : vector<8x512xf32> to vector<8x128xf32>
    %316 = arith.negf %315 : vector<8x128xf32>
    %317 = math.exp %316 : vector<8x128xf32>
    %cst_60 = arith.constant 1.000000e+00 : f32
    %318 = vector.broadcast %cst_60 : f32 to vector<8x128xf32>
    %319 = arith.addf %318, %317 : vector<8x128xf32>
    %320 = arith.divf %318, %319 : vector<8x128xf32>
    %321 = arith.mulf %312, %265 : vector<8x128xf32>
    %322 = arith.mulf %306, %314 : vector<8x128xf32>
    %323 = arith.addf %321, %322 : vector<8x128xf32>
    %324 = math.tanh %323 : vector<8x128xf32>
    %325 = arith.mulf %320, %324 : vector<8x128xf32>
    %326 = tpu.concatenate %325, %295 in 1 : vector<8x128xf32>, vector<8x128xf32> -> vector<8x256xf32>
    %cst_61 = arith.constant dense<0.000000e+00> : vector<8x512xf32>
    %327 = tpu.matmul %326, %1, %cst_61 {dimension_numbers = #tpu.dot_dimension_numbers<[1], [0], [0], [1], [0, 0, 1, 1], [], []>} : vector<8x256xf32>, vector<256x512xf32>, vector<8x512xf32> -> vector<8x512xf32>
    %328 = arith.addf %327, %4 : vector<8x512xf32>
    %329 = vector.extract_strided_slice %328 {offsets = [0, 0], sizes = [8, 128], strides = [1, 1]} : vector<8x512xf32> to vector<8x128xf32>
    %330 = arith.negf %329 : vector<8x128xf32>
    %331 = math.exp %330 : vector<8x128xf32>
    %cst_62 = arith.constant 1.000000e+00 : f32
    %332 = vector.broadcast %cst_62 : f32 to vector<8x128xf32>
    %333 = arith.addf %332, %331 : vector<8x128xf32>
    %334 = arith.divf %332, %333 : vector<8x128xf32>
    %335 = vector.extract_strided_slice %328 {offsets = [0, 128], sizes = [8, 128], strides = [1, 1]} : vector<8x512xf32> to vector<8x128xf32>
    %336 = arith.negf %335 : vector<8x128xf32>
    %337 = math.exp %336 : vector<8x128xf32>
    %cst_63 = arith.constant 1.000000e+00 : f32
    %338 = vector.broadcast %cst_63 : f32 to vector<8x128xf32>
    %339 = arith.addf %338, %337 : vector<8x128xf32>
    %340 = arith.divf %338, %339 : vector<8x128xf32>
    %341 = vector.extract_strided_slice %328 {offsets = [0, 256], sizes = [8, 128], strides = [1, 1]} : vector<8x512xf32> to vector<8x128xf32>
    %342 = math.tanh %341 : vector<8x128xf32>
    %343 = vector.extract_strided_slice %328 {offsets = [0, 384], sizes = [8, 128], strides = [1, 1]} : vector<8x512xf32> to vector<8x128xf32>
    %344 = arith.negf %343 : vector<8x128xf32>
    %345 = math.exp %344 : vector<8x128xf32>
    %cst_64 = arith.constant 1.000000e+00 : f32
    %346 = vector.broadcast %cst_64 : f32 to vector<8x128xf32>
    %347 = arith.addf %346, %345 : vector<8x128xf32>
    %348 = arith.divf %346, %347 : vector<8x128xf32>
    %349 = arith.mulf %340, %293 : vector<8x128xf32>
    %350 = arith.mulf %334, %342 : vector<8x128xf32>
    %351 = arith.addf %349, %350 : vector<8x128xf32>
    %352 = math.tanh %351 : vector<8x128xf32>
    %353 = arith.mulf %348, %352 : vector<8x128xf32>
    %c6_i32 = arith.constant 6 : i32
    %354 = arith.index_cast %c6_i32 : i32 to index
    %c0_65 = arith.constant 0 : index
    %c0_66 = arith.constant 0 : index
    %355 = vector.load %arg0[%354, %c0_65, %c0_66] : memref<8x8x512xf32, #tpu.memory_space<vmem>>, vector<1x8x512xf32>
    %356 = vector.shape_cast %355 : vector<1x8x512xf32> to vector<8x512xf32>
    %cst_67 = arith.constant dense<0.000000e+00> : vector<8x512xf32>
    %357 = tpu.matmul %325, %0, %cst_67 {dimension_numbers = #tpu.dot_dimension_numbers<[1], [0], [0], [1], [0, 0, 1, 1], [], []>} : vector<8x128xf32>, vector<128x512xf32>, vector<8x512xf32> -> vector<8x512xf32>
    %358 = arith.addf %356, %357 : vector<8x512xf32>
    %359 = vector.extract_strided_slice %358 {offsets = [0, 0], sizes = [8, 128], strides = [1, 1]} : vector<8x512xf32> to vector<8x128xf32>
    %360 = arith.negf %359 : vector<8x128xf32>
    %361 = math.exp %360 : vector<8x128xf32>
    %cst_68 = arith.constant 1.000000e+00 : f32
    %362 = vector.broadcast %cst_68 : f32 to vector<8x128xf32>
    %363 = arith.addf %362, %361 : vector<8x128xf32>
    %364 = arith.divf %362, %363 : vector<8x128xf32>
    %365 = vector.extract_strided_slice %358 {offsets = [0, 128], sizes = [8, 128], strides = [1, 1]} : vector<8x512xf32> to vector<8x128xf32>
    %366 = arith.negf %365 : vector<8x128xf32>
    %367 = math.exp %366 : vector<8x128xf32>
    %cst_69 = arith.constant 1.000000e+00 : f32
    %368 = vector.broadcast %cst_69 : f32 to vector<8x128xf32>
    %369 = arith.addf %368, %367 : vector<8x128xf32>
    %370 = arith.divf %368, %369 : vector<8x128xf32>
    %371 = vector.extract_strided_slice %358 {offsets = [0, 256], sizes = [8, 128], strides = [1, 1]} : vector<8x512xf32> to vector<8x128xf32>
    %372 = math.tanh %371 : vector<8x128xf32>
    %373 = vector.extract_strided_slice %358 {offsets = [0, 384], sizes = [8, 128], strides = [1, 1]} : vector<8x512xf32> to vector<8x128xf32>
    %374 = arith.negf %373 : vector<8x128xf32>
    %375 = math.exp %374 : vector<8x128xf32>
    %cst_70 = arith.constant 1.000000e+00 : f32
    %376 = vector.broadcast %cst_70 : f32 to vector<8x128xf32>
    %377 = arith.addf %376, %375 : vector<8x128xf32>
    %378 = arith.divf %376, %377 : vector<8x128xf32>
    %379 = arith.mulf %370, %323 : vector<8x128xf32>
    %380 = arith.mulf %364, %372 : vector<8x128xf32>
    %381 = arith.addf %379, %380 : vector<8x128xf32>
    %382 = math.tanh %381 : vector<8x128xf32>
    %383 = arith.mulf %378, %382 : vector<8x128xf32>
    %384 = tpu.concatenate %383, %353 in 1 : vector<8x128xf32>, vector<8x128xf32> -> vector<8x256xf32>
    %cst_71 = arith.constant dense<0.000000e+00> : vector<8x512xf32>
    %385 = tpu.matmul %384, %1, %cst_71 {dimension_numbers = #tpu.dot_dimension_numbers<[1], [0], [0], [1], [0, 0, 1, 1], [], []>} : vector<8x256xf32>, vector<256x512xf32>, vector<8x512xf32> -> vector<8x512xf32>
    %386 = arith.addf %385, %4 : vector<8x512xf32>
    %387 = vector.extract_strided_slice %386 {offsets = [0, 0], sizes = [8, 128], strides = [1, 1]} : vector<8x512xf32> to vector<8x128xf32>
    %388 = arith.negf %387 : vector<8x128xf32>
    %389 = math.exp %388 : vector<8x128xf32>
    %cst_72 = arith.constant 1.000000e+00 : f32
    %390 = vector.broadcast %cst_72 : f32 to vector<8x128xf32>
    %391 = arith.addf %390, %389 : vector<8x128xf32>
    %392 = arith.divf %390, %391 : vector<8x128xf32>
    %393 = vector.extract_strided_slice %386 {offsets = [0, 128], sizes = [8, 128], strides = [1, 1]} : vector<8x512xf32> to vector<8x128xf32>
    %394 = arith.negf %393 : vector<8x128xf32>
    %395 = math.exp %394 : vector<8x128xf32>
    %cst_73 = arith.constant 1.000000e+00 : f32
    %396 = vector.broadcast %cst_73 : f32 to vector<8x128xf32>
    %397 = arith.addf %396, %395 : vector<8x128xf32>
    %398 = arith.divf %396, %397 : vector<8x128xf32>
    %399 = vector.extract_strided_slice %386 {offsets = [0, 256], sizes = [8, 128], strides = [1, 1]} : vector<8x512xf32> to vector<8x128xf32>
    %400 = math.tanh %399 : vector<8x128xf32>
    %401 = vector.extract_strided_slice %386 {offsets = [0, 384], sizes = [8, 128], strides = [1, 1]} : vector<8x512xf32> to vector<8x128xf32>
    %402 = arith.negf %401 : vector<8x128xf32>
    %403 = math.exp %402 : vector<8x128xf32>
    %cst_74 = arith.constant 1.000000e+00 : f32
    %404 = vector.broadcast %cst_74 : f32 to vector<8x128xf32>
    %405 = arith.addf %404, %403 : vector<8x128xf32>
    %406 = arith.divf %404, %405 : vector<8x128xf32>
    %407 = arith.mulf %398, %351 : vector<8x128xf32>
    %408 = arith.mulf %392, %400 : vector<8x128xf32>
    %409 = arith.addf %407, %408 : vector<8x128xf32>
    %410 = math.tanh %409 : vector<8x128xf32>
    %411 = arith.mulf %406, %410 : vector<8x128xf32>
    %c7_i32 = arith.constant 7 : i32
    %412 = arith.index_cast %c7_i32 : i32 to index
    %c0_75 = arith.constant 0 : index
    %c0_76 = arith.constant 0 : index
    %413 = vector.load %arg0[%412, %c0_75, %c0_76] : memref<8x8x512xf32, #tpu.memory_space<vmem>>, vector<1x8x512xf32>
    %414 = vector.shape_cast %413 : vector<1x8x512xf32> to vector<8x512xf32>
    %cst_77 = arith.constant dense<0.000000e+00> : vector<8x512xf32>
    %415 = tpu.matmul %383, %0, %cst_77 {dimension_numbers = #tpu.dot_dimension_numbers<[1], [0], [0], [1], [0, 0, 1, 1], [], []>} : vector<8x128xf32>, vector<128x512xf32>, vector<8x512xf32> -> vector<8x512xf32>
    %416 = arith.addf %414, %415 : vector<8x512xf32>
    %417 = vector.extract_strided_slice %416 {offsets = [0, 0], sizes = [8, 128], strides = [1, 1]} : vector<8x512xf32> to vector<8x128xf32>
    %418 = arith.negf %417 : vector<8x128xf32>
    %419 = math.exp %418 : vector<8x128xf32>
    %cst_78 = arith.constant 1.000000e+00 : f32
    %420 = vector.broadcast %cst_78 : f32 to vector<8x128xf32>
    %421 = arith.addf %420, %419 : vector<8x128xf32>
    %422 = arith.divf %420, %421 : vector<8x128xf32>
    %423 = vector.extract_strided_slice %416 {offsets = [0, 128], sizes = [8, 128], strides = [1, 1]} : vector<8x512xf32> to vector<8x128xf32>
    %424 = arith.negf %423 : vector<8x128xf32>
    %425 = math.exp %424 : vector<8x128xf32>
    %cst_79 = arith.constant 1.000000e+00 : f32
    %426 = vector.broadcast %cst_79 : f32 to vector<8x128xf32>
    %427 = arith.addf %426, %425 : vector<8x128xf32>
    %428 = arith.divf %426, %427 : vector<8x128xf32>
    %429 = vector.extract_strided_slice %416 {offsets = [0, 256], sizes = [8, 128], strides = [1, 1]} : vector<8x512xf32> to vector<8x128xf32>
    %430 = math.tanh %429 : vector<8x128xf32>
    %431 = vector.extract_strided_slice %416 {offsets = [0, 384], sizes = [8, 128], strides = [1, 1]} : vector<8x512xf32> to vector<8x128xf32>
    %432 = arith.negf %431 : vector<8x128xf32>
    %433 = math.exp %432 : vector<8x128xf32>
    %cst_80 = arith.constant 1.000000e+00 : f32
    %434 = vector.broadcast %cst_80 : f32 to vector<8x128xf32>
    %435 = arith.addf %434, %433 : vector<8x128xf32>
    %436 = arith.divf %434, %435 : vector<8x128xf32>
    %437 = arith.mulf %428, %381 : vector<8x128xf32>
    %438 = arith.mulf %422, %430 : vector<8x128xf32>
    %439 = arith.addf %437, %438 : vector<8x128xf32>
    %440 = math.tanh %439 : vector<8x128xf32>
    %441 = arith.mulf %436, %440 : vector<8x128xf32>
    %442 = tpu.concatenate %441, %411 in 1 : vector<8x128xf32>, vector<8x128xf32> -> vector<8x256xf32>
    %cst_81 = arith.constant dense<0.000000e+00> : vector<8x512xf32>
    %443 = tpu.matmul %442, %1, %cst_81 {dimension_numbers = #tpu.dot_dimension_numbers<[1], [0], [0], [1], [0, 0, 1, 1], [], []>} : vector<8x256xf32>, vector<256x512xf32>, vector<8x512xf32> -> vector<8x512xf32>
    %444 = arith.addf %443, %4 : vector<8x512xf32>
    %445 = vector.extract_strided_slice %444 {offsets = [0, 0], sizes = [8, 128], strides = [1, 1]} : vector<8x512xf32> to vector<8x128xf32>
    %446 = arith.negf %445 : vector<8x128xf32>
    %447 = math.exp %446 : vector<8x128xf32>
    %cst_82 = arith.constant 1.000000e+00 : f32
    %448 = vector.broadcast %cst_82 : f32 to vector<8x128xf32>
    %449 = arith.addf %448, %447 : vector<8x128xf32>
    %450 = arith.divf %448, %449 : vector<8x128xf32>
    %451 = vector.extract_strided_slice %444 {offsets = [0, 128], sizes = [8, 128], strides = [1, 1]} : vector<8x512xf32> to vector<8x128xf32>
    %452 = arith.negf %451 : vector<8x128xf32>
    %453 = math.exp %452 : vector<8x128xf32>
    %cst_83 = arith.constant 1.000000e+00 : f32
    %454 = vector.broadcast %cst_83 : f32 to vector<8x128xf32>
    %455 = arith.addf %454, %453 : vector<8x128xf32>
    %456 = arith.divf %454, %455 : vector<8x128xf32>
    %457 = vector.extract_strided_slice %444 {offsets = [0, 256], sizes = [8, 128], strides = [1, 1]} : vector<8x512xf32> to vector<8x128xf32>
    %458 = math.tanh %457 : vector<8x128xf32>
    %459 = vector.extract_strided_slice %444 {offsets = [0, 384], sizes = [8, 128], strides = [1, 1]} : vector<8x512xf32> to vector<8x128xf32>
    %460 = arith.negf %459 : vector<8x128xf32>
    %461 = math.exp %460 : vector<8x128xf32>
    %cst_84 = arith.constant 1.000000e+00 : f32
    %462 = vector.broadcast %cst_84 : f32 to vector<8x128xf32>
    %463 = arith.addf %462, %461 : vector<8x128xf32>
    %464 = arith.divf %462, %463 : vector<8x128xf32>
    %465 = arith.mulf %456, %409 : vector<8x128xf32>
    %466 = arith.mulf %450, %458 : vector<8x128xf32>
    %467 = arith.addf %465, %466 : vector<8x128xf32>
    %468 = math.tanh %467 : vector<8x128xf32>
    %469 = arith.mulf %464, %468 : vector<8x128xf32>
    %c8_i32 = arith.constant 8 : i32
    %c0_85 = arith.constant 0 : index
    %c0_86 = arith.constant 0 : index
    %470 = vector.load %arg4[%c0_85, %c0_86] : memref<128x128xf32, #tpu.memory_space<vmem>>, vector<128x128xf32>
    %cst_87 = arith.constant dense<0.000000e+00> : vector<8x128xf32>
    %471 = tpu.matmul %469, %470, %cst_87 {dimension_numbers = #tpu.dot_dimension_numbers<[1], [0], [0], [1], [0, 0, 1, 1], [], []>} : vector<8x128xf32>, vector<128x128xf32>, vector<8x128xf32> -> vector<8x128xf32>
    %c0_88 = arith.constant 0 : index
    %c0_89 = arith.constant 0 : index
    %472 = vector.load %arg5[%c0_88, %c0_89] : memref<1x128xf32, #tpu.memory_space<vmem>>, vector<1x128xf32>
    %473 = vector.broadcast %472 : vector<1x128xf32> to vector<8x128xf32>
    %474 = arith.addf %471, %473 : vector<8x128xf32>
    %cst_90 = arith.constant 0.000000e+00 : f32
    %475 = vector.broadcast %cst_90 : f32 to vector<8x128xf32>
    %476 = arith.maximumf %474, %475 : vector<8x128xf32>
    %c0_91 = arith.constant 0 : index
    %c0_92 = arith.constant 0 : index
    %477 = vector.load %arg6[%c0_91, %c0_92] : memref<128x128xf32, #tpu.memory_space<vmem>>, vector<128x128xf32>
    %cst_93 = arith.constant dense<0.000000e+00> : vector<8x128xf32>
    %478 = tpu.matmul %476, %477, %cst_93 {dimension_numbers = #tpu.dot_dimension_numbers<[1], [0], [0], [1], [0, 0, 1, 1], [], []>} : vector<8x128xf32>, vector<128x128xf32>, vector<8x128xf32> -> vector<8x128xf32>
    %c0_94 = arith.constant 0 : index
    %c0_95 = arith.constant 0 : index
    %479 = vector.load %arg7[%c0_94, %c0_95] : memref<1x128xf32, #tpu.memory_space<vmem>>, vector<1x128xf32>
    %480 = vector.broadcast %479 : vector<1x128xf32> to vector<8x128xf32>
    %481 = arith.addf %478, %480 : vector<8x128xf32>
    %482 = arith.negf %481 : vector<8x128xf32>
    %483 = math.exp %482 : vector<8x128xf32>
    %cst_96 = arith.constant 1.000000e+00 : f32
    %484 = vector.broadcast %cst_96 : f32 to vector<8x128xf32>
    %485 = arith.addf %484, %483 : vector<8x128xf32>
    %486 = arith.divf %484, %485 : vector<8x128xf32>
    %c0_97 = arith.constant 0 : index
    %c0_98 = arith.constant 0 : index
    %487 = vector.load %arg8[%c0_97, %c0_98] : memref<8x128xf32, #tpu.memory_space<vmem>>, vector<8x128xf32>
    tpu.vector_store %arg8[%c0_97, %c0_98], %486 {strides = array<i32>} : memref<8x128xf32, #tpu.memory_space<vmem>>, vector<8x128xf32>,
    return
  }
}

</mosaic_0001>

<bundles_post_ra>
// kernel: lstm_model_forward.1
= control target key start
LH: loop header
LB: loop body
LE: loop exit
PB: predicated region body
PF: predicated region fallthrough
CT: control target
= control target key end

     0   :  { %13 = vsyncpa [#allocation3], 0  ;;  %s7792_s0 = inlined_call_operand.vmem [shape: f32[8,8,512], index: 0, kind: input, shape index: {}]   ;;  %s7793_s1 = inlined_call_operand.hbm [shape: f32[128,512], index: 1, kind: input, shape index: {}]   ;;  %s7794_s2 = inlined_call_operand.hbm [shape: f32[256,512], index: 2, kind: input, shape index: {}]   ;;  %s7795_s3 = inlined_call_operand.vmem [shape: f32[1,512], index: 3, kind: input, shape index: {}]   ;;  %s7796_s4 = inlined_call_operand.vmem [shape: f32[128,128], index: 4, kind: input, shape index: {}]   ;;  %s7797_s5 = inlined_call_operand.vmem [shape: f32[1,128], index: 5, kind: input, shape index: {}]   ;;  %s7798_s6 = inlined_call_operand.vmem [shape: f32[128,128], index: 6, kind: input, shape index: {}]   ;;  %s7799_s7 = inlined_call_operand.vmem [shape: f32[1,128], index: 7, kind: input, shape index: {}]   ;;  %s7800_s8 = inlined_call_operand.vmem [shape: f32[8,128], index: 8, kind: output, shape index: {}]  }
   0x1   :  { %14 = vsyncpa [#allocation5], 0  ;;  %s4267_s27 = smov [#allocation2]  }
   0x2   :  { %s22_s28 = sshll.u32 %s4267_s27, 4  ;;  %s23_s28 = int_to_ptr.vmem [resolvable:$true] %s22_s28 }
   0x3   :  { %s4231_s29 = scalar_lea.vmem %s23_s28, 8192  ;;  %p4236_p1 = scmp.lt.s32.totalorder %s23_s28, %s23_s28 }
   0x4   :  { %p4232_p0 = scmp.ne.s32.totalorder %s23_s28, %s4231_s29  ;;  %p4237_p2 = scmp.lt.s32.totalorder %s4231_s29, %s4231_s29 }
   0x6   :  { %p4238_p3 = por %p4237_p2, %p4236_p1 }
   0x8   :  { %p4239_p4 = pnand %p4238_p3, %p4232_p0 }
   0xa   :  { %4242 = shalt.err (!%p4239_p4)
}
   0xb   :  { %s4268_s30 = smov 512   ;;  %s4269_s9 = smov 32  }
   0xc   :  { %28 = dma.hbm_to_vmem [thread:$0]  %s7793_s1, 8192, %s23_s28, [#allocation3], %s4268_s30, %s4268_s30, %s4269_s9  }
   0xd   :  { %s4270_s12 = smov [#allocation4]  }
   0xe   :  { %s34_s13 = sshll.u32 %s4270_s12, 4  ;;  %s35_s13 = int_to_ptr.vmem [resolvable:$true] %s34_s13 }
   0xf   :  { %s4251_s14 = scalar_lea.vmem %s35_s13, 16384  ;;  %p4256_p6 = scmp.lt.s32.totalorder %s35_s13, %s35_s13 }
  0x10   :  { %p4252_p5 = scmp.ne.s32.totalorder %s35_s13, %s4251_s14  ;;  %p4257_p7 = scmp.lt.s32.totalorder %s4251_s14, %s4251_s14 }
  0x12   :  { %p4258_p8 = por %p4257_p7, %p4256_p6 }
  0x14   :  { %p4259_p9 = pnand %p4258_p8, %p4252_p5 }
  0x16   :  { %4262 = shalt.err (!%p4259_p9)
}
  0x17   :  { %40 = dma.hbm_to_vmem [thread:$0]  %s7794_s2, 16384, %s35_s13, [#allocation5], %s4268_s30, %s4268_s30, %s4269_s9  }
  0x18   :  { %4263 = dma.done.wait [#allocation3], 8192  }
  0x19   :  { %4264 = vsyncadd [#allocation3], 4294959104 }
  0x1a   :  { %4265 = dma.done.wait [#allocation5], 16384  }
  0x1b   :  { %4266 = vsyncadd [#allocation5], 4294950912  ;;  %v7801_v0 = vmov 0.0   ;;  %v4326_v1 = vld [vmem:[#allocation2 + $0x1e8] sm:$0xff]  ;;  %v4328_v2 = vld [vmem:[#allocation2 + $0x1e0] sm:$0xff]  ;;  %vm4272_vm0 = vmmov 0  }
  0x1c   :  { %339 = vmatprep.mubr.f32.mxu0 %v7801_v0  ;;  %410 = vmatprep.mubr.f32.mxu1 %v7801_v0  ;;  %v4330_v3 = vld [vmem:[#allocation2 + $0x1c8] sm:$0xff]  ;;  %v4333_v4 = vld [vmem:[#allocation2 + $0x1c0] sm:$0xff]  ;;  %v4347_v9 = vld [vmem:[#allocation2 + $0x1f8] sm:$0xff] }
  0x1d   :  { %275 = vmatprep.subr.mxu0 %v4326_v1  ;;  %v4336_v5 = vld [vmem:[#allocation2 + $0x1a8] sm:$0xff]  ;;  %v4339_v6 = vld [vmem:[#allocation2 + $0x1a0] sm:$0xff]  ;;  %346 = vmatprep.subr.mxu1 %v4347_v9  ;;  %v4353_v11 = vld [vmem:[#allocation2 + $0x1f0] sm:$0xff] }
  0x1e   :  { %276 = vmatpush1.msra.mxu0 %v4328_v2  ;;  %v4342_v7 = vld [vmem:[#allocation2 + $0x188] sm:$0xff]  ;;  %v4345_v8 = vld [vmem:[#allocation2 + $0x180] sm:$0xff]  ;;  %347 = vmatpush1.msra.mxu1 %v4353_v11  ;;  %v4359_v13 = vld [vmem:[#allocation2 + $0x1d8] sm:$0xff] }
  0x1f   :  { %277 = vmatprep.subr.mxu0 %v4330_v3  ;;  %v4350_v10 = vld [vmem:[#allocation2 + $0x168] sm:$0xff]  ;;  %v4356_v12 = vld [vmem:[#allocation2 + $0x160] sm:$0xff]  ;;  %v4361_v14 = vld [vmem:[#allocation2 + $0x1d0] sm:$0xff]  ;;  %348 = vmatprep.subr.mxu1 %v4359_v13 }
  0x20   :  { %278 = vmatpush1.msra.mxu0 %v4333_v4  ;;  %v4364_v15 = vld [vmem:[#allocation2 + $0x148] sm:$0xff]  ;;  %v4367_v16 = vld [vmem:[#allocation2 + $0x1b8] sm:$0xff]  ;;  %v4370_v17 = vld [vmem:[#allocation2 + $0x140] sm:$0xff]  ;;  %349 = vmatpush1.msra.mxu1 %v4361_v14 }
  0x21   :  { %279 = vmatprep.subr.mxu0 %v4336_v5  ;;  %v4373_v18 = vld [vmem:[#allocation2 + $0x1b0] sm:$0xff]  ;;  %v4375_v19 = vld [vmem:[#allocation2 + $0x198] sm:$0xff]  ;;  %v4378_v20 = vld [vmem:[#allocation2 + $0x128] sm:$0xff]  ;;  %350 = vmatprep.subr.mxu1 %v4367_v16 }
  0x22   :  { %280 = vmatpush1.msra.mxu0 %v4339_v6  ;;  %v4381_v21 = vld [vmem:[#allocation2 + $0x190] sm:$0xff]  ;;  %v4384_v22 = vld [vmem:[#allocation2 + $0x120] sm:$0xff]  ;;  %351 = vmatpush1.msra.mxu1 %v4373_v18  ;;  %v4387_v23 = vld [vmem:[#allocation2 + $0x178] sm:$0xff] }
  0x23   :  { %281 = vmatprep.subr.mxu0 %v4342_v7  ;;  %v4390_v24 = vld [vmem:[#allocation2 + $0x108] sm:$0xff]  ;;  %352 = vmatprep.subr.mxu1 %v4375_v19  ;;  %v4393_v25 = vld [vmem:[#allocation2 + $0x170] sm:$0xff]  ;;  %v4396_v26 = vld [vmem:[#allocation2 + $0x100] sm:$0xff] }
  0x24   :  { %282 = vmatpush1.msra.mxu0 %v4345_v8  ;;  %353 = vmatpush1.msra.mxu1 %v4381_v21  ;;  %v4399_v27 = vld [vmem:[#allocation2 + $0x158] sm:$0xff]  ;;  %v4402_v28 = vld [vmem:[#allocation2 + $0xe8] sm:$0xff]  ;;  %v4405_v29 = vld [vmem:[#allocation2 + $0x150] sm:$0xff] }
  0x25   :  { %283 = vmatprep.subr.mxu0 %v4350_v10  ;;  %354 = vmatprep.subr.mxu1 %v4387_v23  ;;  %v4408_v30 = vld [vmem:[#allocation2 + $0xe0] sm:$0xff]  ;;  %v4411_v31 = vld [vmem:[#allocation2 + $0x138] sm:$0xff]  ;;  %v4414_v32 = vld [vmem:[#allocation2 + $0xc8] sm:$0xff] }
  0x26   :  { %284 = vmatpush1.msra.mxu0 %v4356_v12  ;;  %355 = vmatpush1.msra.mxu1 %v4393_v25  ;;  %v4417_v33 = vld [vmem:[#allocation2 + $0x130] sm:$0xff]  ;;  %v4420_v34 = vld [vmem:[#allocation2 + $0xc0] sm:$0xff]  ;;  %v4423_v35 = vld [vmem:[#allocation2 + $0x118] sm:$0xff] }
  0x27   :  { %285 = vmatprep.subr.mxu0 %v4364_v15  ;;  %356 = vmatprep.subr.mxu1 %v4399_v27  ;;  %v4426_v36 = vld [vmem:[#allocation2 + $0xa8] sm:$0xff]  ;;  %v4429_v37 = vld [vmem:[#allocation2 + $0x110] sm:$0xff]  ;;  %v4432_v38 = vld [vmem:[#allocation2 + $0xa0] sm:$0xff] }
  0x28   :  { %286 = vmatpush1.msra.mxu0 %v4370_v17  ;;  %357 = vmatpush1.msra.mxu1 %v4405_v29  ;;  %v4435_v39 = vld [vmem:[#allocation2 + $0xf8] sm:$0xff]  ;;  %v4438_v40 = vld [vmem:[#allocation2 + $0x88] sm:$0xff]  ;;  %v4441_v41 = vld [vmem:[#allocation2 + $0xf0] sm:$0xff] }
  0x29   :  { %287 = vmatprep.subr.mxu0 %v4378_v20  ;;  %358 = vmatprep.subr.mxu1 %v4411_v31  ;;  %v4444_v42 = vld [vmem:[#allocation2 + $0x80] sm:$0xff]  ;;  %v4447_v43 = vld [vmem:[#allocation2 + $0xd8] sm:$0xff]  ;;  %v4450_v44 = vld [vmem:[#allocation2 + $0x68] sm:$0xff] }
  0x2a   :  { %288 = vmatpush1.msra.mxu0 %v4384_v22  ;;  %359 = vmatpush1.msra.mxu1 %v4417_v33  ;;  %8402 = vst [vmem:[#allocation8_spill] sm:$0xff] %v4450_v44  ;;  %v4453_v45 = vld [vmem:[#allocation2 + $0xd0] sm:$0xff]  ;;  %v4456_v46 = vld [vmem:[#allocation2 + $0x60] sm:$0xff]  ;;  %v4459_v47 = vld [vmem:[#allocation2 + $0xb8] sm:$0xff] }
  0x2b   :  { %289 = vmatprep.subr.mxu0 %v4390_v24  ;;  %360 = vmatprep.subr.mxu1 %v4423_v35  ;;  %8403 = vst [vmem:[#allocation9_spill] sm:$0xff] %v4456_v46  ;;  %v4462_v48 = vld [vmem:[#allocation2 + $0x48] sm:$0xff]  ;;  %v4465_v49 = vld [vmem:[#allocation2 + $0xb0] sm:$0xff]  ;;  %v4468_v50 = vld [vmem:[#allocation2 + $0x40] sm:$0xff] }
  0x2c   :  { %290 = vmatpush1.msra.mxu0 %v4396_v26  ;;  %361 = vmatpush1.msra.mxu1 %v4429_v37  ;;  %8404 = vst [vmem:[#allocation10_spill] sm:$0xff] %v4462_v48  ;;  %8405 = vst [vmem:[#allocation11_spill] sm:$0xff] %v4468_v50  ;;  %v4471_v51 = vld [vmem:[#allocation2 + $0x98] sm:$0xff]  ;;  %v4474_v52 = vld [vmem:[#allocation2 + $0x28] sm:$0xff] }
  0x2d   :  { %291 = vmatprep.subr.mxu0 %v4402_v28  ;;  %362 = vmatprep.subr.mxu1 %v4435_v39  ;;  %8406 = vst [vmem:[#allocation12_spill] sm:$0xff] %v4474_v52  ;;  %v4477_v53 = vld [vmem:[#allocation2 + $0x90] sm:$0xff]  ;;  %v4480_v54 = vld [vmem:[#allocation2 + $0x20] sm:$0xff]  ;;  %v4483_v55 = vld [vmem:[#allocation2 + $0x78] sm:$0xff] }
  0x2e   :  { %292 = vmatpush1.msra.mxu0 %v4408_v30  ;;  %363 = vmatpush1.msra.mxu1 %v4441_v41  ;;  %8407 = vst [vmem:[#allocation13_spill] sm:$0xff] %v4477_v53  ;;  %8408 = vst [vmem:[#allocation14_spill] sm:$0xff] %v4480_v54  ;;  %v4486_v56 = vld [vmem:[#allocation2 + $0x8] sm:$0xff]  ;;  %v4489_v57 = vld [vmem:[#allocation2 + $0x70] sm:$0xff] }
  0x2f   :  { %293 = vmatprep.subr.mxu0 %v4414_v32  ;;  %364 = vmatprep.subr.mxu1 %v4447_v43  ;;  %8409 = vst [vmem:[#allocation15_spill] sm:$0xff] %v4483_v55  ;;  %8410 = vst [vmem:[#allocation16_spill] sm:$0xff] %v4486_v56  ;;  %v4492_v58 = vld [vmem:[#allocation2] sm:$0xff]  ;;  %v4495_v59 = vld [vmem:[#allocation2 + $0x58] sm:$0xff] }
  0x30   :  { %294 = vmatpush1.msra.mxu0 %v4420_v34  ;;  %365 = vmatpush1.msra.mxu1 %v4453_v45  ;;  %8411 = vst [vmem:[#allocation17_spill] sm:$0xff] %v4489_v57  ;;  %8412 = vst [vmem:[#allocation18_spill] sm:$0xff] %v4492_v58  ;;  %v4499_v60 = vld [vmem:[#allocation2 + $0x50] sm:$0xff]  ;;  %v4503_v61 = vld [vmem:[#allocation2 + $0x38] sm:$0xff] }
  0x31   :  { %295 = vmatprep.subr.mxu0 %v4426_v36  ;;  %366 = vmatprep.subr.mxu1 %v4459_v47  ;;  %8413 = vst [vmem:[#allocation19_spill] sm:$0xff] %v4495_v59  ;;  %8414 = vst [vmem:[#allocation20_spill] sm:$0xff] %v4499_v60  ;;  %v4505_v62 = vld [vmem:[#allocation4 + $0x1e8] sm:$0xff]  ;;  %v4509_v63 = vld [vmem:[#allocation2 + $0x30] sm:$0xff] }
  0x32   :  { %296 = vmatpush1.msra.mxu0 %v4432_v38  ;;  %367 = vmatpush1.msra.mxu1 %v4465_v49  ;;  %8415 = vst [vmem:[#allocation21_spill] sm:$0xff] %v4503_v61  ;;  %8416 = vst [vmem:[#allocation22_spill] sm:$0xff] %v4505_v62  ;;  %v4511_v0 = vld [vmem:[#allocation4 + $0x1e0] sm:$0xff] }
  0x33   :  { %297 = vmatprep.subr.mxu0 %v4438_v40  ;;  %368 = vmatprep.subr.mxu1 %v4471_v51  ;;  %8417 = vst [vmem:[#allocation23_spill] sm:$0xff] %v4509_v63  ;;  %8418 = vst [vmem:[#allocation24_spill] sm:$0xff] %v4511_v0 }
  0x34   :  { %298 = vmatpush1.msra.mxu0 %v4444_v42  ;;  %369 = vmatpush1.msra.mxu1 %v4477_v53 }
  0x35   :  { %299 = vmatprep.subr.mxu0 %v4450_v44  ;;  %370 = vmatprep.subr.mxu1 %v4483_v55 }
  0x36   :  { %300 = vmatpush1.msra.mxu0 %v4456_v46  ;;  %371 = vmatpush1.msra.mxu1 %v4489_v57 }
  0x37   :  { %301 = vmatprep.subr.mxu0 %v4462_v48  ;;  %372 = vmatprep.subr.mxu1 %v4495_v59  ;;  %v4526_v59 = vld [vmem:[#allocation4 + $0x1f8] sm:$0xff]  ;;  %v4533_v48 = vld [vmem:[#allocation4 + $0x1a8] sm:$0xff] }
  0x38   :  { %302 = vmatpush1.msra.mxu0 %v4468_v50  ;;  %373 = vmatpush1.msra.mxu1 %v4499_v60  ;;  %v4520_v50 = vld [vmem:[#allocation2 + $0x10] sm:$0xff]  ;;  %8424 = vst [vmem:[#allocation29_spill] sm:$0xff] %v4526_v59  ;;  %8426 = vst [vmem:[#allocation31_spill] sm:$0xff] %v4533_v48 }
  0x39   :  { %303 = vmatprep.subr.mxu0 %v4474_v52  ;;  %v4515_v52 = vld [vmem:[#allocation2 + $0x18] sm:$0xff]  ;;  %374 = vmatprep.subr.mxu1 %v4503_v61  ;;  %8422 = vst [vmem:[#allocation27_spill] sm:$0xff] %v4520_v50  ;;  %v4530_v60 = vld [vmem:[#allocation4 + $0x1f0] sm:$0xff] }
  0x3a   :  { %304 = vmatpush1.msra.mxu0 %v4480_v54  ;;  %v8419_v54 = vmov 0.0   ;;  %8420 = vst [vmem:[#allocation25_spill] sm:$0xff] %v4515_v52  ;;  %375 = vmatpush1.msra.mxu1 %v4509_v63  ;;  %8425 = vst [vmem:[#allocation30_spill] sm:$0xff] %v4530_v60  ;;  %v4536_v61 = vld [vmem:[#allocation4 + $0x1d8] sm:$0xff] }
  0x3b   :  { %305 = vmatprep.subr.mxu0 %v4486_v56  ;;  %v4517_v56 = vld [vmem:[#allocation4 + $0x1c8] sm:$0xff]  ;;  %376 = vmatprep.subr.mxu1 %v4515_v52  ;;  %8427 = vst [vmem:[#allocation32_spill] sm:$0xff] %v4536_v61 }
  0x3c   :  { %306 = vmatpush1.msra.mxu0 %v4492_v58  ;;  %8421 = vst [vmem:[#allocation26_spill] sm:$0xff] %v4517_v56  ;;  %v4523_v58 = vld [vmem:[#allocation4 + $0x1c0] sm:$0xff]  ;;  %377 = vmatpush1.msra.mxu1 %v4520_v50  ;;  %v4545_v52 = vld [vmem:[#allocation4 + $0x188] sm:$0xff] }
  0x3d   :  { %340 = vmatmul.mubr.f32.vlgmr.msra.gmra.mxu0 %v8419_v54  ;;  %445 = vmatprep.subr.mxu0 %v4505_v62  ;;  %8423 = vst [vmem:[#allocation28_spill] sm:$0xff] %v4523_v58  ;;  %v4539_v62 = vld [vmem:[#allocation4 + $0x1a0] sm:$0xff]  ;;  %8430 = vst [vmem:[#allocation35_spill] sm:$0xff] %v4545_v52 }
  0x3e   :  { %446 = vmatpush1.msra.mxu0 %v4511_v0  ;;  %8428 = vst [vmem:[#allocation33_spill] sm:$0xff] %v4539_v62  ;;  %411 = vmatmul.mubr.f32.vlgmr.msra.gmra.mxu1 %v8419_v54  ;;  %v4543_v0 = vld [vmem:[#allocation4 + $0x1d0] sm:$0xff]  ;;  %v4551_v50 = vld [vmem:[#allocation4 + $0x180] sm:$0xff] }
  0x3f   :  { %447 = vmatprep.subr.mxu0 %v4517_v56  ;;  %516 = vmatprep.subr.mxu1 %v4526_v59  ;;  %8429 = vst [vmem:[#allocation34_spill] sm:$0xff] %v4543_v0  ;;  %v4549_v56 = vld [vmem:[#allocation4 + $0x1b8] sm:$0xff]  ;;  %8432 = vst [vmem:[#allocation37_spill] sm:$0xff] %v4551_v50 }
  0x40   :  { %448 = vmatpush1.msra.mxu0 %v4523_v58  ;;  %517 = vmatpush1.msra.mxu1 %v4530_v60  ;;  %8431 = vst [vmem:[#allocation36_spill] sm:$0xff] %v4549_v56  ;;  %v4555_v58 = vld [vmem:[#allocation4 + $0x1b0] sm:$0xff]  ;;  %v4559_v59 = vld [vmem:[#allocation4 + $0x198] sm:$0xff]  ;;  %v4841_v60 = vld [vmem:[#allocation4 + $0x288] sm:$0xff] }
  0x41   :  { %449 = vmatprep.subr.mxu0 %v4533_v48  ;;  %518 = vmatprep.subr.mxu1 %v4536_v61  ;;  %8433 = vst [vmem:[#allocation38_spill] sm:$0xff] %v4555_v58  ;;  %8434 = vst [vmem:[#allocation39_spill] sm:$0xff] %v4559_v59  ;;  %v4563_v48 = vld [vmem:[#allocation4 + $0x190] sm:$0xff]  ;;  %v4833_v61 = vld [vmem:[#allocation4 + $0x2b8] sm:$0xff] }
  0x42   :  { %450 = vmatpush1.msra.mxu0 %v4539_v62  ;;  %519 = vmatpush1.msra.mxu1 %v4543_v0  ;;  %8435 = vst [vmem:[#allocation40_spill] sm:$0xff] %v4563_v48  ;;  %v4570_v62 = vld [vmem:[#allocation4 + $0x168] sm:$0xff]  ;;  %v4691_v0 = vld [vmem:[#allocation4 + $0x38] sm:$0xff]  ;;  %8525 = vst [vmem:[#allocation130_spill] sm:$0xff] %v4833_v61 }
  0x43   :  { %451 = vmatprep.subr.mxu0 %v4545_v52  ;;  %520 = vmatprep.subr.mxu1 %v4549_v56  ;;  %8436 = vst [vmem:[#allocation41_spill] sm:$0xff] %v4570_v62  ;;  %v4572_v52 = vld [vmem:[#allocation4 + $0x178] sm:$0xff]  ;;  %v4578_v56 = vld [vmem:[#allocation4 + $0x170] sm:$0xff]  ;;  %8477 = vst [vmem:[#allocation82_spill] sm:$0xff] %v4691_v0 }
  0x44   :  { %452 = vmatpush1.msra.mxu0 %v4551_v50  ;;  %521 = vmatpush1.msra.mxu1 %v4555_v58  ;;  %8437 = vst [vmem:[#allocation42_spill] sm:$0xff] %v4572_v52  ;;  %v4576_v50 = vld [vmem:[#allocation4 + $0x160] sm:$0xff]  ;;  %8439 = vst [vmem:[#allocation44_spill] sm:$0xff] %v4578_v56  ;;  %v4584_v58 = vld [vmem:[#allocation4 + $0x158] sm:$0xff] }
  0x45   :  { %509 = vmatprep.mubr.f32.mxu0 %v8419_v54  ;;  %522 = vmatprep.subr.mxu1 %v4559_v59  ;;  %8438 = vst [vmem:[#allocation43_spill] sm:$0xff] %v4576_v50  ;;  %v4582_v59 = vld [vmem:[#allocation4 + $0x148] sm:$0xff]  ;;  %8441 = vst [vmem:[#allocation46_spill] sm:$0xff] %v4584_v58 }
  0x46   :  { %580 = vmatprep.mubr.f32.mxu1 %v8419_v54  ;;  %523 = vmatpush1.msra.mxu1 %v4563_v48  ;;  %8440 = vst [vmem:[#allocation45_spill] sm:$0xff] %v4582_v59  ;;  %v4588_v48 = vld [vmem:[#allocation4 + $0x140] sm:$0xff]  ;;  %8528 = vst [vmem:[#allocation133_spill] sm:$0xff] %v4841_v60  ;;  %v4857_v54 = vld [vmem:[#allocation4 + $0x278] sm:$0xff] }
  0x47   :  { %453 = vmatprep.subr.mxu0 %v4570_v62  ;;  %524 = vmatprep.subr.mxu1 %v4572_v52  ;;  %8442 = vst [vmem:[#allocation47_spill] sm:$0xff] %v4588_v48  ;;  %v4590_v62 = vld [vmem:[#allocation4 + $0x150] sm:$0xff]  ;;  %v4594_v52 = vld [vmem:[#allocation4 + $0x128] sm:$0xff]  ;;  %8533 = vst [vmem:[#allocation138_spill] sm:$0xff] %v4857_v54 }
  0x48   :  { %454 = vmatpush1.msra.mxu0 %v4576_v50  ;;  %525 = vmatpush1.msra.mxu1 %v4578_v56  ;;  %8443 = vst [vmem:[#allocation48_spill] sm:$0xff] %v4590_v62  ;;  %8444 = vst [vmem:[#allocation49_spill] sm:$0xff] %v4594_v52  ;;  %v4596_v50 = vld [vmem:[#allocation4 + $0x138] sm:$0xff]  ;;  %v4600_v56 = vld [vmem:[#allocation4 + $0x120] sm:$0xff] }
  0x49   :  { %455 = vmatprep.subr.mxu0 %v4582_v59  ;;  %526 = vmatprep.subr.mxu1 %v4584_v58  ;;  %8445 = vst [vmem:[#allocation50_spill] sm:$0xff] %v4596_v50  ;;  %8446 = vst [vmem:[#allocation51_spill] sm:$0xff] %v4600_v56  ;;  %v4602_v59 = vld [vmem:[#allocation4 + $0x130] sm:$0xff]  ;;  %v4606_v58 = vld [vmem:[#allocation4 + $0x108] sm:$0xff] }
  0x4a   :  { %456 = vmatpush1.msra.mxu0 %v4588_v48  ;;  %527 = vmatpush1.msra.mxu1 %v4590_v62  ;;  %8447 = vst [vmem:[#allocation52_spill] sm:$0xff] %v4602_v59  ;;  %8448 = vst [vmem:[#allocation53_spill] sm:$0xff] %v4606_v58  ;;  %v4608_v48 = vld [vmem:[#allocation4 + $0x118] sm:$0xff]  ;;  %v4612_v62 = vld [vmem:[#allocation4 + $0x100] sm:$0xff] }
  0x4b   :  { %457 = vmatprep.subr.mxu0 %v4594_v52  ;;  %528 = vmatprep.subr.mxu1 %v4596_v50  ;;  %8449 = vst [vmem:[#allocation54_spill] sm:$0xff] %v4608_v48  ;;  %8450 = vst [vmem:[#allocation55_spill] sm:$0xff] %v4612_v62  ;;  %v4614_v52 = vld [vmem:[#allocation4 + $0x110] sm:$0xff]  ;;  %v4618_v50 = vld [vmem:[#allocation4 + $0xe8] sm:$0xff] }
  0x4c   :  { %458 = vmatpush1.msra.mxu0 %v4600_v56  ;;  %529 = vmatpush1.msra.mxu1 %v4602_v59  ;;  %8451 = vst [vmem:[#allocation56_spill] sm:$0xff] %v4614_v52  ;;  %8452 = vst [vmem:[#allocation57_spill] sm:$0xff] %v4618_v50  ;;  %v4620_v56 = vld [vmem:[#allocation4 + $0xf8] sm:$0xff]  ;;  %v4624_v59 = vld [vmem:[#allocation4 + $0xe0] sm:$0xff] }
  0x4d   :  { %459 = vmatprep.subr.mxu0 %v4606_v58  ;;  %530 = vmatprep.subr.mxu1 %v4608_v48  ;;  %8453 = vst [vmem:[#allocation58_spill] sm:$0xff] %v4620_v56  ;;  %8454 = vst [vmem:[#allocation59_spill] sm:$0xff] %v4624_v59  ;;  %v4626_v58 = vld [vmem:[#allocation4 + $0xf0] sm:$0xff]  ;;  %v4630_v48 = vld [vmem:[#allocation4 + $0xc8] sm:$0xff] }
  0x4e   :  { %460 = vmatpush1.msra.mxu0 %v4612_v62  ;;  %531 = vmatpush1.msra.mxu1 %v4614_v52  ;;  %8455 = vst [vmem:[#allocation60_spill] sm:$0xff] %v4626_v58  ;;  %8456 = vst [vmem:[#allocation61_spill] sm:$0xff] %v4630_v48  ;;  %v4632_v62 = vld [vmem:[#allocation4 + $0xd8] sm:$0xff]  ;;  %v4636_v52 = vld [vmem:[#allocation4 + $0xc0] sm:$0xff] }
  0x4f   :  { %461 = vmatprep.subr.mxu0 %v4618_v50  ;;  %532 = vmatprep.subr.mxu1 %v4620_v56  ;;  %8457 = vst [vmem:[#allocation62_spill] sm:$0xff] %v4632_v62  ;;  %8458 = vst [vmem:[#allocation63_spill] sm:$0xff] %v4636_v52  ;;  %v4638_v50 = vld [vmem:[#allocation4 + $0xd0] sm:$0xff]  ;;  %v4642_v56 = vld [vmem:[#allocation4 + $0xa8] sm:$0xff] }
  0x50   :  { %462 = vmatpush1.msra.mxu0 %v4624_v59  ;;  %533 = vmatpush1.msra.mxu1 %v4626_v58  ;;  %8459 = vst [vmem:[#allocation64_spill] sm:$0xff] %v4638_v50  ;;  %8460 = vst [vmem:[#allocation65_spill] sm:$0xff] %v4642_v56  ;;  %v4644_v59 = vld [vmem:[#allocation4 + $0xb8] sm:$0xff]  ;;  %v4648_v58 = vld [vmem:[#allocation4 + $0xa0] sm:$0xff] }
  0x51   :  { %463 = vmatprep.subr.mxu0 %v4630_v48  ;;  %534 = vmatprep.subr.mxu1 %v4632_v62  ;;  %8461 = vst [vmem:[#allocation66_spill] sm:$0xff] %v4644_v59  ;;  %8462 = vst [vmem:[#allocation67_spill] sm:$0xff] %v4648_v58  ;;  %v4650_v48 = vld [vmem:[#allocation4 + $0xb0] sm:$0xff]  ;;  %v4654_v62 = vld [vmem:[#allocation4 + $0x88] sm:$0xff] }
  0x52   :  { %464 = vmatpush1.msra.mxu0 %v4636_v52  ;;  %535 = vmatpush1.msra.mxu1 %v4638_v50  ;;  %8463 = vst [vmem:[#allocation68_spill] sm:$0xff] %v4650_v48  ;;  %8464 = vst [vmem:[#allocation69_spill] sm:$0xff] %v4654_v62  ;;  %v4656_v52 = vld [vmem:[#allocation4 + $0x98] sm:$0xff]  ;;  %v4660_v50 = vld [vmem:[#allocation4 + $0x80] sm:$0xff] }
  0x53   :  { %465 = vmatprep.subr.mxu0 %v4642_v56  ;;  %536 = vmatprep.subr.mxu1 %v4644_v59  ;;  %8465 = vst [vmem:[#allocation70_spill] sm:$0xff] %v4656_v52  ;;  %8466 = vst [vmem:[#allocation71_spill] sm:$0xff] %v4660_v50  ;;  %v4662_v56 = vld [vmem:[#allocation4 + $0x90] sm:$0xff]  ;;  %v4666_v59 = vld [vmem:[#allocation4 + $0x68] sm:$0xff] }
  0x54   :  { %466 = vmatpush1.msra.mxu0 %v4648_v58  ;;  %537 = vmatpush1.msra.mxu1 %v4650_v48  ;;  %8467 = vst [vmem:[#allocation72_spill] sm:$0xff] %v4662_v56  ;;  %8468 = vst [vmem:[#allocation73_spill] sm:$0xff] %v4666_v59  ;;  %v4668_v58 = vld [vmem:[#allocation4 + $0x78] sm:$0xff]  ;;  %v4672_v48 = vld [vmem:[#allocation4 + $0x60] sm:$0xff] }
  0x55   :  { %467 = vmatprep.subr.mxu0 %v4654_v62  ;;  %538 = vmatprep.subr.mxu1 %v4656_v52  ;;  %8469 = vst [vmem:[#allocation74_spill] sm:$0xff] %v4668_v58  ;;  %8470 = vst [vmem:[#allocation75_spill] sm:$0xff] %v4672_v48  ;;  %v4674_v62 = vld [vmem:[#allocation4 + $0x70] sm:$0xff]  ;;  %v4678_v52 = vld [vmem:[#allocation4 + $0x48] sm:$0xff] }
  0x56   :  { %468 = vmatpush1.msra.mxu0 %v4660_v50  ;;  %539 = vmatpush1.msra.mxu1 %v4662_v56  ;;  %8471 = vst [vmem:[#allocation76_spill] sm:$0xff] %v4674_v62  ;;  %8472 = vst [vmem:[#allocation77_spill] sm:$0xff] %v4678_v52  ;;  %v4680_v50 = vld [vmem:[#allocation4 + $0x58] sm:$0xff]  ;;  %v4684_v56 = vld [vmem:[#allocation4 + $0x40] sm:$0xff] }
  0x57   :  { %469 = vmatprep.subr.mxu0 %v4666_v59  ;;  %540 = vmatprep.subr.mxu1 %v4668_v58  ;;  %8473 = vst [vmem:[#allocation78_spill] sm:$0xff] %v4680_v50  ;;  %8474 = vst [vmem:[#allocation79_spill] sm:$0xff] %v4684_v56  ;;  %v4687_v58 = vld [vmem:[#allocation4 + $0x50] sm:$0xff]  ;;  %v4689_v59 = vld [vmem:[#allocation4 + $0x28] sm:$0xff] }
  0x58   :  { %470 = vmatpush1.msra.mxu0 %v4672_v48  ;;  %541 = vmatpush1.msra.mxu1 %v4674_v62  ;;  %8475 = vst [vmem:[#allocation80_spill] sm:$0xff] %v4687_v58  ;;  %8476 = vst [vmem:[#allocation81_spill] sm:$0xff] %v4689_v59  ;;  %v4695_v62 = vld [vmem:[#allocation4 + $0x20] sm:$0xff]  ;;  %v4697_v48 = vld [vmem:[#allocation4 + $0x30] sm:$0xff] }
  0x59   :  { %471 = vmatprep.subr.mxu0 %v4678_v52  ;;  %542 = vmatprep.subr.mxu1 %v4680_v50  ;;  %8478 = vst [vmem:[#allocation83_spill] sm:$0xff] %v4695_v62  ;;  %8479 = vst [vmem:[#allocation84_spill] sm:$0xff] %v4697_v48  ;;  %v4701_v50 = vld [vmem:[#allocation4 + $0x8] sm:$0xff]  ;;  %v4707_v52 = vld [vmem:[#allocation4] sm:$0xff] }
  0x5a   :  { %472 = vmatpush1.msra.mxu0 %v4684_v56  ;;  %543 = vmatpush1.msra.mxu1 %v4687_v58  ;;  %8480 = vst [vmem:[#allocation85_spill] sm:$0xff] %v4701_v50  ;;  %v4703_v56 = vld [vmem:[#allocation4 + $0x18] sm:$0xff]  ;;  %8482 = vst [vmem:[#allocation87_spill] sm:$0xff] %v4707_v52  ;;  %v4709_v58 = vld [vmem:[#allocation4 + $0x10] sm:$0xff] }
  0x5b   :  { %473 = vmatprep.subr.mxu0 %v4689_v59  ;;  %544 = vmatprep.subr.mxu1 %v4691_v0  ;;  %8481 = vst [vmem:[#allocation86_spill] sm:$0xff] %v4703_v56  ;;  %8483 = vst [vmem:[#allocation88_spill] sm:$0xff] %v4709_v58  ;;  %v4713_v59 = vld [vmem:[#allocation4 + $0x3e8] sm:$0xff]  ;;  %v4715_v0 = vld [vmem:[#allocation4 + $0x3f8] sm:$0xff] }
  0x5c   :  { %474 = vmatpush1.msra.mxu0 %v4695_v62  ;;  %545 = vmatpush1.msra.mxu1 %v4697_v48  ;;  %8484 = vst [vmem:[#allocation89_spill] sm:$0xff] %v4713_v59  ;;  %8485 = vst [vmem:[#allocation90_spill] sm:$0xff] %v4715_v0  ;;  %v4719_v62 = vld [vmem:[#allocation4 + $0x3e0] sm:$0xff]  ;;  %v4721_v48 = vld [vmem:[#allocation4 + $0x3f0] sm:$0xff] }
  0x5d   :  { %475 = vmatprep.subr.mxu0 %v4701_v50  ;;  %546 = vmatprep.subr.mxu1 %v4703_v56  ;;  %8486 = vst [vmem:[#allocation91_spill] sm:$0xff] %v4719_v62  ;;  %8487 = vst [vmem:[#allocation92_spill] sm:$0xff] %v4721_v48  ;;  %v4725_v50 = vld [vmem:[#allocation4 + $0x3c8] sm:$0xff]  ;;  %v4727_v56 = vld [vmem:[#allocation4 + $0x3d8] sm:$0xff] }
  0x5e   :  { %476 = vmatpush1.msra.mxu0 %v4707_v52  ;;  %547 = vmatpush1.msra.mxu1 %v4709_v58  ;;  %8488 = vst [vmem:[#allocation93_spill] sm:$0xff] %v4725_v50  ;;  %8489 = vst [vmem:[#allocation94_spill] sm:$0xff] %v4727_v56  ;;  %v4731_v52 = vld [vmem:[#allocation4 + $0x3c0] sm:$0xff]  ;;  %v4733_v58 = vld [vmem:[#allocation4 + $0x3d0] sm:$0xff] }
  0x5f   :  { %477 = vmatprep.subr.mxu0 %v4713_v59  ;;  %548 = vmatprep.subr.mxu1 %v4715_v0  ;;  %8490 = vst [vmem:[#allocation95_spill] sm:$0xff] %v4731_v52  ;;  %8491 = vst [vmem:[#allocation96_spill] sm:$0xff] %v4733_v58  ;;  %v4737_v59 = vld [vmem:[#allocation4 + $0x3a8] sm:$0xff]  ;;  %v4739_v0 = vld [vmem:[#allocation4 + $0x3b8] sm:$0xff] }
  0x60   :  { %478 = vmatpush2.msra.mxu0 %v4719_v62  ;;  %549 = vmatpush2.msra.mxu1 %v4721_v48  ;;  %8492 = vst [vmem:[#allocation97_spill] sm:$0xff] %v4737_v59  ;;  %8493 = vst [vmem:[#allocation98_spill] sm:$0xff] %v4739_v0  ;;  %v4743_v62 = vld [vmem:[#allocation4 + $0x3a0] sm:$0xff]  ;;  %v4745_v48 = vld [vmem:[#allocation4 + $0x3b0] sm:$0xff] }
  0x61   :  { %479 = vmatprep.subr.mxu0 %v4725_v50  ;;  %550 = vmatprep.subr.mxu1 %v4727_v56  ;;  %8494 = vst [vmem:[#allocation99_spill] sm:$0xff] %v4743_v62  ;;  %8495 = vst [vmem:[#allocation100_spill] sm:$0xff] %v4745_v48  ;;  %v4749_v50 = vld [vmem:[#allocation4 + $0x388] sm:$0xff]  ;;  %v4751_v56 = vld [vmem:[#allocation4 + $0x398] sm:$0xff] }
  0x62   :  { %480 = vmatpush2.msra.mxu0 %v4731_v52  ;;  %551 = vmatpush2.msra.mxu1 %v4733_v58  ;;  %8496 = vst [vmem:[#allocation101_spill] sm:$0xff] %v4749_v50  ;;  %8497 = vst [vmem:[#allocation102_spill] sm:$0xff] %v4751_v56  ;;  %v4755_v52 = vld [vmem:[#allocation4 + $0x380] sm:$0xff]  ;;  %v4757_v58 = vld [vmem:[#allocation4 + $0x390] sm:$0xff] }
  0x63   :  { %481 = vmatprep.subr.mxu0 %v4737_v59  ;;  %552 = vmatprep.subr.mxu1 %v4739_v0  ;;  %8498 = vst [vmem:[#allocation103_spill] sm:$0xff] %v4755_v52  ;;  %8499 = vst [vmem:[#allocation104_spill] sm:$0xff] %v4757_v58  ;;  %v4761_v59 = vld [vmem:[#allocation4 + $0x368] sm:$0xff]  ;;  %v4763_v0 = vld [vmem:[#allocation4 + $0x378] sm:$0xff] }
  0x64   :  { %482 = vmatpush2.msra.mxu0 %v4743_v62  ;;  %553 = vmatpush2.msra.mxu1 %v4745_v48  ;;  %8500 = vst [vmem:[#allocation105_spill] sm:$0xff] %v4761_v59  ;;  %8501 = vst [vmem:[#allocation106_spill] sm:$0xff] %v4763_v0  ;;  %v4767_v62 = vld [vmem:[#allocation4 + $0x360] sm:$0xff]  ;;  %v4769_v48 = vld [vmem:[#allocation4 + $0x370] sm:$0xff] }
  0x65   :  { %483 = vmatprep.subr.mxu0 %v4749_v50  ;;  %554 = vmatprep.subr.mxu1 %v4751_v56  ;;  %8502 = vst [vmem:[#allocation107_spill] sm:$0xff] %v4767_v62  ;;  %8503 = vst [vmem:[#allocation108_spill] sm:$0xff] %v4769_v48  ;;  %v4773_v50 = vld [vmem:[#allocation4 + $0x348] sm:$0xff]  ;;  %v4775_v56 = vld [vmem:[#allocation4 + $0x358] sm:$0xff] }
  0x66   :  { %484 = vmatpush2.msra.mxu0 %v4755_v52  ;;  %555 = vmatpush2.msra.mxu1 %v4757_v58  ;;  %8504 = vst [vmem:[#allocation109_spill] sm:$0xff] %v4773_v50  ;;  %8505 = vst [vmem:[#allocation110_spill] sm:$0xff] %v4775_v56  ;;  %v4779_v52 = vld [vmem:[#allocation4 + $0x340] sm:$0xff]  ;;  %v4781_v58 = vld [vmem:[#allocation4 + $0x350] sm:$0xff] }
  0x67   :  { %485 = vmatprep.subr.mxu0 %v4761_v59  ;;  %556 = vmatprep.subr.mxu1 %v4763_v0  ;;  %8506 = vst [vmem:[#allocation111_spill] sm:$0xff] %v4779_v52  ;;  %8507 = vst [vmem:[#allocation112_spill] sm:$0xff] %v4781_v58  ;;  %v4785_v59 = vld [vmem:[#allocation4 + $0x328] sm:$0xff]  ;;  %v4787_v0 = vld [vmem:[#allocation4 + $0x338] sm:$0xff] }
  0x68   :  { %486 = vmatpush2.msra.mxu0 %v4767_v62  ;;  %557 = vmatpush2.msra.mxu1 %v4769_v48  ;;  %8508 = vst [vmem:[#allocation113_spill] sm:$0xff] %v4785_v59  ;;  %8509 = vst [vmem:[#allocation114_spill] sm:$0xff] %v4787_v0  ;;  %v4791_v62 = vld [vmem:[#allocation4 + $0x320] sm:$0xff]  ;;  %v4793_v48 = vld [vmem:[#allocation4 + $0x330] sm:$0xff] }
  0x69   :  { %487 = vmatprep.subr.mxu0 %v4773_v50  ;;  %558 = vmatprep.subr.mxu1 %v4775_v56  ;;  %8510 = vst [vmem:[#allocation115_spill] sm:$0xff] %v4791_v62  ;;  %8511 = vst [vmem:[#allocation116_spill] sm:$0xff] %v4793_v48  ;;  %v4797_v50 = vld [vmem:[#allocation4 + $0x308] sm:$0xff]  ;;  %v4799_v56 = vld [vmem:[#allocation4 + $0x318] sm:$0xff] }
  0x6a   :  { %488 = vmatpush2.msra.mxu0 %v4779_v52  ;;  %559 = vmatpush2.msra.mxu1 %v4781_v58  ;;  %8512 = vst [vmem:[#allocation117_spill] sm:$0xff] %v4797_v50  ;;  %8513 = vst [vmem:[#allocation118_spill] sm:$0xff] %v4799_v56  ;;  %v4803_v52 = vld [vmem:[#allocation4 + $0x300] sm:$0xff]  ;;  %v4805_v58 = vld [vmem:[#allocation4 + $0x310] sm:$0xff] }
  0x6b   :  { %489 = vmatprep.subr.mxu0 %v4785_v59  ;;  %560 = vmatprep.subr.mxu1 %v4787_v0  ;;  %8514 = vst [vmem:[#allocation119_spill] sm:$0xff] %v4803_v52  ;;  %8515 = vst [vmem:[#allocation120_spill] sm:$0xff] %v4805_v58  ;;  %v4809_v59 = vld [vmem:[#allocation4 + $0x2e8] sm:$0xff]  ;;  %v4811_v0 = vld [vmem:[#allocation4 + $0x2f8] sm:$0xff] }
  0x6c   :  { %490 = vmatpush2.msra.mxu0 %v4791_v62  ;;  %561 = vmatpush2.msra.mxu1 %v4793_v48  ;;  %8516 = vst [vmem:[#allocation121_spill] sm:$0xff] %v4809_v59  ;;  %8517 = vst [vmem:[#allocation122_spill] sm:$0xff] %v4811_v0  ;;  %v4815_v62 = vld [vmem:[#allocation4 + $0x2e0] sm:$0xff]  ;;  %v4817_v48 = vld [vmem:[#allocation4 + $0x2f0] sm:$0xff] }
  0x6d   :  { %491 = vmatprep.subr.mxu0 %v4797_v50  ;;  %562 = vmatprep.subr.mxu1 %v4799_v56  ;;  %8518 = vst [vmem:[#allocation123_spill] sm:$0xff] %v4815_v62  ;;  %8519 = vst [vmem:[#allocation124_spill] sm:$0xff] %v4817_v48  ;;  %v4821_v50 = vld [vmem:[#allocation4 + $0x2c8] sm:$0xff]  ;;  %v4823_v56 = vld [vmem:[#allocation4 + $0x2d8] sm:$0xff] }
  0x6e   :  { %492 = vmatpush2.msra.mxu0 %v4803_v52  ;;  %563 = vmatpush2.msra.mxu1 %v4805_v58  ;;  %8520 = vst [vmem:[#allocation125_spill] sm:$0xff] %v4821_v50  ;;  %8521 = vst [vmem:[#allocation126_spill] sm:$0xff] %v4823_v56  ;;  %v4825_v52 = vld [vmem:[#allocation4 + $0x2c0] sm:$0xff]  ;;  %v4829_v58 = vld [vmem:[#allocation4 + $0x2d0] sm:$0xff] }
  0x6f   :  { %493 = vmatprep.subr.mxu0 %v4809_v59  ;;  %564 = vmatprep.subr.mxu1 %v4811_v0  ;;  %8522 = vst [vmem:[#allocation127_spill] sm:$0xff] %v4825_v52  ;;  %8523 = vst [vmem:[#allocation128_spill] sm:$0xff] %v4829_v58  ;;  %v4831_v59 = vld [vmem:[#allocation4 + $0x2a8] sm:$0xff]  ;;  %v4839_v0 = vld [vmem:[#allocation4 + $0x2b0] sm:$0xff] }
  0x70   :  { %494 = vmatpush2.msra.mxu0 %v4815_v62  ;;  %565 = vmatpush2.msra.mxu1 %v4817_v48  ;;  %8524 = vst [vmem:[#allocation129_spill] sm:$0xff] %v4831_v59  ;;  %v4837_v62 = vld [vmem:[#allocation4 + $0x2a0] sm:$0xff]  ;;  %8527 = vst [vmem:[#allocation132_spill] sm:$0xff] %v4839_v0 }
  0x71   :  { %495 = vmatprep.subr.mxu0 %v4821_v50  ;;  %566 = vmatprep.subr.mxu1 %v4823_v56  ;;  %8526 = vst [vmem:[#allocation131_spill] sm:$0xff] %v4837_v62  ;;  %v4845_v50 = vld [vmem:[#allocation4 + $0x298] sm:$0xff]  ;;  %v4847_v48 = vld [vmem:[#allocation4 + $0x280] sm:$0xff]  ;;  %v4851_v56 = vld [vmem:[#allocation4 + $0x290] sm:$0xff] }
  0x72   :  { %496 = vmatpush2.msra.mxu0 %v4825_v52  ;;  %567 = vmatpush2.msra.mxu1 %v4829_v58  ;;  %8529 = vst [vmem:[#allocation134_spill] sm:$0xff] %v4845_v50  ;;  %8530 = vst [vmem:[#allocation135_spill] sm:$0xff] %v4847_v48  ;;  %v4853_v52 = vld [vmem:[#allocation4 + $0x268] sm:$0xff]  ;;  %v4859_v58 = vld [vmem:[#allocation4 + $0x260] sm:$0xff] }
  0x73   :  { %497 = vmatprep.subr.mxu0 %v4831_v59  ;;  %568 = vmatprep.subr.mxu1 %v4833_v61  ;;  %8531 = vst [vmem:[#allocation136_spill] sm:$0xff] %v4851_v56  ;;  %8532 = vst [vmem:[#allocation137_spill] sm:$0xff] %v4853_v52  ;;  %v4863_v59 = vld [vmem:[#allocation4 + $0x270] sm:$0xff]  ;;  %v4865_v61 = vld [vmem:[#allocation4 + $0x248] sm:$0xff] }
  0x74   :  { %498 = vmatpush2.msra.mxu0 %v4837_v62  ;;  %569 = vmatpush2.msra.mxu1 %v4839_v0  ;;  %8534 = vst [vmem:[#allocation139_spill] sm:$0xff] %v4859_v58  ;;  %8535 = vst [vmem:[#allocation140_spill] sm:$0xff] %v4863_v59  ;;  %v4869_v62 = vld [vmem:[#allocation4 + $0x258] sm:$0xff]  ;;  %v4871_v0 = vld [vmem:[#allocation4 + $0x240] sm:$0xff] }
  0x75   :  { %499 = vmatprep.subr.mxu0 %v4841_v60  ;;  %570 = vmatprep.subr.mxu1 %v4845_v50  ;;  %8536 = vst [vmem:[#allocation141_spill] sm:$0xff] %v4865_v61  ;;  %8537 = vst [vmem:[#allocation142_spill] sm:$0xff] %v4869_v62  ;;  %v4875_v60 = vld [vmem:[#allocation4 + $0x250] sm:$0xff]  ;;  %v4877_v50 = vld [vmem:[#allocation4 + $0x228] sm:$0xff] }
  0x76   :  { %500 = vmatpush2.msra.mxu0 %v4847_v48  ;;  %571 = vmatpush2.msra.mxu1 %v4851_v56  ;;  %8538 = vst [vmem:[#allocation143_spill] sm:$0xff] %v4871_v0  ;;  %8539 = vst [vmem:[#allocation144_spill] sm:$0xff] %v4875_v60  ;;  %v4881_v48 = vld [vmem:[#allocation4 + $0x238] sm:$0xff]  ;;  %v4883_v56 = vld [vmem:[#allocation4 + $0x220] sm:$0xff] }
  0x77   :  { %501 = vmatprep.subr.mxu0 %v4853_v52  ;;  %572 = vmatprep.subr.mxu1 %v4857_v54  ;;  %8540 = vst [vmem:[#allocation145_spill] sm:$0xff] %v4877_v50  ;;  %8541 = vst [vmem:[#allocation146_spill] sm:$0xff] %v4881_v48  ;;  %v4887_v52 = vld [vmem:[#allocation4 + $0x230] sm:$0xff]  ;;  %v4889_v54 = vld [vmem:[#allocation4 + $0x208] sm:$0xff] }
  0x78   :  { %502 = vmatpush2.msra.mxu0 %v4859_v58  ;;  %573 = vmatpush2.msra.mxu1 %v4863_v59  ;;  %8542 = vst [vmem:[#allocation147_spill] sm:$0xff] %v4883_v56  ;;  %8543 = vst [vmem:[#allocation148_spill] sm:$0xff] %v4887_v52  ;;  %v4893_v58 = vld [vmem:[#allocation4 + $0x218] sm:$0xff]  ;;  %v4895_v59 = vld [vmem:[#allocation4 + $0x200] sm:$0xff] }
  0x79   :  { %503 = vmatprep.subr.mxu0 %v4865_v61  ;;  %574 = vmatprep.subr.mxu1 %v4869_v62  ;;  %8544 = vst [vmem:[#allocation149_spill] sm:$0xff] %v4889_v54  ;;  %8545 = vst [vmem:[#allocation150_spill] sm:$0xff] %v4893_v58  ;;  %v4899_v61 = vld [vmem:[#allocation4 + $0x210] sm:$0xff] }
  0x7a   :  { %504 = vmatpush2.msra.mxu0 %v4871_v0  ;;  %575 = vmatpush2.msra.mxu1 %v4875_v60  ;;  %8546 = vst [vmem:[#allocation151_spill] sm:$0xff] %v4895_v59  ;;  %8547 = vst [vmem:[#allocation152_spill] sm:$0xff] %v4899_v61  ;;  %v273_v0 = vld [vmem:[%s7792_s0 + $0x10] sm:$0xff] }
  0x7b   :  { %505 = vmatprep.subr.mxu0 %v4877_v50  ;;  %576 = vmatprep.subr.mxu1 %v4881_v48 }
  0x7c   :  { %506 = vmatpush2.msra.mxu0 %v4883_v56  ;;  %577 = vmatpush2.msra.mxu1 %v4887_v52  ;;  %v271_v56 = vld [vmem:[%s7792_s0] sm:$0xff]  ;;  %v272_v52 = vld [vmem:[%s7792_s0 + $0x8] sm:$0xff] }
  0x7d   :  { %507 = vmatprep.subr.mxu0 %v4889_v54  ;;  %578 = vmatprep.subr.mxu1 %v4893_v58 }
  0x7e   :  { %508 = vmatpush2.msra.mxu0 %v4895_v59  ;;  %579 = vmatpush2.msra.mxu1 %v4899_v61 }
  0x7f   :  { %616 = vmatprep.subr.mxu0 %v4326_v1  ;;  %687 = vmatprep.subr.mxu1 %v4347_v9  ;;  %v274_v1 = vld [vmem:[%s7792_s0 + $0x18] sm:$0xff] }
  0xfd   :  { %v341_v48 = vpop.f32.mrf.mxu0 }
  0xfe   :  { %v417_v54 = vadd.f32 %v341_v48, %v271_v56  ;;  %v412_v61 = vpop.f32.mrf.mxu1 }
  0xff   :  { %v343_v50 = vpop.f32.mrf.mxu0  ;;  %v419_v63 = vadd.f32 %v412_v61, %v273_v0 }
 0x100   :  { %v3198_v58 = vmul.f32 -1.442695, %v417_v54  ;;  %v418_v60 = vadd.f32 %v343_v50, %v272_v52  ;;  %v414_v9 = vpop.f32.mrf.mxu1 }
 0x101   :  { %v420_v62 = vadd.f32 %v414_v9, %v274_v1  ;;  %v8598_v1 = vld [vmem:[#allocation57_spill] sm:$0xff]  ;;  %v8599_v9 = vld [vmem:[#allocation58_spill] sm:$0xff] }
 0x102   :  { %3387 = vpow2.f32 %v3198_v58  ;;  %v3199_v59 = vmul.f32 -1.442695, %v418_v60 }
 0x103   :  { %v3200_v57 = vmul.f32 -1.442695, %v420_v62 }
 0x104   :  { %3389 = vpow2.f32 %v3199_v59 }
 0x105   :  { %3391 = vtanh.f32 %v419_v63  ;;  %v8597_v63 = vld [vmem:[#allocation56_spill] sm:$0xff] }
 0x106   :  { %3393 = vpow2.f32 %v3200_v57  ;;  %v8596_v57 = vld [vmem:[#allocation55_spill] sm:$0xff] }
 0x10f   :  { %v3388_v48 = vpop.eup %3387 }
 0x110   :  { %v424_v56 = vadd.f32 1.0, %v3388_v48  ;;  %v8600_v48 = vld [vmem:[#allocation59_spill] sm:$0xff] }
 0x111   :  { %v3390_v50 = vpop.eup %3389 }
 0x112   :  { %3395 = vrcp.f32 %v424_v56  ;;  %v430_v52 = vadd.f32 1.0, %v3390_v50  ;;  %v3392_v54 = vpop.eup %3391  ;;  %v8601_v56 = vld [vmem:[#allocation60_spill] sm:$0xff]  ;;  %v8602_v50 = vld [vmem:[#allocation61_spill] sm:$0xff] }
 0x113   :  { %v3394_v58 = vpop.eup %3393 }
 0x114   :  { %3397 = vrcp.f32 %v430_v52  ;;  %v437_v46 = vadd.f32 1.0, %v3394_v58  ;;  %v8603_v52 = vld [vmem:[#allocation62_spill] sm:$0xff]  ;;  %v8605_v58 = vld [vmem:[#allocation64_spill] sm:$0xff] }
 0x116   :  { %3399 = vrcp.f32 %v437_v46  ;;  %v8591_v46 = vld [vmem:[#allocation50_spill] sm:$0xff] }
 0x11f   :  { %v3396_v59 = vpop.eup %3395 }
 0x120   :  { %v441_v44 = vmul.f32 %v3396_v59, %v3392_v54  ;;  %v8604_v54 = vld [vmem:[#allocation63_spill] sm:$0xff]  ;;  %v8606_v59 = vld [vmem:[#allocation65_spill] sm:$0xff] }
 0x121   :  { %v3398_v60 = vpop.eup %3397 }
 0x122   :  { %v440_v55 = vmul.f32 0.0, %v3398_v60  ;;  %v8607_v60 = vld [vmem:[#allocation66_spill] sm:$0xff] }
 0x123   :  { %v3400_v0 = vpop.eup %3399 }
 0x124   :  { %v4920_v53 = vadd.f32 %v441_v44, %v440_v55  ;;  %v8589_v44 = vld [vmem:[#allocation48_spill] sm:$0xff]  ;;  %v8595_v55 = vld [vmem:[#allocation54_spill] sm:$0xff] }
 0x126   :  { %3401 = vtanh.f32 %v4920_v53 }
 0x133   :  { %v3402_v61 = vpop.eup %3401 }
 0x134   :  { %v4923_v62 = vmul.f32 %v3402_v61, %v3400_v0  ;;  %v8608_v0 = vld [vmem:[#allocation67_spill] sm:$0xff]  ;;  %v8609_v61 = vld [vmem:[#allocation68_spill] sm:$0xff] }
 0x136   :  { %510 = vmatmul.mubr.f32.vlgmr.msra.gmra.mxu0 %v4923_v62  ;;  %581 = vmatmul.mubr.f32.vlgmr.msra.gmra.mxu1 %v4923_v62 }
 0x137   :  { %617 = vmatpush1.msra.mxu0 %v4328_v2  ;;  %688 = vmatpush1.msra.mxu1 %v4353_v11  ;;  %v8548_v2 = vld [vmem:[#allocation13_spill] sm:$0xff]  ;;  %v8556_v11 = vld [vmem:[#allocation20_spill] sm:$0xff] }
 0x138   :  { %618 = vmatprep.subr.mxu0 %v4330_v3  ;;  %689 = vmatprep.subr.mxu1 %v4359_v13  ;;  %v8549_v3 = vld [vmem:[#allocation8_spill] sm:$0xff]  ;;  %v8558_v13 = vld [vmem:[#allocation21_spill] sm:$0xff] }
 0x139   :  { %619 = vmatpush1.msra.mxu0 %v4333_v4  ;;  %690 = vmatpush1.msra.mxu1 %v4361_v14  ;;  %v8550_v4 = vld [vmem:[#allocation15_spill] sm:$0xff]  ;;  %v8559_v14 = vld [vmem:[#allocation14_spill] sm:$0xff] }
 0x13a   :  { %620 = vmatprep.subr.mxu0 %v4336_v5  ;;  %691 = vmatprep.subr.mxu1 %v4367_v16  ;;  %v8551_v5 = vld [vmem:[#allocation9_spill] sm:$0xff]  ;;  %v8561_v16 = vld [vmem:[#allocation16_spill] sm:$0xff] }
 0x13b   :  { %621 = vmatpush1.msra.mxu0 %v4339_v6  ;;  %692 = vmatpush1.msra.mxu1 %v4373_v18  ;;  %v8552_v6 = vld [vmem:[#allocation17_spill] sm:$0xff]  ;;  %v8563_v18 = vld [vmem:[#allocation18_spill] sm:$0xff] }
 0x13c   :  { %622 = vmatprep.subr.mxu0 %v4342_v7  ;;  %693 = vmatprep.subr.mxu1 %v4375_v19  ;;  %v8553_v7 = vld [vmem:[#allocation10_spill] sm:$0xff]  ;;  %v8564_v19 = vmov 0.0  }
 0x13d   :  { %623 = vmatpush1.msra.mxu0 %v4345_v8  ;;  %694 = vmatpush1.msra.mxu1 %v4381_v21  ;;  %v8554_v8 = vld [vmem:[#allocation19_spill] sm:$0xff]  ;;  %v8566_v21 = vld [vmem:[#allocation22_spill] sm:$0xff] }
 0x13e   :  { %624 = vmatprep.subr.mxu0 %v4350_v10  ;;  %695 = vmatprep.subr.mxu1 %v4387_v23  ;;  %v8555_v10 = vld [vmem:[#allocation11_spill] sm:$0xff]  ;;  %v8568_v23 = vld [vmem:[#allocation24_spill] sm:$0xff] }
 0x13f   :  { %625 = vmatpush1.msra.mxu0 %v4356_v12  ;;  %696 = vmatpush1.msra.mxu1 %v4393_v25  ;;  %v8557_v12 = vld [vmem:[#allocation12_spill] sm:$0xff]  ;;  %v8570_v25 = vld [vmem:[#allocation26_spill] sm:$0xff] }
 0x140   :  { %626 = vmatprep.subr.mxu0 %v4364_v15  ;;  %697 = vmatprep.subr.mxu1 %v4399_v27  ;;  %v8560_v15 = vld [vmem:[#allocation23_spill] sm:$0xff]  ;;  %v8572_v27 = vld [vmem:[#allocation28_spill] sm:$0xff] }
 0x141   :  { %627 = vmatpush1.msra.mxu0 %v4370_v17  ;;  %698 = vmatpush1.msra.mxu1 %v4405_v29  ;;  %v8562_v17 = vld [vmem:[#allocation25_spill] sm:$0xff]  ;;  %v8574_v29 = vld [vmem:[#allocation31_spill] sm:$0xff] }
 0x142   :  { %628 = vmatprep.subr.mxu0 %v4378_v20  ;;  %699 = vmatprep.subr.mxu1 %v4411_v31  ;;  %v8565_v20 = vld [vmem:[#allocation27_spill] sm:$0xff]  ;;  %v8576_v31 = vld [vmem:[#allocation33_spill] sm:$0xff] }
 0x143   :  { %629 = vmatpush1.msra.mxu0 %v4384_v22  ;;  %700 = vmatpush1.msra.mxu1 %v4417_v33  ;;  %v8567_v22 = vld [vmem:[#allocation29_spill] sm:$0xff]  ;;  %v8578_v33 = vld [vmem:[#allocation35_spill] sm:$0xff] }
 0x144   :  { %630 = vmatprep.subr.mxu0 %v4390_v24  ;;  %701 = vmatprep.subr.mxu1 %v4423_v35  ;;  %v8569_v24 = vld [vmem:[#allocation30_spill] sm:$0xff]  ;;  %v8580_v35 = vld [vmem:[#allocation37_spill] sm:$0xff] }
 0x145   :  { %631 = vmatpush1.msra.mxu0 %v4396_v26  ;;  %702 = vmatpush1.msra.mxu1 %v4429_v37  ;;  %v8571_v26 = vld [vmem:[#allocation32_spill] sm:$0xff]  ;;  %v8582_v37 = vld [vmem:[#allocation41_spill] sm:$0xff] }
 0x146   :  { %632 = vmatprep.subr.mxu0 %v4402_v28  ;;  %703 = vmatprep.subr.mxu1 %v4435_v39  ;;  %v8573_v28 = vld [vmem:[#allocation34_spill] sm:$0xff]  ;;  %v8584_v39 = vld [vmem:[#allocation43_spill] sm:$0xff] }
 0x147   :  { %633 = vmatpush1.msra.mxu0 %v4408_v30  ;;  %704 = vmatpush1.msra.mxu1 %v4441_v41  ;;  %v8575_v30 = vld [vmem:[#allocation36_spill] sm:$0xff]  ;;  %v8586_v41 = vld [vmem:[#allocation45_spill] sm:$0xff] }
 0x148   :  { %634 = vmatprep.subr.mxu0 %v4414_v32  ;;  %705 = vmatprep.subr.mxu1 %v4447_v43  ;;  %v8577_v32 = vld [vmem:[#allocation38_spill] sm:$0xff]  ;;  %v8588_v43 = vld [vmem:[#allocation47_spill] sm:$0xff] }
 0x149   :  { %635 = vmatpush1.msra.mxu0 %v4420_v34  ;;  %706 = vmatpush1.msra.mxu1 %v4453_v45  ;;  %v8579_v34 = vld [vmem:[#allocation39_spill] sm:$0xff]  ;;  %v8590_v45 = vld [vmem:[#allocation49_spill] sm:$0xff] }
 0x14a   :  { %636 = vmatprep.subr.mxu0 %v4426_v36  ;;  %707 = vmatprep.subr.mxu1 %v4459_v47  ;;  %v8581_v36 = vld [vmem:[#allocation40_spill] sm:$0xff]  ;;  %v8592_v47 = vld [vmem:[#allocation51_spill] sm:$0xff] }
 0x14b   :  { %637 = vmatpush1.msra.mxu0 %v4432_v38  ;;  %708 = vmatpush1.msra.mxu1 %v4465_v49  ;;  %v8583_v38 = vld [vmem:[#allocation42_spill] sm:$0xff]  ;;  %v8593_v49 = vld [vmem:[#allocation52_spill] sm:$0xff] }
 0x14c   :  { %638 = vmatprep.subr.mxu0 %v4438_v40  ;;  %709 = vmatprep.subr.mxu1 %v4471_v51  ;;  %v8585_v40 = vld [vmem:[#allocation44_spill] sm:$0xff]  ;;  %v8594_v51 = vld [vmem:[#allocation53_spill] sm:$0xff] }
 0x14d   :  { %639 = vmatpush1.msra.mxu0 %v4444_v42  ;;  %710 = vmatpush1.msra.mxu1 %v8548_v2  ;;  %v8587_v42 = vld [vmem:[#allocation46_spill] sm:$0xff] }
 0x14e   :  { %640 = vmatprep.subr.mxu0 %v8549_v3  ;;  %711 = vmatprep.subr.mxu1 %v8550_v4  ;;  %v8611_v2 = vld [vmem:[#allocation70_spill] sm:$0xff]  ;;  %v8612_v3 = vld [vmem:[#allocation71_spill] sm:$0xff]  ;;  %v8613_v4 = vld [vmem:[#allocation72_spill] sm:$0xff] }
 0x14f   :  { %641 = vmatpush1.msra.mxu0 %v8551_v5  ;;  %712 = vmatpush1.msra.mxu1 %v8552_v6  ;;  %v8614_v5 = vld [vmem:[#allocation73_spill] sm:$0xff]  ;;  %v8615_v6 = vld [vmem:[#allocation74_spill] sm:$0xff] }
 0x150   :  { %642 = vmatprep.subr.mxu0 %v8553_v7  ;;  %713 = vmatprep.subr.mxu1 %v8554_v8  ;;  %v8616_v7 = vld [vmem:[#allocation75_spill] sm:$0xff]  ;;  %v8617_v8 = vld [vmem:[#allocation76_spill] sm:$0xff] }
 0x151   :  { %643 = vmatpush1.msra.mxu0 %v8555_v10  ;;  %714 = vmatpush1.msra.mxu1 %v8556_v11  ;;  %v8618_v10 = vld [vmem:[#allocation77_spill] sm:$0xff]  ;;  %v8619_v11 = vld [vmem:[#allocation78_spill] sm:$0xff] }
 0x152   :  { %644 = vmatprep.subr.mxu0 %v8557_v12  ;;  %715 = vmatprep.subr.mxu1 %v8558_v13  ;;  %v8620_v12 = vld [vmem:[#allocation79_spill] sm:$0xff]  ;;  %v8621_v13 = vld [vmem:[#allocation80_spill] sm:$0xff] }
 0x153   :  { %645 = vmatpush1.msra.mxu0 %v8559_v14  ;;  %716 = vmatpush1.msra.mxu1 %v8560_v15  ;;  %v8622_v14 = vld [vmem:[#allocation81_spill] sm:$0xff]  ;;  %v8623_v15 = vld [vmem:[#allocation82_spill] sm:$0xff] }
 0x154   :  { %646 = vmatprep.subr.mxu0 %v8561_v16  ;;  %717 = vmatprep.subr.mxu1 %v8562_v17  ;;  %v8624_v16 = vld [vmem:[#allocation83_spill] sm:$0xff]  ;;  %v8625_v17 = vld [vmem:[#allocation84_spill] sm:$0xff] }
 0x155   :  { %647 = vmatpush1.msra.mxu0 %v8563_v18  ;;  %680 = vmatprep.mubr.f32.mxu0 %v8564_v19  ;;  %v8626_v18 = vld [vmem:[#allocation85_spill] sm:$0xff] }
 0x156   :  { %718 = vmatpush1.msra.mxu1 %v8565_v20  ;;  %751 = vmatprep.mubr.f32.mxu1 %v8564_v19  ;;  %v8627_v20 = vld [vmem:[#allocation86_spill] sm:$0xff] }
 0x157   :  { %681 = vmatmul.mubr.f32.vlgmr.msra.gmra.mxu0 %v4923_v62  ;;  %752 = vmatmul.mubr.f32.vlgmr.msra.gmra.mxu1 %v4923_v62  ;;  %v8610_v62 = vld [vmem:[#allocation69_spill] sm:$0xff] }
 0x158   :  { %786 = vmatprep.subr.mxu0 %v8566_v21  ;;  %857 = vmatprep.subr.mxu1 %v8567_v22  ;;  %v8628_v21 = vld [vmem:[#allocation87_spill] sm:$0xff]  ;;  %v8629_v22 = vld [vmem:[#allocation88_spill] sm:$0xff] }
 0x159   :  { %787 = vmatpush1.msra.mxu0 %v8568_v23  ;;  %858 = vmatpush1.msra.mxu1 %v8569_v24  ;;  %v8630_v23 = vld [vmem:[#allocation89_spill] sm:$0xff]  ;;  %v8631_v24 = vld [vmem:[#allocation90_spill] sm:$0xff] }
 0x15a   :  { %788 = vmatprep.subr.mxu0 %v8570_v25  ;;  %859 = vmatprep.subr.mxu1 %v8571_v26  ;;  %v8632_v25 = vld [vmem:[#allocation91_spill] sm:$0xff]  ;;  %v8633_v26 = vld [vmem:[#allocation92_spill] sm:$0xff] }
 0x15b   :  { %789 = vmatpush1.msra.mxu0 %v8572_v27  ;;  %860 = vmatpush1.msra.mxu1 %v8573_v28  ;;  %v8634_v27 = vld [vmem:[#allocation93_spill] sm:$0xff]  ;;  %v8635_v28 = vld [vmem:[#allocation94_spill] sm:$0xff] }
 0x15c   :  { %790 = vmatprep.subr.mxu0 %v8574_v29  ;;  %861 = vmatprep.subr.mxu1 %v8575_v30  ;;  %v8636_v29 = vld [vmem:[#allocation95_spill] sm:$0xff]  ;;  %v8637_v30 = vld [vmem:[#allocation96_spill] sm:$0xff] }
 0x15d   :  { %791 = vmatpush1.msra.mxu0 %v8576_v31  ;;  %862 = vmatpush1.msra.mxu1 %v8577_v32  ;;  %v8638_v31 = vld [vmem:[#allocation97_spill] sm:$0xff]  ;;  %v8639_v32 = vld [vmem:[#allocation98_spill] sm:$0xff] }
 0x15e   :  { %792 = vmatprep.subr.mxu0 %v8578_v33  ;;  %863 = vmatprep.subr.mxu1 %v8579_v34  ;;  %v8640_v33 = vld [vmem:[#allocation99_spill] sm:$0xff]  ;;  %v8641_v34 = vld [vmem:[#allocation100_spill] sm:$0xff] }
 0x15f   :  { %793 = vmatpush1.msra.mxu0 %v8580_v35  ;;  %864 = vmatpush1.msra.mxu1 %v8581_v36  ;;  %v8642_v35 = vld [vmem:[#allocation101_spill] sm:$0xff]  ;;  %v8643_v36 = vld [vmem:[#allocation102_spill] sm:$0xff] }
 0x160   :  { %794 = vmatprep.subr.mxu0 %v8582_v37  ;;  %865 = vmatprep.subr.mxu1 %v8583_v38  ;;  %v8644_v37 = vld [vmem:[#allocation103_spill] sm:$0xff]  ;;  %v8645_v38 = vld [vmem:[#allocation104_spill] sm:$0xff] }
 0x161   :  { %795 = vmatpush1.msra.mxu0 %v8584_v39  ;;  %866 = vmatpush1.msra.mxu1 %v8585_v40  ;;  %v8646_v39 = vld [vmem:[#allocation105_spill] sm:$0xff]  ;;  %v8647_v40 = vld [vmem:[#allocation106_spill] sm:$0xff] }
 0x162   :  { %796 = vmatprep.subr.mxu0 %v8586_v41  ;;  %867 = vmatprep.subr.mxu1 %v8587_v42  ;;  %v8648_v41 = vld [vmem:[#allocation107_spill] sm:$0xff]  ;;  %v8649_v42 = vld [vmem:[#allocation108_spill] sm:$0xff] }
 0x163   :  { %797 = vmatpush1.msra.mxu0 %v8588_v43  ;;  %868 = vmatpush1.msra.mxu1 %v8589_v44  ;;  %v8650_v43 = vld [vmem:[#allocation109_spill] sm:$0xff]  ;;  %v8651_v44 = vld [vmem:[#allocation110_spill] sm:$0xff] }
 0x164   :  { %798 = vmatprep.subr.mxu0 %v8590_v45  ;;  %869 = vmatprep.subr.mxu1 %v8591_v46  ;;  %v8652_v45 = vld [vmem:[#allocation111_spill] sm:$0xff]  ;;  %v8653_v46 = vld [vmem:[#allocation112_spill] sm:$0xff] }
 0x165   :  { %799 = vmatpush1.msra.mxu0 %v8592_v47  ;;  %870 = vmatpush1.msra.mxu1 %v8593_v49  ;;  %v8654_v47 = vld [vmem:[#allocation113_spill] sm:$0xff]  ;;  %v8655_v49 = vld [vmem:[#allocation114_spill] sm:$0xff] }
 0x166   :  { %800 = vmatprep.subr.mxu0 %v8594_v51  ;;  %871 = vmatprep.subr.mxu1 %v8595_v55  ;;  %v8656_v51 = vld [vmem:[#allocation115_spill] sm:$0xff]  ;;  %v8657_v55 = vld [vmem:[#allocation116_spill] sm:$0xff] }
 0x167   :  { %801 = vmatpush1.msra.mxu0 %v8596_v57  ;;  %872 = vmatpush1.msra.mxu1 %v8597_v63  ;;  %v8658_v57 = vld [vmem:[#allocation117_spill] sm:$0xff]  ;;  %v8659_v63 = vld [vmem:[#allocation118_spill] sm:$0xff] }
 0x168   :  { %802 = vmatprep.subr.mxu0 %v8598_v1  ;;  %873 = vmatprep.subr.mxu1 %v8599_v9  ;;  %v8660_v1 = vld [vmem:[#allocation119_spill] sm:$0xff]  ;;  %v8661_v9 = vld [vmem:[#allocation120_spill] sm:$0xff] }
 0x169   :  { %803 = vmatpush1.msra.mxu0 %v8600_v48  ;;  %874 = vmatpush1.msra.mxu1 %v8601_v56  ;;  %v8662_v48 = vld [vmem:[#allocation121_spill] sm:$0xff]  ;;  %v8663_v56 = vld [vmem:[#allocation122_spill] sm:$0xff] }
 0x16a   :  { %804 = vmatprep.subr.mxu0 %v8602_v50  ;;  %875 = vmatprep.subr.mxu1 %v8603_v52  ;;  %v8664_v50 = vld [vmem:[#allocation123_spill] sm:$0xff]  ;;  %v8665_v52 = vld [vmem:[#allocation124_spill] sm:$0xff] }
 0x16b   :  { %805 = vmatpush1.msra.mxu0 %v8604_v54  ;;  %876 = vmatpush1.msra.mxu1 %v8605_v58  ;;  %v8666_v54 = vld [vmem:[#allocation125_spill] sm:$0xff]  ;;  %v8667_v58 = vld [vmem:[#allocation126_spill] sm:$0xff] }
 0x16c   :  { %806 = vmatprep.subr.mxu0 %v8606_v59  ;;  %877 = vmatprep.subr.mxu1 %v8607_v60  ;;  %v8668_v59 = vld [vmem:[#allocation127_spill] sm:$0xff]  ;;  %v8669_v60 = vld [vmem:[#allocation128_spill] sm:$0xff] }
 0x16d   :  { %807 = vmatpush1.msra.mxu0 %v8608_v0  ;;  %878 = vmatpush1.msra.mxu1 %v8609_v61  ;;  %v8670_v0 = vld [vmem:[#allocation129_spill] sm:$0xff]  ;;  %v8671_v61 = vld [vmem:[#allocation130_spill] sm:$0xff] }
 0x16e   :  { %808 = vmatprep.subr.mxu0 %v8610_v62  ;;  %879 = vmatprep.subr.mxu1 %v8611_v2  ;;  %v8672_v62 = vld [vmem:[#allocation131_spill] sm:$0xff]  ;;  %v8673_v2 = vld [vmem:[#allocation132_spill] sm:$0xff] }
 0x16f   :  { %809 = vmatpush1.msra.mxu0 %v8612_v3  ;;  %880 = vmatpush1.msra.mxu1 %v8613_v4  ;;  %v8674_v3 = vld [vmem:[#allocation133_spill] sm:$0xff]  ;;  %v8675_v4 = vld [vmem:[#allocation134_spill] sm:$0xff] }
 0x170   :  { %810 = vmatprep.subr.mxu0 %v8614_v5  ;;  %881 = vmatprep.subr.mxu1 %v8615_v6  ;;  %v8676_v5 = vld [vmem:[#allocation135_spill] sm:$0xff]  ;;  %v8677_v6 = vld [vmem:[#allocation136_spill] sm:$0xff] }
 0x171   :  { %811 = vmatpush1.msra.mxu0 %v8616_v7  ;;  %882 = vmatpush1.msra.mxu1 %v8617_v8  ;;  %v8678_v7 = vld [vmem:[#allocation137_spill] sm:$0xff]  ;;  %v8679_v8 = vld [vmem:[#allocation138_spill] sm:$0xff] }
 0x172   :  { %812 = vmatprep.subr.mxu0 %v8618_v10  ;;  %883 = vmatprep.subr.mxu1 %v8619_v11  ;;  %v8680_v10 = vld [vmem:[#allocation139_spill] sm:$0xff]  ;;  %v8681_v11 = vld [vmem:[#allocation140_spill] sm:$0xff] }
 0x173   :  { %813 = vmatpush1.msra.mxu0 %v8620_v12  ;;  %884 = vmatpush1.msra.mxu1 %v8621_v13  ;;  %v8682_v12 = vld [vmem:[#allocation141_spill] sm:$0xff]  ;;  %v8683_v13 = vld [vmem:[#allocation142_spill] sm:$0xff] }
 0x174   :  { %814 = vmatprep.subr.mxu0 %v8622_v14  ;;  %885 = vmatprep.subr.mxu1 %v8623_v15  ;;  %v8684_v14 = vld [vmem:[#allocation143_spill] sm:$0xff]  ;;  %v8685_v15 = vld [vmem:[#allocation144_spill] sm:$0xff] }
 0x175   :  { %815 = vmatpush1.msra.mxu0 %v8624_v16  ;;  %886 = vmatpush1.msra.mxu1 %v8625_v17  ;;  %v8686_v16 = vld [vmem:[#allocation145_spill] sm:$0xff]  ;;  %v8687_v17 = vld [vmem:[#allocation146_spill] sm:$0xff] }
 0x176   :  { %816 = vmatprep.subr.mxu0 %v8626_v18  ;;  %887 = vmatprep.subr.mxu1 %v8627_v20  ;;  %v8688_v18 = vld [vmem:[#allocation147_spill] sm:$0xff]  ;;  %v8689_v20 = vld [vmem:[#allocation148_spill] sm:$0xff] }
 0x177   :  { %817 = vmatpush1.msra.mxu0 %v8628_v21  ;;  %888 = vmatpush1.msra.mxu1 %v8629_v22  ;;  %v8690_v21 = vld [vmem:[#allocation149_spill] sm:$0xff]  ;;  %v8691_v22 = vld [vmem:[#allocation150_spill] sm:$0xff] }
 0x178   :  { %818 = vmatprep.subr.mxu0 %v8630_v23  ;;  %889 = vmatprep.subr.mxu1 %v8631_v24  ;;  %v8692_v23 = vld [vmem:[#allocation151_spill] sm:$0xff]  ;;  %v8693_v24 = vld [vmem:[#allocation152_spill] sm:$0xff] }
 0x179   :  { %819 = vmatpush2.msra.mxu0 %v8632_v25  ;;  %890 = vmatpush2.msra.mxu1 %v8633_v26  ;;  %v5121_v25 = vld [vmem:[#allocation2 + $0x1e8] sm:$0xff]  ;;  %v5124_v26 = vld [vmem:[#allocation2 + $0x1f8] sm:$0xff] }
 0x17a   :  { %820 = vmatprep.subr.mxu0 %v8634_v27  ;;  %891 = vmatprep.subr.mxu1 %v8635_v28  ;;  %v251_v27 = vlaneseq }
 0x17b   :  { %821 = vmatpush2.msra.mxu0 %v8636_v29  ;;  %892 = vmatpush2.msra.mxu1 %v8637_v30  ;;  %v249_v30 = vld [vmem:[%s7795_s3] sm:$0xf] }
 0x17c   :  { %822 = vmatprep.subr.mxu0 %v8638_v31  ;;  %893 = vmatprep.subr.mxu1 %v8639_v32  ;;  %v252_v28 = vshrl.u32 %v251_v27, 7 }
 0x17d   :  { %823 = vmatpush2.msra.mxu0 %v8640_v33  ;;  %894 = vmatpush2.msra.mxu1 %v8641_v34 }
 0x17e   :  { %824 = vmatprep.subr.mxu0 %v8642_v35  ;;  %895 = vmatprep.subr.mxu1 %v8643_v36  ;;  %v253_v29 = vsub.s32 0, %v252_v28  ;;  %v257_v31 = vsub.s32 1, %v252_v28 }
 0x17f   :  { %825 = vmatpush2.msra.mxu0 %v8644_v37  ;;  %896 = vmatpush2.msra.mxu1 %v8645_v38 }
 0x180   :  { %826 = vmatprep.subr.mxu0 %v8646_v39  ;;  %897 = vmatprep.subr.mxu1 %v8647_v40  ;;  %v5130_v32 = vrot.slane %v249_v30, %v253_v29  ;;  %v5132_v33 = vrot.slane %v249_v30, %v257_v31  ;;  %v265_v39 = vsub.s32 3, %v252_v28 }
 0x181   :  { %827 = vmatpush2.msra.mxu0 %v8648_v41  ;;  %898 = vmatpush2.msra.mxu1 %v8649_v42 }
 0x182   :  { %828 = vmatprep.subr.mxu0 %v8650_v43  ;;  %899 = vmatprep.subr.mxu1 %v8651_v44  ;;  %8694 = vst [vmem:[#allocation13_spill] sm:$0xff] %v5132_v33  ;;  %v5136_v42 = vrot.slane %v249_v30, %v265_v39  ;;  %v261_v44 = vsub.s32 2, %v252_v28  ;;  %v5177_v39 = vld [vmem:[#allocation2 + $0x1c0] sm:$0xff] }
 0x183   :  { %829 = vmatpush2.msra.mxu0 %v8652_v45  ;;  %900 = vmatpush2.msra.mxu1 %v8653_v46 }
 0x184   :  { %830 = vmatprep.subr.mxu0 %v8654_v47  ;;  %901 = vmatprep.subr.mxu1 %v8655_v49  ;;  %8695 = vst [vmem:[#allocation8_spill] sm:$0xff] %v5136_v42  ;;  %v5139_v46 = vrot.slane %v249_v30, %v261_v44  ;;  %v5189_v44 = vld [vmem:[#allocation2 + $0x1a0] sm:$0xff] }
 0x185   :  { %831 = vmatpush2.msra.mxu0 %v8656_v51  ;;  %902 = vmatpush2.msra.mxu1 %v8657_v55 }
 0x186   :  { %832 = vmatprep.subr.mxu0 %v8658_v57  ;;  %903 = vmatprep.subr.mxu1 %v8659_v63  ;;  %8696 = vst [vmem:[#allocation15_spill] sm:$0xff] %v5139_v46 }
 0x187   :  { %833 = vmatpush2.msra.mxu0 %v8660_v1  ;;  %904 = vmatpush2.msra.mxu1 %v8661_v9  ;;  %v3204_v1 = vld [vmem:[%s7792_s0 + $0x20] sm:$0xff] }
 0x188   :  { %834 = vmatprep.subr.mxu0 %v8662_v48  ;;  %905 = vmatprep.subr.mxu1 %v8663_v56  ;;  %v3205_v56 = vld [vmem:[%s7792_s0 + $0x28] sm:$0xff] }
 0x189   :  { %835 = vmatpush2.msra.mxu0 %v8664_v50  ;;  %906 = vmatpush2.msra.mxu1 %v8665_v52 }
 0x18a   :  { %836 = vmatprep.subr.mxu0 %v8666_v54  ;;  %907 = vmatprep.subr.mxu1 %v8667_v58 }
 0x18b   :  { %837 = vmatpush2.msra.mxu0 %v8668_v59  ;;  %908 = vmatpush2.msra.mxu1 %v8669_v60 }
 0x18c   :  { %838 = vmatprep.subr.mxu0 %v8670_v0  ;;  %909 = vmatprep.subr.mxu1 %v8671_v61 }
 0x18d   :  { %839 = vmatpush2.msra.mxu0 %v8672_v62  ;;  %910 = vmatpush2.msra.mxu1 %v8673_v2 }
 0x18e   :  { %840 = vmatprep.subr.mxu0 %v8674_v3  ;;  %911 = vmatprep.subr.mxu1 %v8675_v4 }
 0x18f   :  { %841 = vmatpush2.msra.mxu0 %v8676_v5  ;;  %912 = vmatpush2.msra.mxu1 %v8677_v6  ;;  %v3207_v6 = vld [vmem:[%s7792_s0 + $0x38] sm:$0xff] }
 0x190   :  { %842 = vmatprep.subr.mxu0 %v8678_v7  ;;  %913 = vmatprep.subr.mxu1 %v8679_v8 }
 0x191   :  { %843 = vmatpush2.msra.mxu0 %v8680_v10  ;;  %914 = vmatpush2.msra.mxu1 %v8681_v11  ;;  %v3206_v10 = vld [vmem:[%s7792_s0 + $0x30] sm:$0xff] }
 0x192   :  { %844 = vmatprep.subr.mxu0 %v8682_v12  ;;  %915 = vmatprep.subr.mxu1 %v8683_v13 }
 0x193   :  { %845 = vmatpush2.msra.mxu0 %v8684_v14  ;;  %916 = vmatpush2.msra.mxu1 %v8685_v15 }
 0x194   :  { %846 = vmatprep.subr.mxu0 %v8686_v16  ;;  %917 = vmatprep.subr.mxu1 %v8687_v17 }
 0x195   :  { %847 = vmatpush2.msra.mxu0 %v8688_v18  ;;  %918 = vmatpush2.msra.mxu1 %v8689_v20 }
 0x196   :  { %848 = vmatprep.subr.mxu0 %v8690_v21  ;;  %919 = vmatprep.subr.mxu1 %v8691_v22 }
 0x197   :  { %849 = vmatpush2.msra.mxu0 %v8692_v23  ;;  %920 = vmatpush2.msra.mxu1 %v8693_v24 }
 0x198   :  { %957 = vmatprep.subr.mxu0 %v5121_v25  ;;  %1028 = vmatprep.subr.mxu1 %v5124_v26 }
 0x1f6   :  { %v511_v34 = vpop.f32.mrf.mxu0  ;;  %v582_v40 = vpop.f32.mrf.mxu1 }
 0x1f7   :  { %v512_v35 = vadd.f32 %v511_v34, %v5130_v32  ;;  %v583_v51 = vadd.f32 %v582_v40, %v5139_v46  ;;  %v5180_v40 = vld [vmem:[#allocation2 + $0x1d0] sm:$0xff] }
 0x1f8   :  { %v513_v36 = vpop.f32.mrf.mxu0  ;;  %v584_v43 = vpop.f32.mrf.mxu1 }
 0x1f9   :  { %v3201_v37 = vmul.f32 -1.442695, %v512_v35  ;;  %v514_v38 = vadd.f32 %v513_v36, %v5132_v33  ;;  %v585_v45 = vadd.f32 %v584_v43, %v5136_v42  ;;  %v5165_v36 = vld [vmem:[#allocation2 + $0x1e0] sm:$0xff]  ;;  %v5186_v43 = vld [vmem:[#allocation2 + $0x1b8] sm:$0xff] }
 0x1fb   :  { %3403 = vpow2.f32 %v3201_v37  ;;  %v3202_v41 = vmul.f32 -1.442695, %v514_v38  ;;  %v3203_v47 = vmul.f32 -1.442695, %v585_v45  ;;  %v5168_v37 = vld [vmem:[#allocation2 + $0x1f0] sm:$0xff]  ;;  %v5174_v38 = vld [vmem:[#allocation2 + $0x1d8] sm:$0xff] }
 0x1fc   :  { %v5192_v45 = vld [vmem:[#allocation2 + $0x1b0] sm:$0xff] }
 0x1fd   :  { %3405 = vpow2.f32 %v3202_v41  ;;  %v5183_v41 = vld [vmem:[#allocation2 + $0x1a8] sm:$0xff] }
 0x1fe   :  { %3407 = vpow2.f32 %v3203_v47  ;;  %v5195_v47 = vld [vmem:[#allocation2 + $0x188] sm:$0xff] }
 0x208   :  { %v3404_v49 = vpop.eup %3403 }
 0x209   :  { %v590_v55 = vadd.f32 1.0, %v3404_v49  ;;  %v5198_v49 = vld [vmem:[#allocation2 + $0x198] sm:$0xff] }
 0x20a   :  { %v3406_v57 = vpop.eup %3405 }
 0x20b   :  { %3409 = vrcp.f32 %v590_v55  ;;  %v596_v63 = vadd.f32 1.0, %v3406_v57  ;;  %v3408_v9 = vpop.eup %3407  ;;  %v5204_v55 = vld [vmem:[#allocation2 + $0x190] sm:$0xff]  ;;  %v5207_v57 = vld [vmem:[#allocation2 + $0x168] sm:$0xff] }
 0x20c   :  { %3411 = vtanh.f32 %v583_v51  ;;  %v603_v58 = vadd.f32 1.0, %v3408_v9  ;;  %v5201_v51 = vld [vmem:[#allocation2 + $0x180] sm:$0xff]  ;;  %v5216_v9 = vld [vmem:[#allocation2 + $0x170] sm:$0xff] }
 0x20d   :  { %3413 = vrcp.f32 %v596_v63  ;;  %v5210_v63 = vld [vmem:[#allocation2 + $0x178] sm:$0xff] }
 0x217   :  { %v682_v48 = vpop.f32.mrf.mxu0  ;;  %v753_v3 = vpop.f32.mrf.mxu1 }
 0x218   :  { %v3410_v50 = vpop.eup %3409  ;;  %v758_v52 = vadd.f32 %v3204_v1, %v682_v48  ;;  %v760_v13 = vadd.f32 %v3206_v10, %v753_v3  ;;  %v5213_v1 = vld [vmem:[#allocation2 + $0x160] sm:$0xff]  ;;  %v5219_v48 = vld [vmem:[#allocation2 + $0x148] sm:$0xff]  ;;  %v5270_v10 = vld [vmem:[#allocation2 + $0xd8] sm:$0xff] }
 0x219   :  { %v3412_v54 = vpop.eup %3411  ;;  %v684_v59 = vpop.f32.mrf.mxu0  ;;  %v5255_v3 = vld [vmem:[#allocation2 + $0xe8] sm:$0xff] }
 0x21a   :  { %v3414_v60 = vpop.eup %3413  ;;  %v3208_v0 = vmul.f32 -1.442695, %v758_v52  ;;  %v759_v61 = vadd.f32 %v3205_v56, %v684_v59  ;;  %v607_v2 = vmul.f32 %v3412_v54, %v3410_v50  ;;  %v755_v7 = vpop.f32.mrf.mxu1  ;;  %v5222_v56 = vld [vmem:[#allocation2 + $0x158] sm:$0xff]  ;;  %v5225_v50 = vld [vmem:[#allocation2 + $0x140] sm:$0xff]  ;;  %v5228_v52 = vld [vmem:[#allocation2 + $0x150] sm:$0xff] }
 0x21b   :  { %v606_v62 = vmul.f32 0.0, %v3414_v60  ;;  %v761_v8 = vadd.f32 %v3207_v6, %v755_v7  ;;  %v5231_v54 = vld [vmem:[#allocation2 + $0x128] sm:$0xff]  ;;  %v5237_v59 = vld [vmem:[#allocation2 + $0x120] sm:$0xff]  ;;  %v5240_v60 = vld [vmem:[#allocation2 + $0x130] sm:$0xff] }
 0x21c   :  { %3415 = vpow2.f32 %v3208_v0  ;;  %v3209_v4 = vmul.f32 -1.442695, %v759_v61  ;;  %v5243_v0 = vld [vmem:[#allocation2 + $0x108] sm:$0xff]  ;;  %v5246_v61 = vld [vmem:[#allocation2 + $0x118] sm:$0xff]  ;;  %v5261_v6 = vld [vmem:[#allocation2 + $0xe0] sm:$0xff] }
 0x21d   :  { %v5148_v5 = vadd.f32 %v607_v2, %v606_v62  ;;  %3417 = vrcp.f32 %v603_v58  ;;  %v3210_v11 = vmul.f32 -1.442695, %v761_v8  ;;  %v5234_v58 = vld [vmem:[#allocation2 + $0x138] sm:$0xff]  ;;  %v5249_v62 = vld [vmem:[#allocation2 + $0x100] sm:$0xff]  ;;  %v5252_v2 = vld [vmem:[#allocation2 + $0x110] sm:$0xff] }
 0x21e   :  { %3419 = vpow2.f32 %v3209_v4  ;;  %v5258_v4 = vld [vmem:[#allocation2 + $0xf8] sm:$0xff]  ;;  %v5264_v7 = vld [vmem:[#allocation2 + $0xf0] sm:$0xff]  ;;  %v5267_v8 = vld [vmem:[#allocation2 + $0xc8] sm:$0xff] }
 0x21f   :  { %3421 = vtanh.f32 %v5148_v5 }
 0x220   :  { %3423 = vpow2.f32 %v3210_v11  ;;  %v5273_v11 = vld [vmem:[#allocation2 + $0xc0] sm:$0xff] }
 0x229   :  { %v3416_v12 = vpop.eup %3415 }
 0x22a   :  { %v3418_v14 = vpop.eup %3417  ;;  %v765_v15 = vadd.f32 1.0, %v3416_v12  ;;  %v5276_v12 = vld [vmem:[#allocation2 + $0xd0] sm:$0xff] }
 0x22b   :  { %v3420_v16 = vpop.eup %3419 }
 0x22c   :  { %v3422_v17 = vpop.eup %3421  ;;  %3425 = vrcp.f32 %v765_v15  ;;  %v771_v18 = vadd.f32 1.0, %v3420_v16  ;;  %v5285_v15 = vld [vmem:[#allocation2 + $0xa0] sm:$0xff]  ;;  %v5288_v16 = vld [vmem:[#allocation2 + $0xb0] sm:$0xff] }
 0x22d   :  { %3427 = vtanh.f32 %v760_v13  ;;  %v610_v20 = vmul.f32 %v3422_v17, %v3418_v14  ;;  %v3424_v21 = vpop.eup %3423  ;;  %v5279_v13 = vld [vmem:[#allocation2 + $0xa8] sm:$0xff]  ;;  %v5282_v14 = vld [vmem:[#allocation2 + $0xb8] sm:$0xff] }
 0x22e   :  { %3429 = vrcp.f32 %v771_v18  ;;  %v778_v27 = vadd.f32 1.0, %v3424_v21  ;;  %v5291_v17 = vld [vmem:[#allocation2 + $0x88] sm:$0xff]  ;;  %v5294_v18 = vld [vmem:[#allocation2 + $0x98] sm:$0xff]  ;;  %v5300_v21 = vld [vmem:[#allocation2 + $0x90] sm:$0xff] }
 0x22f   :  { %850 = vmatprep.mubr.f32.mxu0 %v610_v20  ;;  %921 = vmatprep.mubr.f32.mxu1 %v610_v20  ;;  %v5297_v20 = vld [vmem:[#allocation2 + $0x80] sm:$0xff]  ;;  %8698 = vst [vmem:[#allocation17_spill] sm:$0xff] %v5300_v21 }
 0x230   :  { %3431 = vrcp.f32 %v778_v27  ;;  %8697 = vst [vmem:[#allocation9_spill] sm:$0xff] %v5297_v20  ;;  %v5312_v27 = vld [vmem:[#allocation2 + $0x70] sm:$0xff] }
 0x231   :  { %8702 = vst [vmem:[#allocation20_spill] sm:$0xff] %v5312_v27 }
 0x239   :  { %v3426_v22 = vpop.eup %3425 }
 0x23a   :  { %v3428_v23 = vpop.eup %3427 }
 0x23b   :  { %v3430_v24 = vpop.eup %3429  ;;  %v782_v28 = vmul.f32 %v3428_v23, %v3426_v22  ;;  %v5303_v22 = vld [vmem:[#allocation2 + $0x68] sm:$0xff]  ;;  %v5306_v23 = vld [vmem:[#allocation2 + $0x78] sm:$0xff] }
 0x23c   :  { %v781_v29 = vmul.f32 %v3430_v24, %v4920_v53  ;;  %v5171_v53 = vld [vmem:[#allocation2 + $0x1c8] sm:$0xff]  ;;  %8699 = vst [vmem:[#allocation10_spill] sm:$0xff] %v5303_v22  ;;  %8700 = vst [vmem:[#allocation19_spill] sm:$0xff] %v5306_v23  ;;  %v5309_v24 = vld [vmem:[#allocation2 + $0x60] sm:$0xff] }
 0x23d   :  { %v3432_v31 = vpop.eup %3431  ;;  %8701 = vst [vmem:[#allocation11_spill] sm:$0xff] %v5309_v24 }
 0x23e   :  { %v5158_v30 = vadd.f32 %v782_v28, %v781_v29  ;;  %v5315_v28 = vld [vmem:[#allocation2 + $0x48] sm:$0xff]  ;;  %v5318_v29 = vld [vmem:[#allocation2 + $0x58] sm:$0xff] }
 0x23f   :  { %8703 = vst [vmem:[#allocation12_spill] sm:$0xff] %v5315_v28  ;;  %8704 = vst [vmem:[#allocation21_spill] sm:$0xff] %v5318_v29 }
 0x240   :  { %3433 = vtanh.f32 %v5158_v30 }
 0x24d   :  { %v3434_v34 = vpop.eup %3433 }
 0x24e   :  { %v5161_v35 = vmul.f32 %v3434_v34, %v3432_v31  ;;  %v5321_v31 = vld [vmem:[#allocation2 + $0x40] sm:$0xff]  ;;  %v5324_v34 = vld [vmem:[#allocation2 + $0x50] sm:$0xff] }
 0x24f   :  { %8705 = vst [vmem:[#allocation14_spill] sm:$0xff] %v5321_v31  ;;  %8706 = vst [vmem:[#allocation23_spill] sm:$0xff] %v5324_v34 }
 0x250   :  { %851 = vmatmul.mubr.f32.vlgmr.msra.gmra.mxu0 %v5161_v35  ;;  %922 = vmatmul.mubr.f32.vlgmr.msra.gmra.mxu1 %v5161_v35 }
 0x251   :  { %958 = vmatpush1.msra.mxu0 %v5165_v36  ;;  %1029 = vmatpush1.msra.mxu1 %v5168_v37 }
 0x252   :  { %959 = vmatprep.subr.mxu0 %v5171_v53  ;;  %1030 = vmatprep.subr.mxu1 %v5174_v38 }
 0x253   :  { %960 = vmatpush1.msra.mxu0 %v5177_v39  ;;  %1031 = vmatpush1.msra.mxu1 %v5180_v40 }
 0x254   :  { %961 = vmatprep.subr.mxu0 %v5183_v41  ;;  %1032 = vmatprep.subr.mxu1 %v5186_v43 }
 0x255   :  { %962 = vmatpush1.msra.mxu0 %v5189_v44  ;;  %1033 = vmatpush1.msra.mxu1 %v5192_v45 }
 0x256   :  { %963 = vmatprep.subr.mxu0 %v5195_v47  ;;  %1034 = vmatprep.subr.mxu1 %v5198_v49 }
 0x257   :  { %964 = vmatpush1.msra.mxu0 %v5201_v51  ;;  %1035 = vmatpush1.msra.mxu1 %v5204_v55 }
 0x258   :  { %965 = vmatprep.subr.mxu0 %v5207_v57  ;;  %1036 = vmatprep.subr.mxu1 %v5210_v63 }
 0x259   :  { %966 = vmatpush1.msra.mxu0 %v5213_v1  ;;  %1037 = vmatpush1.msra.mxu1 %v5216_v9 }
 0x25a   :  { %967 = vmatprep.subr.mxu0 %v5219_v48  ;;  %1038 = vmatprep.subr.mxu1 %v5222_v56 }
 0x25b   :  { %968 = vmatpush1.msra.mxu0 %v5225_v50  ;;  %1039 = vmatpush1.msra.mxu1 %v5228_v52 }
 0x25c   :  { %969 = vmatprep.subr.mxu0 %v5231_v54  ;;  %1040 = vmatprep.subr.mxu1 %v5234_v58 }
 0x25d   :  { %970 = vmatpush1.msra.mxu0 %v5237_v59  ;;  %1041 = vmatpush1.msra.mxu1 %v5240_v60 }
 0x25e   :  { %971 = vmatprep.subr.mxu0 %v5243_v0  ;;  %1042 = vmatprep.subr.mxu1 %v5246_v61 }
 0x25f   :  { %972 = vmatpush1.msra.mxu0 %v5249_v62  ;;  %1043 = vmatpush1.msra.mxu1 %v5252_v2 }
 0x260   :  { %973 = vmatprep.subr.mxu0 %v5255_v3  ;;  %1044 = vmatprep.subr.mxu1 %v5258_v4 }
 0x261   :  { %974 = vmatpush1.msra.mxu0 %v5261_v6  ;;  %1045 = vmatpush1.msra.mxu1 %v5264_v7 }
 0x262   :  { %975 = vmatprep.subr.mxu0 %v5267_v8  ;;  %1046 = vmatprep.subr.mxu1 %v5270_v10 }
 0x263   :  { %976 = vmatpush1.msra.mxu0 %v5273_v11  ;;  %1047 = vmatpush1.msra.mxu1 %v5276_v12 }
 0x264   :  { %977 = vmatprep.subr.mxu0 %v5279_v13  ;;  %1048 = vmatprep.subr.mxu1 %v5282_v14 }
 0x265   :  { %978 = vmatpush1.msra.mxu0 %v5285_v15  ;;  %1049 = vmatpush1.msra.mxu1 %v5288_v16 }
 0x266   :  { %979 = vmatprep.subr.mxu0 %v5291_v17  ;;  %1050 = vmatprep.subr.mxu1 %v5294_v18 }
 0x267   :  { %980 = vmatpush1.msra.mxu0 %v5297_v20  ;;  %1051 = vmatpush1.msra.mxu1 %v5300_v21 }
 0x268   :  { %981 = vmatprep.subr.mxu0 %v5303_v22  ;;  %1052 = vmatprep.subr.mxu1 %v5306_v23 }
 0x269   :  { %982 = vmatpush1.msra.mxu0 %v5309_v24  ;;  %1053 = vmatpush1.msra.mxu1 %v5312_v27  ;;  %v5327_v24 = vld [vmem:[#allocation2 + $0x28] sm:$0xff]  ;;  %v5330_v27 = vld [vmem:[#allocation2 + $0x38] sm:$0xff] }
 0x26a   :  { %983 = vmatprep.subr.mxu0 %v5315_v28  ;;  %1054 = vmatprep.subr.mxu1 %v5318_v29  ;;  %8707 = vst [vmem:[#allocation16_spill] sm:$0xff] %v5327_v24  ;;  %8708 = vst [vmem:[#allocation25_spill] sm:$0xff] %v5330_v27  ;;  %v5333_v28 = vld [vmem:[#allocation2 + $0x20] sm:$0xff]  ;;  %v5336_v29 = vld [vmem:[#allocation2 + $0x30] sm:$0xff] }
 0x26b   :  { %984 = vmatpush1.msra.mxu0 %v5321_v31  ;;  %1055 = vmatpush1.msra.mxu1 %v5324_v34  ;;  %8709 = vst [vmem:[#allocation18_spill] sm:$0xff] %v5333_v28  ;;  %8710 = vst [vmem:[#allocation27_spill] sm:$0xff] %v5336_v29  ;;  %v5339_v31 = vld [vmem:[#allocation2 + $0x8] sm:$0xff]  ;;  %v5342_v34 = vld [vmem:[#allocation2 + $0x18] sm:$0xff] }
 0x26c   :  { %985 = vmatprep.subr.mxu0 %v5327_v24  ;;  %1056 = vmatprep.subr.mxu1 %v5330_v27  ;;  %8711 = vst [vmem:[#allocation22_spill] sm:$0xff] %v5339_v31  ;;  %8712 = vst [vmem:[#allocation29_spill] sm:$0xff] %v5342_v34  ;;  %v5345_v24 = vld [vmem:[#allocation2] sm:$0xff]  ;;  %v5349_v27 = vld [vmem:[#allocation2 + $0x10] sm:$0xff] }
 0x26d   :  { %986 = vmatpush1.msra.mxu0 %v5333_v28  ;;  %1057 = vmatpush1.msra.mxu1 %v5336_v29  ;;  %8713 = vst [vmem:[#allocation24_spill] sm:$0xff] %v5345_v24  ;;  %8714 = vst [vmem:[#allocation30_spill] sm:$0xff] %v5349_v27  ;;  %v5364_v29 = vld [vmem:[#allocation4 + $0x1f0] sm:$0xff] }
 0x26e   :  { %987 = vmatprep.subr.mxu0 %v5339_v31  ;;  %1058 = vmatprep.subr.mxu1 %v5342_v34  ;;  %v5355_v31 = vld [vmem:[#allocation4 + $0x1e8] sm:$0xff]  ;;  %v5358_v34 = vld [vmem:[#allocation4 + $0x1f8] sm:$0xff]  ;;  %8718 = vst [vmem:[#allocation34_spill] sm:$0xff] %v5364_v29 }
 0x26f   :  { %988 = vmatpush1.msra.mxu0 %v5345_v24  ;;  %1021 = vmatprep.mubr.f32.mxu0 %v8564_v19  ;;  %8715 = vst [vmem:[#allocation26_spill] sm:$0xff] %v5355_v31  ;;  %8716 = vst [vmem:[#allocation32_spill] sm:$0xff] %v5358_v34  ;;  %v5361_v24 = vld [vmem:[#allocation4 + $0x1e0] sm:$0xff] }
 0x270   :  { %1059 = vmatpush1.msra.mxu1 %v5349_v27  ;;  %1092 = vmatprep.mubr.f32.mxu1 %v8564_v19  ;;  %8717 = vst [vmem:[#allocation28_spill] sm:$0xff] %v5361_v24  ;;  %v5367_v27 = vld [vmem:[#allocation4 + $0x1c8] sm:$0xff] }
 0x271   :  { %1022 = vmatmul.mubr.f32.vlgmr.msra.gmra.mxu0 %v5161_v35  ;;  %1093 = vmatmul.mubr.f32.vlgmr.msra.gmra.mxu1 %v5161_v35  ;;  %8719 = vst [vmem:[#allocation31_spill] sm:$0xff] %v5367_v27  ;;  %v5370_v35 = vld [vmem:[#allocation4 + $0x1d8] sm:$0xff] }
 0x272   :  { %1127 = vmatprep.subr.mxu0 %v5355_v31  ;;  %1198 = vmatprep.subr.mxu1 %v5358_v34  ;;  %8720 = vst [vmem:[#allocation36_spill] sm:$0xff] %v5370_v35  ;;  %v5373_v31 = vld [vmem:[#allocation4 + $0x1c0] sm:$0xff]  ;;  %v5376_v34 = vld [vmem:[#allocation4 + $0x1d0] sm:$0xff] }
 0x273   :  { %1128 = vmatpush1.msra.mxu0 %v5361_v24  ;;  %1199 = vmatpush1.msra.mxu1 %v5364_v29  ;;  %8721 = vst [vmem:[#allocation33_spill] sm:$0xff] %v5373_v31  ;;  %8722 = vst [vmem:[#allocation38_spill] sm:$0xff] %v5376_v34  ;;  %v5379_v24 = vld [vmem:[#allocation4 + $0x1a8] sm:$0xff]  ;;  %v5382_v29 = vld [vmem:[#allocation4 + $0x1b8] sm:$0xff] }
 0x274   :  { %1129 = vmatprep.subr.mxu0 %v5367_v27  ;;  %1200 = vmatprep.subr.mxu1 %v5370_v35  ;;  %8723 = vst [vmem:[#allocation35_spill] sm:$0xff] %v5379_v24  ;;  %8724 = vst [vmem:[#allocation39_spill] sm:$0xff] %v5382_v29  ;;  %v5385_v27 = vld [vmem:[#allocation4 + $0x1a0] sm:$0xff]  ;;  %v5388_v35 = vld [vmem:[#allocation4 + $0x1b0] sm:$0xff] }
 0x275   :  { %1130 = vmatpush1.msra.mxu0 %v5373_v31  ;;  %1201 = vmatpush1.msra.mxu1 %v5376_v34  ;;  %8725 = vst [vmem:[#allocation37_spill] sm:$0xff] %v5385_v27  ;;  %8726 = vst [vmem:[#allocation40_spill] sm:$0xff] %v5388_v35  ;;  %v5391_v31 = vld [vmem:[#allocation4 + $0x188] sm:$0xff]  ;;  %v5394_v34 = vld [vmem:[#allocation4 + $0x198] sm:$0xff] }
 0x276   :  { %1131 = vmatprep.subr.mxu0 %v5379_v24  ;;  %1202 = vmatprep.subr.mxu1 %v5382_v29  ;;  %8727 = vst [vmem:[#allocation41_spill] sm:$0xff] %v5391_v31  ;;  %8728 = vst [vmem:[#allocation42_spill] sm:$0xff] %v5394_v34  ;;  %v5397_v24 = vld [vmem:[#allocation4 + $0x180] sm:$0xff]  ;;  %v5400_v29 = vld [vmem:[#allocation4 + $0x190] sm:$0xff] }
 0x277   :  { %1132 = vmatpush1.msra.mxu0 %v5385_v27  ;;  %1203 = vmatpush1.msra.mxu1 %v5388_v35  ;;  %8729 = vst [vmem:[#allocation43_spill] sm:$0xff] %v5397_v24  ;;  %8730 = vst [vmem:[#allocation44_spill] sm:$0xff] %v5400_v29  ;;  %v5403_v27 = vld [vmem:[#allocation4 + $0x168] sm:$0xff]  ;;  %v5406_v35 = vld [vmem:[#allocation4 + $0x178] sm:$0xff] }
 0x278   :  { %1133 = vmatprep.subr.mxu0 %v5391_v31  ;;  %1204 = vmatprep.subr.mxu1 %v5394_v34  ;;  %8731 = vst [vmem:[#allocation45_spill] sm:$0xff] %v5403_v27  ;;  %8732 = vst [vmem:[#allocation46_spill] sm:$0xff] %v5406_v35  ;;  %v5409_v31 = vld [vmem:[#allocation4 + $0x160] sm:$0xff]  ;;  %v5412_v34 = vld [vmem:[#allocation4 + $0x170] sm:$0xff] }
 0x279   :  { %1134 = vmatpush1.msra.mxu0 %v5397_v24  ;;  %1205 = vmatpush1.msra.mxu1 %v5400_v29  ;;  %8733 = vst [vmem:[#allocation47_spill] sm:$0xff] %v5409_v31  ;;  %8734 = vst [vmem:[#allocation48_spill] sm:$0xff] %v5412_v34  ;;  %v5415_v24 = vld [vmem:[#allocation4 + $0x148] sm:$0xff]  ;;  %v5418_v29 = vld [vmem:[#allocation4 + $0x158] sm:$0xff] }
 0x27a   :  { %1135 = vmatprep.subr.mxu0 %v5403_v27  ;;  %1206 = vmatprep.subr.mxu1 %v5406_v35  ;;  %8735 = vst [vmem:[#allocation49_spill] sm:$0xff] %v5415_v24  ;;  %8736 = vst [vmem:[#allocation50_spill] sm:$0xff] %v5418_v29  ;;  %v5421_v27 = vld [vmem:[#allocation4 + $0x140] sm:$0xff]  ;;  %v5424_v35 = vld [vmem:[#allocation4 + $0x150] sm:$0xff] }
 0x27b   :  { %1136 = vmatpush1.msra.mxu0 %v5409_v31  ;;  %1207 = vmatpush1.msra.mxu1 %v5412_v34  ;;  %8737 = vst [vmem:[#allocation51_spill] sm:$0xff] %v5421_v27  ;;  %8738 = vst [vmem:[#allocation52_spill] sm:$0xff] %v5424_v35  ;;  %v5427_v31 = vld [vmem:[#allocation4 + $0x128] sm:$0xff]  ;;  %v5430_v34 = vld [vmem:[#allocation4 + $0x138] sm:$0xff] }
 0x27c   :  { %1137 = vmatprep.subr.mxu0 %v5415_v24  ;;  %1208 = vmatprep.subr.mxu1 %v5418_v29  ;;  %8739 = vst [vmem:[#allocation53_spill] sm:$0xff] %v5427_v31  ;;  %8740 = vst [vmem:[#allocation54_spill] sm:$0xff] %v5430_v34  ;;  %v5433_v24 = vld [vmem:[#allocation4 + $0x120] sm:$0xff]  ;;  %v5436_v29 = vld [vmem:[#allocation4 + $0x130] sm:$0xff] }
 0x27d   :  { %1138 = vmatpush1.msra.mxu0 %v5421_v27  ;;  %1209 = vmatpush1.msra.mxu1 %v5424_v35  ;;  %8741 = vst [vmem:[#allocation55_spill] sm:$0xff] %v5433_v24  ;;  %8742 = vst [vmem:[#allocation56_spill] sm:$0xff] %v5436_v29  ;;  %v5439_v27 = vld [vmem:[#allocation4 + $0x108] sm:$0xff]  ;;  %v5442_v35 = vld [vmem:[#allocation4 + $0x118] sm:$0xff] }
 0x27e   :  { %1139 = vmatprep.subr.mxu0 %v5427_v31  ;;  %1210 = vmatprep.subr.mxu1 %v5430_v34  ;;  %8743 = vst [vmem:[#allocation57_spill] sm:$0xff] %v5439_v27  ;;  %8744 = vst [vmem:[#allocation58_spill] sm:$0xff] %v5442_v35  ;;  %v5445_v31 = vld [vmem:[#allocation4 + $0x100] sm:$0xff]  ;;  %v5448_v34 = vld [vmem:[#allocation4 + $0x110] sm:$0xff] }
 0x27f   :  { %1140 = vmatpush1.msra.mxu0 %v5433_v24  ;;  %1211 = vmatpush1.msra.mxu1 %v5436_v29  ;;  %8745 = vst [vmem:[#allocation59_spill] sm:$0xff] %v5445_v31  ;;  %8746 = vst [vmem:[#allocation60_spill] sm:$0xff] %v5448_v34  ;;  %v5451_v24 = vld [vmem:[#allocation4 + $0xe8] sm:$0xff]  ;;  %v5454_v29 = vld [vmem:[#allocation4 + $0xf8] sm:$0xff] }
 0x280   :  { %1141 = vmatprep.subr.mxu0 %v5439_v27  ;;  %1212 = vmatprep.subr.mxu1 %v5442_v35  ;;  %8747 = vst [vmem:[#allocation61_spill] sm:$0xff] %v5451_v24  ;;  %8748 = vst [vmem:[#allocation62_spill] sm:$0xff] %v5454_v29  ;;  %v5457_v27 = vld [vmem:[#allocation4 + $0xe0] sm:$0xff]  ;;  %v5460_v35 = vld [vmem:[#allocation4 + $0xf0] sm:$0xff] }
 0x281   :  { %1142 = vmatpush1.msra.mxu0 %v5445_v31  ;;  %1213 = vmatpush1.msra.mxu1 %v5448_v34  ;;  %8749 = vst [vmem:[#allocation63_spill] sm:$0xff] %v5457_v27  ;;  %8750 = vst [vmem:[#allocation64_spill] sm:$0xff] %v5460_v35  ;;  %v5463_v31 = vld [vmem:[#allocation4 + $0xc8] sm:$0xff]  ;;  %v5466_v34 = vld [vmem:[#allocation4 + $0xd8] sm:$0xff] }
 0x282   :  { %1143 = vmatprep.subr.mxu0 %v5451_v24  ;;  %1214 = vmatprep.subr.mxu1 %v5454_v29  ;;  %8751 = vst [vmem:[#allocation65_spill] sm:$0xff] %v5463_v31  ;;  %8752 = vst [vmem:[#allocation66_spill] sm:$0xff] %v5466_v34  ;;  %v5469_v24 = vld [vmem:[#allocation4 + $0xc0] sm:$0xff]  ;;  %v5472_v29 = vld [vmem:[#allocation4 + $0xd0] sm:$0xff] }
 0x283   :  { %1144 = vmatpush1.msra.mxu0 %v5457_v27  ;;  %1215 = vmatpush1.msra.mxu1 %v5460_v35  ;;  %8753 = vst [vmem:[#allocation67_spill] sm:$0xff] %v5469_v24  ;;  %8754 = vst [vmem:[#allocation68_spill] sm:$0xff] %v5472_v29  ;;  %v5475_v27 = vld [vmem:[#allocation4 + $0xa8] sm:$0xff]  ;;  %v5478_v35 = vld [vmem:[#allocation4 + $0xb8] sm:$0xff] }
 0x284   :  { %1145 = vmatprep.subr.mxu0 %v5463_v31  ;;  %1216 = vmatprep.subr.mxu1 %v5466_v34  ;;  %8755 = vst [vmem:[#allocation69_spill] sm:$0xff] %v5475_v27  ;;  %8756 = vst [vmem:[#allocation70_spill] sm:$0xff] %v5478_v35  ;;  %v5481_v31 = vld [vmem:[#allocation4 + $0xa0] sm:$0xff]  ;;  %v5484_v34 = vld [vmem:[#allocation4 + $0xb0] sm:$0xff] }
 0x285   :  { %1146 = vmatpush1.msra.mxu0 %v5469_v24  ;;  %1217 = vmatpush1.msra.mxu1 %v5472_v29  ;;  %8757 = vst [vmem:[#allocation71_spill] sm:$0xff] %v5481_v31  ;;  %8758 = vst [vmem:[#allocation72_spill] sm:$0xff] %v5484_v34  ;;  %v5487_v24 = vld [vmem:[#allocation4 + $0x88] sm:$0xff]  ;;  %v5490_v29 = vld [vmem:[#allocation4 + $0x98] sm:$0xff] }
 0x286   :  { %1147 = vmatprep.subr.mxu0 %v5475_v27  ;;  %1218 = vmatprep.subr.mxu1 %v5478_v35  ;;  %8759 = vst [vmem:[#allocation73_spill] sm:$0xff] %v5487_v24  ;;  %8760 = vst [vmem:[#allocation74_spill] sm:$0xff] %v5490_v29  ;;  %v5493_v27 = vld [vmem:[#allocation4 + $0x80] sm:$0xff]  ;;  %v5496_v35 = vld [vmem:[#allocation4 + $0x90] sm:$0xff] }
 0x287   :  { %1148 = vmatpush1.msra.mxu0 %v5481_v31  ;;  %1219 = vmatpush1.msra.mxu1 %v5484_v34  ;;  %8761 = vst [vmem:[#allocation75_spill] sm:$0xff] %v5493_v27  ;;  %8762 = vst [vmem:[#allocation76_spill] sm:$0xff] %v5496_v35  ;;  %v5499_v31 = vld [vmem:[#allocation4 + $0x68] sm:$0xff]  ;;  %v5502_v34 = vld [vmem:[#allocation4 + $0x78] sm:$0xff] }
 0x288   :  { %1149 = vmatprep.subr.mxu0 %v5487_v24  ;;  %1220 = vmatprep.subr.mxu1 %v5490_v29  ;;  %8763 = vst [vmem:[#allocation77_spill] sm:$0xff] %v5499_v31  ;;  %8764 = vst [vmem:[#allocation78_spill] sm:$0xff] %v5502_v34  ;;  %v5505_v24 = vld [vmem:[#allocation4 + $0x60] sm:$0xff]  ;;  %v5508_v29 = vld [vmem:[#allocation4 + $0x70] sm:$0xff] }
 0x289   :  { %1150 = vmatpush1.msra.mxu0 %v5493_v27  ;;  %1221 = vmatpush1.msra.mxu1 %v5496_v35  ;;  %8765 = vst [vmem:[#allocation79_spill] sm:$0xff] %v5505_v24  ;;  %8766 = vst [vmem:[#allocation80_spill] sm:$0xff] %v5508_v29  ;;  %v5511_v27 = vld [vmem:[#allocation4 + $0x48] sm:$0xff]  ;;  %v5514_v35 = vld [vmem:[#allocation4 + $0x58] sm:$0xff] }
 0x28a   :  { %1151 = vmatprep.subr.mxu0 %v5499_v31  ;;  %1222 = vmatprep.subr.mxu1 %v5502_v34  ;;  %8767 = vst [vmem:[#allocation81_spill] sm:$0xff] %v5511_v27  ;;  %8768 = vst [vmem:[#allocation82_spill] sm:$0xff] %v5514_v35  ;;  %v5517_v31 = vld [vmem:[#allocation4 + $0x40] sm:$0xff]  ;;  %v5520_v34 = vld [vmem:[#allocation4 + $0x50] sm:$0xff] }
 0x28b   :  { %1152 = vmatpush1.msra.mxu0 %v5505_v24  ;;  %1223 = vmatpush1.msra.mxu1 %v5508_v29  ;;  %8769 = vst [vmem:[#allocation83_spill] sm:$0xff] %v5517_v31  ;;  %8770 = vst [vmem:[#allocation84_spill] sm:$0xff] %v5520_v34  ;;  %v5523_v24 = vld [vmem:[#allocation4 + $0x28] sm:$0xff]  ;;  %v5526_v29 = vld [vmem:[#allocation4 + $0x38] sm:$0xff] }
 0x28c   :  { %1153 = vmatprep.subr.mxu0 %v5511_v27  ;;  %1224 = vmatprep.subr.mxu1 %v5514_v35  ;;  %8771 = vst [vmem:[#allocation85_spill] sm:$0xff] %v5523_v24  ;;  %8772 = vst [vmem:[#allocation86_spill] sm:$0xff] %v5526_v29  ;;  %v5529_v27 = vld [vmem:[#allocation4 + $0x20] sm:$0xff]  ;;  %v5532_v35 = vld [vmem:[#allocation4 + $0x30] sm:$0xff] }
 0x28d   :  { %1154 = vmatpush1.msra.mxu0 %v5517_v31  ;;  %1225 = vmatpush1.msra.mxu1 %v5520_v34  ;;  %8773 = vst [vmem:[#allocation87_spill] sm:$0xff] %v5529_v27  ;;  %8774 = vst [vmem:[#allocation88_spill] sm:$0xff] %v5532_v35  ;;  %v5535_v31 = vld [vmem:[#allocation4 + $0x8] sm:$0xff]  ;;  %v5538_v34 = vld [vmem:[#allocation4 + $0x18] sm:$0xff] }
 0x28e   :  { %1155 = vmatprep.subr.mxu0 %v5523_v24  ;;  %1226 = vmatprep.subr.mxu1 %v5526_v29  ;;  %8775 = vst [vmem:[#allocation89_spill] sm:$0xff] %v5535_v31  ;;  %8776 = vst [vmem:[#allocation90_spill] sm:$0xff] %v5538_v34  ;;  %v5541_v24 = vld [vmem:[#allocation4] sm:$0xff]  ;;  %v5544_v29 = vld [vmem:[#allocation4 + $0x10] sm:$0xff] }
 0x28f   :  { %1156 = vmatpush1.msra.mxu0 %v5529_v27  ;;  %1227 = vmatpush1.msra.mxu1 %v5532_v35  ;;  %8777 = vst [vmem:[#allocation91_spill] sm:$0xff] %v5541_v24  ;;  %8778 = vst [vmem:[#allocation92_spill] sm:$0xff] %v5544_v29  ;;  %v5547_v27 = vld [vmem:[#allocation4 + $0x3e8] sm:$0xff]  ;;  %v5550_v35 = vld [vmem:[#allocation4 + $0x3f8] sm:$0xff] }
 0x290   :  { %1157 = vmatprep.subr.mxu0 %v5535_v31  ;;  %1228 = vmatprep.subr.mxu1 %v5538_v34  ;;  %8779 = vst [vmem:[#allocation93_spill] sm:$0xff] %v5547_v27  ;;  %8780 = vst [vmem:[#allocation94_spill] sm:$0xff] %v5550_v35  ;;  %v5553_v31 = vld [vmem:[#allocation4 + $0x3e0] sm:$0xff]  ;;  %v5556_v34 = vld [vmem:[#allocation4 + $0x3f0] sm:$0xff] }
 0x291   :  { %1158 = vmatpush1.msra.mxu0 %v5541_v24  ;;  %1229 = vmatpush1.msra.mxu1 %v5544_v29  ;;  %8781 = vst [vmem:[#allocation95_spill] sm:$0xff] %v5553_v31  ;;  %8782 = vst [vmem:[#allocation96_spill] sm:$0xff] %v5556_v34  ;;  %v5559_v24 = vld [vmem:[#allocation4 + $0x3c8] sm:$0xff]  ;;  %v5562_v29 = vld [vmem:[#allocation4 + $0x3d8] sm:$0xff] }
 0x292   :  { %1159 = vmatprep.subr.mxu0 %v5547_v27  ;;  %1230 = vmatprep.subr.mxu1 %v5550_v35  ;;  %8783 = vst [vmem:[#allocation97_spill] sm:$0xff] %v5559_v24  ;;  %8784 = vst [vmem:[#allocation98_spill] sm:$0xff] %v5562_v29  ;;  %v5565_v27 = vld [vmem:[#allocation4 + $0x3c0] sm:$0xff]  ;;  %v5568_v35 = vld [vmem:[#allocation4 + $0x3d0] sm:$0xff] }
 0x293   :  { %1160 = vmatpush2.msra.mxu0 %v5553_v31  ;;  %1231 = vmatpush2.msra.mxu1 %v5556_v34  ;;  %8785 = vst [vmem:[#allocation99_spill] sm:$0xff] %v5565_v27  ;;  %8786 = vst [vmem:[#allocation100_spill] sm:$0xff] %v5568_v35  ;;  %v5571_v31 = vld [vmem:[#allocation4 + $0x3a8] sm:$0xff]  ;;  %v5574_v34 = vld [vmem:[#allocation4 + $0x3b8] sm:$0xff] }
 0x294   :  { %1161 = vmatprep.subr.mxu0 %v5559_v24  ;;  %1232 = vmatprep.subr.mxu1 %v5562_v29  ;;  %8787 = vst [vmem:[#allocation101_spill] sm:$0xff] %v5571_v31  ;;  %8788 = vst [vmem:[#allocation102_spill] sm:$0xff] %v5574_v34  ;;  %v5577_v24 = vld [vmem:[#allocation4 + $0x3a0] sm:$0xff]  ;;  %v5580_v29 = vld [vmem:[#allocation4 + $0x3b0] sm:$0xff] }
 0x295   :  { %1162 = vmatpush2.msra.mxu0 %v5565_v27  ;;  %1233 = vmatpush2.msra.mxu1 %v5568_v35  ;;  %8789 = vst [vmem:[#allocation103_spill] sm:$0xff] %v5577_v24  ;;  %8790 = vst [vmem:[#allocation104_spill] sm:$0xff] %v5580_v29  ;;  %v5583_v27 = vld [vmem:[#allocation4 + $0x388] sm:$0xff]  ;;  %v5586_v35 = vld [vmem:[#allocation4 + $0x398] sm:$0xff] }
 0x296   :  { %1163 = vmatprep.subr.mxu0 %v5571_v31  ;;  %1234 = vmatprep.subr.mxu1 %v5574_v34  ;;  %8791 = vst [vmem:[#allocation105_spill] sm:$0xff] %v5583_v27  ;;  %8792 = vst [vmem:[#allocation106_spill] sm:$0xff] %v5586_v35  ;;  %v5589_v31 = vld [vmem:[#allocation4 + $0x380] sm:$0xff]  ;;  %v5592_v34 = vld [vmem:[#allocation4 + $0x390] sm:$0xff] }
 0x297   :  { %1164 = vmatpush2.msra.mxu0 %v5577_v24  ;;  %1235 = vmatpush2.msra.mxu1 %v5580_v29  ;;  %8793 = vst [vmem:[#allocation107_spill] sm:$0xff] %v5589_v31  ;;  %8794 = vst [vmem:[#allocation108_spill] sm:$0xff] %v5592_v34  ;;  %v5595_v24 = vld [vmem:[#allocation4 + $0x368] sm:$0xff]  ;;  %v5598_v29 = vld [vmem:[#allocation4 + $0x378] sm:$0xff] }
 0x298   :  { %1165 = vmatprep.subr.mxu0 %v5583_v27  ;;  %1236 = vmatprep.subr.mxu1 %v5586_v35  ;;  %8795 = vst [vmem:[#allocation109_spill] sm:$0xff] %v5595_v24  ;;  %8796 = vst [vmem:[#allocation110_spill] sm:$0xff] %v5598_v29  ;;  %v5601_v27 = vld [vmem:[#allocation4 + $0x360] sm:$0xff]  ;;  %v5604_v35 = vld [vmem:[#allocation4 + $0x370] sm:$0xff] }
 0x299   :  { %1166 = vmatpush2.msra.mxu0 %v5589_v31  ;;  %1237 = vmatpush2.msra.mxu1 %v5592_v34  ;;  %8797 = vst [vmem:[#allocation111_spill] sm:$0xff] %v5601_v27  ;;  %8798 = vst [vmem:[#allocation112_spill] sm:$0xff] %v5604_v35  ;;  %v5607_v31 = vld [vmem:[#allocation4 + $0x348] sm:$0xff]  ;;  %v5610_v34 = vld [vmem:[#allocation4 + $0x358] sm:$0xff] }
 0x29a   :  { %1167 = vmatprep.subr.mxu0 %v5595_v24  ;;  %1238 = vmatprep.subr.mxu1 %v5598_v29  ;;  %8799 = vst [vmem:[#allocation113_spill] sm:$0xff] %v5607_v31  ;;  %8800 = vst [vmem:[#allocation114_spill] sm:$0xff] %v5610_v34  ;;  %v5613_v24 = vld [vmem:[#allocation4 + $0x340] sm:$0xff]  ;;  %v5616_v29 = vld [vmem:[#allocation4 + $0x350] sm:$0xff] }
 0x29b   :  { %1168 = vmatpush2.msra.mxu0 %v5601_v27  ;;  %1239 = vmatpush2.msra.mxu1 %v5604_v35  ;;  %8801 = vst [vmem:[#allocation115_spill] sm:$0xff] %v5613_v24  ;;  %8802 = vst [vmem:[#allocation116_spill] sm:$0xff] %v5616_v29  ;;  %v5619_v27 = vld [vmem:[#allocation4 + $0x328] sm:$0xff]  ;;  %v5622_v35 = vld [vmem:[#allocation4 + $0x338] sm:$0xff] }
 0x29c   :  { %1169 = vmatprep.subr.mxu0 %v5607_v31  ;;  %1240 = vmatprep.subr.mxu1 %v5610_v34  ;;  %8803 = vst [vmem:[#allocation117_spill] sm:$0xff] %v5619_v27  ;;  %8804 = vst [vmem:[#allocation118_spill] sm:$0xff] %v5622_v35  ;;  %v5625_v31 = vld [vmem:[#allocation4 + $0x320] sm:$0xff]  ;;  %v5628_v34 = vld [vmem:[#allocation4 + $0x330] sm:$0xff] }
 0x29d   :  { %1170 = vmatpush2.msra.mxu0 %v5613_v24  ;;  %1241 = vmatpush2.msra.mxu1 %v5616_v29  ;;  %8805 = vst [vmem:[#allocation119_spill] sm:$0xff] %v5625_v31  ;;  %8806 = vst [vmem:[#allocation120_spill] sm:$0xff] %v5628_v34  ;;  %v5631_v24 = vld [vmem:[#allocation4 + $0x308] sm:$0xff]  ;;  %v5634_v29 = vld [vmem:[#allocation4 + $0x318] sm:$0xff] }
 0x29e   :  { %1171 = vmatprep.subr.mxu0 %v5619_v27  ;;  %1242 = vmatprep.subr.mxu1 %v5622_v35  ;;  %8807 = vst [vmem:[#allocation121_spill] sm:$0xff] %v5631_v24  ;;  %8808 = vst [vmem:[#allocation122_spill] sm:$0xff] %v5634_v29  ;;  %v5637_v27 = vld [vmem:[#allocation4 + $0x300] sm:$0xff]  ;;  %v5640_v35 = vld [vmem:[#allocation4 + $0x310] sm:$0xff] }
 0x29f   :  { %1172 = vmatpush2.msra.mxu0 %v5625_v31  ;;  %1243 = vmatpush2.msra.mxu1 %v5628_v34  ;;  %8809 = vst [vmem:[#allocation123_spill] sm:$0xff] %v5637_v27  ;;  %8810 = vst [vmem:[#allocation124_spill] sm:$0xff] %v5640_v35  ;;  %v5643_v31 = vld [vmem:[#allocation4 + $0x2e8] sm:$0xff]  ;;  %v5646_v34 = vld [vmem:[#allocation4 + $0x2f8] sm:$0xff] }
 0x2a0   :  { %1173 = vmatprep.subr.mxu0 %v5631_v24  ;;  %1244 = vmatprep.subr.mxu1 %v5634_v29  ;;  %8811 = vst [vmem:[#allocation125_spill] sm:$0xff] %v5643_v31  ;;  %8812 = vst [vmem:[#allocation126_spill] sm:$0xff] %v5646_v34  ;;  %v5649_v24 = vld [vmem:[#allocation4 + $0x2e0] sm:$0xff]  ;;  %v5652_v29 = vld [vmem:[#allocation4 + $0x2f0] sm:$0xff] }
 0x2a1   :  { %1174 = vmatpush2.msra.mxu0 %v5637_v27  ;;  %1245 = vmatpush2.msra.mxu1 %v5640_v35  ;;  %8813 = vst [vmem:[#allocation127_spill] sm:$0xff] %v5649_v24  ;;  %8814 = vst [vmem:[#allocation128_spill] sm:$0xff] %v5652_v29  ;;  %v5655_v27 = vld [vmem:[#allocation4 + $0x2c8] sm:$0xff]  ;;  %v5658_v35 = vld [vmem:[#allocation4 + $0x2d8] sm:$0xff] }
 0x2a2   :  { %1175 = vmatprep.subr.mxu0 %v5643_v31  ;;  %1246 = vmatprep.subr.mxu1 %v5646_v34  ;;  %8815 = vst [vmem:[#allocation129_spill] sm:$0xff] %v5655_v27  ;;  %8816 = vst [vmem:[#allocation130_spill] sm:$0xff] %v5658_v35  ;;  %v5661_v31 = vld [vmem:[#allocation4 + $0x2c0] sm:$0xff]  ;;  %v5664_v34 = vld [vmem:[#allocation4 + $0x2d0] sm:$0xff] }
 0x2a3   :  { %1176 = vmatpush2.msra.mxu0 %v5649_v24  ;;  %1247 = vmatpush2.msra.mxu1 %v5652_v29  ;;  %8817 = vst [vmem:[#allocation131_spill] sm:$0xff] %v5661_v31  ;;  %8818 = vst [vmem:[#allocation132_spill] sm:$0xff] %v5664_v34  ;;  %v5667_v24 = vld [vmem:[#allocation4 + $0x2a8] sm:$0xff]  ;;  %v5670_v29 = vld [vmem:[#allocation4 + $0x2b8] sm:$0xff] }
 0x2a4   :  { %1177 = vmatprep.subr.mxu0 %v5655_v27  ;;  %1248 = vmatprep.subr.mxu1 %v5658_v35  ;;  %8819 = vst [vmem:[#allocation133_spill] sm:$0xff] %v5667_v24  ;;  %8820 = vst [vmem:[#allocation134_spill] sm:$0xff] %v5670_v29  ;;  %v5673_v27 = vld [vmem:[#allocation4 + $0x2a0] sm:$0xff]  ;;  %v5676_v35 = vld [vmem:[#allocation4 + $0x2b0] sm:$0xff] }
 0x2a5   :  { %1178 = vmatpush2.msra.mxu0 %v5661_v31  ;;  %1249 = vmatpush2.msra.mxu1 %v5664_v34  ;;  %8821 = vst [vmem:[#allocation135_spill] sm:$0xff] %v5673_v27  ;;  %8822 = vst [vmem:[#allocation136_spill] sm:$0xff] %v5676_v35  ;;  %v5679_v31 = vld [vmem:[#allocation4 + $0x288] sm:$0xff]  ;;  %v5682_v34 = vld [vmem:[#allocation4 + $0x298] sm:$0xff] }
 0x2a6   :  { %1179 = vmatprep.subr.mxu0 %v5667_v24  ;;  %1250 = vmatprep.subr.mxu1 %v5670_v29  ;;  %8823 = vst [vmem:[#allocation137_spill] sm:$0xff] %v5679_v31  ;;  %8824 = vst [vmem:[#allocation138_spill] sm:$0xff] %v5682_v34  ;;  %v5685_v24 = vld [vmem:[#allocation4 + $0x280] sm:$0xff]  ;;  %v5688_v29 = vld [vmem:[#allocation4 + $0x290] sm:$0xff] }
 0x2a7   :  { %1180 = vmatpush2.msra.mxu0 %v5673_v27  ;;  %1251 = vmatpush2.msra.mxu1 %v5676_v35  ;;  %8825 = vst [vmem:[#allocation139_spill] sm:$0xff] %v5685_v24  ;;  %8826 = vst [vmem:[#allocation140_spill] sm:$0xff] %v5688_v29  ;;  %v5691_v27 = vld [vmem:[#allocation4 + $0x268] sm:$0xff]  ;;  %v5694_v35 = vld [vmem:[#allocation4 + $0x278] sm:$0xff] }
 0x2a8   :  { %1181 = vmatprep.subr.mxu0 %v5679_v31  ;;  %1252 = vmatprep.subr.mxu1 %v5682_v34  ;;  %8827 = vst [vmem:[#allocation141_spill] sm:$0xff] %v5691_v27  ;;  %8828 = vst [vmem:[#allocation142_spill] sm:$0xff] %v5694_v35  ;;  %v5697_v31 = vld [vmem:[#allocation4 + $0x260] sm:$0xff]  ;;  %v5700_v34 = vld [vmem:[#allocation4 + $0x270] sm:$0xff] }
 0x2a9   :  { %1182 = vmatpush2.msra.mxu0 %v5685_v24  ;;  %1253 = vmatpush2.msra.mxu1 %v5688_v29  ;;  %8829 = vst [vmem:[#allocation143_spill] sm:$0xff] %v5697_v31  ;;  %8830 = vst [vmem:[#allocation144_spill] sm:$0xff] %v5700_v34  ;;  %v5703_v24 = vld [vmem:[#allocation4 + $0x248] sm:$0xff]  ;;  %v5706_v29 = vld [vmem:[#allocation4 + $0x258] sm:$0xff] }
 0x2aa   :  { %1183 = vmatprep.subr.mxu0 %v5691_v27  ;;  %1254 = vmatprep.subr.mxu1 %v5694_v35  ;;  %8831 = vst [vmem:[#allocation145_spill] sm:$0xff] %v5703_v24  ;;  %8832 = vst [vmem:[#allocation146_spill] sm:$0xff] %v5706_v29  ;;  %v5709_v27 = vld [vmem:[#allocation4 + $0x240] sm:$0xff]  ;;  %v5712_v35 = vld [vmem:[#allocation4 + $0x250] sm:$0xff] }
 0x2ab   :  { %1184 = vmatpush2.msra.mxu0 %v5697_v31  ;;  %1255 = vmatpush2.msra.mxu1 %v5700_v34  ;;  %8833 = vst [vmem:[#allocation147_spill] sm:$0xff] %v5709_v27  ;;  %8834 = vst [vmem:[#allocation148_spill] sm:$0xff] %v5712_v35  ;;  %v5715_v31 = vld [vmem:[#allocation4 + $0x228] sm:$0xff]  ;;  %v5718_v34 = vld [vmem:[#allocation4 + $0x238] sm:$0xff] }
 0x2ac   :  { %1185 = vmatprep.subr.mxu0 %v5703_v24  ;;  %1256 = vmatprep.subr.mxu1 %v5706_v29  ;;  %8835 = vst [vmem:[#allocation149_spill] sm:$0xff] %v5715_v31  ;;  %8836 = vst [vmem:[#allocation150_spill] sm:$0xff] %v5718_v34  ;;  %v5721_v24 = vld [vmem:[#allocation4 + $0x220] sm:$0xff]  ;;  %v5724_v29 = vld [vmem:[#allocation4 + $0x230] sm:$0xff] }
 0x2ad   :  { %1186 = vmatpush2.msra.mxu0 %v5709_v27  ;;  %1257 = vmatpush2.msra.mxu1 %v5712_v35  ;;  %8837 = vst [vmem:[#allocation151_spill] sm:$0xff] %v5721_v24  ;;  %8838 = vst [vmem:[#allocation152_spill] sm:$0xff] %v5724_v29  ;;  %v5727_v27 = vld [vmem:[#allocation4 + $0x208] sm:$0xff]  ;;  %v5730_v35 = vld [vmem:[#allocation4 + $0x218] sm:$0xff] }
 0x2ae   :  { %1187 = vmatprep.subr.mxu0 %v5715_v31  ;;  %1258 = vmatprep.subr.mxu1 %v5718_v34  ;;  %8839 = vst [vmem:[#allocation153_spill] sm:$0xff] %v5727_v27  ;;  %8840 = vst [vmem:[#allocation154_spill] sm:$0xff] %v5730_v35  ;;  %v5733_v31 = vld [vmem:[#allocation4 + $0x200] sm:$0xff]  ;;  %v5736_v34 = vld [vmem:[#allocation4 + $0x210] sm:$0xff] }
 0x2af   :  { %1188 = vmatpush2.msra.mxu0 %v5721_v24  ;;  %1259 = vmatpush2.msra.mxu1 %v5724_v29  ;;  %8841 = vst [vmem:[#allocation155_spill] sm:$0xff] %v5733_v31  ;;  %8842 = vst [vmem:[#allocation156_spill] sm:$0xff] %v5736_v34 }
 0x2b0   :  { %1189 = vmatprep.subr.mxu0 %v5727_v27  ;;  %1260 = vmatprep.subr.mxu1 %v5730_v35 }
 0x2b1   :  { %1190 = vmatpush2.msra.mxu0 %v5733_v31  ;;  %1261 = vmatpush2.msra.mxu1 %v5736_v34 }
 0x2b2   :  { %1298 = vmatprep.subr.mxu0 %v5121_v25  ;;  %1369 = vmatprep.subr.mxu1 %v5124_v26 }
 0x310   :  { %v852_v29 = vpop.f32.mrf.mxu0  ;;  %v923_v35 = vpop.f32.mrf.mxu1 }
 0x311   :  { %v853_v24 = vadd.f32 %v852_v29, %v5130_v32  ;;  %v924_v25 = vadd.f32 %v923_v35, %v5139_v46 }
 0x312   :  { %v854_v27 = vpop.f32.mrf.mxu0  ;;  %v925_v31 = vpop.f32.mrf.mxu1 }
 0x313   :  { %v3211_v19 = vmul.f32 -1.442695, %v853_v24  ;;  %v855_v28 = vadd.f32 %v854_v27, %v5132_v33  ;;  %v926_v22 = vadd.f32 %v925_v31, %v5136_v42 }
 0x315   :  { %3435 = vpow2.f32 %v3211_v19  ;;  %v3212_v23 = vmul.f32 -1.442695, %v855_v28  ;;  %v3213_v21 = vmul.f32 -1.442695, %v926_v22  ;;  %v3214_v19 = vld [vmem:[%s7792_s0 + $0x40] sm:$0xff]  ;;  %v3215_v22 = vld [vmem:[%s7792_s0 + $0x48] sm:$0xff] }
 0x317   :  { %3437 = vpow2.f32 %v3212_v23 }
 0x318   :  { %3439 = vpow2.f32 %v3213_v21 }
 0x322   :  { %v3436_v34 = vpop.eup %3435 }
 0x323   :  { %v931_v20 = vadd.f32 1.0, %v3436_v34 }
 0x324   :  { %v3438_v26 = vpop.eup %3437 }
 0x325   :  { %3441 = vrcp.f32 %v931_v20  ;;  %v937_v29 = vadd.f32 1.0, %v3438_v26  ;;  %v3440_v24 = vpop.eup %3439 }
 0x326   :  { %3443 = vtanh.f32 %v924_v25 }
 0x327   :  { %3445 = vrcp.f32 %v937_v29  ;;  %v944_v29 = vadd.f32 1.0, %v3440_v24 }
 0x331   :  { %v1023_v23 = vpop.f32.mrf.mxu0  ;;  %v1094_v46 = vpop.f32.mrf.mxu1 }
 0x332   :  { %v3442_v27 = vpop.eup %3441  ;;  %v1099_v28 = vadd.f32 %v3214_v19, %v1023_v23  ;;  %v3217_v19 = vld [vmem:[%s7792_s0 + $0x58] sm:$0xff] }
 0x333   :  { %v3444_v31 = vpop.eup %3443  ;;  %v1025_v34 = vpop.f32.mrf.mxu0 }
 0x334   :  { %v3446_v35 = vpop.eup %3445  ;;  %v3218_v21 = vmul.f32 -1.442695, %v1099_v28  ;;  %v1100_v20 = vadd.f32 %v3215_v22, %v1025_v34  ;;  %v948_v26 = vmul.f32 %v3444_v31, %v3442_v27  ;;  %v1096_v23 = vpop.f32.mrf.mxu1 }
 0x335   :  { %v947_v25 = vmul.f32 %v3446_v35, %v5148_v5  ;;  %v1102_v28 = vadd.f32 %v3217_v19, %v1096_v23  ;;  %v3216_v5 = vld [vmem:[%s7792_s0 + $0x50] sm:$0xff] }
 0x336   :  { %3447 = vpow2.f32 %v3218_v21  ;;  %v3219_v42 = vmul.f32 -1.442695, %v1100_v20  ;;  %v1101_v27 = vadd.f32 %v3216_v5, %v1094_v46 }
 0x337   :  { %v5752_v33 = vadd.f32 %v948_v26, %v947_v25  ;;  %v3220_v24 = vmul.f32 -1.442695, %v1102_v28 }
 0x338   :  { %3449 = vpow2.f32 %v3219_v42 }
 0x339   :  { %3451 = vrcp.f32 %v944_v29 }
 0x33a   :  { %3453 = vtanh.f32 %v5752_v33 }
 0x33b   :  { %3455 = vpow2.f32 %v3220_v24 }
 0x343   :  { %v3448_v22 = vpop.eup %3447 }
 0x344   :  { %v1106_v31 = vadd.f32 1.0, %v3448_v22 }
 0x345   :  { %v3450_v34 = vpop.eup %3449 }
 0x346   :  { %v3452_v42 = vpop.eup %3451  ;;  %3457 = vrcp.f32 %v1106_v31  ;;  %v1112_v35 = vadd.f32 1.0, %v3450_v34  ;;  %v8888_v31 = vld [vmem:[#allocation55_spill] sm:$0xff]  ;;  %v8889_v34 = vld [vmem:[#allocation56_spill] sm:$0xff] }
 0x347   :  { %v3454_v21 = vpop.eup %3453  ;;  %3459 = vtanh.f32 %v1101_v27 }
 0x348   :  { %3461 = vrcp.f32 %v1112_v35  ;;  %v951_v20 = vmul.f32 %v3454_v21, %v3452_v42  ;;  %v3456_v26 = vpop.eup %3455  ;;  %v8890_v42 = vld [vmem:[#allocation57_spill] sm:$0xff]  ;;  %v8891_v35 = vld [vmem:[#allocation58_spill] sm:$0xff]  ;;  %v8892_v21 = vld [vmem:[#allocation59_spill] sm:$0xff] }
 0x349   :  { %v1119_v23 = vadd.f32 1.0, %v3456_v26  ;;  %v8894_v26 = vld [vmem:[#allocation61_spill] sm:$0xff] }
 0x34a   :  { %1191 = vmatprep.mubr.f32.mxu0 %v951_v20  ;;  %1262 = vmatprep.mubr.f32.mxu1 %v951_v20  ;;  %v8893_v20 = vld [vmem:[#allocation60_spill] sm:$0xff] }
 0x34b   :  { %3463 = vrcp.f32 %v1119_v23  ;;  %v8898_v23 = vld [vmem:[#allocation65_spill] sm:$0xff] }
 0x353   :  { %v3458_v25 = vpop.eup %3457 }
 0x354   :  { %v3460_v29 = vpop.eup %3459 }
 0x355   :  { %v3462_v19 = vpop.eup %3461  ;;  %v1123_v28 = vmul.f32 %v3460_v29, %v3458_v25  ;;  %v8895_v25 = vld [vmem:[#allocation62_spill] sm:$0xff]  ;;  %v8896_v29 = vld [vmem:[#allocation63_spill] sm:$0xff] }
 0x356   :  { %v1122_v46 = vmul.f32 %v3462_v19, %v5158_v30  ;;  %v8843_v30 = vld [vmem:[#allocation9_spill] sm:$0xff]  ;;  %v8897_v19 = vld [vmem:[#allocation64_spill] sm:$0xff] }
 0x358   :  { %v5762_v5 = vadd.f32 %v1123_v28, %v1122_v46  ;;  %v3464_v24 = vpop.eup %3463  ;;  %v8899_v28 = vld [vmem:[#allocation66_spill] sm:$0xff]  ;;  %v8900_v46 = vld [vmem:[#allocation67_spill] sm:$0xff] }
 0x35a   :  { %3465 = vtanh.f32 %v5762_v5 }
 0x367   :  { %v3466_v22 = vpop.eup %3465 }
 0x368   :  { %v5765_v27 = vmul.f32 %v3466_v22, %v3464_v24  ;;  %v8901_v24 = vld [vmem:[#allocation68_spill] sm:$0xff]  ;;  %v8902_v22 = vld [vmem:[#allocation69_spill] sm:$0xff] }
 0x36a   :  { %1192 = vmatmul.mubr.f32.vlgmr.msra.gmra.mxu0 %v5765_v27  ;;  %1263 = vmatmul.mubr.f32.vlgmr.msra.gmra.mxu1 %v5765_v27 }
 0x36b   :  { %1299 = vmatpush1.msra.mxu0 %v5165_v36  ;;  %1370 = vmatpush1.msra.mxu1 %v5168_v37  ;;  %v8844_v36 = vld [vmem:[#allocation17_spill] sm:$0xff]  ;;  %v8845_v37 = vld [vmem:[#allocation10_spill] sm:$0xff] }
 0x36c   :  { %1300 = vmatprep.subr.mxu0 %v5171_v53  ;;  %1371 = vmatprep.subr.mxu1 %v5174_v38  ;;  %v8846_v53 = vld [vmem:[#allocation19_spill] sm:$0xff] }
 0x36d   :  { %1301 = vmatpush1.msra.mxu0 %v5177_v39  ;;  %1372 = vmatpush1.msra.mxu1 %v5180_v40  ;;  %v8847_v38 = vld [vmem:[#allocation11_spill] sm:$0xff]  ;;  %v8848_v39 = vld [vmem:[#allocation20_spill] sm:$0xff] }
 0x36e   :  { %1302 = vmatprep.subr.mxu0 %v5183_v41  ;;  %1373 = vmatprep.subr.mxu1 %v5186_v43  ;;  %v8849_v40 = vld [vmem:[#allocation12_spill] sm:$0xff]  ;;  %v8850_v41 = vld [vmem:[#allocation21_spill] sm:$0xff]  ;;  %v8851_v43 = vld [vmem:[#allocation14_spill] sm:$0xff] }
 0x36f   :  { %1303 = vmatpush1.msra.mxu0 %v5189_v44  ;;  %1374 = vmatpush1.msra.mxu1 %v5192_v45  ;;  %v8852_v44 = vld [vmem:[#allocation23_spill] sm:$0xff]  ;;  %v8853_v45 = vld [vmem:[#allocation16_spill] sm:$0xff] }
 0x370   :  { %1304 = vmatprep.subr.mxu0 %v5195_v47  ;;  %1375 = vmatprep.subr.mxu1 %v5198_v49  ;;  %v8854_v47 = vld [vmem:[#allocation25_spill] sm:$0xff]  ;;  %v8855_v49 = vld [vmem:[#allocation18_spill] sm:$0xff] }
 0x371   :  { %1305 = vmatpush1.msra.mxu0 %v5201_v51  ;;  %1376 = vmatpush1.msra.mxu1 %v5204_v55  ;;  %v8856_v51 = vld [vmem:[#allocation27_spill] sm:$0xff]  ;;  %v8857_v55 = vld [vmem:[#allocation22_spill] sm:$0xff] }
 0x372   :  { %1306 = vmatprep.subr.mxu0 %v5207_v57  ;;  %1377 = vmatprep.subr.mxu1 %v5210_v63  ;;  %v8858_v57 = vld [vmem:[#allocation29_spill] sm:$0xff]  ;;  %v8859_v63 = vld [vmem:[#allocation24_spill] sm:$0xff] }
 0x373   :  { %1307 = vmatpush1.msra.mxu0 %v5213_v1  ;;  %1378 = vmatpush1.msra.mxu1 %v5216_v9  ;;  %v8860_v1 = vmov 0.0   ;;  %v8861_v9 = vld [vmem:[#allocation30_spill] sm:$0xff] }
 0x374   :  { %1308 = vmatprep.subr.mxu0 %v5219_v48  ;;  %1379 = vmatprep.subr.mxu1 %v5222_v56  ;;  %v8862_v48 = vld [vmem:[#allocation26_spill] sm:$0xff]  ;;  %v8863_v56 = vld [vmem:[#allocation32_spill] sm:$0xff] }
 0x375   :  { %1309 = vmatpush1.msra.mxu0 %v5225_v50  ;;  %1380 = vmatpush1.msra.mxu1 %v5228_v52  ;;  %v8864_v50 = vld [vmem:[#allocation28_spill] sm:$0xff]  ;;  %v8865_v52 = vld [vmem:[#allocation34_spill] sm:$0xff] }
 0x376   :  { %1310 = vmatprep.subr.mxu0 %v5231_v54  ;;  %1381 = vmatprep.subr.mxu1 %v5234_v58  ;;  %v8866_v54 = vld [vmem:[#allocation31_spill] sm:$0xff]  ;;  %v8867_v58 = vld [vmem:[#allocation36_spill] sm:$0xff] }
 0x377   :  { %1311 = vmatpush1.msra.mxu0 %v5237_v59  ;;  %1382 = vmatpush1.msra.mxu1 %v5240_v60  ;;  %v8868_v59 = vld [vmem:[#allocation33_spill] sm:$0xff]  ;;  %v8869_v60 = vld [vmem:[#allocation38_spill] sm:$0xff] }
 0x378   :  { %1312 = vmatprep.subr.mxu0 %v5243_v0  ;;  %1383 = vmatprep.subr.mxu1 %v5246_v61  ;;  %v8870_v0 = vld [vmem:[#allocation35_spill] sm:$0xff] }
 0x379   :  { %1313 = vmatpush1.msra.mxu0 %v5249_v62  ;;  %1384 = vmatpush1.msra.mxu1 %v5252_v2  ;;  %v8871_v61 = vld [vmem:[#allocation39_spill] sm:$0xff]  ;;  %v8872_v62 = vld [vmem:[#allocation37_spill] sm:$0xff]  ;;  %v8873_v2 = vld [vmem:[#allocation40_spill] sm:$0xff] }
 0x37a   :  { %1314 = vmatprep.subr.mxu0 %v5255_v3  ;;  %1385 = vmatprep.subr.mxu1 %v5258_v4  ;;  %v8874_v3 = vld [vmem:[#allocation41_spill] sm:$0xff]  ;;  %v8875_v4 = vld [vmem:[#allocation42_spill] sm:$0xff] }
 0x37b   :  { %1315 = vmatpush1.msra.mxu0 %v5261_v6  ;;  %1386 = vmatpush1.msra.mxu1 %v5264_v7  ;;  %v8876_v6 = vld [vmem:[#allocation43_spill] sm:$0xff]  ;;  %v8877_v7 = vld [vmem:[#allocation44_spill] sm:$0xff] }
 0x37c   :  { %1316 = vmatprep.subr.mxu0 %v5267_v8  ;;  %1387 = vmatprep.subr.mxu1 %v5270_v10  ;;  %v8878_v8 = vld [vmem:[#allocation45_spill] sm:$0xff]  ;;  %v8879_v10 = vld [vmem:[#allocation46_spill] sm:$0xff] }
 0x37d   :  { %1317 = vmatpush1.msra.mxu0 %v5273_v11  ;;  %1388 = vmatpush1.msra.mxu1 %v5276_v12  ;;  %v8880_v11 = vld [vmem:[#allocation47_spill] sm:$0xff]  ;;  %v8881_v12 = vld [vmem:[#allocation48_spill] sm:$0xff] }
 0x37e   :  { %1318 = vmatprep.subr.mxu0 %v5279_v13  ;;  %1389 = vmatprep.subr.mxu1 %v5282_v14  ;;  %v8882_v13 = vld [vmem:[#allocation49_spill] sm:$0xff]  ;;  %v8883_v14 = vld [vmem:[#allocation50_spill] sm:$0xff] }
 0x37f   :  { %1319 = vmatpush1.msra.mxu0 %v5285_v15  ;;  %1390 = vmatpush1.msra.mxu1 %v5288_v16  ;;  %v8884_v15 = vld [vmem:[#allocation51_spill] sm:$0xff]  ;;  %v8885_v16 = vld [vmem:[#allocation52_spill] sm:$0xff] }
 0x380   :  { %1320 = vmatprep.subr.mxu0 %v5291_v17  ;;  %1391 = vmatprep.subr.mxu1 %v5294_v18  ;;  %v8886_v17 = vld [vmem:[#allocation53_spill] sm:$0xff]  ;;  %v8887_v18 = vld [vmem:[#allocation54_spill] sm:$0xff] }
 0x381   :  { %1321 = vmatpush1.msra.mxu0 %v8843_v30  ;;  %1392 = vmatpush1.msra.mxu1 %v8844_v36  ;;  %v8904_v30 = vld [vmem:[#allocation71_spill] sm:$0xff]  ;;  %v8905_v36 = vld [vmem:[#allocation72_spill] sm:$0xff] }
 0x382   :  { %1322 = vmatprep.subr.mxu0 %v8845_v37  ;;  %1393 = vmatprep.subr.mxu1 %v8846_v53  ;;  %v8906_v37 = vld [vmem:[#allocation73_spill] sm:$0xff]  ;;  %v8907_v53 = vld [vmem:[#allocation74_spill] sm:$0xff] }
 0x383   :  { %1323 = vmatpush1.msra.mxu0 %v8847_v38  ;;  %1394 = vmatpush1.msra.mxu1 %v8848_v39  ;;  %v8908_v38 = vld [vmem:[#allocation75_spill] sm:$0xff]  ;;  %v8909_v39 = vld [vmem:[#allocation76_spill] sm:$0xff] }
 0x384   :  { %1324 = vmatprep.subr.mxu0 %v8849_v40  ;;  %1395 = vmatprep.subr.mxu1 %v8850_v41  ;;  %v8910_v40 = vld [vmem:[#allocation77_spill] sm:$0xff]  ;;  %v8911_v41 = vld [vmem:[#allocation78_spill] sm:$0xff] }
 0x385   :  { %1325 = vmatpush1.msra.mxu0 %v8851_v43  ;;  %1396 = vmatpush1.msra.mxu1 %v8852_v44  ;;  %v8912_v43 = vld [vmem:[#allocation79_spill] sm:$0xff]  ;;  %v8913_v44 = vld [vmem:[#allocation80_spill] sm:$0xff] }
 0x386   :  { %1326 = vmatprep.subr.mxu0 %v8853_v45  ;;  %1397 = vmatprep.subr.mxu1 %v8854_v47  ;;  %v8914_v45 = vld [vmem:[#allocation81_spill] sm:$0xff]  ;;  %v8915_v47 = vld [vmem:[#allocation82_spill] sm:$0xff] }
 0x387   :  { %1327 = vmatpush1.msra.mxu0 %v8855_v49  ;;  %1398 = vmatpush1.msra.mxu1 %v8856_v51  ;;  %v8916_v49 = vld [vmem:[#allocation83_spill] sm:$0xff]  ;;  %v8917_v51 = vld [vmem:[#allocation84_spill] sm:$0xff] }
 0x388   :  { %1328 = vmatprep.subr.mxu0 %v8857_v55  ;;  %1399 = vmatprep.subr.mxu1 %v8858_v57  ;;  %v8918_v55 = vld [vmem:[#allocation85_spill] sm:$0xff]  ;;  %v8919_v57 = vld [vmem:[#allocation86_spill] sm:$0xff] }
 0x389   :  { %1329 = vmatpush1.msra.mxu0 %v8859_v63  ;;  %1362 = vmatprep.mubr.f32.mxu0 %v8860_v1  ;;  %v8920_v63 = vld [vmem:[#allocation87_spill] sm:$0xff] }
 0x38a   :  { %1400 = vmatpush1.msra.mxu1 %v8861_v9  ;;  %1433 = vmatprep.mubr.f32.mxu1 %v8860_v1  ;;  %v8921_v9 = vld [vmem:[#allocation88_spill] sm:$0xff] }
 0x38b   :  { %1363 = vmatmul.mubr.f32.vlgmr.msra.gmra.mxu0 %v5765_v27  ;;  %1434 = vmatmul.mubr.f32.vlgmr.msra.gmra.mxu1 %v5765_v27  ;;  %v8903_v27 = vld [vmem:[#allocation70_spill] sm:$0xff] }
 0x38c   :  { %1468 = vmatprep.subr.mxu0 %v8862_v48  ;;  %1539 = vmatprep.subr.mxu1 %v8863_v56  ;;  %v8922_v48 = vld [vmem:[#allocation89_spill] sm:$0xff]  ;;  %v8923_v56 = vld [vmem:[#allocation90_spill] sm:$0xff] }
 0x38d   :  { %1469 = vmatpush1.msra.mxu0 %v8864_v50  ;;  %1540 = vmatpush1.msra.mxu1 %v8865_v52  ;;  %v8924_v50 = vld [vmem:[#allocation91_spill] sm:$0xff]  ;;  %v8925_v52 = vld [vmem:[#allocation92_spill] sm:$0xff] }
 0x38e   :  { %1470 = vmatprep.subr.mxu0 %v8866_v54  ;;  %1541 = vmatprep.subr.mxu1 %v8867_v58  ;;  %v8926_v54 = vld [vmem:[#allocation93_spill] sm:$0xff]  ;;  %v8927_v58 = vld [vmem:[#allocation94_spill] sm:$0xff] }
 0x38f   :  { %1471 = vmatpush1.msra.mxu0 %v8868_v59  ;;  %1542 = vmatpush1.msra.mxu1 %v8869_v60  ;;  %v8928_v59 = vld [vmem:[#allocation95_spill] sm:$0xff]  ;;  %v8929_v60 = vld [vmem:[#allocation96_spill] sm:$0xff] }
 0x390   :  { %1472 = vmatprep.subr.mxu0 %v8870_v0  ;;  %1543 = vmatprep.subr.mxu1 %v8871_v61  ;;  %v8930_v0 = vld [vmem:[#allocation97_spill] sm:$0xff]  ;;  %v8931_v61 = vld [vmem:[#allocation98_spill] sm:$0xff] }
 0x391   :  { %1473 = vmatpush1.msra.mxu0 %v8872_v62  ;;  %1544 = vmatpush1.msra.mxu1 %v8873_v2  ;;  %v8932_v62 = vld [vmem:[#allocation99_spill] sm:$0xff]  ;;  %v8933_v2 = vld [vmem:[#allocation100_spill] sm:$0xff] }
 0x392   :  { %1474 = vmatprep.subr.mxu0 %v8874_v3  ;;  %1545 = vmatprep.subr.mxu1 %v8875_v4  ;;  %v8934_v3 = vld [vmem:[#allocation101_spill] sm:$0xff]  ;;  %v8935_v4 = vld [vmem:[#allocation102_spill] sm:$0xff] }
 0x393   :  { %1475 = vmatpush1.msra.mxu0 %v8876_v6  ;;  %1546 = vmatpush1.msra.mxu1 %v8877_v7  ;;  %v8936_v6 = vld [vmem:[#allocation103_spill] sm:$0xff]  ;;  %v8937_v7 = vld [vmem:[#allocation104_spill] sm:$0xff] }
 0x394   :  { %1476 = vmatprep.subr.mxu0 %v8878_v8  ;;  %1547 = vmatprep.subr.mxu1 %v8879_v10  ;;  %v8938_v8 = vld [vmem:[#allocation105_spill] sm:$0xff]  ;;  %v8939_v10 = vld [vmem:[#allocation106_spill] sm:$0xff] }
 0x395   :  { %1477 = vmatpush1.msra.mxu0 %v8880_v11  ;;  %1548 = vmatpush1.msra.mxu1 %v8881_v12  ;;  %v8940_v11 = vld [vmem:[#allocation107_spill] sm:$0xff]  ;;  %v8941_v12 = vld [vmem:[#allocation108_spill] sm:$0xff] }
 0x396   :  { %1478 = vmatprep.subr.mxu0 %v8882_v13  ;;  %1549 = vmatprep.subr.mxu1 %v8883_v14  ;;  %v8942_v13 = vld [vmem:[#allocation109_spill] sm:$0xff]  ;;  %v8943_v14 = vld [vmem:[#allocation110_spill] sm:$0xff] }
 0x397   :  { %1479 = vmatpush1.msra.mxu0 %v8884_v15  ;;  %1550 = vmatpush1.msra.mxu1 %v8885_v16  ;;  %v8944_v15 = vld [vmem:[#allocation111_spill] sm:$0xff]  ;;  %v8945_v16 = vld [vmem:[#allocation112_spill] sm:$0xff] }
 0x398   :  { %1480 = vmatprep.subr.mxu0 %v8886_v17  ;;  %1551 = vmatprep.subr.mxu1 %v8887_v18  ;;  %v8946_v17 = vld [vmem:[#allocation113_spill] sm:$0xff]  ;;  %v8947_v18 = vld [vmem:[#allocation114_spill] sm:$0xff] }
 0x399   :  { %1481 = vmatpush1.msra.mxu0 %v8888_v31  ;;  %1552 = vmatpush1.msra.mxu1 %v8889_v34  ;;  %v8948_v31 = vld [vmem:[#allocation115_spill] sm:$0xff]  ;;  %v8949_v34 = vld [vmem:[#allocation116_spill] sm:$0xff] }
 0x39a   :  { %1482 = vmatprep.subr.mxu0 %v8890_v42  ;;  %1553 = vmatprep.subr.mxu1 %v8891_v35  ;;  %v8950_v42 = vld [vmem:[#allocation117_spill] sm:$0xff]  ;;  %v8951_v35 = vld [vmem:[#allocation118_spill] sm:$0xff] }
 0x39b   :  { %1483 = vmatpush1.msra.mxu0 %v8892_v21  ;;  %1554 = vmatpush1.msra.mxu1 %v8893_v20  ;;  %v8952_v21 = vld [vmem:[#allocation119_spill] sm:$0xff]  ;;  %v8953_v20 = vld [vmem:[#allocation120_spill] sm:$0xff] }
 0x39c   :  { %1484 = vmatprep.subr.mxu0 %v8894_v26  ;;  %1555 = vmatprep.subr.mxu1 %v8895_v25  ;;  %v8954_v26 = vld [vmem:[#allocation121_spill] sm:$0xff]  ;;  %v8955_v25 = vld [vmem:[#allocation122_spill] sm:$0xff] }
 0x39d   :  { %1485 = vmatpush1.msra.mxu0 %v8896_v29  ;;  %1556 = vmatpush1.msra.mxu1 %v8897_v19  ;;  %v8956_v29 = vld [vmem:[#allocation123_spill] sm:$0xff]  ;;  %v8957_v19 = vld [vmem:[#allocation124_spill] sm:$0xff] }
 0x39e   :  { %1486 = vmatprep.subr.mxu0 %v8898_v23  ;;  %1557 = vmatprep.subr.mxu1 %v8899_v28  ;;  %v8958_v23 = vld [vmem:[#allocation125_spill] sm:$0xff]  ;;  %v8959_v28 = vld [vmem:[#allocation126_spill] sm:$0xff] }
 0x39f   :  { %1487 = vmatpush1.msra.mxu0 %v8900_v46  ;;  %1558 = vmatpush1.msra.mxu1 %v8901_v24  ;;  %v8960_v46 = vld [vmem:[#allocation127_spill] sm:$0xff]  ;;  %v8961_v24 = vld [vmem:[#allocation128_spill] sm:$0xff] }
 0x3a0   :  { %1488 = vmatprep.subr.mxu0 %v8902_v22  ;;  %1559 = vmatprep.subr.mxu1 %v8903_v27  ;;  %v8962_v22 = vld [vmem:[#allocation129_spill] sm:$0xff]  ;;  %v8963_v27 = vld [vmem:[#allocation130_spill] sm:$0xff] }
 0x3a1   :  { %1489 = vmatpush1.msra.mxu0 %v8904_v30  ;;  %1560 = vmatpush1.msra.mxu1 %v8905_v36  ;;  %v8964_v30 = vld [vmem:[#allocation131_spill] sm:$0xff]  ;;  %v8965_v36 = vld [vmem:[#allocation132_spill] sm:$0xff] }
 0x3a2   :  { %1490 = vmatprep.subr.mxu0 %v8906_v37  ;;  %1561 = vmatprep.subr.mxu1 %v8907_v53  ;;  %v8966_v37 = vld [vmem:[#allocation133_spill] sm:$0xff]  ;;  %v8967_v53 = vld [vmem:[#allocation134_spill] sm:$0xff] }
 0x3a3   :  { %1491 = vmatpush1.msra.mxu0 %v8908_v38  ;;  %1562 = vmatpush1.msra.mxu1 %v8909_v39  ;;  %v8968_v38 = vld [vmem:[#allocation135_spill] sm:$0xff]  ;;  %v8969_v39 = vld [vmem:[#allocation136_spill] sm:$0xff] }
 0x3a4   :  { %1492 = vmatprep.subr.mxu0 %v8910_v40  ;;  %1563 = vmatprep.subr.mxu1 %v8911_v41  ;;  %v8970_v40 = vld [vmem:[#allocation137_spill] sm:$0xff]  ;;  %v8971_v41 = vld [vmem:[#allocation138_spill] sm:$0xff] }
 0x3a5   :  { %1493 = vmatpush1.msra.mxu0 %v8912_v43  ;;  %1564 = vmatpush1.msra.mxu1 %v8913_v44  ;;  %v8972_v43 = vld [vmem:[#allocation139_spill] sm:$0xff]  ;;  %v8973_v44 = vld [vmem:[#allocation140_spill] sm:$0xff] }
 0x3a6   :  { %1494 = vmatprep.subr.mxu0 %v8914_v45  ;;  %1565 = vmatprep.subr.mxu1 %v8915_v47  ;;  %v8974_v45 = vld [vmem:[#allocation141_spill] sm:$0xff]  ;;  %v8975_v47 = vld [vmem:[#allocation142_spill] sm:$0xff] }
 0x3a7   :  { %1495 = vmatpush1.msra.mxu0 %v8916_v49  ;;  %1566 = vmatpush1.msra.mxu1 %v8917_v51  ;;  %v8976_v49 = vld [vmem:[#allocation143_spill] sm:$0xff]  ;;  %v8977_v51 = vld [vmem:[#allocation144_spill] sm:$0xff] }
 0x3a8   :  { %1496 = vmatprep.subr.mxu0 %v8918_v55  ;;  %1567 = vmatprep.subr.mxu1 %v8919_v57  ;;  %v8978_v55 = vld [vmem:[#allocation145_spill] sm:$0xff]  ;;  %v8979_v57 = vld [vmem:[#allocation146_spill] sm:$0xff] }
 0x3a9   :  { %1497 = vmatpush1.msra.mxu0 %v8920_v63  ;;  %1568 = vmatpush1.msra.mxu1 %v8921_v9  ;;  %v8980_v63 = vld [vmem:[#allocation147_spill] sm:$0xff]  ;;  %v8981_v9 = vld [vmem:[#allocation148_spill] sm:$0xff] }
 0x3aa   :  { %1498 = vmatprep.subr.mxu0 %v8922_v48  ;;  %1569 = vmatprep.subr.mxu1 %v8923_v56  ;;  %v8982_v48 = vld [vmem:[#allocation149_spill] sm:$0xff]  ;;  %v8983_v56 = vld [vmem:[#allocation150_spill] sm:$0xff] }
 0x3ab   :  { %1499 = vmatpush1.msra.mxu0 %v8924_v50  ;;  %1570 = vmatpush1.msra.mxu1 %v8925_v52  ;;  %v8984_v50 = vld [vmem:[#allocation151_spill] sm:$0xff]  ;;  %v8985_v52 = vld [vmem:[#allocation152_spill] sm:$0xff] }
 0x3ac   :  { %1500 = vmatprep.subr.mxu0 %v8926_v54  ;;  %1571 = vmatprep.subr.mxu1 %v8927_v58  ;;  %v8986_v54 = vld [vmem:[#allocation153_spill] sm:$0xff]  ;;  %v8987_v58 = vld [vmem:[#allocation154_spill] sm:$0xff] }
 0x3ad   :  { %1501 = vmatpush2.msra.mxu0 %v8928_v59  ;;  %1572 = vmatpush2.msra.mxu1 %v8929_v60  ;;  %v8988_v59 = vld [vmem:[#allocation155_spill] sm:$0xff]  ;;  %v8989_v60 = vld [vmem:[#allocation156_spill] sm:$0xff] }
 0x3ae   :  { %1502 = vmatprep.subr.mxu0 %v8930_v0  ;;  %1573 = vmatprep.subr.mxu1 %v8931_v61  ;;  %v5963_v0 = vld [vmem:[#allocation2 + $0x1e8] sm:$0xff]  ;;  %v5966_v61 = vld [vmem:[#allocation2 + $0x1f8] sm:$0xff] }
 0x3af   :  { %1503 = vmatpush2.msra.mxu0 %v8932_v62  ;;  %1574 = vmatpush2.msra.mxu1 %v8933_v2 }
 0x3b0   :  { %1504 = vmatprep.subr.mxu0 %v8934_v3  ;;  %1575 = vmatprep.subr.mxu1 %v8935_v4 }
 0x3b1   :  { %1505 = vmatpush2.msra.mxu0 %v8936_v6  ;;  %1576 = vmatpush2.msra.mxu1 %v8937_v7  ;;  %v8990_v6 = vld [vmem:[#allocation13_spill] sm:$0xff] }
 0x3b2   :  { %1506 = vmatprep.subr.mxu0 %v8938_v8  ;;  %1577 = vmatprep.subr.mxu1 %v8939_v10 }
 0x3b3   :  { %1507 = vmatpush2.msra.mxu0 %v8940_v11  ;;  %1578 = vmatpush2.msra.mxu1 %v8941_v12  ;;  %v8991_v12 = vld [vmem:[#allocation8_spill] sm:$0xff] }
 0x3b4   :  { %1508 = vmatprep.subr.mxu0 %v8942_v13  ;;  %1579 = vmatprep.subr.mxu1 %v8943_v14 }
 0x3b5   :  { %1509 = vmatpush2.msra.mxu0 %v8944_v15  ;;  %1580 = vmatpush2.msra.mxu1 %v8945_v16  ;;  %v8992_v16 = vld [vmem:[#allocation15_spill] sm:$0xff] }
 0x3b6   :  { %1510 = vmatprep.subr.mxu0 %v8946_v17  ;;  %1581 = vmatprep.subr.mxu1 %v8947_v18 }
 0x3b7   :  { %1511 = vmatpush2.msra.mxu0 %v8948_v31  ;;  %1582 = vmatpush2.msra.mxu1 %v8949_v34 }
 0x3b8   :  { %1512 = vmatprep.subr.mxu0 %v8950_v42  ;;  %1583 = vmatprep.subr.mxu1 %v8951_v35  ;;  %v3224_v42 = vld [vmem:[%s7792_s0 + $0x60] sm:$0xff] }
 0x3b9   :  { %1513 = vmatpush2.msra.mxu0 %v8952_v21  ;;  %1584 = vmatpush2.msra.mxu1 %v8953_v20  ;;  %v3225_v20 = vld [vmem:[%s7792_s0 + $0x68] sm:$0xff] }
 0x3ba   :  { %1514 = vmatprep.subr.mxu0 %v8954_v26  ;;  %1585 = vmatprep.subr.mxu1 %v8955_v25 }
 0x3bb   :  { %1515 = vmatpush2.msra.mxu0 %v8956_v29  ;;  %1586 = vmatpush2.msra.mxu1 %v8957_v19 }
 0x3bc   :  { %1516 = vmatprep.subr.mxu0 %v8958_v23  ;;  %1587 = vmatprep.subr.mxu1 %v8959_v28 }
 0x3bd   :  { %1517 = vmatpush2.msra.mxu0 %v8960_v46  ;;  %1588 = vmatpush2.msra.mxu1 %v8961_v24 }
 0x3be   :  { %1518 = vmatprep.subr.mxu0 %v8962_v22  ;;  %1589 = vmatprep.subr.mxu1 %v8963_v27 }
 0x3bf   :  { %1519 = vmatpush2.msra.mxu0 %v8964_v30  ;;  %1590 = vmatpush2.msra.mxu1 %v8965_v36 }
 0x3c0   :  { %1520 = vmatprep.subr.mxu0 %v8966_v37  ;;  %1591 = vmatprep.subr.mxu1 %v8967_v53  ;;  %v3227_v53 = vld [vmem:[%s7792_s0 + $0x78] sm:$0xff] }
 0x3c1   :  { %1521 = vmatpush2.msra.mxu0 %v8968_v38  ;;  %1592 = vmatpush2.msra.mxu1 %v8969_v39 }
 0x3c2   :  { %1522 = vmatprep.subr.mxu0 %v8970_v40  ;;  %1593 = vmatprep.subr.mxu1 %v8971_v41 }
 0x3c3   :  { %1523 = vmatpush2.msra.mxu0 %v8972_v43  ;;  %1594 = vmatpush2.msra.mxu1 %v8973_v44 }
 0x3c4   :  { %1524 = vmatprep.subr.mxu0 %v8974_v45  ;;  %1595 = vmatprep.subr.mxu1 %v8975_v47 }
 0x3c5   :  { %1525 = vmatpush2.msra.mxu0 %v8976_v49  ;;  %1596 = vmatpush2.msra.mxu1 %v8977_v51 }
 0x3c6   :  { %1526 = vmatprep.subr.mxu0 %v8978_v55  ;;  %1597 = vmatprep.subr.mxu1 %v8979_v57 }
 0x3c7   :  { %1527 = vmatpush2.msra.mxu0 %v8980_v63  ;;  %1598 = vmatpush2.msra.mxu1 %v8981_v9 }
 0x3c8   :  { %1528 = vmatprep.subr.mxu0 %v8982_v48  ;;  %1599 = vmatprep.subr.mxu1 %v8983_v56 }
 0x3c9   :  { %1529 = vmatpush2.msra.mxu0 %v8984_v50  ;;  %1600 = vmatpush2.msra.mxu1 %v8985_v52 }
 0x3ca   :  { %1530 = vmatprep.subr.mxu0 %v8986_v54  ;;  %1601 = vmatprep.subr.mxu1 %v8987_v58 }
 0x3cb   :  { %1531 = vmatpush2.msra.mxu0 %v8988_v59  ;;  %1602 = vmatpush2.msra.mxu1 %v8989_v60 }
 0x3cc   :  { %1639 = vmatprep.subr.mxu0 %v5963_v0  ;;  %1710 = vmatprep.subr.mxu1 %v5966_v61 }
 0x42a   :  { %v1193_v62 = vpop.f32.mrf.mxu0  ;;  %v1264_v8 = vpop.f32.mrf.mxu1 }
 0x42b   :  { %v1194_v2 = vadd.f32 %v1193_v62, %v5130_v32  ;;  %v1265_v17 = vadd.f32 %v1264_v8, %v8992_v16  ;;  %v5997_v62 = vld [vmem:[#allocation2 + $0x1e0] sm:$0xff]  ;;  %v6015_v8 = vld [vmem:[#allocation2 + $0x1a8] sm:$0xff] }
 0x42c   :  { %v1195_v3 = vpop.f32.mrf.mxu0  ;;  %v1266_v11 = vpop.f32.mrf.mxu1 }
 0x42d   :  { %v3221_v4 = vmul.f32 -1.442695, %v1194_v2  ;;  %v1196_v7 = vadd.f32 %v1195_v3, %v8990_v6  ;;  %v1267_v13 = vadd.f32 %v1266_v11, %v8991_v12  ;;  %v6000_v2 = vld [vmem:[#allocation2 + $0x1f0] sm:$0xff]  ;;  %v6006_v3 = vld [vmem:[#allocation2 + $0x1d8] sm:$0xff]  ;;  %v6021_v11 = vld [vmem:[#allocation2 + $0x1a0] sm:$0xff] }
 0x42f   :  { %3467 = vpow2.f32 %v3221_v4  ;;  %v3222_v10 = vmul.f32 -1.442695, %v1196_v7  ;;  %v3223_v14 = vmul.f32 -1.442695, %v1267_v13  ;;  %v6009_v4 = vld [vmem:[#allocation2 + $0x1c0] sm:$0xff]  ;;  %v6012_v7 = vld [vmem:[#allocation2 + $0x1d0] sm:$0xff] }
 0x430   :  { %v6024_v13 = vld [vmem:[#allocation2 + $0x1b0] sm:$0xff] }
 0x431   :  { %3469 = vpow2.f32 %v3222_v10  ;;  %v6018_v10 = vld [vmem:[#allocation2 + $0x1b8] sm:$0xff] }
 0x432   :  { %3471 = vpow2.f32 %v3223_v14  ;;  %v6027_v14 = vld [vmem:[#allocation2 + $0x188] sm:$0xff] }
 0x43c   :  { %v3468_v15 = vpop.eup %3467 }
 0x43d   :  { %v1272_v18 = vadd.f32 1.0, %v3468_v15  ;;  %v6030_v15 = vld [vmem:[#allocation2 + $0x198] sm:$0xff] }
 0x43e   :  { %v3470_v31 = vpop.eup %3469 }
 0x43f   :  { %3473 = vrcp.f32 %v1272_v18  ;;  %v1278_v34 = vadd.f32 1.0, %v3470_v31  ;;  %v3472_v35 = vpop.eup %3471  ;;  %v6036_v18 = vld [vmem:[#allocation2 + $0x190] sm:$0xff]  ;;  %v6039_v31 = vld [vmem:[#allocation2 + $0x168] sm:$0xff] }
 0x440   :  { %3475 = vtanh.f32 %v1265_v17  ;;  %v1285_v27 = vadd.f32 1.0, %v3472_v35  ;;  %v6033_v17 = vld [vmem:[#allocation2 + $0x180] sm:$0xff]  ;;  %v6048_v35 = vld [vmem:[#allocation2 + $0x170] sm:$0xff] }
 0x441   :  { %3477 = vrcp.f32 %v1278_v34  ;;  %v6042_v34 = vld [vmem:[#allocation2 + $0x178] sm:$0xff] }
 0x44b   :  { %v1364_v21 = vpop.f32.mrf.mxu0  ;;  %v1435_v30 = vpop.f32.mrf.mxu1 }
 0x44c   :  { %v3474_v26 = vpop.eup %3473  ;;  %v1440_v25 = vadd.f32 %v3224_v42, %v1364_v21  ;;  %v6045_v42 = vld [vmem:[#allocation2 + $0x160] sm:$0xff]  ;;  %v6051_v21 = vld [vmem:[#allocation2 + $0x148] sm:$0xff] }
 0x44d   :  { %v3476_v29 = vpop.eup %3475  ;;  %v1366_v19 = vpop.f32.mrf.mxu0 }
 0x44e   :  { %v3478_v23 = vpop.eup %3477  ;;  %v3228_v28 = vmul.f32 -1.442695, %v1440_v25  ;;  %v1441_v46 = vadd.f32 %v3225_v20, %v1366_v19  ;;  %v1289_v24 = vmul.f32 %v3476_v29, %v3474_v26  ;;  %v1437_v38 = vpop.f32.mrf.mxu1  ;;  %v6054_v20 = vld [vmem:[#allocation2 + $0x158] sm:$0xff]  ;;  %v6057_v26 = vld [vmem:[#allocation2 + $0x140] sm:$0xff]  ;;  %v6060_v25 = vld [vmem:[#allocation2 + $0x150] sm:$0xff] }
 0x44f   :  { %v1288_v22 = vmul.f32 %v3478_v23, %v5752_v33  ;;  %v1443_v39 = vadd.f32 %v3227_v53, %v1437_v38  ;;  %v3226_v33 = vld [vmem:[%s7792_s0 + $0x70] sm:$0xff]  ;;  %v6063_v29 = vld [vmem:[#allocation2 + $0x128] sm:$0xff]  ;;  %v6066_v19 = vld [vmem:[#allocation2 + $0x138] sm:$0xff] }
 0x450   :  { %3479 = vpow2.f32 %v3228_v28  ;;  %v3229_v36 = vmul.f32 -1.442695, %v1441_v46  ;;  %v1442_v43 = vadd.f32 %v3226_v33, %v1435_v30  ;;  %v6069_v23 = vld [vmem:[#allocation2 + $0x120] sm:$0xff]  ;;  %v6072_v28 = vld [vmem:[#allocation2 + $0x130] sm:$0xff]  ;;  %v6075_v46 = vld [vmem:[#allocation2 + $0x108] sm:$0xff] }
 0x451   :  { %v5980_v37 = vadd.f32 %v1289_v24, %v1288_v22  ;;  %v3230_v40 = vmul.f32 -1.442695, %v1443_v39  ;;  %v6078_v24 = vld [vmem:[#allocation2 + $0x118] sm:$0xff]  ;;  %v6081_v22 = vld [vmem:[#allocation2 + $0x100] sm:$0xff]  ;;  %v6087_v30 = vld [vmem:[#allocation2 + $0xe8] sm:$0xff] }
 0x452   :  { %3481 = vpow2.f32 %v3229_v36  ;;  %v6090_v36 = vld [vmem:[#allocation2 + $0xf8] sm:$0xff]  ;;  %v6093_v53 = vld [vmem:[#allocation2 + $0xe0] sm:$0xff]  ;;  %v6096_v38 = vld [vmem:[#allocation2 + $0xf0] sm:$0xff] }
 0x453   :  { %3483 = vrcp.f32 %v1285_v27  ;;  %v6084_v27 = vld [vmem:[#allocation2 + $0x110] sm:$0xff]  ;;  %v6099_v39 = vld [vmem:[#allocation2 + $0xc8] sm:$0xff]  ;;  %v6102_v33 = vld [vmem:[#allocation2 + $0xd8] sm:$0xff] }
 0x454   :  { %3485 = vtanh.f32 %v5980_v37 }
 0x455   :  { %3487 = vpow2.f32 %v3230_v40  ;;  %v6105_v40 = vld [vmem:[#allocation2 + $0xc0] sm:$0xff] }
 0x45d   :  { %v3480_v41 = vpop.eup %3479 }
 0x45e   :  { %v1447_v44 = vadd.f32 1.0, %v3480_v41  ;;  %v6108_v41 = vld [vmem:[#allocation2 + $0xd0] sm:$0xff] }
 0x45f   :  { %v3482_v45 = vpop.eup %3481 }
 0x460   :  { %v3484_v47 = vpop.eup %3483  ;;  %3489 = vrcp.f32 %v1447_v44  ;;  %v1453_v49 = vadd.f32 1.0, %v3482_v45  ;;  %v6114_v44 = vld [vmem:[#allocation2 + $0xb8] sm:$0xff]  ;;  %v6117_v45 = vld [vmem:[#allocation2 + $0xa0] sm:$0xff] }
 0x461   :  { %v3486_v51 = vpop.eup %3485  ;;  %3491 = vtanh.f32 %v1442_v43  ;;  %v6111_v43 = vld [vmem:[#allocation2 + $0xa8] sm:$0xff] }
 0x462   :  { %3493 = vrcp.f32 %v1453_v49  ;;  %v1292_v55 = vmul.f32 %v3486_v51, %v3484_v47  ;;  %v3488_v57 = vpop.eup %3487  ;;  %v6120_v47 = vld [vmem:[#allocation2 + $0xb0] sm:$0xff]  ;;  %v6123_v49 = vld [vmem:[#allocation2 + $0x88] sm:$0xff]  ;;  %v6126_v51 = vld [vmem:[#allocation2 + $0x98] sm:$0xff] }
 0x463   :  { %v1460_v56 = vadd.f32 1.0, %v3488_v57  ;;  %v6132_v57 = vld [vmem:[#allocation2 + $0x90] sm:$0xff] }
 0x464   :  { %1532 = vmatprep.mubr.f32.mxu0 %v1292_v55  ;;  %1603 = vmatprep.mubr.f32.mxu1 %v1292_v55  ;;  %v6129_v55 = vld [vmem:[#allocation2 + $0x80] sm:$0xff]  ;;  %8994 = vst [vmem:[#allocation17_spill] sm:$0xff] %v6132_v57 }
 0x465   :  { %3495 = vrcp.f32 %v1460_v56  ;;  %8993 = vst [vmem:[#allocation9_spill] sm:$0xff] %v6129_v55  ;;  %v6144_v56 = vld [vmem:[#allocation2 + $0x70] sm:$0xff] }
 0x466   :  { %8998 = vst [vmem:[#allocation20_spill] sm:$0xff] %v6144_v56 }
 0x46d   :  { %v3490_v63 = vpop.eup %3489 }
 0x46e   :  { %v3492_v9 = vpop.eup %3491 }
 0x46f   :  { %v3494_v48 = vpop.eup %3493  ;;  %v1464_v50 = vmul.f32 %v3492_v9, %v3490_v63  ;;  %v6135_v63 = vld [vmem:[#allocation2 + $0x68] sm:$0xff]  ;;  %v6138_v9 = vld [vmem:[#allocation2 + $0x78] sm:$0xff] }
 0x470   :  { %v1463_v52 = vmul.f32 %v3494_v48, %v5762_v5  ;;  %v6003_v5 = vld [vmem:[#allocation2 + $0x1c8] sm:$0xff]  ;;  %8995 = vst [vmem:[#allocation10_spill] sm:$0xff] %v6135_v63  ;;  %8996 = vst [vmem:[#allocation19_spill] sm:$0xff] %v6138_v9  ;;  %v6141_v48 = vld [vmem:[#allocation2 + $0x60] sm:$0xff] }
 0x471   :  { %8997 = vst [vmem:[#allocation11_spill] sm:$0xff] %v6141_v48 }
 0x472   :  { %v5990_v54 = vadd.f32 %v1464_v50, %v1463_v52  ;;  %v3496_v58 = vpop.eup %3495  ;;  %v6147_v50 = vld [vmem:[#allocation2 + $0x48] sm:$0xff]  ;;  %v6150_v52 = vld [vmem:[#allocation2 + $0x58] sm:$0xff] }
 0x473   :  { %8999 = vst [vmem:[#allocation12_spill] sm:$0xff] %v6147_v50  ;;  %9000 = vst [vmem:[#allocation21_spill] sm:$0xff] %v6150_v52 }
 0x474   :  { %3497 = vtanh.f32 %v5990_v54 }
 0x481   :  { %v3498_v59 = vpop.eup %3497 }
 0x482   :  { %v5993_v60 = vmul.f32 %v3498_v59, %v3496_v58  ;;  %v6153_v58 = vld [vmem:[#allocation2 + $0x40] sm:$0xff]  ;;  %v6156_v59 = vld [vmem:[#allocation2 + $0x50] sm:$0xff] }
 0x483   :  { %9001 = vst [vmem:[#allocation14_spill] sm:$0xff] %v6153_v58  ;;  %9002 = vst [vmem:[#allocation23_spill] sm:$0xff] %v6156_v59 }
 0x484   :  { %1533 = vmatmul.mubr.f32.vlgmr.msra.gmra.mxu0 %v5993_v60  ;;  %1604 = vmatmul.mubr.f32.vlgmr.msra.gmra.mxu1 %v5993_v60 }
 0x485   :  { %1640 = vmatpush1.msra.mxu0 %v5997_v62  ;;  %1711 = vmatpush1.msra.mxu1 %v6000_v2 }
 0x486   :  { %1641 = vmatprep.subr.mxu0 %v6003_v5  ;;  %1712 = vmatprep.subr.mxu1 %v6006_v3 }
 0x487   :  { %1642 = vmatpush1.msra.mxu0 %v6009_v4  ;;  %1713 = vmatpush1.msra.mxu1 %v6012_v7 }
 0x488   :  { %1643 = vmatprep.subr.mxu0 %v6015_v8  ;;  %1714 = vmatprep.subr.mxu1 %v6018_v10 }
 0x489   :  { %1644 = vmatpush1.msra.mxu0 %v6021_v11  ;;  %1715 = vmatpush1.msra.mxu1 %v6024_v13 }
 0x48a   :  { %1645 = vmatprep.subr.mxu0 %v6027_v14  ;;  %1716 = vmatprep.subr.mxu1 %v6030_v15 }
 0x48b   :  { %1646 = vmatpush1.msra.mxu0 %v6033_v17  ;;  %1717 = vmatpush1.msra.mxu1 %v6036_v18 }
 0x48c   :  { %1647 = vmatprep.subr.mxu0 %v6039_v31  ;;  %1718 = vmatprep.subr.mxu1 %v6042_v34 }
 0x48d   :  { %1648 = vmatpush1.msra.mxu0 %v6045_v42  ;;  %1719 = vmatpush1.msra.mxu1 %v6048_v35 }
 0x48e   :  { %1649 = vmatprep.subr.mxu0 %v6051_v21  ;;  %1720 = vmatprep.subr.mxu1 %v6054_v20 }
 0x48f   :  { %1650 = vmatpush1.msra.mxu0 %v6057_v26  ;;  %1721 = vmatpush1.msra.mxu1 %v6060_v25 }
 0x490   :  { %1651 = vmatprep.subr.mxu0 %v6063_v29  ;;  %1722 = vmatprep.subr.mxu1 %v6066_v19 }
 0x491   :  { %1652 = vmatpush1.msra.mxu0 %v6069_v23  ;;  %1723 = vmatpush1.msra.mxu1 %v6072_v28 }
 0x492   :  { %1653 = vmatprep.subr.mxu0 %v6075_v46  ;;  %1724 = vmatprep.subr.mxu1 %v6078_v24 }
 0x493   :  { %1654 = vmatpush1.msra.mxu0 %v6081_v22  ;;  %1725 = vmatpush1.msra.mxu1 %v6084_v27 }
 0x494   :  { %1655 = vmatprep.subr.mxu0 %v6087_v30  ;;  %1726 = vmatprep.subr.mxu1 %v6090_v36 }
 0x495   :  { %1656 = vmatpush1.msra.mxu0 %v6093_v53  ;;  %1727 = vmatpush1.msra.mxu1 %v6096_v38 }
 0x496   :  { %1657 = vmatprep.subr.mxu0 %v6099_v39  ;;  %1728 = vmatprep.subr.mxu1 %v6102_v33 }
 0x497   :  { %1658 = vmatpush1.msra.mxu0 %v6105_v40  ;;  %1729 = vmatpush1.msra.mxu1 %v6108_v41 }
 0x498   :  { %1659 = vmatprep.subr.mxu0 %v6111_v43  ;;  %1730 = vmatprep.subr.mxu1 %v6114_v44 }
 0x499   :  { %1660 = vmatpush1.msra.mxu0 %v6117_v45  ;;  %1731 = vmatpush1.msra.mxu1 %v6120_v47 }
 0x49a   :  { %1661 = vmatprep.subr.mxu0 %v6123_v49  ;;  %1732 = vmatprep.subr.mxu1 %v6126_v51 }
 0x49b   :  { %1662 = vmatpush1.msra.mxu0 %v6129_v55  ;;  %1733 = vmatpush1.msra.mxu1 %v6132_v57 }
 0x49c   :  { %1663 = vmatprep.subr.mxu0 %v6135_v63  ;;  %1734 = vmatprep.subr.mxu1 %v6138_v9 }
 0x49d   :  { %1664 = vmatpush1.msra.mxu0 %v6141_v48  ;;  %1735 = vmatpush1.msra.mxu1 %v6144_v56  ;;  %v6159_v48 = vld [vmem:[#allocation2 + $0x28] sm:$0xff]  ;;  %v6162_v56 = vld [vmem:[#allocation2 + $0x38] sm:$0xff] }
 0x49e   :  { %1665 = vmatprep.subr.mxu0 %v6147_v50  ;;  %1736 = vmatprep.subr.mxu1 %v6150_v52  ;;  %9003 = vst [vmem:[#allocation16_spill] sm:$0xff] %v6159_v48  ;;  %9004 = vst [vmem:[#allocation25_spill] sm:$0xff] %v6162_v56  ;;  %v6165_v50 = vld [vmem:[#allocation2 + $0x20] sm:$0xff]  ;;  %v6168_v52 = vld [vmem:[#allocation2 + $0x30] sm:$0xff] }
 0x49f   :  { %1666 = vmatpush1.msra.mxu0 %v6153_v58  ;;  %1737 = vmatpush1.msra.mxu1 %v6156_v59  ;;  %9005 = vst [vmem:[#allocation18_spill] sm:$0xff] %v6165_v50  ;;  %9006 = vst [vmem:[#allocation27_spill] sm:$0xff] %v6168_v52  ;;  %v6171_v58 = vld [vmem:[#allocation2 + $0x8] sm:$0xff]  ;;  %v6174_v59 = vld [vmem:[#allocation2 + $0x18] sm:$0xff] }
 0x4a0   :  { %1667 = vmatprep.subr.mxu0 %v6159_v48  ;;  %1738 = vmatprep.subr.mxu1 %v6162_v56  ;;  %9007 = vst [vmem:[#allocation22_spill] sm:$0xff] %v6171_v58  ;;  %9008 = vst [vmem:[#allocation29_spill] sm:$0xff] %v6174_v59  ;;  %v6177_v48 = vld [vmem:[#allocation2] sm:$0xff]  ;;  %v6181_v56 = vld [vmem:[#allocation2 + $0x10] sm:$0xff] }
 0x4a1   :  { %1668 = vmatpush1.msra.mxu0 %v6165_v50  ;;  %1739 = vmatpush1.msra.mxu1 %v6168_v52  ;;  %9009 = vst [vmem:[#allocation24_spill] sm:$0xff] %v6177_v48  ;;  %9010 = vst [vmem:[#allocation30_spill] sm:$0xff] %v6181_v56  ;;  %v6196_v52 = vld [vmem:[#allocation4 + $0x1f0] sm:$0xff] }
 0x4a2   :  { %1669 = vmatprep.subr.mxu0 %v6171_v58  ;;  %1740 = vmatprep.subr.mxu1 %v6174_v59  ;;  %v6187_v58 = vld [vmem:[#allocation4 + $0x1e8] sm:$0xff]  ;;  %v6190_v59 = vld [vmem:[#allocation4 + $0x1f8] sm:$0xff]  ;;  %9014 = vst [vmem:[#allocation34_spill] sm:$0xff] %v6196_v52 }
 0x4a3   :  { %1670 = vmatpush1.msra.mxu0 %v6177_v48  ;;  %1703 = vmatprep.mubr.f32.mxu0 %v8860_v1  ;;  %9011 = vst [vmem:[#allocation26_spill] sm:$0xff] %v6187_v58  ;;  %9012 = vst [vmem:[#allocation32_spill] sm:$0xff] %v6190_v59  ;;  %v6193_v48 = vld [vmem:[#allocation4 + $0x1e0] sm:$0xff] }
 0x4a4   :  { %1741 = vmatpush1.msra.mxu1 %v6181_v56  ;;  %1774 = vmatprep.mubr.f32.mxu1 %v8860_v1  ;;  %9013 = vst [vmem:[#allocation28_spill] sm:$0xff] %v6193_v48  ;;  %v6199_v56 = vld [vmem:[#allocation4 + $0x1c8] sm:$0xff] }
 0x4a5   :  { %1704 = vmatmul.mubr.f32.vlgmr.msra.gmra.mxu0 %v5993_v60  ;;  %1775 = vmatmul.mubr.f32.vlgmr.msra.gmra.mxu1 %v5993_v60  ;;  %9015 = vst [vmem:[#allocation31_spill] sm:$0xff] %v6199_v56  ;;  %v6202_v60 = vld [vmem:[#allocation4 + $0x1d8] sm:$0xff] }
 0x4a6   :  { %1809 = vmatprep.subr.mxu0 %v6187_v58  ;;  %1880 = vmatprep.subr.mxu1 %v6190_v59  ;;  %9016 = vst [vmem:[#allocation36_spill] sm:$0xff] %v6202_v60  ;;  %v6205_v58 = vld [vmem:[#allocation4 + $0x1c0] sm:$0xff]  ;;  %v6208_v59 = vld [vmem:[#allocation4 + $0x1d0] sm:$0xff] }
 0x4a7   :  { %1810 = vmatpush1.msra.mxu0 %v6193_v48  ;;  %1881 = vmatpush1.msra.mxu1 %v6196_v52  ;;  %9017 = vst [vmem:[#allocation33_spill] sm:$0xff] %v6205_v58  ;;  %9018 = vst [vmem:[#allocation38_spill] sm:$0xff] %v6208_v59  ;;  %v6211_v48 = vld [vmem:[#allocation4 + $0x1a8] sm:$0xff]  ;;  %v6214_v52 = vld [vmem:[#allocation4 + $0x1b8] sm:$0xff] }
 0x4a8   :  { %1811 = vmatprep.subr.mxu0 %v6199_v56  ;;  %1882 = vmatprep.subr.mxu1 %v6202_v60  ;;  %9019 = vst [vmem:[#allocation35_spill] sm:$0xff] %v6211_v48  ;;  %9020 = vst [vmem:[#allocation39_spill] sm:$0xff] %v6214_v52  ;;  %v6217_v56 = vld [vmem:[#allocation4 + $0x1a0] sm:$0xff]  ;;  %v6220_v60 = vld [vmem:[#allocation4 + $0x1b0] sm:$0xff] }
 0x4a9   :  { %1812 = vmatpush1.msra.mxu0 %v6205_v58  ;;  %1883 = vmatpush1.msra.mxu1 %v6208_v59  ;;  %9021 = vst [vmem:[#allocation37_spill] sm:$0xff] %v6217_v56  ;;  %9022 = vst [vmem:[#allocation40_spill] sm:$0xff] %v6220_v60  ;;  %v6223_v58 = vld [vmem:[#allocation4 + $0x188] sm:$0xff]  ;;  %v6226_v59 = vld [vmem:[#allocation4 + $0x198] sm:$0xff] }
 0x4aa   :  { %1813 = vmatprep.subr.mxu0 %v6211_v48  ;;  %1884 = vmatprep.subr.mxu1 %v6214_v52  ;;  %9023 = vst [vmem:[#allocation41_spill] sm:$0xff] %v6223_v58  ;;  %9024 = vst [vmem:[#allocation42_spill] sm:$0xff] %v6226_v59  ;;  %v6229_v48 = vld [vmem:[#allocation4 + $0x180] sm:$0xff]  ;;  %v6232_v52 = vld [vmem:[#allocation4 + $0x190] sm:$0xff] }
 0x4ab   :  { %1814 = vmatpush1.msra.mxu0 %v6217_v56  ;;  %1885 = vmatpush1.msra.mxu1 %v6220_v60  ;;  %9025 = vst [vmem:[#allocation43_spill] sm:$0xff] %v6229_v48  ;;  %9026 = vst [vmem:[#allocation44_spill] sm:$0xff] %v6232_v52  ;;  %v6235_v56 = vld [vmem:[#allocation4 + $0x168] sm:$0xff]  ;;  %v6238_v60 = vld [vmem:[#allocation4 + $0x178] sm:$0xff] }
 0x4ac   :  { %1815 = vmatprep.subr.mxu0 %v6223_v58  ;;  %1886 = vmatprep.subr.mxu1 %v6226_v59  ;;  %9027 = vst [vmem:[#allocation45_spill] sm:$0xff] %v6235_v56  ;;  %9028 = vst [vmem:[#allocation46_spill] sm:$0xff] %v6238_v60  ;;  %v6241_v58 = vld [vmem:[#allocation4 + $0x160] sm:$0xff]  ;;  %v6244_v59 = vld [vmem:[#allocation4 + $0x170] sm:$0xff] }
 0x4ad   :  { %1816 = vmatpush1.msra.mxu0 %v6229_v48  ;;  %1887 = vmatpush1.msra.mxu1 %v6232_v52  ;;  %9029 = vst [vmem:[#allocation47_spill] sm:$0xff] %v6241_v58  ;;  %9030 = vst [vmem:[#allocation48_spill] sm:$0xff] %v6244_v59  ;;  %v6247_v48 = vld [vmem:[#allocation4 + $0x148] sm:$0xff]  ;;  %v6250_v52 = vld [vmem:[#allocation4 + $0x158] sm:$0xff] }
 0x4ae   :  { %1817 = vmatprep.subr.mxu0 %v6235_v56  ;;  %1888 = vmatprep.subr.mxu1 %v6238_v60  ;;  %9031 = vst [vmem:[#allocation49_spill] sm:$0xff] %v6247_v48  ;;  %9032 = vst [vmem:[#allocation50_spill] sm:$0xff] %v6250_v52  ;;  %v6253_v56 = vld [vmem:[#allocation4 + $0x140] sm:$0xff]  ;;  %v6256_v60 = vld [vmem:[#allocation4 + $0x150] sm:$0xff] }
 0x4af   :  { %1818 = vmatpush1.msra.mxu0 %v6241_v58  ;;  %1889 = vmatpush1.msra.mxu1 %v6244_v59  ;;  %9033 = vst [vmem:[#allocation51_spill] sm:$0xff] %v6253_v56  ;;  %9034 = vst [vmem:[#allocation52_spill] sm:$0xff] %v6256_v60  ;;  %v6259_v58 = vld [vmem:[#allocation4 + $0x128] sm:$0xff]  ;;  %v6262_v59 = vld [vmem:[#allocation4 + $0x138] sm:$0xff] }
 0x4b0   :  { %1819 = vmatprep.subr.mxu0 %v6247_v48  ;;  %1890 = vmatprep.subr.mxu1 %v6250_v52  ;;  %9035 = vst [vmem:[#allocation53_spill] sm:$0xff] %v6259_v58  ;;  %9036 = vst [vmem:[#allocation54_spill] sm:$0xff] %v6262_v59  ;;  %v6265_v48 = vld [vmem:[#allocation4 + $0x120] sm:$0xff]  ;;  %v6268_v52 = vld [vmem:[#allocation4 + $0x130] sm:$0xff] }
 0x4b1   :  { %1820 = vmatpush1.msra.mxu0 %v6253_v56  ;;  %1891 = vmatpush1.msra.mxu1 %v6256_v60  ;;  %9037 = vst [vmem:[#allocation55_spill] sm:$0xff] %v6265_v48  ;;  %9038 = vst [vmem:[#allocation56_spill] sm:$0xff] %v6268_v52  ;;  %v6271_v56 = vld [vmem:[#allocation4 + $0x108] sm:$0xff]  ;;  %v6274_v60 = vld [vmem:[#allocation4 + $0x118] sm:$0xff] }
 0x4b2   :  { %1821 = vmatprep.subr.mxu0 %v6259_v58  ;;  %1892 = vmatprep.subr.mxu1 %v6262_v59  ;;  %9039 = vst [vmem:[#allocation57_spill] sm:$0xff] %v6271_v56  ;;  %9040 = vst [vmem:[#allocation58_spill] sm:$0xff] %v6274_v60  ;;  %v6277_v58 = vld [vmem:[#allocation4 + $0x100] sm:$0xff]  ;;  %v6280_v59 = vld [vmem:[#allocation4 + $0x110] sm:$0xff] }
 0x4b3   :  { %1822 = vmatpush1.msra.mxu0 %v6265_v48  ;;  %1893 = vmatpush1.msra.mxu1 %v6268_v52  ;;  %9041 = vst [vmem:[#allocation59_spill] sm:$0xff] %v6277_v58  ;;  %9042 = vst [vmem:[#allocation60_spill] sm:$0xff] %v6280_v59  ;;  %v6283_v48 = vld [vmem:[#allocation4 + $0xe8] sm:$0xff]  ;;  %v6286_v52 = vld [vmem:[#allocation4 + $0xf8] sm:$0xff] }
 0x4b4   :  { %1823 = vmatprep.subr.mxu0 %v6271_v56  ;;  %1894 = vmatprep.subr.mxu1 %v6274_v60  ;;  %9043 = vst [vmem:[#allocation61_spill] sm:$0xff] %v6283_v48  ;;  %9044 = vst [vmem:[#allocation62_spill] sm:$0xff] %v6286_v52  ;;  %v6289_v56 = vld [vmem:[#allocation4 + $0xe0] sm:$0xff]  ;;  %v6292_v60 = vld [vmem:[#allocation4 + $0xf0] sm:$0xff] }
 0x4b5   :  { %1824 = vmatpush1.msra.mxu0 %v6277_v58  ;;  %1895 = vmatpush1.msra.mxu1 %v6280_v59  ;;  %9045 = vst [vmem:[#allocation63_spill] sm:$0xff] %v6289_v56  ;;  %9046 = vst [vmem:[#allocation64_spill] sm:$0xff] %v6292_v60  ;;  %v6295_v58 = vld [vmem:[#allocation4 + $0xc8] sm:$0xff]  ;;  %v6298_v59 = vld [vmem:[#allocation4 + $0xd8] sm:$0xff] }
 0x4b6   :  { %1825 = vmatprep.subr.mxu0 %v6283_v48  ;;  %1896 = vmatprep.subr.mxu1 %v6286_v52  ;;  %9047 = vst [vmem:[#allocation65_spill] sm:$0xff] %v6295_v58  ;;  %9048 = vst [vmem:[#allocation66_spill] sm:$0xff] %v6298_v59  ;;  %v6301_v48 = vld [vmem:[#allocation4 + $0xc0] sm:$0xff]  ;;  %v6304_v52 = vld [vmem:[#allocation4 + $0xd0] sm:$0xff] }
 0x4b7   :  { %1826 = vmatpush1.msra.mxu0 %v6289_v56  ;;  %1897 = vmatpush1.msra.mxu1 %v6292_v60  ;;  %9049 = vst [vmem:[#allocation67_spill] sm:$0xff] %v6301_v48  ;;  %9050 = vst [vmem:[#allocation68_spill] sm:$0xff] %v6304_v52  ;;  %v6307_v56 = vld [vmem:[#allocation4 + $0xa8] sm:$0xff]  ;;  %v6310_v60 = vld [vmem:[#allocation4 + $0xb8] sm:$0xff] }
 0x4b8   :  { %1827 = vmatprep.subr.mxu0 %v6295_v58  ;;  %1898 = vmatprep.subr.mxu1 %v6298_v59  ;;  %9051 = vst [vmem:[#allocation69_spill] sm:$0xff] %v6307_v56  ;;  %9052 = vst [vmem:[#allocation70_spill] sm:$0xff] %v6310_v60  ;;  %v6313_v58 = vld [vmem:[#allocation4 + $0xa0] sm:$0xff]  ;;  %v6316_v59 = vld [vmem:[#allocation4 + $0xb0] sm:$0xff] }
 0x4b9   :  { %1828 = vmatpush1.msra.mxu0 %v6301_v48  ;;  %1899 = vmatpush1.msra.mxu1 %v6304_v52  ;;  %9053 = vst [vmem:[#allocation71_spill] sm:$0xff] %v6313_v58  ;;  %9054 = vst [vmem:[#allocation72_spill] sm:$0xff] %v6316_v59  ;;  %v6319_v48 = vld [vmem:[#allocation4 + $0x88] sm:$0xff]  ;;  %v6322_v52 = vld [vmem:[#allocation4 + $0x98] sm:$0xff] }
 0x4ba   :  { %1829 = vmatprep.subr.mxu0 %v6307_v56  ;;  %1900 = vmatprep.subr.mxu1 %v6310_v60  ;;  %9055 = vst [vmem:[#allocation73_spill] sm:$0xff] %v6319_v48  ;;  %9056 = vst [vmem:[#allocation74_spill] sm:$0xff] %v6322_v52  ;;  %v6325_v56 = vld [vmem:[#allocation4 + $0x80] sm:$0xff]  ;;  %v6328_v60 = vld [vmem:[#allocation4 + $0x90] sm:$0xff] }
 0x4bb   :  { %1830 = vmatpush1.msra.mxu0 %v6313_v58  ;;  %1901 = vmatpush1.msra.mxu1 %v6316_v59  ;;  %9057 = vst [vmem:[#allocation75_spill] sm:$0xff] %v6325_v56  ;;  %9058 = vst [vmem:[#allocation76_spill] sm:$0xff] %v6328_v60  ;;  %v6331_v58 = vld [vmem:[#allocation4 + $0x68] sm:$0xff]  ;;  %v6334_v59 = vld [vmem:[#allocation4 + $0x78] sm:$0xff] }
 0x4bc   :  { %1831 = vmatprep.subr.mxu0 %v6319_v48  ;;  %1902 = vmatprep.subr.mxu1 %v6322_v52  ;;  %9059 = vst [vmem:[#allocation77_spill] sm:$0xff] %v6331_v58  ;;  %9060 = vst [vmem:[#allocation78_spill] sm:$0xff] %v6334_v59  ;;  %v6337_v48 = vld [vmem:[#allocation4 + $0x60] sm:$0xff]  ;;  %v6340_v52 = vld [vmem:[#allocation4 + $0x70] sm:$0xff] }
 0x4bd   :  { %1832 = vmatpush1.msra.mxu0 %v6325_v56  ;;  %1903 = vmatpush1.msra.mxu1 %v6328_v60  ;;  %9061 = vst [vmem:[#allocation79_spill] sm:$0xff] %v6337_v48  ;;  %9062 = vst [vmem:[#allocation80_spill] sm:$0xff] %v6340_v52  ;;  %v6343_v56 = vld [vmem:[#allocation4 + $0x48] sm:$0xff]  ;;  %v6346_v60 = vld [vmem:[#allocation4 + $0x58] sm:$0xff] }
 0x4be   :  { %1833 = vmatprep.subr.mxu0 %v6331_v58  ;;  %1904 = vmatprep.subr.mxu1 %v6334_v59  ;;  %9063 = vst [vmem:[#allocation81_spill] sm:$0xff] %v6343_v56  ;;  %9064 = vst [vmem:[#allocation82_spill] sm:$0xff] %v6346_v60  ;;  %v6349_v58 = vld [vmem:[#allocation4 + $0x40] sm:$0xff]  ;;  %v6352_v59 = vld [vmem:[#allocation4 + $0x50] sm:$0xff] }
 0x4bf   :  { %1834 = vmatpush1.msra.mxu0 %v6337_v48  ;;  %1905 = vmatpush1.msra.mxu1 %v6340_v52  ;;  %9065 = vst [vmem:[#allocation83_spill] sm:$0xff] %v6349_v58  ;;  %9066 = vst [vmem:[#allocation84_spill] sm:$0xff] %v6352_v59  ;;  %v6355_v48 = vld [vmem:[#allocation4 + $0x28] sm:$0xff]  ;;  %v6358_v52 = vld [vmem:[#allocation4 + $0x38] sm:$0xff] }
 0x4c0   :  { %1835 = vmatprep.subr.mxu0 %v6343_v56  ;;  %1906 = vmatprep.subr.mxu1 %v6346_v60  ;;  %9067 = vst [vmem:[#allocation85_spill] sm:$0xff] %v6355_v48  ;;  %9068 = vst [vmem:[#allocation86_spill] sm:$0xff] %v6358_v52  ;;  %v6361_v56 = vld [vmem:[#allocation4 + $0x20] sm:$0xff]  ;;  %v6364_v60 = vld [vmem:[#allocation4 + $0x30] sm:$0xff] }
 0x4c1   :  { %1836 = vmatpush1.msra.mxu0 %v6349_v58  ;;  %1907 = vmatpush1.msra.mxu1 %v6352_v59  ;;  %9069 = vst [vmem:[#allocation87_spill] sm:$0xff] %v6361_v56  ;;  %9070 = vst [vmem:[#allocation88_spill] sm:$0xff] %v6364_v60  ;;  %v6367_v58 = vld [vmem:[#allocation4 + $0x8] sm:$0xff]  ;;  %v6370_v59 = vld [vmem:[#allocation4 + $0x18] sm:$0xff] }
 0x4c2   :  { %1837 = vmatprep.subr.mxu0 %v6355_v48  ;;  %1908 = vmatprep.subr.mxu1 %v6358_v52  ;;  %9071 = vst [vmem:[#allocation89_spill] sm:$0xff] %v6367_v58  ;;  %9072 = vst [vmem:[#allocation90_spill] sm:$0xff] %v6370_v59  ;;  %v6373_v48 = vld [vmem:[#allocation4] sm:$0xff]  ;;  %v6376_v52 = vld [vmem:[#allocation4 + $0x10] sm:$0xff] }
 0x4c3   :  { %1838 = vmatpush1.msra.mxu0 %v6361_v56  ;;  %1909 = vmatpush1.msra.mxu1 %v6364_v60  ;;  %9073 = vst [vmem:[#allocation91_spill] sm:$0xff] %v6373_v48  ;;  %9074 = vst [vmem:[#allocation92_spill] sm:$0xff] %v6376_v52  ;;  %v6379_v56 = vld [vmem:[#allocation4 + $0x3e8] sm:$0xff]  ;;  %v6382_v60 = vld [vmem:[#allocation4 + $0x3f8] sm:$0xff] }
 0x4c4   :  { %1839 = vmatprep.subr.mxu0 %v6367_v58  ;;  %1910 = vmatprep.subr.mxu1 %v6370_v59  ;;  %9075 = vst [vmem:[#allocation93_spill] sm:$0xff] %v6379_v56  ;;  %9076 = vst [vmem:[#allocation94_spill] sm:$0xff] %v6382_v60  ;;  %v6385_v58 = vld [vmem:[#allocation4 + $0x3e0] sm:$0xff]  ;;  %v6388_v59 = vld [vmem:[#allocation4 + $0x3f0] sm:$0xff] }
 0x4c5   :  { %1840 = vmatpush1.msra.mxu0 %v6373_v48  ;;  %1911 = vmatpush1.msra.mxu1 %v6376_v52  ;;  %9077 = vst [vmem:[#allocation95_spill] sm:$0xff] %v6385_v58  ;;  %9078 = vst [vmem:[#allocation96_spill] sm:$0xff] %v6388_v59  ;;  %v6391_v48 = vld [vmem:[#allocation4 + $0x3c8] sm:$0xff]  ;;  %v6394_v52 = vld [vmem:[#allocation4 + $0x3d8] sm:$0xff] }
 0x4c6   :  { %1841 = vmatprep.subr.mxu0 %v6379_v56  ;;  %1912 = vmatprep.subr.mxu1 %v6382_v60  ;;  %9079 = vst [vmem:[#allocation97_spill] sm:$0xff] %v6391_v48  ;;  %9080 = vst [vmem:[#allocation98_spill] sm:$0xff] %v6394_v52  ;;  %v6397_v56 = vld [vmem:[#allocation4 + $0x3c0] sm:$0xff]  ;;  %v6400_v60 = vld [vmem:[#allocation4 + $0x3d0] sm:$0xff] }
 0x4c7   :  { %1842 = vmatpush2.msra.mxu0 %v6385_v58  ;;  %1913 = vmatpush2.msra.mxu1 %v6388_v59  ;;  %9081 = vst [vmem:[#allocation99_spill] sm:$0xff] %v6397_v56  ;;  %9082 = vst [vmem:[#allocation100_spill] sm:$0xff] %v6400_v60  ;;  %v6403_v58 = vld [vmem:[#allocation4 + $0x3a8] sm:$0xff]  ;;  %v6406_v59 = vld [vmem:[#allocation4 + $0x3b8] sm:$0xff] }
 0x4c8   :  { %1843 = vmatprep.subr.mxu0 %v6391_v48  ;;  %1914 = vmatprep.subr.mxu1 %v6394_v52  ;;  %9083 = vst [vmem:[#allocation101_spill] sm:$0xff] %v6403_v58  ;;  %9084 = vst [vmem:[#allocation102_spill] sm:$0xff] %v6406_v59  ;;  %v6409_v48 = vld [vmem:[#allocation4 + $0x3a0] sm:$0xff]  ;;  %v6412_v52 = vld [vmem:[#allocation4 + $0x3b0] sm:$0xff] }
 0x4c9   :  { %1844 = vmatpush2.msra.mxu0 %v6397_v56  ;;  %1915 = vmatpush2.msra.mxu1 %v6400_v60  ;;  %9085 = vst [vmem:[#allocation103_spill] sm:$0xff] %v6409_v48  ;;  %9086 = vst [vmem:[#allocation104_spill] sm:$0xff] %v6412_v52  ;;  %v6415_v56 = vld [vmem:[#allocation4 + $0x388] sm:$0xff]  ;;  %v6418_v60 = vld [vmem:[#allocation4 + $0x398] sm:$0xff] }
 0x4ca   :  { %1845 = vmatprep.subr.mxu0 %v6403_v58  ;;  %1916 = vmatprep.subr.mxu1 %v6406_v59  ;;  %9087 = vst [vmem:[#allocation105_spill] sm:$0xff] %v6415_v56  ;;  %9088 = vst [vmem:[#allocation106_spill] sm:$0xff] %v6418_v60  ;;  %v6421_v58 = vld [vmem:[#allocation4 + $0x380] sm:$0xff]  ;;  %v6424_v59 = vld [vmem:[#allocation4 + $0x390] sm:$0xff] }
 0x4cb   :  { %1846 = vmatpush2.msra.mxu0 %v6409_v48  ;;  %1917 = vmatpush2.msra.mxu1 %v6412_v52  ;;  %9089 = vst [vmem:[#allocation107_spill] sm:$0xff] %v6421_v58  ;;  %9090 = vst [vmem:[#allocation108_spill] sm:$0xff] %v6424_v59  ;;  %v6427_v48 = vld [vmem:[#allocation4 + $0x368] sm:$0xff]  ;;  %v6430_v52 = vld [vmem:[#allocation4 + $0x378] sm:$0xff] }
 0x4cc   :  { %1847 = vmatprep.subr.mxu0 %v6415_v56  ;;  %1918 = vmatprep.subr.mxu1 %v6418_v60  ;;  %9091 = vst [vmem:[#allocation109_spill] sm:$0xff] %v6427_v48  ;;  %9092 = vst [vmem:[#allocation110_spill] sm:$0xff] %v6430_v52  ;;  %v6433_v56 = vld [vmem:[#allocation4 + $0x360] sm:$0xff]  ;;  %v6436_v60 = vld [vmem:[#allocation4 + $0x370] sm:$0xff] }
 0x4cd   :  { %1848 = vmatpush2.msra.mxu0 %v6421_v58  ;;  %1919 = vmatpush2.msra.mxu1 %v6424_v59  ;;  %9093 = vst [vmem:[#allocation111_spill] sm:$0xff] %v6433_v56  ;;  %9094 = vst [vmem:[#allocation112_spill] sm:$0xff] %v6436_v60  ;;  %v6439_v58 = vld [vmem:[#allocation4 + $0x348] sm:$0xff]  ;;  %v6442_v59 = vld [vmem:[#allocation4 + $0x358] sm:$0xff] }
 0x4ce   :  { %1849 = vmatprep.subr.mxu0 %v6427_v48  ;;  %1920 = vmatprep.subr.mxu1 %v6430_v52  ;;  %9095 = vst [vmem:[#allocation113_spill] sm:$0xff] %v6439_v58  ;;  %9096 = vst [vmem:[#allocation114_spill] sm:$0xff] %v6442_v59  ;;  %v6445_v48 = vld [vmem:[#allocation4 + $0x340] sm:$0xff]  ;;  %v6448_v52 = vld [vmem:[#allocation4 + $0x350] sm:$0xff] }
 0x4cf   :  { %1850 = vmatpush2.msra.mxu0 %v6433_v56  ;;  %1921 = vmatpush2.msra.mxu1 %v6436_v60  ;;  %9097 = vst [vmem:[#allocation115_spill] sm:$0xff] %v6445_v48  ;;  %9098 = vst [vmem:[#allocation116_spill] sm:$0xff] %v6448_v52  ;;  %v6451_v56 = vld [vmem:[#allocation4 + $0x328] sm:$0xff]  ;;  %v6454_v60 = vld [vmem:[#allocation4 + $0x338] sm:$0xff] }
 0x4d0   :  { %1851 = vmatprep.subr.mxu0 %v6439_v58  ;;  %1922 = vmatprep.subr.mxu1 %v6442_v59  ;;  %9099 = vst [vmem:[#allocation117_spill] sm:$0xff] %v6451_v56  ;;  %9100 = vst [vmem:[#allocation118_spill] sm:$0xff] %v6454_v60  ;;  %v6457_v58 = vld [vmem:[#allocation4 + $0x320] sm:$0xff]  ;;  %v6460_v59 = vld [vmem:[#allocation4 + $0x330] sm:$0xff] }
 0x4d1   :  { %1852 = vmatpush2.msra.mxu0 %v6445_v48  ;;  %1923 = vmatpush2.msra.mxu1 %v6448_v52  ;;  %9101 = vst [vmem:[#allocation119_spill] sm:$0xff] %v6457_v58  ;;  %9102 = vst [vmem:[#allocation120_spill] sm:$0xff] %v6460_v59  ;;  %v6463_v48 = vld [vmem:[#allocation4 + $0x308] sm:$0xff]  ;;  %v6466_v52 = vld [vmem:[#allocation4 + $0x318] sm:$0xff] }
 0x4d2   :  { %1853 = vmatprep.subr.mxu0 %v6451_v56  ;;  %1924 = vmatprep.subr.mxu1 %v6454_v60  ;;  %9103 = vst [vmem:[#allocation121_spill] sm:$0xff] %v6463_v48  ;;  %9104 = vst [vmem:[#allocation122_spill] sm:$0xff] %v6466_v52  ;;  %v6469_v56 = vld [vmem:[#allocation4 + $0x300] sm:$0xff]  ;;  %v6472_v60 = vld [vmem:[#allocation4 + $0x310] sm:$0xff] }
 0x4d3   :  { %1854 = vmatpush2.msra.mxu0 %v6457_v58  ;;  %1925 = vmatpush2.msra.mxu1 %v6460_v59  ;;  %9105 = vst [vmem:[#allocation123_spill] sm:$0xff] %v6469_v56  ;;  %9106 = vst [vmem:[#allocation124_spill] sm:$0xff] %v6472_v60  ;;  %v6475_v58 = vld [vmem:[#allocation4 + $0x2e8] sm:$0xff]  ;;  %v6478_v59 = vld [vmem:[#allocation4 + $0x2f8] sm:$0xff] }
 0x4d4   :  { %1855 = vmatprep.subr.mxu0 %v6463_v48  ;;  %1926 = vmatprep.subr.mxu1 %v6466_v52  ;;  %9107 = vst [vmem:[#allocation125_spill] sm:$0xff] %v6475_v58  ;;  %9108 = vst [vmem:[#allocation126_spill] sm:$0xff] %v6478_v59  ;;  %v6481_v48 = vld [vmem:[#allocation4 + $0x2e0] sm:$0xff]  ;;  %v6484_v52 = vld [vmem:[#allocation4 + $0x2f0] sm:$0xff] }
 0x4d5   :  { %1856 = vmatpush2.msra.mxu0 %v6469_v56  ;;  %1927 = vmatpush2.msra.mxu1 %v6472_v60  ;;  %9109 = vst [vmem:[#allocation127_spill] sm:$0xff] %v6481_v48  ;;  %9110 = vst [vmem:[#allocation128_spill] sm:$0xff] %v6484_v52  ;;  %v6487_v56 = vld [vmem:[#allocation4 + $0x2c8] sm:$0xff]  ;;  %v6490_v60 = vld [vmem:[#allocation4 + $0x2d8] sm:$0xff] }
 0x4d6   :  { %1857 = vmatprep.subr.mxu0 %v6475_v58  ;;  %1928 = vmatprep.subr.mxu1 %v6478_v59  ;;  %9111 = vst [vmem:[#allocation129_spill] sm:$0xff] %v6487_v56  ;;  %9112 = vst [vmem:[#allocation130_spill] sm:$0xff] %v6490_v60  ;;  %v6493_v58 = vld [vmem:[#allocation4 + $0x2c0] sm:$0xff]  ;;  %v6496_v59 = vld [vmem:[#allocation4 + $0x2d0] sm:$0xff] }
 0x4d7   :  { %1858 = vmatpush2.msra.mxu0 %v6481_v48  ;;  %1929 = vmatpush2.msra.mxu1 %v6484_v52  ;;  %9113 = vst [vmem:[#allocation131_spill] sm:$0xff] %v6493_v58  ;;  %9114 = vst [vmem:[#allocation132_spill] sm:$0xff] %v6496_v59  ;;  %v6499_v48 = vld [vmem:[#allocation4 + $0x2a8] sm:$0xff]  ;;  %v6502_v52 = vld [vmem:[#allocation4 + $0x2b8] sm:$0xff] }
 0x4d8   :  { %1859 = vmatprep.subr.mxu0 %v6487_v56  ;;  %1930 = vmatprep.subr.mxu1 %v6490_v60  ;;  %9115 = vst [vmem:[#allocation133_spill] sm:$0xff] %v6499_v48  ;;  %9116 = vst [vmem:[#allocation134_spill] sm:$0xff] %v6502_v52  ;;  %v6505_v56 = vld [vmem:[#allocation4 + $0x2a0] sm:$0xff]  ;;  %v6508_v60 = vld [vmem:[#allocation4 + $0x2b0] sm:$0xff] }
 0x4d9   :  { %1860 = vmatpush2.msra.mxu0 %v6493_v58  ;;  %1931 = vmatpush2.msra.mxu1 %v6496_v59  ;;  %9117 = vst [vmem:[#allocation135_spill] sm:$0xff] %v6505_v56  ;;  %9118 = vst [vmem:[#allocation136_spill] sm:$0xff] %v6508_v60  ;;  %v6511_v58 = vld [vmem:[#allocation4 + $0x288] sm:$0xff]  ;;  %v6514_v59 = vld [vmem:[#allocation4 + $0x298] sm:$0xff] }
 0x4da   :  { %1861 = vmatprep.subr.mxu0 %v6499_v48  ;;  %1932 = vmatprep.subr.mxu1 %v6502_v52  ;;  %9119 = vst [vmem:[#allocation137_spill] sm:$0xff] %v6511_v58  ;;  %9120 = vst [vmem:[#allocation138_spill] sm:$0xff] %v6514_v59  ;;  %v6517_v48 = vld [vmem:[#allocation4 + $0x280] sm:$0xff]  ;;  %v6520_v52 = vld [vmem:[#allocation4 + $0x290] sm:$0xff] }
 0x4db   :  { %1862 = vmatpush2.msra.mxu0 %v6505_v56  ;;  %1933 = vmatpush2.msra.mxu1 %v6508_v60  ;;  %9121 = vst [vmem:[#allocation139_spill] sm:$0xff] %v6517_v48  ;;  %9122 = vst [vmem:[#allocation140_spill] sm:$0xff] %v6520_v52  ;;  %v6523_v56 = vld [vmem:[#allocation4 + $0x268] sm:$0xff]  ;;  %v6526_v60 = vld [vmem:[#allocation4 + $0x278] sm:$0xff] }
 0x4dc   :  { %1863 = vmatprep.subr.mxu0 %v6511_v58  ;;  %1934 = vmatprep.subr.mxu1 %v6514_v59  ;;  %9123 = vst [vmem:[#allocation141_spill] sm:$0xff] %v6523_v56  ;;  %9124 = vst [vmem:[#allocation142_spill] sm:$0xff] %v6526_v60  ;;  %v6529_v58 = vld [vmem:[#allocation4 + $0x260] sm:$0xff]  ;;  %v6532_v59 = vld [vmem:[#allocation4 + $0x270] sm:$0xff] }
 0x4dd   :  { %1864 = vmatpush2.msra.mxu0 %v6517_v48  ;;  %1935 = vmatpush2.msra.mxu1 %v6520_v52  ;;  %9125 = vst [vmem:[#allocation143_spill] sm:$0xff] %v6529_v58  ;;  %9126 = vst [vmem:[#allocation144_spill] sm:$0xff] %v6532_v59  ;;  %v6535_v48 = vld [vmem:[#allocation4 + $0x248] sm:$0xff]  ;;  %v6538_v52 = vld [vmem:[#allocation4 + $0x258] sm:$0xff] }
 0x4de   :  { %1865 = vmatprep.subr.mxu0 %v6523_v56  ;;  %1936 = vmatprep.subr.mxu1 %v6526_v60  ;;  %9127 = vst [vmem:[#allocation145_spill] sm:$0xff] %v6535_v48  ;;  %9128 = vst [vmem:[#allocation146_spill] sm:$0xff] %v6538_v52  ;;  %v6541_v56 = vld [vmem:[#allocation4 + $0x240] sm:$0xff]  ;;  %v6544_v60 = vld [vmem:[#allocation4 + $0x250] sm:$0xff] }
 0x4df   :  { %1866 = vmatpush2.msra.mxu0 %v6529_v58  ;;  %1937 = vmatpush2.msra.mxu1 %v6532_v59  ;;  %9129 = vst [vmem:[#allocation147_spill] sm:$0xff] %v6541_v56  ;;  %9130 = vst [vmem:[#allocation148_spill] sm:$0xff] %v6544_v60  ;;  %v6547_v58 = vld [vmem:[#allocation4 + $0x228] sm:$0xff]  ;;  %v6550_v59 = vld [vmem:[#allocation4 + $0x238] sm:$0xff] }
 0x4e0   :  { %1867 = vmatprep.subr.mxu0 %v6535_v48  ;;  %1938 = vmatprep.subr.mxu1 %v6538_v52  ;;  %9131 = vst [vmem:[#allocation149_spill] sm:$0xff] %v6547_v58  ;;  %9132 = vst [vmem:[#allocation150_spill] sm:$0xff] %v6550_v59  ;;  %v6553_v48 = vld [vmem:[#allocation4 + $0x220] sm:$0xff]  ;;  %v6556_v52 = vld [vmem:[#allocation4 + $0x230] sm:$0xff] }
 0x4e1   :  { %1868 = vmatpush2.msra.mxu0 %v6541_v56  ;;  %1939 = vmatpush2.msra.mxu1 %v6544_v60  ;;  %9133 = vst [vmem:[#allocation151_spill] sm:$0xff] %v6553_v48  ;;  %9134 = vst [vmem:[#allocation152_spill] sm:$0xff] %v6556_v52  ;;  %v6559_v56 = vld [vmem:[#allocation4 + $0x208] sm:$0xff]  ;;  %v6562_v60 = vld [vmem:[#allocation4 + $0x218] sm:$0xff] }
 0x4e2   :  { %1869 = vmatprep.subr.mxu0 %v6547_v58  ;;  %1940 = vmatprep.subr.mxu1 %v6550_v59  ;;  %9135 = vst [vmem:[#allocation153_spill] sm:$0xff] %v6559_v56  ;;  %9136 = vst [vmem:[#allocation154_spill] sm:$0xff] %v6562_v60  ;;  %v6565_v58 = vld [vmem:[#allocation4 + $0x200] sm:$0xff]  ;;  %v6568_v59 = vld [vmem:[#allocation4 + $0x210] sm:$0xff] }
 0x4e3   :  { %1870 = vmatpush2.msra.mxu0 %v6553_v48  ;;  %1941 = vmatpush2.msra.mxu1 %v6556_v52  ;;  %9137 = vst [vmem:[#allocation155_spill] sm:$0xff] %v6565_v58  ;;  %9138 = vst [vmem:[#allocation156_spill] sm:$0xff] %v6568_v59 }
 0x4e4   :  { %1871 = vmatprep.subr.mxu0 %v6559_v56  ;;  %1942 = vmatprep.subr.mxu1 %v6562_v60 }
 0x4e5   :  { %1872 = vmatpush2.msra.mxu0 %v6565_v58  ;;  %1943 = vmatpush2.msra.mxu1 %v6568_v59 }
 0x4e6   :  { %1980 = vmatprep.subr.mxu0 %v5963_v0  ;;  %2051 = vmatprep.subr.mxu1 %v5966_v61 }
 0x544   :  { %v1534_v52 = vpop.f32.mrf.mxu0  ;;  %v1605_v60 = vpop.f32.mrf.mxu1 }
 0x545   :  { %v1535_v48 = vadd.f32 %v1534_v52, %v5130_v32  ;;  %v1606_v0 = vadd.f32 %v1605_v60, %v8992_v16 }
 0x546   :  { %v1536_v56 = vpop.f32.mrf.mxu0  ;;  %v1607_v58 = vpop.f32.mrf.mxu1 }
 0x547   :  { %v3231_v1 = vmul.f32 -1.442695, %v1535_v48  ;;  %v1537_v50 = vadd.f32 %v1536_v56, %v8990_v6  ;;  %v1608_v63 = vadd.f32 %v1607_v58, %v8991_v12 }
 0x549   :  { %3499 = vpow2.f32 %v3231_v1  ;;  %v3232_v9 = vmul.f32 -1.442695, %v1537_v50  ;;  %v3233_v57 = vmul.f32 -1.442695, %v1608_v63  ;;  %v3234_v1 = vld [vmem:[%s7792_s0 + $0x80] sm:$0xff]  ;;  %v3235_v63 = vld [vmem:[%s7792_s0 + $0x88] sm:$0xff] }
 0x54b   :  { %3501 = vpow2.f32 %v3232_v9 }
 0x54c   :  { %3503 = vpow2.f32 %v3233_v57 }
 0x556   :  { %v3500_v59 = vpop.eup %3499 }
 0x557   :  { %v1613_v55 = vadd.f32 1.0, %v3500_v59 }
 0x558   :  { %v3502_v61 = vpop.eup %3501 }
 0x559   :  { %3505 = vrcp.f32 %v1613_v55  ;;  %v1619_v52 = vadd.f32 1.0, %v3502_v61  ;;  %v3504_v48 = vpop.eup %3503 }
 0x55a   :  { %3507 = vtanh.f32 %v1606_v0 }
 0x55b   :  { %3509 = vrcp.f32 %v1619_v52  ;;  %v1626_v52 = vadd.f32 1.0, %v3504_v48 }
 0x565   :  { %v1705_v9 = vpop.f32.mrf.mxu0  ;;  %v1776_v16 = vpop.f32.mrf.mxu1 }
 0x566   :  { %v3506_v56 = vpop.eup %3505  ;;  %v1781_v50 = vadd.f32 %v3234_v1, %v1705_v9  ;;  %v3237_v1 = vld [vmem:[%s7792_s0 + $0x98] sm:$0xff] }
 0x567   :  { %v3508_v58 = vpop.eup %3507  ;;  %v1707_v59 = vpop.f32.mrf.mxu0 }
 0x568   :  { %v3510_v60 = vpop.eup %3509  ;;  %v3238_v57 = vmul.f32 -1.442695, %v1781_v50  ;;  %v1782_v55 = vadd.f32 %v3235_v63, %v1707_v59  ;;  %v1630_v61 = vmul.f32 %v3508_v58, %v3506_v56  ;;  %v1778_v9 = vpop.f32.mrf.mxu1 }
 0x569   :  { %v1629_v0 = vmul.f32 %v3510_v60, %v5980_v37  ;;  %v1784_v50 = vadd.f32 %v3237_v1, %v1778_v9  ;;  %v3236_v37 = vld [vmem:[%s7792_s0 + $0x90] sm:$0xff] }
 0x56a   :  { %3511 = vpow2.f32 %v3238_v57  ;;  %v3239_v12 = vmul.f32 -1.442695, %v1782_v55  ;;  %v1783_v56 = vadd.f32 %v3236_v37, %v1776_v16 }
 0x56b   :  { %v6584_v6 = vadd.f32 %v1630_v61, %v1629_v0  ;;  %v3240_v48 = vmul.f32 -1.442695, %v1784_v50 }
 0x56c   :  { %3513 = vpow2.f32 %v3239_v12 }
 0x56d   :  { %3515 = vrcp.f32 %v1626_v52 }
 0x56e   :  { %3517 = vtanh.f32 %v6584_v6 }
 0x56f   :  { %3519 = vpow2.f32 %v3240_v48 }
 0x577   :  { %v3512_v63 = vpop.eup %3511 }
 0x578   :  { %v1788_v58 = vadd.f32 1.0, %v3512_v63 }
 0x579   :  { %v3514_v59 = vpop.eup %3513 }
 0x57a   :  { %v3516_v12 = vpop.eup %3515  ;;  %3521 = vrcp.f32 %v1788_v58  ;;  %v1794_v60 = vadd.f32 1.0, %v3514_v59  ;;  %v9184_v58 = vld [vmem:[#allocation55_spill] sm:$0xff]  ;;  %v9185_v59 = vld [vmem:[#allocation56_spill] sm:$0xff] }
 0x57b   :  { %v3518_v57 = vpop.eup %3517  ;;  %3523 = vtanh.f32 %v1783_v56 }
 0x57c   :  { %3525 = vrcp.f32 %v1794_v60  ;;  %v1633_v55 = vmul.f32 %v3518_v57, %v3516_v12  ;;  %v3520_v61 = vpop.eup %3519  ;;  %v9186_v12 = vld [vmem:[#allocation57_spill] sm:$0xff]  ;;  %v9187_v60 = vld [vmem:[#allocation58_spill] sm:$0xff]  ;;  %v9188_v57 = vld [vmem:[#allocation59_spill] sm:$0xff] }
 0x57d   :  { %v1801_v9 = vadd.f32 1.0, %v3520_v61  ;;  %v9190_v61 = vld [vmem:[#allocation61_spill] sm:$0xff] }
 0x57e   :  { %1873 = vmatprep.mubr.f32.mxu0 %v1633_v55  ;;  %1944 = vmatprep.mubr.f32.mxu1 %v1633_v55  ;;  %v9189_v55 = vld [vmem:[#allocation60_spill] sm:$0xff] }
 0x57f   :  { %3527 = vrcp.f32 %v1801_v9  ;;  %v9194_v9 = vld [vmem:[#allocation65_spill] sm:$0xff] }
 0x587   :  { %v3522_v0 = vpop.eup %3521 }
 0x588   :  { %v3524_v52 = vpop.eup %3523 }
 0x589   :  { %v3526_v1 = vpop.eup %3525  ;;  %v1805_v50 = vmul.f32 %v3524_v52, %v3522_v0  ;;  %v9191_v0 = vld [vmem:[#allocation62_spill] sm:$0xff]  ;;  %v9192_v52 = vld [vmem:[#allocation63_spill] sm:$0xff] }
 0x58a   :  { %v1804_v16 = vmul.f32 %v3526_v1, %v5990_v54  ;;  %v9139_v54 = vld [vmem:[#allocation9_spill] sm:$0xff]  ;;  %v9193_v1 = vld [vmem:[#allocation64_spill] sm:$0xff] }
 0x58c   :  { %v6594_v37 = vadd.f32 %v1805_v50, %v1804_v16  ;;  %v3528_v48 = vpop.eup %3527  ;;  %v9195_v50 = vld [vmem:[#allocation66_spill] sm:$0xff]  ;;  %v9196_v16 = vld [vmem:[#allocation67_spill] sm:$0xff] }
 0x58e   :  { %3529 = vtanh.f32 %v6594_v37 }
 0x59b   :  { %v3530_v63 = vpop.eup %3529 }
 0x59c   :  { %v6597_v56 = vmul.f32 %v3530_v63, %v3528_v48  ;;  %v9197_v48 = vld [vmem:[#allocation68_spill] sm:$0xff]  ;;  %v9198_v63 = vld [vmem:[#allocation69_spill] sm:$0xff] }
 0x59e   :  { %1874 = vmatmul.mubr.f32.vlgmr.msra.gmra.mxu0 %v6597_v56  ;;  %1945 = vmatmul.mubr.f32.vlgmr.msra.gmra.mxu1 %v6597_v56 }
 0x59f   :  { %1981 = vmatpush1.msra.mxu0 %v5997_v62  ;;  %2052 = vmatpush1.msra.mxu1 %v6000_v2  ;;  %v9140_v62 = vld [vmem:[#allocation17_spill] sm:$0xff]  ;;  %v9141_v2 = vld [vmem:[#allocation10_spill] sm:$0xff] }
 0x5a0   :  { %1982 = vmatprep.subr.mxu0 %v6003_v5  ;;  %2053 = vmatprep.subr.mxu1 %v6006_v3  ;;  %v9142_v5 = vld [vmem:[#allocation19_spill] sm:$0xff] }
 0x5a1   :  { %1983 = vmatpush1.msra.mxu0 %v6009_v4  ;;  %2054 = vmatpush1.msra.mxu1 %v6012_v7  ;;  %v9143_v3 = vld [vmem:[#allocation11_spill] sm:$0xff]  ;;  %v9144_v4 = vld [vmem:[#allocation20_spill] sm:$0xff] }
 0x5a2   :  { %1984 = vmatprep.subr.mxu0 %v6015_v8  ;;  %2055 = vmatprep.subr.mxu1 %v6018_v10  ;;  %v9145_v7 = vld [vmem:[#allocation12_spill] sm:$0xff]  ;;  %v9146_v8 = vld [vmem:[#allocation21_spill] sm:$0xff]  ;;  %v9147_v10 = vld [vmem:[#allocation14_spill] sm:$0xff] }
 0x5a3   :  { %1985 = vmatpush1.msra.mxu0 %v6021_v11  ;;  %2056 = vmatpush1.msra.mxu1 %v6024_v13  ;;  %v9148_v11 = vld [vmem:[#allocation23_spill] sm:$0xff]  ;;  %v9149_v13 = vld [vmem:[#allocation16_spill] sm:$0xff] }
 0x5a4   :  { %1986 = vmatprep.subr.mxu0 %v6027_v14  ;;  %2057 = vmatprep.subr.mxu1 %v6030_v15  ;;  %v9150_v14 = vld [vmem:[#allocation25_spill] sm:$0xff]  ;;  %v9151_v15 = vld [vmem:[#allocation18_spill] sm:$0xff] }
 0x5a5   :  { %1987 = vmatpush1.msra.mxu0 %v6033_v17  ;;  %2058 = vmatpush1.msra.mxu1 %v6036_v18  ;;  %v9152_v17 = vld [vmem:[#allocation27_spill] sm:$0xff]  ;;  %v9153_v18 = vld [vmem:[#allocation22_spill] sm:$0xff] }
 0x5a6   :  { %1988 = vmatprep.subr.mxu0 %v6039_v31  ;;  %2059 = vmatprep.subr.mxu1 %v6042_v34  ;;  %v9154_v31 = vld [vmem:[#allocation29_spill] sm:$0xff]  ;;  %v9155_v34 = vld [vmem:[#allocation24_spill] sm:$0xff] }
 0x5a7   :  { %1989 = vmatpush1.msra.mxu0 %v6045_v42  ;;  %2060 = vmatpush1.msra.mxu1 %v6048_v35  ;;  %v9156_v42 = vmov 0.0   ;;  %v9157_v35 = vld [vmem:[#allocation30_spill] sm:$0xff] }
 0x5a8   :  { %1990 = vmatprep.subr.mxu0 %v6051_v21  ;;  %2061 = vmatprep.subr.mxu1 %v6054_v20  ;;  %v9158_v21 = vld [vmem:[#allocation26_spill] sm:$0xff]  ;;  %v9159_v20 = vld [vmem:[#allocation32_spill] sm:$0xff] }
 0x5a9   :  { %1991 = vmatpush1.msra.mxu0 %v6057_v26  ;;  %2062 = vmatpush1.msra.mxu1 %v6060_v25  ;;  %v9160_v26 = vld [vmem:[#allocation28_spill] sm:$0xff]  ;;  %v9161_v25 = vld [vmem:[#allocation34_spill] sm:$0xff] }
 0x5aa   :  { %1992 = vmatprep.subr.mxu0 %v6063_v29  ;;  %2063 = vmatprep.subr.mxu1 %v6066_v19  ;;  %v9162_v29 = vld [vmem:[#allocation31_spill] sm:$0xff]  ;;  %v9163_v19 = vld [vmem:[#allocation36_spill] sm:$0xff] }
 0x5ab   :  { %1993 = vmatpush1.msra.mxu0 %v6069_v23  ;;  %2064 = vmatpush1.msra.mxu1 %v6072_v28  ;;  %v9164_v23 = vld [vmem:[#allocation33_spill] sm:$0xff]  ;;  %v9165_v28 = vld [vmem:[#allocation38_spill] sm:$0xff] }
 0x5ac   :  { %1994 = vmatprep.subr.mxu0 %v6075_v46  ;;  %2065 = vmatprep.subr.mxu1 %v6078_v24  ;;  %v9166_v46 = vld [vmem:[#allocation35_spill] sm:$0xff] }
 0x5ad   :  { %1995 = vmatpush1.msra.mxu0 %v6081_v22  ;;  %2066 = vmatpush1.msra.mxu1 %v6084_v27  ;;  %v9167_v24 = vld [vmem:[#allocation39_spill] sm:$0xff]  ;;  %v9168_v22 = vld [vmem:[#allocation37_spill] sm:$0xff]  ;;  %v9169_v27 = vld [vmem:[#allocation40_spill] sm:$0xff] }
 0x5ae   :  { %1996 = vmatprep.subr.mxu0 %v6087_v30  ;;  %2067 = vmatprep.subr.mxu1 %v6090_v36  ;;  %v9170_v30 = vld [vmem:[#allocation41_spill] sm:$0xff]  ;;  %v9171_v36 = vld [vmem:[#allocation42_spill] sm:$0xff] }
 0x5af   :  { %1997 = vmatpush1.msra.mxu0 %v6093_v53  ;;  %2068 = vmatpush1.msra.mxu1 %v6096_v38  ;;  %v9172_v53 = vld [vmem:[#allocation43_spill] sm:$0xff]  ;;  %v9173_v38 = vld [vmem:[#allocation44_spill] sm:$0xff] }
 0x5b0   :  { %1998 = vmatprep.subr.mxu0 %v6099_v39  ;;  %2069 = vmatprep.subr.mxu1 %v6102_v33  ;;  %v9174_v39 = vld [vmem:[#allocation45_spill] sm:$0xff]  ;;  %v9175_v33 = vld [vmem:[#allocation46_spill] sm:$0xff] }
 0x5b1   :  { %1999 = vmatpush1.msra.mxu0 %v6105_v40  ;;  %2070 = vmatpush1.msra.mxu1 %v6108_v41  ;;  %v9176_v40 = vld [vmem:[#allocation47_spill] sm:$0xff]  ;;  %v9177_v41 = vld [vmem:[#allocation48_spill] sm:$0xff] }
 0x5b2   :  { %2000 = vmatprep.subr.mxu0 %v6111_v43  ;;  %2071 = vmatprep.subr.mxu1 %v6114_v44  ;;  %v9178_v43 = vld [vmem:[#allocation49_spill] sm:$0xff]  ;;  %v9179_v44 = vld [vmem:[#allocation50_spill] sm:$0xff] }
 0x5b3   :  { %2001 = vmatpush1.msra.mxu0 %v6117_v45  ;;  %2072 = vmatpush1.msra.mxu1 %v6120_v47  ;;  %v9180_v45 = vld [vmem:[#allocation51_spill] sm:$0xff]  ;;  %v9181_v47 = vld [vmem:[#allocation52_spill] sm:$0xff] }
 0x5b4   :  { %2002 = vmatprep.subr.mxu0 %v6123_v49  ;;  %2073 = vmatprep.subr.mxu1 %v6126_v51  ;;  %v9182_v49 = vld [vmem:[#allocation53_spill] sm:$0xff]  ;;  %v9183_v51 = vld [vmem:[#allocation54_spill] sm:$0xff] }
 0x5b5   :  { %2003 = vmatpush1.msra.mxu0 %v9139_v54  ;;  %2074 = vmatpush1.msra.mxu1 %v9140_v62  ;;  %v9200_v54 = vld [vmem:[#allocation71_spill] sm:$0xff]  ;;  %v9201_v62 = vld [vmem:[#allocation72_spill] sm:$0xff] }
 0x5b6   :  { %2004 = vmatprep.subr.mxu0 %v9141_v2  ;;  %2075 = vmatprep.subr.mxu1 %v9142_v5  ;;  %v9202_v2 = vld [vmem:[#allocation73_spill] sm:$0xff]  ;;  %v9203_v5 = vld [vmem:[#allocation74_spill] sm:$0xff] }
 0x5b7   :  { %2005 = vmatpush1.msra.mxu0 %v9143_v3  ;;  %2076 = vmatpush1.msra.mxu1 %v9144_v4  ;;  %v9204_v3 = vld [vmem:[#allocation75_spill] sm:$0xff]  ;;  %v9205_v4 = vld [vmem:[#allocation76_spill] sm:$0xff] }
 0x5b8   :  { %2006 = vmatprep.subr.mxu0 %v9145_v7  ;;  %2077 = vmatprep.subr.mxu1 %v9146_v8  ;;  %v9206_v7 = vld [vmem:[#allocation77_spill] sm:$0xff]  ;;  %v9207_v8 = vld [vmem:[#allocation78_spill] sm:$0xff] }
 0x5b9   :  { %2007 = vmatpush1.msra.mxu0 %v9147_v10  ;;  %2078 = vmatpush1.msra.mxu1 %v9148_v11  ;;  %v9208_v10 = vld [vmem:[#allocation79_spill] sm:$0xff]  ;;  %v9209_v11 = vld [vmem:[#allocation80_spill] sm:$0xff] }
 0x5ba   :  { %2008 = vmatprep.subr.mxu0 %v9149_v13  ;;  %2079 = vmatprep.subr.mxu1 %v9150_v14  ;;  %v9210_v13 = vld [vmem:[#allocation81_spill] sm:$0xff]  ;;  %v9211_v14 = vld [vmem:[#allocation82_spill] sm:$0xff] }
 0x5bb   :  { %2009 = vmatpush1.msra.mxu0 %v9151_v15  ;;  %2080 = vmatpush1.msra.mxu1 %v9152_v17  ;;  %v9212_v15 = vld [vmem:[#allocation83_spill] sm:$0xff]  ;;  %v9213_v17 = vld [vmem:[#allocation84_spill] sm:$0xff] }
 0x5bc   :  { %2010 = vmatprep.subr.mxu0 %v9153_v18  ;;  %2081 = vmatprep.subr.mxu1 %v9154_v31  ;;  %v9214_v18 = vld [vmem:[#allocation85_spill] sm:$0xff]  ;;  %v9215_v31 = vld [vmem:[#allocation86_spill] sm:$0xff] }
 0x5bd   :  { %2011 = vmatpush1.msra.mxu0 %v9155_v34  ;;  %2044 = vmatprep.mubr.f32.mxu0 %v9156_v42  ;;  %v9216_v34 = vld [vmem:[#allocation87_spill] sm:$0xff] }
 0x5be   :  { %2082 = vmatpush1.msra.mxu1 %v9157_v35  ;;  %2115 = vmatprep.mubr.f32.mxu1 %v9156_v42  ;;  %v9217_v35 = vld [vmem:[#allocation88_spill] sm:$0xff] }
 0x5bf   :  { %2045 = vmatmul.mubr.f32.vlgmr.msra.gmra.mxu0 %v6597_v56  ;;  %2116 = vmatmul.mubr.f32.vlgmr.msra.gmra.mxu1 %v6597_v56  ;;  %v9199_v56 = vld [vmem:[#allocation70_spill] sm:$0xff] }
 0x5c0   :  { %2150 = vmatprep.subr.mxu0 %v9158_v21  ;;  %2221 = vmatprep.subr.mxu1 %v9159_v20  ;;  %v9218_v21 = vld [vmem:[#allocation89_spill] sm:$0xff]  ;;  %v9219_v20 = vld [vmem:[#allocation90_spill] sm:$0xff] }
 0x5c1   :  { %2151 = vmatpush1.msra.mxu0 %v9160_v26  ;;  %2222 = vmatpush1.msra.mxu1 %v9161_v25  ;;  %v9220_v26 = vld [vmem:[#allocation91_spill] sm:$0xff]  ;;  %v9221_v25 = vld [vmem:[#allocation92_spill] sm:$0xff] }
 0x5c2   :  { %2152 = vmatprep.subr.mxu0 %v9162_v29  ;;  %2223 = vmatprep.subr.mxu1 %v9163_v19  ;;  %v9222_v29 = vld [vmem:[#allocation93_spill] sm:$0xff]  ;;  %v9223_v19 = vld [vmem:[#allocation94_spill] sm:$0xff] }
 0x5c3   :  { %2153 = vmatpush1.msra.mxu0 %v9164_v23  ;;  %2224 = vmatpush1.msra.mxu1 %v9165_v28  ;;  %v9224_v23 = vld [vmem:[#allocation95_spill] sm:$0xff]  ;;  %v9225_v28 = vld [vmem:[#allocation96_spill] sm:$0xff] }
 0x5c4   :  { %2154 = vmatprep.subr.mxu0 %v9166_v46  ;;  %2225 = vmatprep.subr.mxu1 %v9167_v24  ;;  %v9226_v46 = vld [vmem:[#allocation97_spill] sm:$0xff]  ;;  %v9227_v24 = vld [vmem:[#allocation98_spill] sm:$0xff] }
 0x5c5   :  { %2155 = vmatpush1.msra.mxu0 %v9168_v22  ;;  %2226 = vmatpush1.msra.mxu1 %v9169_v27  ;;  %v9228_v22 = vld [vmem:[#allocation99_spill] sm:$0xff]  ;;  %v9229_v27 = vld [vmem:[#allocation100_spill] sm:$0xff] }
 0x5c6   :  { %2156 = vmatprep.subr.mxu0 %v9170_v30  ;;  %2227 = vmatprep.subr.mxu1 %v9171_v36  ;;  %v9230_v30 = vld [vmem:[#allocation101_spill] sm:$0xff]  ;;  %v9231_v36 = vld [vmem:[#allocation102_spill] sm:$0xff] }
 0x5c7   :  { %2157 = vmatpush1.msra.mxu0 %v9172_v53  ;;  %2228 = vmatpush1.msra.mxu1 %v9173_v38  ;;  %v9232_v53 = vld [vmem:[#allocation103_spill] sm:$0xff]  ;;  %v9233_v38 = vld [vmem:[#allocation104_spill] sm:$0xff] }
 0x5c8   :  { %2158 = vmatprep.subr.mxu0 %v9174_v39  ;;  %2229 = vmatprep.subr.mxu1 %v9175_v33  ;;  %v9234_v39 = vld [vmem:[#allocation105_spill] sm:$0xff]  ;;  %v9235_v33 = vld [vmem:[#allocation106_spill] sm:$0xff] }
 0x5c9   :  { %2159 = vmatpush1.msra.mxu0 %v9176_v40  ;;  %2230 = vmatpush1.msra.mxu1 %v9177_v41  ;;  %v9236_v40 = vld [vmem:[#allocation107_spill] sm:$0xff]  ;;  %v9237_v41 = vld [vmem:[#allocation108_spill] sm:$0xff] }
 0x5ca   :  { %2160 = vmatprep.subr.mxu0 %v9178_v43  ;;  %2231 = vmatprep.subr.mxu1 %v9179_v44  ;;  %v9238_v43 = vld [vmem:[#allocation109_spill] sm:$0xff]  ;;  %v9239_v44 = vld [vmem:[#allocation110_spill] sm:$0xff] }
 0x5cb   :  { %2161 = vmatpush1.msra.mxu0 %v9180_v45  ;;  %2232 = vmatpush1.msra.mxu1 %v9181_v47  ;;  %v9240_v45 = vld [vmem:[#allocation111_spill] sm:$0xff]  ;;  %v9241_v47 = vld [vmem:[#allocation112_spill] sm:$0xff] }
 0x5cc   :  { %2162 = vmatprep.subr.mxu0 %v9182_v49  ;;  %2233 = vmatprep.subr.mxu1 %v9183_v51  ;;  %v9242_v49 = vld [vmem:[#allocation113_spill] sm:$0xff]  ;;  %v9243_v51 = vld [vmem:[#allocation114_spill] sm:$0xff] }
 0x5cd   :  { %2163 = vmatpush1.msra.mxu0 %v9184_v58  ;;  %2234 = vmatpush1.msra.mxu1 %v9185_v59  ;;  %v9244_v58 = vld [vmem:[#allocation115_spill] sm:$0xff]  ;;  %v9245_v59 = vld [vmem:[#allocation116_spill] sm:$0xff] }
 0x5ce   :  { %2164 = vmatprep.subr.mxu0 %v9186_v12  ;;  %2235 = vmatprep.subr.mxu1 %v9187_v60  ;;  %v9246_v12 = vld [vmem:[#allocation117_spill] sm:$0xff]  ;;  %v9247_v60 = vld [vmem:[#allocation118_spill] sm:$0xff] }
 0x5cf   :  { %2165 = vmatpush1.msra.mxu0 %v9188_v57  ;;  %2236 = vmatpush1.msra.mxu1 %v9189_v55  ;;  %v9248_v57 = vld [vmem:[#allocation119_spill] sm:$0xff]  ;;  %v9249_v55 = vld [vmem:[#allocation120_spill] sm:$0xff] }
 0x5d0   :  { %2166 = vmatprep.subr.mxu0 %v9190_v61  ;;  %2237 = vmatprep.subr.mxu1 %v9191_v0  ;;  %v9250_v61 = vld [vmem:[#allocation121_spill] sm:$0xff]  ;;  %v9251_v0 = vld [vmem:[#allocation122_spill] sm:$0xff] }
 0x5d1   :  { %2167 = vmatpush1.msra.mxu0 %v9192_v52  ;;  %2238 = vmatpush1.msra.mxu1 %v9193_v1  ;;  %v9252_v52 = vld [vmem:[#allocation123_spill] sm:$0xff]  ;;  %v9253_v1 = vld [vmem:[#allocation124_spill] sm:$0xff] }
 0x5d2   :  { %2168 = vmatprep.subr.mxu0 %v9194_v9  ;;  %2239 = vmatprep.subr.mxu1 %v9195_v50  ;;  %v9254_v9 = vld [vmem:[#allocation125_spill] sm:$0xff]  ;;  %v9255_v50 = vld [vmem:[#allocation126_spill] sm:$0xff] }
 0x5d3   :  { %2169 = vmatpush1.msra.mxu0 %v9196_v16  ;;  %2240 = vmatpush1.msra.mxu1 %v9197_v48  ;;  %v9256_v16 = vld [vmem:[#allocation127_spill] sm:$0xff]  ;;  %v9257_v48 = vld [vmem:[#allocation128_spill] sm:$0xff] }
 0x5d4   :  { %2170 = vmatprep.subr.mxu0 %v9198_v63  ;;  %2241 = vmatprep.subr.mxu1 %v9199_v56  ;;  %v9258_v63 = vld [vmem:[#allocation129_spill] sm:$0xff]  ;;  %v9259_v56 = vld [vmem:[#allocation130_spill] sm:$0xff] }
 0x5d5   :  { %2171 = vmatpush1.msra.mxu0 %v9200_v54  ;;  %2242 = vmatpush1.msra.mxu1 %v9201_v62  ;;  %v9260_v54 = vld [vmem:[#allocation131_spill] sm:$0xff]  ;;  %v9261_v62 = vld [vmem:[#allocation132_spill] sm:$0xff] }
 0x5d6   :  { %2172 = vmatprep.subr.mxu0 %v9202_v2  ;;  %2243 = vmatprep.subr.mxu1 %v9203_v5  ;;  %v9262_v2 = vld [vmem:[#allocation133_spill] sm:$0xff]  ;;  %v9263_v5 = vld [vmem:[#allocation134_spill] sm:$0xff] }
 0x5d7   :  { %2173 = vmatpush1.msra.mxu0 %v9204_v3  ;;  %2244 = vmatpush1.msra.mxu1 %v9205_v4  ;;  %v9264_v3 = vld [vmem:[#allocation135_spill] sm:$0xff]  ;;  %v9265_v4 = vld [vmem:[#allocation136_spill] sm:$0xff] }
 0x5d8   :  { %2174 = vmatprep.subr.mxu0 %v9206_v7  ;;  %2245 = vmatprep.subr.mxu1 %v9207_v8  ;;  %v9266_v7 = vld [vmem:[#allocation137_spill] sm:$0xff]  ;;  %v9267_v8 = vld [vmem:[#allocation138_spill] sm:$0xff] }
 0x5d9   :  { %2175 = vmatpush1.msra.mxu0 %v9208_v10  ;;  %2246 = vmatpush1.msra.mxu1 %v9209_v11  ;;  %v9268_v10 = vld [vmem:[#allocation139_spill] sm:$0xff]  ;;  %v9269_v11 = vld [vmem:[#allocation140_spill] sm:$0xff] }
 0x5da   :  { %2176 = vmatprep.subr.mxu0 %v9210_v13  ;;  %2247 = vmatprep.subr.mxu1 %v9211_v14  ;;  %v9270_v13 = vld [vmem:[#allocation141_spill] sm:$0xff]  ;;  %v9271_v14 = vld [vmem:[#allocation142_spill] sm:$0xff] }
 0x5db   :  { %2177 = vmatpush1.msra.mxu0 %v9212_v15  ;;  %2248 = vmatpush1.msra.mxu1 %v9213_v17  ;;  %v9272_v15 = vld [vmem:[#allocation143_spill] sm:$0xff]  ;;  %v9273_v17 = vld [vmem:[#allocation144_spill] sm:$0xff] }
 0x5dc   :  { %2178 = vmatprep.subr.mxu0 %v9214_v18  ;;  %2249 = vmatprep.subr.mxu1 %v9215_v31  ;;  %v9274_v18 = vld [vmem:[#allocation145_spill] sm:$0xff]  ;;  %v9275_v31 = vld [vmem:[#allocation146_spill] sm:$0xff] }
 0x5dd   :  { %2179 = vmatpush1.msra.mxu0 %v9216_v34  ;;  %2250 = vmatpush1.msra.mxu1 %v9217_v35  ;;  %v9276_v34 = vld [vmem:[#allocation147_spill] sm:$0xff]  ;;  %v9277_v35 = vld [vmem:[#allocation148_spill] sm:$0xff] }
 0x5de   :  { %2180 = vmatprep.subr.mxu0 %v9218_v21  ;;  %2251 = vmatprep.subr.mxu1 %v9219_v20  ;;  %v9278_v21 = vld [vmem:[#allocation149_spill] sm:$0xff]  ;;  %v9279_v20 = vld [vmem:[#allocation150_spill] sm:$0xff] }
 0x5df   :  { %2181 = vmatpush1.msra.mxu0 %v9220_v26  ;;  %2252 = vmatpush1.msra.mxu1 %v9221_v25  ;;  %v9280_v26 = vld [vmem:[#allocation151_spill] sm:$0xff]  ;;  %v9281_v25 = vld [vmem:[#allocation152_spill] sm:$0xff] }
 0x5e0   :  { %2182 = vmatprep.subr.mxu0 %v9222_v29  ;;  %2253 = vmatprep.subr.mxu1 %v9223_v19  ;;  %v9282_v29 = vld [vmem:[#allocation153_spill] sm:$0xff]  ;;  %v9283_v19 = vld [vmem:[#allocation154_spill] sm:$0xff] }
 0x5e1   :  { %2183 = vmatpush2.msra.mxu0 %v9224_v23  ;;  %2254 = vmatpush2.msra.mxu1 %v9225_v28  ;;  %v9284_v23 = vld [vmem:[#allocation155_spill] sm:$0xff]  ;;  %v9285_v28 = vld [vmem:[#allocation156_spill] sm:$0xff] }
 0x5e2   :  { %2184 = vmatprep.subr.mxu0 %v9226_v46  ;;  %2255 = vmatprep.subr.mxu1 %v9227_v24  ;;  %v6795_v46 = vld [vmem:[#allocation2 + $0x1e8] sm:$0xff]  ;;  %v6798_v24 = vld [vmem:[#allocation2 + $0x1f8] sm:$0xff] }
 0x5e3   :  { %2185 = vmatpush2.msra.mxu0 %v9228_v22  ;;  %2256 = vmatpush2.msra.mxu1 %v9229_v27 }
 0x5e4   :  { %2186 = vmatprep.subr.mxu0 %v9230_v30  ;;  %2257 = vmatprep.subr.mxu1 %v9231_v36 }
 0x5e5   :  { %2187 = vmatpush2.msra.mxu0 %v9232_v53  ;;  %2258 = vmatpush2.msra.mxu1 %v9233_v38  ;;  %v9286_v53 = vld [vmem:[#allocation13_spill] sm:$0xff] }
 0x5e6   :  { %2188 = vmatprep.subr.mxu0 %v9234_v39  ;;  %2259 = vmatprep.subr.mxu1 %v9235_v33 }
 0x5e7   :  { %2189 = vmatpush2.msra.mxu0 %v9236_v40  ;;  %2260 = vmatpush2.msra.mxu1 %v9237_v41  ;;  %v9287_v41 = vld [vmem:[#allocation8_spill] sm:$0xff] }
 0x5e8   :  { %2190 = vmatprep.subr.mxu0 %v9238_v43  ;;  %2261 = vmatprep.subr.mxu1 %v9239_v44 }
 0x5e9   :  { %2191 = vmatpush2.msra.mxu0 %v9240_v45  ;;  %2262 = vmatpush2.msra.mxu1 %v9241_v47  ;;  %v9288_v47 = vld [vmem:[#allocation15_spill] sm:$0xff] }
 0x5ea   :  { %2192 = vmatprep.subr.mxu0 %v9242_v49  ;;  %2263 = vmatprep.subr.mxu1 %v9243_v51 }
 0x5eb   :  { %2193 = vmatpush2.msra.mxu0 %v9244_v58  ;;  %2264 = vmatpush2.msra.mxu1 %v9245_v59 }
 0x5ec   :  { %2194 = vmatprep.subr.mxu0 %v9246_v12  ;;  %2265 = vmatprep.subr.mxu1 %v9247_v60  ;;  %v3244_v12 = vld [vmem:[%s7792_s0 + $0xa0] sm:$0xff] }
 0x5ed   :  { %2195 = vmatpush2.msra.mxu0 %v9248_v57  ;;  %2266 = vmatpush2.msra.mxu1 %v9249_v55  ;;  %v3245_v55 = vld [vmem:[%s7792_s0 + $0xa8] sm:$0xff] }
 0x5ee   :  { %2196 = vmatprep.subr.mxu0 %v9250_v61  ;;  %2267 = vmatprep.subr.mxu1 %v9251_v0 }
 0x5ef   :  { %2197 = vmatpush2.msra.mxu0 %v9252_v52  ;;  %2268 = vmatpush2.msra.mxu1 %v9253_v1 }
 0x5f0   :  { %2198 = vmatprep.subr.mxu0 %v9254_v9  ;;  %2269 = vmatprep.subr.mxu1 %v9255_v50 }
 0x5f1   :  { %2199 = vmatpush2.msra.mxu0 %v9256_v16  ;;  %2270 = vmatpush2.msra.mxu1 %v9257_v48 }
 0x5f2   :  { %2200 = vmatprep.subr.mxu0 %v9258_v63  ;;  %2271 = vmatprep.subr.mxu1 %v9259_v56 }
 0x5f3   :  { %2201 = vmatpush2.msra.mxu0 %v9260_v54  ;;  %2272 = vmatpush2.msra.mxu1 %v9261_v62 }
 0x5f4   :  { %2202 = vmatprep.subr.mxu0 %v9262_v2  ;;  %2273 = vmatprep.subr.mxu1 %v9263_v5  ;;  %v3247_v5 = vld [vmem:[%s7792_s0 + $0xb8] sm:$0xff] }
 0x5f5   :  { %2203 = vmatpush2.msra.mxu0 %v9264_v3  ;;  %2274 = vmatpush2.msra.mxu1 %v9265_v4 }
 0x5f6   :  { %2204 = vmatprep.subr.mxu0 %v9266_v7  ;;  %2275 = vmatprep.subr.mxu1 %v9267_v8 }
 0x5f7   :  { %2205 = vmatpush2.msra.mxu0 %v9268_v10  ;;  %2276 = vmatpush2.msra.mxu1 %v9269_v11 }
 0x5f8   :  { %2206 = vmatprep.subr.mxu0 %v9270_v13  ;;  %2277 = vmatprep.subr.mxu1 %v9271_v14 }
 0x5f9   :  { %2207 = vmatpush2.msra.mxu0 %v9272_v15  ;;  %2278 = vmatpush2.msra.mxu1 %v9273_v17 }
 0x5fa   :  { %2208 = vmatprep.subr.mxu0 %v9274_v18  ;;  %2279 = vmatprep.subr.mxu1 %v9275_v31 }
 0x5fb   :  { %2209 = vmatpush2.msra.mxu0 %v9276_v34  ;;  %2280 = vmatpush2.msra.mxu1 %v9277_v35 }
 0x5fc   :  { %2210 = vmatprep.subr.mxu0 %v9278_v21  ;;  %2281 = vmatprep.subr.mxu1 %v9279_v20 }
 0x5fd   :  { %2211 = vmatpush2.msra.mxu0 %v9280_v26  ;;  %2282 = vmatpush2.msra.mxu1 %v9281_v25 }
 0x5fe   :  { %2212 = vmatprep.subr.mxu0 %v9282_v29  ;;  %2283 = vmatprep.subr.mxu1 %v9283_v19 }
 0x5ff   :  { %2213 = vmatpush2.msra.mxu0 %v9284_v23  ;;  %2284 = vmatpush2.msra.mxu1 %v9285_v28 }
 0x600   :  { %2321 = vmatprep.subr.mxu0 %v6795_v46  ;;  %2392 = vmatprep.subr.mxu1 %v6798_v24 }
 0x65e   :  { %v1875_v22 = vpop.f32.mrf.mxu0  ;;  %v1946_v39 = vpop.f32.mrf.mxu1 }
 0x65f   :  { %v1876_v27 = vadd.f32 %v1875_v22, %v5130_v32  ;;  %v1947_v49 = vadd.f32 %v1946_v39, %v9288_v47  ;;  %v6829_v22 = vld [vmem:[#allocation2 + $0x1e0] sm:$0xff]  ;;  %v6847_v39 = vld [vmem:[#allocation2 + $0x1a8] sm:$0xff] }
 0x660   :  { %v1877_v30 = vpop.f32.mrf.mxu0  ;;  %v1948_v40 = vpop.f32.mrf.mxu1 }
 0x661   :  { %v3241_v36 = vmul.f32 -1.442695, %v1876_v27  ;;  %v1878_v38 = vadd.f32 %v1877_v30, %v9286_v53  ;;  %v1949_v43 = vadd.f32 %v1948_v40, %v9287_v41  ;;  %v6832_v27 = vld [vmem:[#allocation2 + $0x1f0] sm:$0xff]  ;;  %v6838_v30 = vld [vmem:[#allocation2 + $0x1d8] sm:$0xff]  ;;  %v6853_v40 = vld [vmem:[#allocation2 + $0x1a0] sm:$0xff] }
 0x663   :  { %3531 = vpow2.f32 %v3241_v36  ;;  %v3242_v33 = vmul.f32 -1.442695, %v1878_v38  ;;  %v3243_v44 = vmul.f32 -1.442695, %v1949_v43  ;;  %v6841_v36 = vld [vmem:[#allocation2 + $0x1c0] sm:$0xff]  ;;  %v6844_v38 = vld [vmem:[#allocation2 + $0x1d0] sm:$0xff] }
 0x664   :  { %v6856_v43 = vld [vmem:[#allocation2 + $0x1b0] sm:$0xff] }
 0x665   :  { %3533 = vpow2.f32 %v3242_v33  ;;  %v6850_v33 = vld [vmem:[#allocation2 + $0x1b8] sm:$0xff] }
 0x666   :  { %3535 = vpow2.f32 %v3243_v44  ;;  %v6859_v44 = vld [vmem:[#allocation2 + $0x188] sm:$0xff] }
 0x670   :  { %v3532_v45 = vpop.eup %3531 }
 0x671   :  { %v1954_v51 = vadd.f32 1.0, %v3532_v45  ;;  %v6862_v45 = vld [vmem:[#allocation2 + $0x198] sm:$0xff] }
 0x672   :  { %v3534_v58 = vpop.eup %3533 }
 0x673   :  { %3537 = vrcp.f32 %v1954_v51  ;;  %v1960_v59 = vadd.f32 1.0, %v3534_v58  ;;  %v3536_v60 = vpop.eup %3535  ;;  %v6868_v51 = vld [vmem:[#allocation2 + $0x190] sm:$0xff]  ;;  %v6871_v58 = vld [vmem:[#allocation2 + $0x168] sm:$0xff] }
 0x674   :  { %3539 = vtanh.f32 %v1947_v49  ;;  %v1967_v56 = vadd.f32 1.0, %v3536_v60  ;;  %v6865_v49 = vld [vmem:[#allocation2 + $0x180] sm:$0xff]  ;;  %v6880_v60 = vld [vmem:[#allocation2 + $0x170] sm:$0xff] }
 0x675   :  { %3541 = vrcp.f32 %v1960_v59  ;;  %v6874_v59 = vld [vmem:[#allocation2 + $0x178] sm:$0xff] }
 0x67f   :  { %v2046_v57 = vpop.f32.mrf.mxu0  ;;  %v2117_v54 = vpop.f32.mrf.mxu1 }
 0x680   :  { %v3538_v61 = vpop.eup %3537  ;;  %v2122_v0 = vadd.f32 %v3244_v12, %v2046_v57  ;;  %v6877_v12 = vld [vmem:[#allocation2 + $0x160] sm:$0xff]  ;;  %v6883_v57 = vld [vmem:[#allocation2 + $0x148] sm:$0xff] }
 0x681   :  { %v3540_v52 = vpop.eup %3539  ;;  %v2048_v1 = vpop.f32.mrf.mxu0 }
 0x682   :  { %v3542_v9 = vpop.eup %3541  ;;  %v3248_v50 = vmul.f32 -1.442695, %v2122_v0  ;;  %v2123_v16 = vadd.f32 %v3245_v55, %v2048_v1  ;;  %v1971_v48 = vmul.f32 %v3540_v52, %v3538_v61  ;;  %v2119_v3 = vpop.f32.mrf.mxu1  ;;  %v6886_v55 = vld [vmem:[#allocation2 + $0x158] sm:$0xff]  ;;  %v6889_v61 = vld [vmem:[#allocation2 + $0x140] sm:$0xff]  ;;  %v6892_v0 = vld [vmem:[#allocation2 + $0x150] sm:$0xff] }
 0x683   :  { %v1970_v63 = vmul.f32 %v3542_v9, %v6584_v6  ;;  %v2125_v4 = vadd.f32 %v3247_v5, %v2119_v3  ;;  %v3246_v6 = vld [vmem:[%s7792_s0 + $0xb0] sm:$0xff]  ;;  %v6895_v52 = vld [vmem:[#allocation2 + $0x128] sm:$0xff]  ;;  %v6898_v1 = vld [vmem:[#allocation2 + $0x138] sm:$0xff] }
 0x684   :  { %3543 = vpow2.f32 %v3248_v50  ;;  %v3249_v62 = vmul.f32 -1.442695, %v2123_v16  ;;  %v2124_v10 = vadd.f32 %v3246_v6, %v2117_v54  ;;  %v6901_v9 = vld [vmem:[#allocation2 + $0x120] sm:$0xff]  ;;  %v6904_v50 = vld [vmem:[#allocation2 + $0x130] sm:$0xff]  ;;  %v6907_v16 = vld [vmem:[#allocation2 + $0x108] sm:$0xff] }
 0x685   :  { %v6812_v2 = vadd.f32 %v1971_v48, %v1970_v63  ;;  %v3250_v7 = vmul.f32 -1.442695, %v2125_v4  ;;  %v6910_v48 = vld [vmem:[#allocation2 + $0x118] sm:$0xff]  ;;  %v6913_v63 = vld [vmem:[#allocation2 + $0x100] sm:$0xff]  ;;  %v6919_v54 = vld [vmem:[#allocation2 + $0xe8] sm:$0xff] }
 0x686   :  { %3545 = vpow2.f32 %v3249_v62  ;;  %v6922_v62 = vld [vmem:[#allocation2 + $0xf8] sm:$0xff]  ;;  %v6925_v5 = vld [vmem:[#allocation2 + $0xe0] sm:$0xff]  ;;  %v6928_v3 = vld [vmem:[#allocation2 + $0xf0] sm:$0xff] }
 0x687   :  { %3547 = vrcp.f32 %v1967_v56  ;;  %v6916_v56 = vld [vmem:[#allocation2 + $0x110] sm:$0xff]  ;;  %v6931_v4 = vld [vmem:[#allocation2 + $0xc8] sm:$0xff]  ;;  %v6934_v6 = vld [vmem:[#allocation2 + $0xd8] sm:$0xff] }
 0x688   :  { %3549 = vtanh.f32 %v6812_v2 }
 0x689   :  { %3551 = vpow2.f32 %v3250_v7  ;;  %v6937_v7 = vld [vmem:[#allocation2 + $0xc0] sm:$0xff] }
 0x691   :  { %v3544_v8 = vpop.eup %3543 }
 0x692   :  { %v2129_v11 = vadd.f32 1.0, %v3544_v8  ;;  %v6940_v8 = vld [vmem:[#allocation2 + $0xd0] sm:$0xff] }
 0x693   :  { %v3546_v13 = vpop.eup %3545 }
 0x694   :  { %v3548_v14 = vpop.eup %3547  ;;  %3553 = vrcp.f32 %v2129_v11  ;;  %v2135_v15 = vadd.f32 1.0, %v3546_v13  ;;  %v6946_v11 = vld [vmem:[#allocation2 + $0xb8] sm:$0xff]  ;;  %v6949_v13 = vld [vmem:[#allocation2 + $0xa0] sm:$0xff] }
 0x695   :  { %v3550_v17 = vpop.eup %3549  ;;  %3555 = vtanh.f32 %v2124_v10  ;;  %v6943_v10 = vld [vmem:[#allocation2 + $0xa8] sm:$0xff] }
 0x696   :  { %3557 = vrcp.f32 %v2135_v15  ;;  %v1974_v18 = vmul.f32 %v3550_v17, %v3548_v14  ;;  %v3552_v31 = vpop.eup %3551  ;;  %v6952_v14 = vld [vmem:[#allocation2 + $0xb0] sm:$0xff]  ;;  %v6955_v15 = vld [vmem:[#allocation2 + $0x88] sm:$0xff]  ;;  %v6958_v17 = vld [vmem:[#allocation2 + $0x98] sm:$0xff] }
 0x697   :  { %v2142_v20 = vadd.f32 1.0, %v3552_v31  ;;  %v6964_v31 = vld [vmem:[#allocation2 + $0x90] sm:$0xff] }
 0x698   :  { %2214 = vmatprep.mubr.f32.mxu0 %v1974_v18  ;;  %2285 = vmatprep.mubr.f32.mxu1 %v1974_v18  ;;  %v6961_v18 = vld [vmem:[#allocation2 + $0x80] sm:$0xff]  ;;  %9290 = vst [vmem:[#allocation17_spill] sm:$0xff] %v6964_v31 }
 0x699   :  { %3559 = vrcp.f32 %v2142_v20  ;;  %9289 = vst [vmem:[#allocation9_spill] sm:$0xff] %v6961_v18  ;;  %v6976_v20 = vld [vmem:[#allocation2 + $0x70] sm:$0xff] }
 0x69a   :  { %9294 = vst [vmem:[#allocation20_spill] sm:$0xff] %v6976_v20 }
 0x6a1   :  { %v3554_v34 = vpop.eup %3553 }
 0x6a2   :  { %v3556_v35 = vpop.eup %3555 }
 0x6a3   :  { %v3558_v21 = vpop.eup %3557  ;;  %v2146_v26 = vmul.f32 %v3556_v35, %v3554_v34  ;;  %v6967_v34 = vld [vmem:[#allocation2 + $0x68] sm:$0xff]  ;;  %v6970_v35 = vld [vmem:[#allocation2 + $0x78] sm:$0xff] }
 0x6a4   :  { %v2145_v25 = vmul.f32 %v3558_v21, %v6594_v37  ;;  %v6835_v37 = vld [vmem:[#allocation2 + $0x1c8] sm:$0xff]  ;;  %9291 = vst [vmem:[#allocation10_spill] sm:$0xff] %v6967_v34  ;;  %9292 = vst [vmem:[#allocation19_spill] sm:$0xff] %v6970_v35  ;;  %v6973_v21 = vld [vmem:[#allocation2 + $0x60] sm:$0xff] }
 0x6a5   :  { %9293 = vst [vmem:[#allocation11_spill] sm:$0xff] %v6973_v21 }
 0x6a6   :  { %v6822_v29 = vadd.f32 %v2146_v26, %v2145_v25  ;;  %v3560_v19 = vpop.eup %3559  ;;  %v6979_v26 = vld [vmem:[#allocation2 + $0x48] sm:$0xff]  ;;  %v6982_v25 = vld [vmem:[#allocation2 + $0x58] sm:$0xff] }
 0x6a7   :  { %9295 = vst [vmem:[#allocation12_spill] sm:$0xff] %v6979_v26  ;;  %9296 = vst [vmem:[#allocation21_spill] sm:$0xff] %v6982_v25 }
 0x6a8   :  { %3561 = vtanh.f32 %v6822_v29 }
 0x6b5   :  { %v3562_v23 = vpop.eup %3561 }
 0x6b6   :  { %v6825_v28 = vmul.f32 %v3562_v23, %v3560_v19  ;;  %v6985_v19 = vld [vmem:[#allocation2 + $0x40] sm:$0xff]  ;;  %v6988_v23 = vld [vmem:[#allocation2 + $0x50] sm:$0xff] }
 0x6b7   :  { %9297 = vst [vmem:[#allocation14_spill] sm:$0xff] %v6985_v19  ;;  %9298 = vst [vmem:[#allocation23_spill] sm:$0xff] %v6988_v23 }
 0x6b8   :  { %2215 = vmatmul.mubr.f32.vlgmr.msra.gmra.mxu0 %v6825_v28  ;;  %2286 = vmatmul.mubr.f32.vlgmr.msra.gmra.mxu1 %v6825_v28 }
 0x6b9   :  { %2322 = vmatpush1.msra.mxu0 %v6829_v22  ;;  %2393 = vmatpush1.msra.mxu1 %v6832_v27 }
 0x6ba   :  { %2323 = vmatprep.subr.mxu0 %v6835_v37  ;;  %2394 = vmatprep.subr.mxu1 %v6838_v30 }
 0x6bb   :  { %2324 = vmatpush1.msra.mxu0 %v6841_v36  ;;  %2395 = vmatpush1.msra.mxu1 %v6844_v38 }
 0x6bc   :  { %2325 = vmatprep.subr.mxu0 %v6847_v39  ;;  %2396 = vmatprep.subr.mxu1 %v6850_v33 }
 0x6bd   :  { %2326 = vmatpush1.msra.mxu0 %v6853_v40  ;;  %2397 = vmatpush1.msra.mxu1 %v6856_v43 }
 0x6be   :  { %2327 = vmatprep.subr.mxu0 %v6859_v44  ;;  %2398 = vmatprep.subr.mxu1 %v6862_v45 }
 0x6bf   :  { %2328 = vmatpush1.msra.mxu0 %v6865_v49  ;;  %2399 = vmatpush1.msra.mxu1 %v6868_v51 }
 0x6c0   :  { %2329 = vmatprep.subr.mxu0 %v6871_v58  ;;  %2400 = vmatprep.subr.mxu1 %v6874_v59 }
 0x6c1   :  { %2330 = vmatpush1.msra.mxu0 %v6877_v12  ;;  %2401 = vmatpush1.msra.mxu1 %v6880_v60 }
 0x6c2   :  { %2331 = vmatprep.subr.mxu0 %v6883_v57  ;;  %2402 = vmatprep.subr.mxu1 %v6886_v55 }
 0x6c3   :  { %2332 = vmatpush1.msra.mxu0 %v6889_v61  ;;  %2403 = vmatpush1.msra.mxu1 %v6892_v0 }
 0x6c4   :  { %2333 = vmatprep.subr.mxu0 %v6895_v52  ;;  %2404 = vmatprep.subr.mxu1 %v6898_v1 }
 0x6c5   :  { %2334 = vmatpush1.msra.mxu0 %v6901_v9  ;;  %2405 = vmatpush1.msra.mxu1 %v6904_v50 }
 0x6c6   :  { %2335 = vmatprep.subr.mxu0 %v6907_v16  ;;  %2406 = vmatprep.subr.mxu1 %v6910_v48 }
 0x6c7   :  { %2336 = vmatpush1.msra.mxu0 %v6913_v63  ;;  %2407 = vmatpush1.msra.mxu1 %v6916_v56 }
 0x6c8   :  { %2337 = vmatprep.subr.mxu0 %v6919_v54  ;;  %2408 = vmatprep.subr.mxu1 %v6922_v62 }
 0x6c9   :  { %2338 = vmatpush1.msra.mxu0 %v6925_v5  ;;  %2409 = vmatpush1.msra.mxu1 %v6928_v3 }
 0x6ca   :  { %2339 = vmatprep.subr.mxu0 %v6931_v4  ;;  %2410 = vmatprep.subr.mxu1 %v6934_v6 }
 0x6cb   :  { %2340 = vmatpush1.msra.mxu0 %v6937_v7  ;;  %2411 = vmatpush1.msra.mxu1 %v6940_v8 }
 0x6cc   :  { %2341 = vmatprep.subr.mxu0 %v6943_v10  ;;  %2412 = vmatprep.subr.mxu1 %v6946_v11 }
 0x6cd   :  { %2342 = vmatpush1.msra.mxu0 %v6949_v13  ;;  %2413 = vmatpush1.msra.mxu1 %v6952_v14 }
 0x6ce   :  { %2343 = vmatprep.subr.mxu0 %v6955_v15  ;;  %2414 = vmatprep.subr.mxu1 %v6958_v17 }
 0x6cf   :  { %2344 = vmatpush1.msra.mxu0 %v6961_v18  ;;  %2415 = vmatpush1.msra.mxu1 %v6964_v31 }
 0x6d0   :  { %2345 = vmatprep.subr.mxu0 %v6967_v34  ;;  %2416 = vmatprep.subr.mxu1 %v6970_v35 }
 0x6d1   :  { %2346 = vmatpush1.msra.mxu0 %v6973_v21  ;;  %2417 = vmatpush1.msra.mxu1 %v6976_v20  ;;  %v6991_v21 = vld [vmem:[#allocation2 + $0x28] sm:$0xff]  ;;  %v6994_v20 = vld [vmem:[#allocation2 + $0x38] sm:$0xff] }
 0x6d2   :  { %2347 = vmatprep.subr.mxu0 %v6979_v26  ;;  %2418 = vmatprep.subr.mxu1 %v6982_v25  ;;  %9299 = vst [vmem:[#allocation16_spill] sm:$0xff] %v6991_v21  ;;  %9300 = vst [vmem:[#allocation25_spill] sm:$0xff] %v6994_v20  ;;  %v6997_v26 = vld [vmem:[#allocation2 + $0x20] sm:$0xff]  ;;  %v7000_v25 = vld [vmem:[#allocation2 + $0x30] sm:$0xff] }
 0x6d3   :  { %2348 = vmatpush1.msra.mxu0 %v6985_v19  ;;  %2419 = vmatpush1.msra.mxu1 %v6988_v23  ;;  %9301 = vst [vmem:[#allocation18_spill] sm:$0xff] %v6997_v26  ;;  %9302 = vst [vmem:[#allocation27_spill] sm:$0xff] %v7000_v25  ;;  %v7003_v19 = vld [vmem:[#allocation2 + $0x8] sm:$0xff]  ;;  %v7006_v23 = vld [vmem:[#allocation2 + $0x18] sm:$0xff] }
 0x6d4   :  { %2349 = vmatprep.subr.mxu0 %v6991_v21  ;;  %2420 = vmatprep.subr.mxu1 %v6994_v20  ;;  %9303 = vst [vmem:[#allocation22_spill] sm:$0xff] %v7003_v19  ;;  %9304 = vst [vmem:[#allocation29_spill] sm:$0xff] %v7006_v23  ;;  %v7009_v21 = vld [vmem:[#allocation2] sm:$0xff]  ;;  %v7013_v20 = vld [vmem:[#allocation2 + $0x10] sm:$0xff] }
 0x6d5   :  { %2350 = vmatpush1.msra.mxu0 %v6997_v26  ;;  %2421 = vmatpush1.msra.mxu1 %v7000_v25  ;;  %9305 = vst [vmem:[#allocation24_spill] sm:$0xff] %v7009_v21  ;;  %9306 = vst [vmem:[#allocation30_spill] sm:$0xff] %v7013_v20  ;;  %v7028_v25 = vld [vmem:[#allocation4 + $0x1f0] sm:$0xff] }
 0x6d6   :  { %2351 = vmatprep.subr.mxu0 %v7003_v19  ;;  %2422 = vmatprep.subr.mxu1 %v7006_v23  ;;  %v7019_v19 = vld [vmem:[#allocation4 + $0x1e8] sm:$0xff]  ;;  %v7022_v23 = vld [vmem:[#allocation4 + $0x1f8] sm:$0xff]  ;;  %9310 = vst [vmem:[#allocation34_spill] sm:$0xff] %v7028_v25 }
 0x6d7   :  { %2352 = vmatpush1.msra.mxu0 %v7009_v21  ;;  %2385 = vmatprep.mubr.f32.mxu0 %v9156_v42  ;;  %9307 = vst [vmem:[#allocation26_spill] sm:$0xff] %v7019_v19  ;;  %9308 = vst [vmem:[#allocation32_spill] sm:$0xff] %v7022_v23  ;;  %v7025_v21 = vld [vmem:[#allocation4 + $0x1e0] sm:$0xff] }
 0x6d8   :  { %2423 = vmatpush1.msra.mxu1 %v7013_v20  ;;  %2456 = vmatprep.mubr.f32.mxu1 %v9156_v42  ;;  %9309 = vst [vmem:[#allocation28_spill] sm:$0xff] %v7025_v21  ;;  %v7031_v20 = vld [vmem:[#allocation4 + $0x1c8] sm:$0xff] }
 0x6d9   :  { %2386 = vmatmul.mubr.f32.vlgmr.msra.gmra.mxu0 %v6825_v28  ;;  %2457 = vmatmul.mubr.f32.vlgmr.msra.gmra.mxu1 %v6825_v28  ;;  %9311 = vst [vmem:[#allocation31_spill] sm:$0xff] %v7031_v20  ;;  %v7034_v28 = vld [vmem:[#allocation4 + $0x1d8] sm:$0xff] }
 0x6da   :  { %2491 = vmatprep.subr.mxu0 %v7019_v19  ;;  %2562 = vmatprep.subr.mxu1 %v7022_v23  ;;  %9312 = vst [vmem:[#allocation36_spill] sm:$0xff] %v7034_v28  ;;  %v7037_v19 = vld [vmem:[#allocation4 + $0x1c0] sm:$0xff]  ;;  %v7040_v23 = vld [vmem:[#allocation4 + $0x1d0] sm:$0xff] }
 0x6db   :  { %2492 = vmatpush1.msra.mxu0 %v7025_v21  ;;  %2563 = vmatpush1.msra.mxu1 %v7028_v25  ;;  %9313 = vst [vmem:[#allocation33_spill] sm:$0xff] %v7037_v19  ;;  %9314 = vst [vmem:[#allocation38_spill] sm:$0xff] %v7040_v23  ;;  %v7043_v21 = vld [vmem:[#allocation4 + $0x1a8] sm:$0xff]  ;;  %v7046_v25 = vld [vmem:[#allocation4 + $0x1b8] sm:$0xff] }
 0x6dc   :  { %2493 = vmatprep.subr.mxu0 %v7031_v20  ;;  %2564 = vmatprep.subr.mxu1 %v7034_v28  ;;  %9315 = vst [vmem:[#allocation35_spill] sm:$0xff] %v7043_v21  ;;  %9316 = vst [vmem:[#allocation39_spill] sm:$0xff] %v7046_v25  ;;  %v7049_v20 = vld [vmem:[#allocation4 + $0x1a0] sm:$0xff]  ;;  %v7052_v28 = vld [vmem:[#allocation4 + $0x1b0] sm:$0xff] }
 0x6dd   :  { %2494 = vmatpush1.msra.mxu0 %v7037_v19  ;;  %2565 = vmatpush1.msra.mxu1 %v7040_v23  ;;  %9317 = vst [vmem:[#allocation37_spill] sm:$0xff] %v7049_v20  ;;  %9318 = vst [vmem:[#allocation40_spill] sm:$0xff] %v7052_v28  ;;  %v7055_v19 = vld [vmem:[#allocation4 + $0x188] sm:$0xff]  ;;  %v7058_v23 = vld [vmem:[#allocation4 + $0x198] sm:$0xff] }
 0x6de   :  { %2495 = vmatprep.subr.mxu0 %v7043_v21  ;;  %2566 = vmatprep.subr.mxu1 %v7046_v25  ;;  %9319 = vst [vmem:[#allocation41_spill] sm:$0xff] %v7055_v19  ;;  %9320 = vst [vmem:[#allocation42_spill] sm:$0xff] %v7058_v23  ;;  %v7061_v21 = vld [vmem:[#allocation4 + $0x180] sm:$0xff]  ;;  %v7064_v25 = vld [vmem:[#allocation4 + $0x190] sm:$0xff] }
 0x6df   :  { %2496 = vmatpush1.msra.mxu0 %v7049_v20  ;;  %2567 = vmatpush1.msra.mxu1 %v7052_v28  ;;  %9321 = vst [vmem:[#allocation43_spill] sm:$0xff] %v7061_v21  ;;  %9322 = vst [vmem:[#allocation44_spill] sm:$0xff] %v7064_v25  ;;  %v7067_v20 = vld [vmem:[#allocation4 + $0x168] sm:$0xff]  ;;  %v7070_v28 = vld [vmem:[#allocation4 + $0x178] sm:$0xff] }
 0x6e0   :  { %2497 = vmatprep.subr.mxu0 %v7055_v19  ;;  %2568 = vmatprep.subr.mxu1 %v7058_v23  ;;  %9323 = vst [vmem:[#allocation45_spill] sm:$0xff] %v7067_v20  ;;  %9324 = vst [vmem:[#allocation46_spill] sm:$0xff] %v7070_v28  ;;  %v7073_v19 = vld [vmem:[#allocation4 + $0x160] sm:$0xff]  ;;  %v7076_v23 = vld [vmem:[#allocation4 + $0x170] sm:$0xff] }
 0x6e1   :  { %2498 = vmatpush1.msra.mxu0 %v7061_v21  ;;  %2569 = vmatpush1.msra.mxu1 %v7064_v25  ;;  %9325 = vst [vmem:[#allocation47_spill] sm:$0xff] %v7073_v19  ;;  %9326 = vst [vmem:[#allocation48_spill] sm:$0xff] %v7076_v23  ;;  %v7079_v21 = vld [vmem:[#allocation4 + $0x148] sm:$0xff]  ;;  %v7082_v25 = vld [vmem:[#allocation4 + $0x158] sm:$0xff] }
 0x6e2   :  { %2499 = vmatprep.subr.mxu0 %v7067_v20  ;;  %2570 = vmatprep.subr.mxu1 %v7070_v28  ;;  %9327 = vst [vmem:[#allocation49_spill] sm:$0xff] %v7079_v21  ;;  %9328 = vst [vmem:[#allocation50_spill] sm:$0xff] %v7082_v25  ;;  %v7085_v20 = vld [vmem:[#allocation4 + $0x140] sm:$0xff]  ;;  %v7088_v28 = vld [vmem:[#allocation4 + $0x150] sm:$0xff] }
 0x6e3   :  { %2500 = vmatpush1.msra.mxu0 %v7073_v19  ;;  %2571 = vmatpush1.msra.mxu1 %v7076_v23  ;;  %9329 = vst [vmem:[#allocation51_spill] sm:$0xff] %v7085_v20  ;;  %9330 = vst [vmem:[#allocation52_spill] sm:$0xff] %v7088_v28  ;;  %v7091_v19 = vld [vmem:[#allocation4 + $0x128] sm:$0xff]  ;;  %v7094_v23 = vld [vmem:[#allocation4 + $0x138] sm:$0xff] }
 0x6e4   :  { %2501 = vmatprep.subr.mxu0 %v7079_v21  ;;  %2572 = vmatprep.subr.mxu1 %v7082_v25  ;;  %9331 = vst [vmem:[#allocation53_spill] sm:$0xff] %v7091_v19  ;;  %9332 = vst [vmem:[#allocation54_spill] sm:$0xff] %v7094_v23  ;;  %v7097_v21 = vld [vmem:[#allocation4 + $0x120] sm:$0xff]  ;;  %v7100_v25 = vld [vmem:[#allocation4 + $0x130] sm:$0xff] }
 0x6e5   :  { %2502 = vmatpush1.msra.mxu0 %v7085_v20  ;;  %2573 = vmatpush1.msra.mxu1 %v7088_v28  ;;  %9333 = vst [vmem:[#allocation55_spill] sm:$0xff] %v7097_v21  ;;  %9334 = vst [vmem:[#allocation56_spill] sm:$0xff] %v7100_v25  ;;  %v7103_v20 = vld [vmem:[#allocation4 + $0x108] sm:$0xff]  ;;  %v7106_v28 = vld [vmem:[#allocation4 + $0x118] sm:$0xff] }
 0x6e6   :  { %2503 = vmatprep.subr.mxu0 %v7091_v19  ;;  %2574 = vmatprep.subr.mxu1 %v7094_v23  ;;  %9335 = vst [vmem:[#allocation57_spill] sm:$0xff] %v7103_v20  ;;  %9336 = vst [vmem:[#allocation58_spill] sm:$0xff] %v7106_v28  ;;  %v7109_v19 = vld [vmem:[#allocation4 + $0x100] sm:$0xff]  ;;  %v7112_v23 = vld [vmem:[#allocation4 + $0x110] sm:$0xff] }
 0x6e7   :  { %2504 = vmatpush1.msra.mxu0 %v7097_v21  ;;  %2575 = vmatpush1.msra.mxu1 %v7100_v25  ;;  %9337 = vst [vmem:[#allocation59_spill] sm:$0xff] %v7109_v19  ;;  %9338 = vst [vmem:[#allocation60_spill] sm:$0xff] %v7112_v23  ;;  %v7115_v21 = vld [vmem:[#allocation4 + $0xe8] sm:$0xff]  ;;  %v7118_v25 = vld [vmem:[#allocation4 + $0xf8] sm:$0xff] }
 0x6e8   :  { %2505 = vmatprep.subr.mxu0 %v7103_v20  ;;  %2576 = vmatprep.subr.mxu1 %v7106_v28  ;;  %9339 = vst [vmem:[#allocation61_spill] sm:$0xff] %v7115_v21  ;;  %9340 = vst [vmem:[#allocation62_spill] sm:$0xff] %v7118_v25  ;;  %v7121_v20 = vld [vmem:[#allocation4 + $0xe0] sm:$0xff]  ;;  %v7124_v28 = vld [vmem:[#allocation4 + $0xf0] sm:$0xff] }
 0x6e9   :  { %2506 = vmatpush1.msra.mxu0 %v7109_v19  ;;  %2577 = vmatpush1.msra.mxu1 %v7112_v23  ;;  %9341 = vst [vmem:[#allocation63_spill] sm:$0xff] %v7121_v20  ;;  %9342 = vst [vmem:[#allocation64_spill] sm:$0xff] %v7124_v28  ;;  %v7127_v19 = vld [vmem:[#allocation4 + $0xc8] sm:$0xff]  ;;  %v7130_v23 = vld [vmem:[#allocation4 + $0xd8] sm:$0xff] }
 0x6ea   :  { %2507 = vmatprep.subr.mxu0 %v7115_v21  ;;  %2578 = vmatprep.subr.mxu1 %v7118_v25  ;;  %9343 = vst [vmem:[#allocation65_spill] sm:$0xff] %v7127_v19  ;;  %9344 = vst [vmem:[#allocation66_spill] sm:$0xff] %v7130_v23  ;;  %v7133_v21 = vld [vmem:[#allocation4 + $0xc0] sm:$0xff]  ;;  %v7136_v25 = vld [vmem:[#allocation4 + $0xd0] sm:$0xff] }
 0x6eb   :  { %2508 = vmatpush1.msra.mxu0 %v7121_v20  ;;  %2579 = vmatpush1.msra.mxu1 %v7124_v28  ;;  %9345 = vst [vmem:[#allocation67_spill] sm:$0xff] %v7133_v21  ;;  %9346 = vst [vmem:[#allocation68_spill] sm:$0xff] %v7136_v25  ;;  %v7139_v20 = vld [vmem:[#allocation4 + $0xa8] sm:$0xff]  ;;  %v7142_v28 = vld [vmem:[#allocation4 + $0xb8] sm:$0xff] }
 0x6ec   :  { %2509 = vmatprep.subr.mxu0 %v7127_v19  ;;  %2580 = vmatprep.subr.mxu1 %v7130_v23  ;;  %9347 = vst [vmem:[#allocation69_spill] sm:$0xff] %v7139_v20  ;;  %9348 = vst [vmem:[#allocation70_spill] sm:$0xff] %v7142_v28  ;;  %v7145_v19 = vld [vmem:[#allocation4 + $0xa0] sm:$0xff]  ;;  %v7148_v23 = vld [vmem:[#allocation4 + $0xb0] sm:$0xff] }
 0x6ed   :  { %2510 = vmatpush1.msra.mxu0 %v7133_v21  ;;  %2581 = vmatpush1.msra.mxu1 %v7136_v25  ;;  %9349 = vst [vmem:[#allocation71_spill] sm:$0xff] %v7145_v19  ;;  %9350 = vst [vmem:[#allocation72_spill] sm:$0xff] %v7148_v23  ;;  %v7151_v21 = vld [vmem:[#allocation4 + $0x88] sm:$0xff]  ;;  %v7154_v25 = vld [vmem:[#allocation4 + $0x98] sm:$0xff] }
 0x6ee   :  { %2511 = vmatprep.subr.mxu0 %v7139_v20  ;;  %2582 = vmatprep.subr.mxu1 %v7142_v28  ;;  %9351 = vst [vmem:[#allocation73_spill] sm:$0xff] %v7151_v21  ;;  %9352 = vst [vmem:[#allocation74_spill] sm:$0xff] %v7154_v25  ;;  %v7157_v20 = vld [vmem:[#allocation4 + $0x80] sm:$0xff]  ;;  %v7160_v28 = vld [vmem:[#allocation4 + $0x90] sm:$0xff] }
 0x6ef   :  { %2512 = vmatpush1.msra.mxu0 %v7145_v19  ;;  %2583 = vmatpush1.msra.mxu1 %v7148_v23  ;;  %9353 = vst [vmem:[#allocation75_spill] sm:$0xff] %v7157_v20  ;;  %9354 = vst [vmem:[#allocation76_spill] sm:$0xff] %v7160_v28  ;;  %v7163_v19 = vld [vmem:[#allocation4 + $0x68] sm:$0xff]  ;;  %v7166_v23 = vld [vmem:[#allocation4 + $0x78] sm:$0xff] }
 0x6f0   :  { %2513 = vmatprep.subr.mxu0 %v7151_v21  ;;  %2584 = vmatprep.subr.mxu1 %v7154_v25  ;;  %9355 = vst [vmem:[#allocation77_spill] sm:$0xff] %v7163_v19  ;;  %9356 = vst [vmem:[#allocation78_spill] sm:$0xff] %v7166_v23  ;;  %v7169_v21 = vld [vmem:[#allocation4 + $0x60] sm:$0xff]  ;;  %v7172_v25 = vld [vmem:[#allocation4 + $0x70] sm:$0xff] }
 0x6f1   :  { %2514 = vmatpush1.msra.mxu0 %v7157_v20  ;;  %2585 = vmatpush1.msra.mxu1 %v7160_v28  ;;  %9357 = vst [vmem:[#allocation79_spill] sm:$0xff] %v7169_v21  ;;  %9358 = vst [vmem:[#allocation80_spill] sm:$0xff] %v7172_v25  ;;  %v7175_v20 = vld [vmem:[#allocation4 + $0x48] sm:$0xff]  ;;  %v7178_v28 = vld [vmem:[#allocation4 + $0x58] sm:$0xff] }
 0x6f2   :  { %2515 = vmatprep.subr.mxu0 %v7163_v19  ;;  %2586 = vmatprep.subr.mxu1 %v7166_v23  ;;  %9359 = vst [vmem:[#allocation81_spill] sm:$0xff] %v7175_v20  ;;  %9360 = vst [vmem:[#allocation82_spill] sm:$0xff] %v7178_v28  ;;  %v7181_v19 = vld [vmem:[#allocation4 + $0x40] sm:$0xff]  ;;  %v7184_v23 = vld [vmem:[#allocation4 + $0x50] sm:$0xff] }
 0x6f3   :  { %2516 = vmatpush1.msra.mxu0 %v7169_v21  ;;  %2587 = vmatpush1.msra.mxu1 %v7172_v25  ;;  %9361 = vst [vmem:[#allocation83_spill] sm:$0xff] %v7181_v19  ;;  %9362 = vst [vmem:[#allocation84_spill] sm:$0xff] %v7184_v23  ;;  %v7187_v21 = vld [vmem:[#allocation4 + $0x28] sm:$0xff]  ;;  %v7190_v25 = vld [vmem:[#allocation4 + $0x38] sm:$0xff] }
 0x6f4   :  { %2517 = vmatprep.subr.mxu0 %v7175_v20  ;;  %2588 = vmatprep.subr.mxu1 %v7178_v28  ;;  %9363 = vst [vmem:[#allocation85_spill] sm:$0xff] %v7187_v21  ;;  %9364 = vst [vmem:[#allocation86_spill] sm:$0xff] %v7190_v25  ;;  %v7193_v20 = vld [vmem:[#allocation4 + $0x20] sm:$0xff]  ;;  %v7196_v28 = vld [vmem:[#allocation4 + $0x30] sm:$0xff] }
 0x6f5   :  { %2518 = vmatpush1.msra.mxu0 %v7181_v19  ;;  %2589 = vmatpush1.msra.mxu1 %v7184_v23  ;;  %9365 = vst [vmem:[#allocation87_spill] sm:$0xff] %v7193_v20  ;;  %9366 = vst [vmem:[#allocation88_spill] sm:$0xff] %v7196_v28  ;;  %v7199_v19 = vld [vmem:[#allocation4 + $0x8] sm:$0xff]  ;;  %v7202_v23 = vld [vmem:[#allocation4 + $0x18] sm:$0xff] }
 0x6f6   :  { %2519 = vmatprep.subr.mxu0 %v7187_v21  ;;  %2590 = vmatprep.subr.mxu1 %v7190_v25  ;;  %9367 = vst [vmem:[#allocation89_spill] sm:$0xff] %v7199_v19  ;;  %9368 = vst [vmem:[#allocation90_spill] sm:$0xff] %v7202_v23  ;;  %v7205_v21 = vld [vmem:[#allocation4] sm:$0xff]  ;;  %v7208_v25 = vld [vmem:[#allocation4 + $0x10] sm:$0xff] }
 0x6f7   :  { %2520 = vmatpush1.msra.mxu0 %v7193_v20  ;;  %2591 = vmatpush1.msra.mxu1 %v7196_v28  ;;  %9369 = vst [vmem:[#allocation91_spill] sm:$0xff] %v7205_v21  ;;  %9370 = vst [vmem:[#allocation92_spill] sm:$0xff] %v7208_v25  ;;  %v7211_v20 = vld [vmem:[#allocation4 + $0x3e8] sm:$0xff]  ;;  %v7214_v28 = vld [vmem:[#allocation4 + $0x3f8] sm:$0xff] }
 0x6f8   :  { %2521 = vmatprep.subr.mxu0 %v7199_v19  ;;  %2592 = vmatprep.subr.mxu1 %v7202_v23  ;;  %9371 = vst [vmem:[#allocation93_spill] sm:$0xff] %v7211_v20  ;;  %9372 = vst [vmem:[#allocation94_spill] sm:$0xff] %v7214_v28  ;;  %v7217_v19 = vld [vmem:[#allocation4 + $0x3e0] sm:$0xff]  ;;  %v7220_v23 = vld [vmem:[#allocation4 + $0x3f0] sm:$0xff] }
 0x6f9   :  { %2522 = vmatpush1.msra.mxu0 %v7205_v21  ;;  %2593 = vmatpush1.msra.mxu1 %v7208_v25  ;;  %9373 = vst [vmem:[#allocation95_spill] sm:$0xff] %v7217_v19  ;;  %9374 = vst [vmem:[#allocation96_spill] sm:$0xff] %v7220_v23  ;;  %v7223_v21 = vld [vmem:[#allocation4 + $0x3c8] sm:$0xff]  ;;  %v7226_v25 = vld [vmem:[#allocation4 + $0x3d8] sm:$0xff] }
 0x6fa   :  { %2523 = vmatprep.subr.mxu0 %v7211_v20  ;;  %2594 = vmatprep.subr.mxu1 %v7214_v28  ;;  %9375 = vst [vmem:[#allocation97_spill] sm:$0xff] %v7223_v21  ;;  %9376 = vst [vmem:[#allocation98_spill] sm:$0xff] %v7226_v25  ;;  %v7229_v20 = vld [vmem:[#allocation4 + $0x3c0] sm:$0xff]  ;;  %v7232_v28 = vld [vmem:[#allocation4 + $0x3d0] sm:$0xff] }
 0x6fb   :  { %2524 = vmatpush2.msra.mxu0 %v7217_v19  ;;  %2595 = vmatpush2.msra.mxu1 %v7220_v23  ;;  %9377 = vst [vmem:[#allocation99_spill] sm:$0xff] %v7229_v20  ;;  %9378 = vst [vmem:[#allocation100_spill] sm:$0xff] %v7232_v28  ;;  %v7235_v19 = vld [vmem:[#allocation4 + $0x3a8] sm:$0xff]  ;;  %v7238_v23 = vld [vmem:[#allocation4 + $0x3b8] sm:$0xff] }
 0x6fc   :  { %2525 = vmatprep.subr.mxu0 %v7223_v21  ;;  %2596 = vmatprep.subr.mxu1 %v7226_v25  ;;  %9379 = vst [vmem:[#allocation101_spill] sm:$0xff] %v7235_v19  ;;  %9380 = vst [vmem:[#allocation102_spill] sm:$0xff] %v7238_v23  ;;  %v7241_v21 = vld [vmem:[#allocation4 + $0x3a0] sm:$0xff]  ;;  %v7244_v25 = vld [vmem:[#allocation4 + $0x3b0] sm:$0xff] }
 0x6fd   :  { %2526 = vmatpush2.msra.mxu0 %v7229_v20  ;;  %2597 = vmatpush2.msra.mxu1 %v7232_v28  ;;  %9381 = vst [vmem:[#allocation103_spill] sm:$0xff] %v7241_v21  ;;  %9382 = vst [vmem:[#allocation104_spill] sm:$0xff] %v7244_v25  ;;  %v7247_v20 = vld [vmem:[#allocation4 + $0x388] sm:$0xff]  ;;  %v7250_v28 = vld [vmem:[#allocation4 + $0x398] sm:$0xff] }
 0x6fe   :  { %2527 = vmatprep.subr.mxu0 %v7235_v19  ;;  %2598 = vmatprep.subr.mxu1 %v7238_v23  ;;  %9383 = vst [vmem:[#allocation105_spill] sm:$0xff] %v7247_v20  ;;  %9384 = vst [vmem:[#allocation106_spill] sm:$0xff] %v7250_v28  ;;  %v7253_v19 = vld [vmem:[#allocation4 + $0x380] sm:$0xff]  ;;  %v7256_v23 = vld [vmem:[#allocation4 + $0x390] sm:$0xff] }
 0x6ff   :  { %2528 = vmatpush2.msra.mxu0 %v7241_v21  ;;  %2599 = vmatpush2.msra.mxu1 %v7244_v25  ;;  %9385 = vst [vmem:[#allocation107_spill] sm:$0xff] %v7253_v19  ;;  %9386 = vst [vmem:[#allocation108_spill] sm:$0xff] %v7256_v23  ;;  %v7259_v21 = vld [vmem:[#allocation4 + $0x368] sm:$0xff]  ;;  %v7262_v25 = vld [vmem:[#allocation4 + $0x378] sm:$0xff] }
 0x700   :  { %2529 = vmatprep.subr.mxu0 %v7247_v20  ;;  %2600 = vmatprep.subr.mxu1 %v7250_v28  ;;  %9387 = vst [vmem:[#allocation109_spill] sm:$0xff] %v7259_v21  ;;  %9388 = vst [vmem:[#allocation110_spill] sm:$0xff] %v7262_v25  ;;  %v7265_v20 = vld [vmem:[#allocation4 + $0x360] sm:$0xff]  ;;  %v7268_v28 = vld [vmem:[#allocation4 + $0x370] sm:$0xff] }
 0x701   :  { %2530 = vmatpush2.msra.mxu0 %v7253_v19  ;;  %2601 = vmatpush2.msra.mxu1 %v7256_v23  ;;  %9389 = vst [vmem:[#allocation111_spill] sm:$0xff] %v7265_v20  ;;  %9390 = vst [vmem:[#allocation112_spill] sm:$0xff] %v7268_v28  ;;  %v7271_v19 = vld [vmem:[#allocation4 + $0x348] sm:$0xff]  ;;  %v7274_v23 = vld [vmem:[#allocation4 + $0x358] sm:$0xff] }
 0x702   :  { %2531 = vmatprep.subr.mxu0 %v7259_v21  ;;  %2602 = vmatprep.subr.mxu1 %v7262_v25  ;;  %9391 = vst [vmem:[#allocation113_spill] sm:$0xff] %v7271_v19  ;;  %9392 = vst [vmem:[#allocation114_spill] sm:$0xff] %v7274_v23  ;;  %v7277_v21 = vld [vmem:[#allocation4 + $0x340] sm:$0xff]  ;;  %v7280_v25 = vld [vmem:[#allocation4 + $0x350] sm:$0xff] }
 0x703   :  { %2532 = vmatpush2.msra.mxu0 %v7265_v20  ;;  %2603 = vmatpush2.msra.mxu1 %v7268_v28  ;;  %9393 = vst [vmem:[#allocation115_spill] sm:$0xff] %v7277_v21  ;;  %9394 = vst [vmem:[#allocation116_spill] sm:$0xff] %v7280_v25  ;;  %v7283_v20 = vld [vmem:[#allocation4 + $0x328] sm:$0xff]  ;;  %v7286_v28 = vld [vmem:[#allocation4 + $0x338] sm:$0xff] }
 0x704   :  { %2533 = vmatprep.subr.mxu0 %v7271_v19  ;;  %2604 = vmatprep.subr.mxu1 %v7274_v23  ;;  %9395 = vst [vmem:[#allocation117_spill] sm:$0xff] %v7283_v20  ;;  %9396 = vst [vmem:[#allocation118_spill] sm:$0xff] %v7286_v28  ;;  %v7289_v19 = vld [vmem:[#allocation4 + $0x320] sm:$0xff]  ;;  %v7292_v23 = vld [vmem:[#allocation4 + $0x330] sm:$0xff] }
 0x705   :  { %2534 = vmatpush2.msra.mxu0 %v7277_v21  ;;  %2605 = vmatpush2.msra.mxu1 %v7280_v25  ;;  %9397 = vst [vmem:[#allocation119_spill] sm:$0xff] %v7289_v19  ;;  %9398 = vst [vmem:[#allocation120_spill] sm:$0xff] %v7292_v23  ;;  %v7295_v21 = vld [vmem:[#allocation4 + $0x308] sm:$0xff]  ;;  %v7298_v25 = vld [vmem:[#allocation4 + $0x318] sm:$0xff] }
 0x706   :  { %2535 = vmatprep.subr.mxu0 %v7283_v20  ;;  %2606 = vmatprep.subr.mxu1 %v7286_v28  ;;  %9399 = vst [vmem:[#allocation121_spill] sm:$0xff] %v7295_v21  ;;  %9400 = vst [vmem:[#allocation122_spill] sm:$0xff] %v7298_v25  ;;  %v7301_v20 = vld [vmem:[#allocation4 + $0x300] sm:$0xff]  ;;  %v7304_v28 = vld [vmem:[#allocation4 + $0x310] sm:$0xff] }
 0x707   :  { %2536 = vmatpush2.msra.mxu0 %v7289_v19  ;;  %2607 = vmatpush2.msra.mxu1 %v7292_v23  ;;  %9401 = vst [vmem:[#allocation123_spill] sm:$0xff] %v7301_v20  ;;  %9402 = vst [vmem:[#allocation124_spill] sm:$0xff] %v7304_v28  ;;  %v7307_v19 = vld [vmem:[#allocation4 + $0x2e8] sm:$0xff]  ;;  %v7310_v23 = vld [vmem:[#allocation4 + $0x2f8] sm:$0xff] }
 0x708   :  { %2537 = vmatprep.subr.mxu0 %v7295_v21  ;;  %2608 = vmatprep.subr.mxu1 %v7298_v25  ;;  %9403 = vst [vmem:[#allocation125_spill] sm:$0xff] %v7307_v19  ;;  %9404 = vst [vmem:[#allocation126_spill] sm:$0xff] %v7310_v23  ;;  %v7313_v21 = vld [vmem:[#allocation4 + $0x2e0] sm:$0xff]  ;;  %v7316_v25 = vld [vmem:[#allocation4 + $0x2f0] sm:$0xff] }
 0x709   :  { %2538 = vmatpush2.msra.mxu0 %v7301_v20  ;;  %2609 = vmatpush2.msra.mxu1 %v7304_v28  ;;  %9405 = vst [vmem:[#allocation127_spill] sm:$0xff] %v7313_v21  ;;  %9406 = vst [vmem:[#allocation128_spill] sm:$0xff] %v7316_v25  ;;  %v7319_v20 = vld [vmem:[#allocation4 + $0x2c8] sm:$0xff]  ;;  %v7322_v28 = vld [vmem:[#allocation4 + $0x2d8] sm:$0xff] }
 0x70a   :  { %2539 = vmatprep.subr.mxu0 %v7307_v19  ;;  %2610 = vmatprep.subr.mxu1 %v7310_v23  ;;  %9407 = vst [vmem:[#allocation129_spill] sm:$0xff] %v7319_v20  ;;  %9408 = vst [vmem:[#allocation130_spill] sm:$0xff] %v7322_v28  ;;  %v7325_v19 = vld [vmem:[#allocation4 + $0x2c0] sm:$0xff]  ;;  %v7328_v23 = vld [vmem:[#allocation4 + $0x2d0] sm:$0xff] }
 0x70b   :  { %2540 = vmatpush2.msra.mxu0 %v7313_v21  ;;  %2611 = vmatpush2.msra.mxu1 %v7316_v25  ;;  %9409 = vst [vmem:[#allocation131_spill] sm:$0xff] %v7325_v19  ;;  %9410 = vst [vmem:[#allocation132_spill] sm:$0xff] %v7328_v23  ;;  %v7331_v21 = vld [vmem:[#allocation4 + $0x2a8] sm:$0xff]  ;;  %v7334_v25 = vld [vmem:[#allocation4 + $0x2b8] sm:$0xff] }
 0x70c   :  { %2541 = vmatprep.subr.mxu0 %v7319_v20  ;;  %2612 = vmatprep.subr.mxu1 %v7322_v28  ;;  %9411 = vst [vmem:[#allocation133_spill] sm:$0xff] %v7331_v21  ;;  %9412 = vst [vmem:[#allocation134_spill] sm:$0xff] %v7334_v25  ;;  %v7337_v20 = vld [vmem:[#allocation4 + $0x2a0] sm:$0xff]  ;;  %v7340_v28 = vld [vmem:[#allocation4 + $0x2b0] sm:$0xff] }
 0x70d   :  { %2542 = vmatpush2.msra.mxu0 %v7325_v19  ;;  %2613 = vmatpush2.msra.mxu1 %v7328_v23  ;;  %9413 = vst [vmem:[#allocation135_spill] sm:$0xff] %v7337_v20  ;;  %9414 = vst [vmem:[#allocation136_spill] sm:$0xff] %v7340_v28  ;;  %v7343_v19 = vld [vmem:[#allocation4 + $0x288] sm:$0xff]  ;;  %v7346_v23 = vld [vmem:[#allocation4 + $0x298] sm:$0xff] }
 0x70e   :  { %2543 = vmatprep.subr.mxu0 %v7331_v21  ;;  %2614 = vmatprep.subr.mxu1 %v7334_v25  ;;  %9415 = vst [vmem:[#allocation137_spill] sm:$0xff] %v7343_v19  ;;  %9416 = vst [vmem:[#allocation138_spill] sm:$0xff] %v7346_v23  ;;  %v7349_v21 = vld [vmem:[#allocation4 + $0x280] sm:$0xff]  ;;  %v7352_v25 = vld [vmem:[#allocation4 + $0x290] sm:$0xff] }
 0x70f   :  { %2544 = vmatpush2.msra.mxu0 %v7337_v20  ;;  %2615 = vmatpush2.msra.mxu1 %v7340_v28  ;;  %9417 = vst [vmem:[#allocation139_spill] sm:$0xff] %v7349_v21  ;;  %9418 = vst [vmem:[#allocation140_spill] sm:$0xff] %v7352_v25  ;;  %v7355_v20 = vld [vmem:[#allocation4 + $0x268] sm:$0xff]  ;;  %v7358_v28 = vld [vmem:[#allocation4 + $0x278] sm:$0xff] }
 0x710   :  { %2545 = vmatprep.subr.mxu0 %v7343_v19  ;;  %2616 = vmatprep.subr.mxu1 %v7346_v23  ;;  %9419 = vst [vmem:[#allocation141_spill] sm:$0xff] %v7355_v20  ;;  %9420 = vst [vmem:[#allocation142_spill] sm:$0xff] %v7358_v28  ;;  %v7361_v19 = vld [vmem:[#allocation4 + $0x260] sm:$0xff]  ;;  %v7364_v23 = vld [vmem:[#allocation4 + $0x270] sm:$0xff] }
 0x711   :  { %2546 = vmatpush2.msra.mxu0 %v7349_v21  ;;  %2617 = vmatpush2.msra.mxu1 %v7352_v25  ;;  %9421 = vst [vmem:[#allocation143_spill] sm:$0xff] %v7361_v19  ;;  %9422 = vst [vmem:[#allocation144_spill] sm:$0xff] %v7364_v23  ;;  %v7367_v21 = vld [vmem:[#allocation4 + $0x248] sm:$0xff]  ;;  %v7370_v25 = vld [vmem:[#allocation4 + $0x258] sm:$0xff] }
 0x712   :  { %2547 = vmatprep.subr.mxu0 %v7355_v20  ;;  %2618 = vmatprep.subr.mxu1 %v7358_v28  ;;  %9423 = vst [vmem:[#allocation145_spill] sm:$0xff] %v7367_v21  ;;  %9424 = vst [vmem:[#allocation146_spill] sm:$0xff] %v7370_v25  ;;  %v7373_v20 = vld [vmem:[#allocation4 + $0x240] sm:$0xff]  ;;  %v7376_v28 = vld [vmem:[#allocation4 + $0x250] sm:$0xff] }
 0x713   :  { %2548 = vmatpush2.msra.mxu0 %v7361_v19  ;;  %2619 = vmatpush2.msra.mxu1 %v7364_v23  ;;  %9425 = vst [vmem:[#allocation147_spill] sm:$0xff] %v7373_v20  ;;  %9426 = vst [vmem:[#allocation148_spill] sm:$0xff] %v7376_v28  ;;  %v7379_v19 = vld [vmem:[#allocation4 + $0x228] sm:$0xff]  ;;  %v7382_v23 = vld [vmem:[#allocation4 + $0x238] sm:$0xff] }
 0x714   :  { %2549 = vmatprep.subr.mxu0 %v7367_v21  ;;  %2620 = vmatprep.subr.mxu1 %v7370_v25  ;;  %9427 = vst [vmem:[#allocation149_spill] sm:$0xff] %v7379_v19  ;;  %9428 = vst [vmem:[#allocation150_spill] sm:$0xff] %v7382_v23  ;;  %v7385_v21 = vld [vmem:[#allocation4 + $0x220] sm:$0xff]  ;;  %v7388_v25 = vld [vmem:[#allocation4 + $0x230] sm:$0xff] }
 0x715   :  { %2550 = vmatpush2.msra.mxu0 %v7373_v20  ;;  %2621 = vmatpush2.msra.mxu1 %v7376_v28  ;;  %9429 = vst [vmem:[#allocation151_spill] sm:$0xff] %v7385_v21  ;;  %9430 = vst [vmem:[#allocation152_spill] sm:$0xff] %v7388_v25  ;;  %v7391_v20 = vld [vmem:[#allocation4 + $0x208] sm:$0xff]  ;;  %v7394_v28 = vld [vmem:[#allocation4 + $0x218] sm:$0xff] }
 0x716   :  { %2551 = vmatprep.subr.mxu0 %v7379_v19  ;;  %2622 = vmatprep.subr.mxu1 %v7382_v23  ;;  %9431 = vst [vmem:[#allocation153_spill] sm:$0xff] %v7391_v20  ;;  %9432 = vst [vmem:[#allocation154_spill] sm:$0xff] %v7394_v28  ;;  %v7397_v19 = vld [vmem:[#allocation4 + $0x200] sm:$0xff]  ;;  %v7400_v23 = vld [vmem:[#allocation4 + $0x210] sm:$0xff] }
 0x717   :  { %2552 = vmatpush2.msra.mxu0 %v7385_v21  ;;  %2623 = vmatpush2.msra.mxu1 %v7388_v25  ;;  %9433 = vst [vmem:[#allocation155_spill] sm:$0xff] %v7397_v19  ;;  %9434 = vst [vmem:[#allocation156_spill] sm:$0xff] %v7400_v23 }
 0x718   :  { %2553 = vmatprep.subr.mxu0 %v7391_v20  ;;  %2624 = vmatprep.subr.mxu1 %v7394_v28 }
 0x719   :  { %2554 = vmatpush2.msra.mxu0 %v7397_v19  ;;  %2625 = vmatpush2.msra.mxu1 %v7400_v23 }
 0x71a   :  { %2662 = vmatprep.subr.mxu0 %v6795_v46  ;;  %2733 = vmatprep.subr.mxu1 %v6798_v24 }
 0x778   :  { %v2216_v25 = vpop.f32.mrf.mxu0  ;;  %v2287_v28 = vpop.f32.mrf.mxu1 }
 0x779   :  { %v2217_v21 = vadd.f32 %v2216_v25, %v5130_v32  ;;  %v2288_v46 = vadd.f32 %v2287_v28, %v9288_v47 }
 0x77a   :  { %v2218_v20 = vpop.f32.mrf.mxu0  ;;  %v2289_v19 = vpop.f32.mrf.mxu1 }
 0x77b   :  { %v3251_v42 = vmul.f32 -1.442695, %v2217_v21  ;;  %v2219_v26 = vadd.f32 %v2218_v20, %v9286_v53  ;;  %v2290_v34 = vadd.f32 %v2289_v19, %v9287_v41 }
 0x77d   :  { %3563 = vpow2.f32 %v3251_v42  ;;  %v3252_v35 = vmul.f32 -1.442695, %v2219_v26  ;;  %v3253_v31 = vmul.f32 -1.442695, %v2290_v34  ;;  %v3254_v42 = vld [vmem:[%s7792_s0 + $0xc0] sm:$0xff]  ;;  %v3255_v34 = vld [vmem:[%s7792_s0 + $0xc8] sm:$0xff] }
 0x77f   :  { %3565 = vpow2.f32 %v3252_v35 }
 0x780   :  { %3567 = vpow2.f32 %v3253_v31 }
 0x78a   :  { %v3564_v23 = vpop.eup %3563 }
 0x78b   :  { %v2295_v18 = vadd.f32 1.0, %v3564_v23 }
 0x78c   :  { %v3566_v24 = vpop.eup %3565 }
 0x78d   :  { %3569 = vrcp.f32 %v2295_v18  ;;  %v2301_v25 = vadd.f32 1.0, %v3566_v24  ;;  %v3568_v21 = vpop.eup %3567 }
 0x78e   :  { %3571 = vtanh.f32 %v2288_v46 }
 0x78f   :  { %3573 = vrcp.f32 %v2301_v25  ;;  %v2308_v25 = vadd.f32 1.0, %v3568_v21 }
 0x799   :  { %v2387_v35 = vpop.f32.mrf.mxu0  ;;  %v2458_v47 = vpop.f32.mrf.mxu1 }
 0x79a   :  { %v3570_v20 = vpop.eup %3569  ;;  %v2463_v26 = vadd.f32 %v3254_v42, %v2387_v35  ;;  %v3257_v42 = vld [vmem:[%s7792_s0 + $0xd8] sm:$0xff] }
 0x79b   :  { %v3572_v19 = vpop.eup %3571  ;;  %v2389_v23 = vpop.f32.mrf.mxu0 }
 0x79c   :  { %v3574_v28 = vpop.eup %3573  ;;  %v3258_v31 = vmul.f32 -1.442695, %v2463_v26  ;;  %v2464_v18 = vadd.f32 %v3255_v34, %v2389_v23  ;;  %v2312_v24 = vmul.f32 %v3572_v19, %v3570_v20  ;;  %v2460_v35 = vpop.f32.mrf.mxu1 }
 0x79d   :  { %v2311_v46 = vmul.f32 %v3574_v28, %v6812_v2  ;;  %v2466_v26 = vadd.f32 %v3257_v42, %v2460_v35  ;;  %v3256_v2 = vld [vmem:[%s7792_s0 + $0xd0] sm:$0xff] }
 0x79e   :  { %3575 = vpow2.f32 %v3258_v31  ;;  %v3259_v41 = vmul.f32 -1.442695, %v2464_v18  ;;  %v2465_v20 = vadd.f32 %v3256_v2, %v2458_v47 }
 0x79f   :  { %v7416_v53 = vadd.f32 %v2312_v24, %v2311_v46  ;;  %v3260_v21 = vmul.f32 -1.442695, %v2466_v26 }
 0x7a0   :  { %3577 = vpow2.f32 %v3259_v41 }
 0x7a1   :  { %3579 = vrcp.f32 %v2308_v25 }
 0x7a2   :  { %3581 = vtanh.f32 %v7416_v53 }
 0x7a3   :  { %3583 = vpow2.f32 %v3260_v21 }
 0x7ab   :  { %v3576_v34 = vpop.eup %3575 }
 0x7ac   :  { %v2470_v19 = vadd.f32 1.0, %v3576_v34 }
 0x7ad   :  { %v3578_v23 = vpop.eup %3577 }
 0x7ae   :  { %v3580_v41 = vpop.eup %3579  ;;  %3585 = vrcp.f32 %v2470_v19  ;;  %v2476_v28 = vadd.f32 1.0, %v3578_v23  ;;  %v9480_v19 = vld [vmem:[#allocation55_spill] sm:$0xff]  ;;  %v9481_v23 = vld [vmem:[#allocation56_spill] sm:$0xff] }
 0x7af   :  { %v3582_v31 = vpop.eup %3581  ;;  %3587 = vtanh.f32 %v2465_v20 }
 0x7b0   :  { %3589 = vrcp.f32 %v2476_v28  ;;  %v2315_v18 = vmul.f32 %v3582_v31, %v3580_v41  ;;  %v3584_v24 = vpop.eup %3583  ;;  %v9482_v41 = vld [vmem:[#allocation57_spill] sm:$0xff]  ;;  %v9483_v28 = vld [vmem:[#allocation58_spill] sm:$0xff]  ;;  %v9484_v31 = vld [vmem:[#allocation59_spill] sm:$0xff] }
 0x7b1   :  { %v2483_v35 = vadd.f32 1.0, %v3584_v24  ;;  %v9486_v24 = vld [vmem:[#allocation61_spill] sm:$0xff] }
 0x7b2   :  { %2555 = vmatprep.mubr.f32.mxu0 %v2315_v18  ;;  %2626 = vmatprep.mubr.f32.mxu1 %v2315_v18  ;;  %v9485_v18 = vld [vmem:[#allocation60_spill] sm:$0xff] }
 0x7b3   :  { %3591 = vrcp.f32 %v2483_v35  ;;  %v9490_v35 = vld [vmem:[#allocation65_spill] sm:$0xff] }
 0x7bb   :  { %v3586_v46 = vpop.eup %3585 }
 0x7bc   :  { %v3588_v25 = vpop.eup %3587 }
 0x7bd   :  { %v3590_v42 = vpop.eup %3589  ;;  %v2487_v26 = vmul.f32 %v3588_v25, %v3586_v46  ;;  %v9487_v46 = vld [vmem:[#allocation62_spill] sm:$0xff]  ;;  %v9488_v25 = vld [vmem:[#allocation63_spill] sm:$0xff] }
 0x7be   :  { %v2486_v47 = vmul.f32 %v3590_v42, %v6822_v29  ;;  %v9435_v29 = vld [vmem:[#allocation9_spill] sm:$0xff]  ;;  %v9489_v42 = vld [vmem:[#allocation64_spill] sm:$0xff] }
 0x7c0   :  { %v7426_v2 = vadd.f32 %v2487_v26, %v2486_v47  ;;  %v3592_v21 = vpop.eup %3591  ;;  %v9491_v26 = vld [vmem:[#allocation66_spill] sm:$0xff]  ;;  %v9492_v47 = vld [vmem:[#allocation67_spill] sm:$0xff] }
 0x7c2   :  { %3593 = vtanh.f32 %v7426_v2 }
 0x7cf   :  { %v3594_v34 = vpop.eup %3593 }
 0x7d0   :  { %v7429_v20 = vmul.f32 %v3594_v34, %v3592_v21  ;;  %v9493_v21 = vld [vmem:[#allocation68_spill] sm:$0xff]  ;;  %v9494_v34 = vld [vmem:[#allocation69_spill] sm:$0xff] }
 0x7d2   :  { %2556 = vmatmul.mubr.f32.vlgmr.msra.gmra.mxu0 %v7429_v20  ;;  %2627 = vmatmul.mubr.f32.vlgmr.msra.gmra.mxu1 %v7429_v20 }
 0x7d3   :  { %2663 = vmatpush1.msra.mxu0 %v6829_v22  ;;  %2734 = vmatpush1.msra.mxu1 %v6832_v27  ;;  %v9436_v22 = vld [vmem:[#allocation17_spill] sm:$0xff]  ;;  %v9437_v27 = vld [vmem:[#allocation10_spill] sm:$0xff] }
 0x7d4   :  { %2664 = vmatprep.subr.mxu0 %v6835_v37  ;;  %2735 = vmatprep.subr.mxu1 %v6838_v30  ;;  %v9438_v37 = vld [vmem:[#allocation19_spill] sm:$0xff] }
 0x7d5   :  { %2665 = vmatpush1.msra.mxu0 %v6841_v36  ;;  %2736 = vmatpush1.msra.mxu1 %v6844_v38  ;;  %v9439_v30 = vld [vmem:[#allocation11_spill] sm:$0xff]  ;;  %v9440_v36 = vld [vmem:[#allocation20_spill] sm:$0xff] }
 0x7d6   :  { %2666 = vmatprep.subr.mxu0 %v6847_v39  ;;  %2737 = vmatprep.subr.mxu1 %v6850_v33  ;;  %v9441_v38 = vld [vmem:[#allocation12_spill] sm:$0xff]  ;;  %v9442_v39 = vld [vmem:[#allocation21_spill] sm:$0xff]  ;;  %v9443_v33 = vld [vmem:[#allocation14_spill] sm:$0xff] }
 0x7d7   :  { %2667 = vmatpush1.msra.mxu0 %v6853_v40  ;;  %2738 = vmatpush1.msra.mxu1 %v6856_v43  ;;  %v9444_v40 = vld [vmem:[#allocation23_spill] sm:$0xff]  ;;  %v9445_v43 = vld [vmem:[#allocation16_spill] sm:$0xff] }
 0x7d8   :  { %2668 = vmatprep.subr.mxu0 %v6859_v44  ;;  %2739 = vmatprep.subr.mxu1 %v6862_v45  ;;  %v9446_v44 = vld [vmem:[#allocation25_spill] sm:$0xff]  ;;  %v9447_v45 = vld [vmem:[#allocation18_spill] sm:$0xff] }
 0x7d9   :  { %2669 = vmatpush1.msra.mxu0 %v6865_v49  ;;  %2740 = vmatpush1.msra.mxu1 %v6868_v51  ;;  %v9448_v49 = vld [vmem:[#allocation27_spill] sm:$0xff]  ;;  %v9449_v51 = vld [vmem:[#allocation22_spill] sm:$0xff] }
 0x7da   :  { %2670 = vmatprep.subr.mxu0 %v6871_v58  ;;  %2741 = vmatprep.subr.mxu1 %v6874_v59  ;;  %v9450_v58 = vld [vmem:[#allocation29_spill] sm:$0xff]  ;;  %v9451_v59 = vld [vmem:[#allocation24_spill] sm:$0xff] }
 0x7db   :  { %2671 = vmatpush1.msra.mxu0 %v6877_v12  ;;  %2742 = vmatpush1.msra.mxu1 %v6880_v60  ;;  %v9452_v12 = vmov 0.0   ;;  %v9453_v60 = vld [vmem:[#allocation30_spill] sm:$0xff] }
 0x7dc   :  { %2672 = vmatprep.subr.mxu0 %v6883_v57  ;;  %2743 = vmatprep.subr.mxu1 %v6886_v55  ;;  %v9454_v57 = vld [vmem:[#allocation26_spill] sm:$0xff]  ;;  %v9455_v55 = vld [vmem:[#allocation32_spill] sm:$0xff] }
 0x7dd   :  { %2673 = vmatpush1.msra.mxu0 %v6889_v61  ;;  %2744 = vmatpush1.msra.mxu1 %v6892_v0  ;;  %v9456_v61 = vld [vmem:[#allocation28_spill] sm:$0xff]  ;;  %v9457_v0 = vld [vmem:[#allocation34_spill] sm:$0xff] }
 0x7de   :  { %2674 = vmatprep.subr.mxu0 %v6895_v52  ;;  %2745 = vmatprep.subr.mxu1 %v6898_v1  ;;  %v9458_v52 = vld [vmem:[#allocation31_spill] sm:$0xff]  ;;  %v9459_v1 = vld [vmem:[#allocation36_spill] sm:$0xff] }
 0x7df   :  { %2675 = vmatpush1.msra.mxu0 %v6901_v9  ;;  %2746 = vmatpush1.msra.mxu1 %v6904_v50  ;;  %v9460_v9 = vld [vmem:[#allocation33_spill] sm:$0xff]  ;;  %v9461_v50 = vld [vmem:[#allocation38_spill] sm:$0xff] }
 0x7e0   :  { %2676 = vmatprep.subr.mxu0 %v6907_v16  ;;  %2747 = vmatprep.subr.mxu1 %v6910_v48  ;;  %v9462_v16 = vld [vmem:[#allocation35_spill] sm:$0xff] }
 0x7e1   :  { %2677 = vmatpush1.msra.mxu0 %v6913_v63  ;;  %2748 = vmatpush1.msra.mxu1 %v6916_v56  ;;  %v9463_v48 = vld [vmem:[#allocation39_spill] sm:$0xff]  ;;  %v9464_v63 = vld [vmem:[#allocation37_spill] sm:$0xff]  ;;  %v9465_v56 = vld [vmem:[#allocation40_spill] sm:$0xff] }
 0x7e2   :  { %2678 = vmatprep.subr.mxu0 %v6919_v54  ;;  %2749 = vmatprep.subr.mxu1 %v6922_v62  ;;  %v9466_v54 = vld [vmem:[#allocation41_spill] sm:$0xff]  ;;  %v9467_v62 = vld [vmem:[#allocation42_spill] sm:$0xff] }
 0x7e3   :  { %2679 = vmatpush1.msra.mxu0 %v6925_v5  ;;  %2750 = vmatpush1.msra.mxu1 %v6928_v3  ;;  %v9468_v5 = vld [vmem:[#allocation43_spill] sm:$0xff]  ;;  %v9469_v3 = vld [vmem:[#allocation44_spill] sm:$0xff] }
 0x7e4   :  { %2680 = vmatprep.subr.mxu0 %v6931_v4  ;;  %2751 = vmatprep.subr.mxu1 %v6934_v6  ;;  %v9470_v4 = vld [vmem:[#allocation45_spill] sm:$0xff]  ;;  %v9471_v6 = vld [vmem:[#allocation46_spill] sm:$0xff] }
 0x7e5   :  { %2681 = vmatpush1.msra.mxu0 %v6937_v7  ;;  %2752 = vmatpush1.msra.mxu1 %v6940_v8  ;;  %v9472_v7 = vld [vmem:[#allocation47_spill] sm:$0xff]  ;;  %v9473_v8 = vld [vmem:[#allocation48_spill] sm:$0xff] }
 0x7e6   :  { %2682 = vmatprep.subr.mxu0 %v6943_v10  ;;  %2753 = vmatprep.subr.mxu1 %v6946_v11  ;;  %v9474_v10 = vld [vmem:[#allocation49_spill] sm:$0xff]  ;;  %v9475_v11 = vld [vmem:[#allocation50_spill] sm:$0xff] }
 0x7e7   :  { %2683 = vmatpush1.msra.mxu0 %v6949_v13  ;;  %2754 = vmatpush1.msra.mxu1 %v6952_v14  ;;  %v9476_v13 = vld [vmem:[#allocation51_spill] sm:$0xff]  ;;  %v9477_v14 = vld [vmem:[#allocation52_spill] sm:$0xff] }
 0x7e8   :  { %2684 = vmatprep.subr.mxu0 %v6955_v15  ;;  %2755 = vmatprep.subr.mxu1 %v6958_v17  ;;  %v9478_v15 = vld [vmem:[#allocation53_spill] sm:$0xff]  ;;  %v9479_v17 = vld [vmem:[#allocation54_spill] sm:$0xff] }
 0x7e9   :  { %2685 = vmatpush1.msra.mxu0 %v9435_v29  ;;  %2756 = vmatpush1.msra.mxu1 %v9436_v22  ;;  %v9496_v29 = vld [vmem:[#allocation71_spill] sm:$0xff]  ;;  %v9497_v22 = vld [vmem:[#allocation72_spill] sm:$0xff] }
 0x7ea   :  { %2686 = vmatprep.subr.mxu0 %v9437_v27  ;;  %2757 = vmatprep.subr.mxu1 %v9438_v37  ;;  %v9498_v27 = vld [vmem:[#allocation73_spill] sm:$0xff]  ;;  %v9499_v37 = vld [vmem:[#allocation74_spill] sm:$0xff] }
 0x7eb   :  { %2687 = vmatpush1.msra.mxu0 %v9439_v30  ;;  %2758 = vmatpush1.msra.mxu1 %v9440_v36  ;;  %v9500_v30 = vld [vmem:[#allocation75_spill] sm:$0xff]  ;;  %v9501_v36 = vld [vmem:[#allocation76_spill] sm:$0xff] }
 0x7ec   :  { %2688 = vmatprep.subr.mxu0 %v9441_v38  ;;  %2759 = vmatprep.subr.mxu1 %v9442_v39  ;;  %v9502_v38 = vld [vmem:[#allocation77_spill] sm:$0xff]  ;;  %v9503_v39 = vld [vmem:[#allocation78_spill] sm:$0xff] }
 0x7ed   :  { %2689 = vmatpush1.msra.mxu0 %v9443_v33  ;;  %2760 = vmatpush1.msra.mxu1 %v9444_v40  ;;  %v9504_v33 = vld [vmem:[#allocation79_spill] sm:$0xff]  ;;  %v9505_v40 = vld [vmem:[#allocation80_spill] sm:$0xff] }
 0x7ee   :  { %2690 = vmatprep.subr.mxu0 %v9445_v43  ;;  %2761 = vmatprep.subr.mxu1 %v9446_v44  ;;  %v9506_v43 = vld [vmem:[#allocation81_spill] sm:$0xff]  ;;  %v9507_v44 = vld [vmem:[#allocation82_spill] sm:$0xff] }
 0x7ef   :  { %2691 = vmatpush1.msra.mxu0 %v9447_v45  ;;  %2762 = vmatpush1.msra.mxu1 %v9448_v49  ;;  %v9508_v45 = vld [vmem:[#allocation83_spill] sm:$0xff]  ;;  %v9509_v49 = vld [vmem:[#allocation84_spill] sm:$0xff] }
 0x7f0   :  { %2692 = vmatprep.subr.mxu0 %v9449_v51  ;;  %2763 = vmatprep.subr.mxu1 %v9450_v58  ;;  %v9510_v51 = vld [vmem:[#allocation85_spill] sm:$0xff]  ;;  %v9511_v58 = vld [vmem:[#allocation86_spill] sm:$0xff] }
 0x7f1   :  { %2693 = vmatpush1.msra.mxu0 %v9451_v59  ;;  %2726 = vmatprep.mubr.f32.mxu0 %v9452_v12  ;;  %v9512_v59 = vld [vmem:[#allocation87_spill] sm:$0xff] }
 0x7f2   :  { %2764 = vmatpush1.msra.mxu1 %v9453_v60  ;;  %2797 = vmatprep.mubr.f32.mxu1 %v9452_v12  ;;  %v9513_v60 = vld [vmem:[#allocation88_spill] sm:$0xff] }
 0x7f3   :  { %2727 = vmatmul.mubr.f32.vlgmr.msra.gmra.mxu0 %v7429_v20  ;;  %2798 = vmatmul.mubr.f32.vlgmr.msra.gmra.mxu1 %v7429_v20  ;;  %v9495_v20 = vld [vmem:[#allocation70_spill] sm:$0xff] }
 0x7f4   :  { %2832 = vmatprep.subr.mxu0 %v9454_v57  ;;  %2903 = vmatprep.subr.mxu1 %v9455_v55  ;;  %v9514_v57 = vld [vmem:[#allocation89_spill] sm:$0xff]  ;;  %v9515_v55 = vld [vmem:[#allocation90_spill] sm:$0xff] }
 0x7f5   :  { %2833 = vmatpush1.msra.mxu0 %v9456_v61  ;;  %2904 = vmatpush1.msra.mxu1 %v9457_v0  ;;  %v9516_v61 = vld [vmem:[#allocation91_spill] sm:$0xff]  ;;  %v9517_v0 = vld [vmem:[#allocation92_spill] sm:$0xff] }
 0x7f6   :  { %2834 = vmatprep.subr.mxu0 %v9458_v52  ;;  %2905 = vmatprep.subr.mxu1 %v9459_v1  ;;  %v9518_v52 = vld [vmem:[#allocation93_spill] sm:$0xff]  ;;  %v9519_v1 = vld [vmem:[#allocation94_spill] sm:$0xff] }
 0x7f7   :  { %2835 = vmatpush1.msra.mxu0 %v9460_v9  ;;  %2906 = vmatpush1.msra.mxu1 %v9461_v50  ;;  %v9520_v9 = vld [vmem:[#allocation95_spill] sm:$0xff]  ;;  %v9521_v50 = vld [vmem:[#allocation96_spill] sm:$0xff] }
 0x7f8   :  { %2836 = vmatprep.subr.mxu0 %v9462_v16  ;;  %2907 = vmatprep.subr.mxu1 %v9463_v48  ;;  %v9522_v16 = vld [vmem:[#allocation97_spill] sm:$0xff]  ;;  %v9523_v48 = vld [vmem:[#allocation98_spill] sm:$0xff] }
 0x7f9   :  { %2837 = vmatpush1.msra.mxu0 %v9464_v63  ;;  %2908 = vmatpush1.msra.mxu1 %v9465_v56  ;;  %v9524_v63 = vld [vmem:[#allocation99_spill] sm:$0xff]  ;;  %v9525_v56 = vld [vmem:[#allocation100_spill] sm:$0xff] }
 0x7fa   :  { %2838 = vmatprep.subr.mxu0 %v9466_v54  ;;  %2909 = vmatprep.subr.mxu1 %v9467_v62  ;;  %v9526_v54 = vld [vmem:[#allocation101_spill] sm:$0xff]  ;;  %v9527_v62 = vld [vmem:[#allocation102_spill] sm:$0xff] }
 0x7fb   :  { %2839 = vmatpush1.msra.mxu0 %v9468_v5  ;;  %2910 = vmatpush1.msra.mxu1 %v9469_v3  ;;  %v9528_v5 = vld [vmem:[#allocation103_spill] sm:$0xff]  ;;  %v9529_v3 = vld [vmem:[#allocation104_spill] sm:$0xff] }
 0x7fc   :  { %2840 = vmatprep.subr.mxu0 %v9470_v4  ;;  %2911 = vmatprep.subr.mxu1 %v9471_v6  ;;  %v9530_v4 = vld [vmem:[#allocation105_spill] sm:$0xff]  ;;  %v9531_v6 = vld [vmem:[#allocation106_spill] sm:$0xff] }
 0x7fd   :  { %2841 = vmatpush1.msra.mxu0 %v9472_v7  ;;  %2912 = vmatpush1.msra.mxu1 %v9473_v8  ;;  %v9532_v7 = vld [vmem:[#allocation107_spill] sm:$0xff]  ;;  %v9533_v8 = vld [vmem:[#allocation108_spill] sm:$0xff] }
 0x7fe   :  { %2842 = vmatprep.subr.mxu0 %v9474_v10  ;;  %2913 = vmatprep.subr.mxu1 %v9475_v11  ;;  %v9534_v10 = vld [vmem:[#allocation109_spill] sm:$0xff]  ;;  %v9535_v11 = vld [vmem:[#allocation110_spill] sm:$0xff] }
 0x7ff   :  { %2843 = vmatpush1.msra.mxu0 %v9476_v13  ;;  %2914 = vmatpush1.msra.mxu1 %v9477_v14  ;;  %v9536_v13 = vld [vmem:[#allocation111_spill] sm:$0xff]  ;;  %v9537_v14 = vld [vmem:[#allocation112_spill] sm:$0xff] }
 0x800   :  { %2844 = vmatprep.subr.mxu0 %v9478_v15  ;;  %2915 = vmatprep.subr.mxu1 %v9479_v17  ;;  %v9538_v15 = vld [vmem:[#allocation113_spill] sm:$0xff]  ;;  %v9539_v17 = vld [vmem:[#allocation114_spill] sm:$0xff] }
 0x801   :  { %2845 = vmatpush1.msra.mxu0 %v9480_v19  ;;  %2916 = vmatpush1.msra.mxu1 %v9481_v23  ;;  %v9540_v19 = vld [vmem:[#allocation115_spill] sm:$0xff]  ;;  %v9541_v23 = vld [vmem:[#allocation116_spill] sm:$0xff] }
 0x802   :  { %2846 = vmatprep.subr.mxu0 %v9482_v41  ;;  %2917 = vmatprep.subr.mxu1 %v9483_v28  ;;  %v9542_v41 = vld [vmem:[#allocation117_spill] sm:$0xff]  ;;  %v9543_v28 = vld [vmem:[#allocation118_spill] sm:$0xff] }
 0x803   :  { %2847 = vmatpush1.msra.mxu0 %v9484_v31  ;;  %2918 = vmatpush1.msra.mxu1 %v9485_v18  ;;  %v9544_v31 = vld [vmem:[#allocation119_spill] sm:$0xff]  ;;  %v9545_v18 = vld [vmem:[#allocation120_spill] sm:$0xff] }
 0x804   :  { %2848 = vmatprep.subr.mxu0 %v9486_v24  ;;  %2919 = vmatprep.subr.mxu1 %v9487_v46  ;;  %v9546_v24 = vld [vmem:[#allocation121_spill] sm:$0xff]  ;;  %v9547_v46 = vld [vmem:[#allocation122_spill] sm:$0xff] }
 0x805   :  { %2849 = vmatpush1.msra.mxu0 %v9488_v25  ;;  %2920 = vmatpush1.msra.mxu1 %v9489_v42  ;;  %v9548_v25 = vld [vmem:[#allocation123_spill] sm:$0xff]  ;;  %v9549_v42 = vld [vmem:[#allocation124_spill] sm:$0xff] }
 0x806   :  { %2850 = vmatprep.subr.mxu0 %v9490_v35  ;;  %2921 = vmatprep.subr.mxu1 %v9491_v26  ;;  %v9550_v35 = vld [vmem:[#allocation125_spill] sm:$0xff]  ;;  %v9551_v26 = vld [vmem:[#allocation126_spill] sm:$0xff] }
 0x807   :  { %2851 = vmatpush1.msra.mxu0 %v9492_v47  ;;  %2922 = vmatpush1.msra.mxu1 %v9493_v21  ;;  %v9552_v47 = vld [vmem:[#allocation127_spill] sm:$0xff]  ;;  %v9553_v21 = vld [vmem:[#allocation128_spill] sm:$0xff] }
 0x808   :  { %2852 = vmatprep.subr.mxu0 %v9494_v34  ;;  %2923 = vmatprep.subr.mxu1 %v9495_v20  ;;  %v9554_v34 = vld [vmem:[#allocation129_spill] sm:$0xff]  ;;  %v9555_v20 = vld [vmem:[#allocation130_spill] sm:$0xff] }
 0x809   :  { %2853 = vmatpush1.msra.mxu0 %v9496_v29  ;;  %2924 = vmatpush1.msra.mxu1 %v9497_v22  ;;  %v9556_v29 = vld [vmem:[#allocation131_spill] sm:$0xff]  ;;  %v9557_v22 = vld [vmem:[#allocation132_spill] sm:$0xff] }
 0x80a   :  { %2854 = vmatprep.subr.mxu0 %v9498_v27  ;;  %2925 = vmatprep.subr.mxu1 %v9499_v37  ;;  %v9558_v27 = vld [vmem:[#allocation133_spill] sm:$0xff]  ;;  %v9559_v37 = vld [vmem:[#allocation134_spill] sm:$0xff] }
 0x80b   :  { %2855 = vmatpush1.msra.mxu0 %v9500_v30  ;;  %2926 = vmatpush1.msra.mxu1 %v9501_v36  ;;  %v9560_v30 = vld [vmem:[#allocation135_spill] sm:$0xff]  ;;  %v9561_v36 = vld [vmem:[#allocation136_spill] sm:$0xff] }
 0x80c   :  { %2856 = vmatprep.subr.mxu0 %v9502_v38  ;;  %2927 = vmatprep.subr.mxu1 %v9503_v39  ;;  %v9562_v38 = vld [vmem:[#allocation137_spill] sm:$0xff]  ;;  %v9563_v39 = vld [vmem:[#allocation138_spill] sm:$0xff] }
 0x80d   :  { %2857 = vmatpush1.msra.mxu0 %v9504_v33  ;;  %2928 = vmatpush1.msra.mxu1 %v9505_v40  ;;  %v9564_v33 = vld [vmem:[#allocation139_spill] sm:$0xff]  ;;  %v9565_v40 = vld [vmem:[#allocation140_spill] sm:$0xff] }
 0x80e   :  { %2858 = vmatprep.subr.mxu0 %v9506_v43  ;;  %2929 = vmatprep.subr.mxu1 %v9507_v44  ;;  %v9566_v43 = vld [vmem:[#allocation141_spill] sm:$0xff]  ;;  %v9567_v44 = vld [vmem:[#allocation142_spill] sm:$0xff] }
 0x80f   :  { %2859 = vmatpush1.msra.mxu0 %v9508_v45  ;;  %2930 = vmatpush1.msra.mxu1 %v9509_v49  ;;  %v9568_v45 = vld [vmem:[#allocation143_spill] sm:$0xff]  ;;  %v9569_v49 = vld [vmem:[#allocation144_spill] sm:$0xff] }
 0x810   :  { %2860 = vmatprep.subr.mxu0 %v9510_v51  ;;  %2931 = vmatprep.subr.mxu1 %v9511_v58  ;;  %v9570_v51 = vld [vmem:[#allocation145_spill] sm:$0xff]  ;;  %v9571_v58 = vld [vmem:[#allocation146_spill] sm:$0xff] }
 0x811   :  { %2861 = vmatpush1.msra.mxu0 %v9512_v59  ;;  %2932 = vmatpush1.msra.mxu1 %v9513_v60  ;;  %v9572_v59 = vld [vmem:[#allocation147_spill] sm:$0xff]  ;;  %v9573_v60 = vld [vmem:[#allocation148_spill] sm:$0xff] }
 0x812   :  { %2862 = vmatprep.subr.mxu0 %v9514_v57  ;;  %2933 = vmatprep.subr.mxu1 %v9515_v55  ;;  %v9574_v57 = vld [vmem:[#allocation149_spill] sm:$0xff]  ;;  %v9575_v55 = vld [vmem:[#allocation150_spill] sm:$0xff] }
 0x813   :  { %2863 = vmatpush1.msra.mxu0 %v9516_v61  ;;  %2934 = vmatpush1.msra.mxu1 %v9517_v0  ;;  %v9576_v61 = vld [vmem:[#allocation151_spill] sm:$0xff]  ;;  %v9577_v0 = vld [vmem:[#allocation152_spill] sm:$0xff] }
 0x814   :  { %2864 = vmatprep.subr.mxu0 %v9518_v52  ;;  %2935 = vmatprep.subr.mxu1 %v9519_v1  ;;  %v9578_v52 = vld [vmem:[#allocation153_spill] sm:$0xff]  ;;  %v9579_v1 = vld [vmem:[#allocation154_spill] sm:$0xff] }
 0x815   :  { %2865 = vmatpush2.msra.mxu0 %v9520_v9  ;;  %2936 = vmatpush2.msra.mxu1 %v9521_v50  ;;  %v9580_v9 = vld [vmem:[#allocation155_spill] sm:$0xff]  ;;  %v9581_v50 = vld [vmem:[#allocation156_spill] sm:$0xff] }
 0x816   :  { %2866 = vmatprep.subr.mxu0 %v9522_v16  ;;  %2937 = vmatprep.subr.mxu1 %v9523_v48 }
 0x817   :  { %2867 = vmatpush2.msra.mxu0 %v9524_v63  ;;  %2938 = vmatpush2.msra.mxu1 %v9525_v56 }
 0x818   :  { %2868 = vmatprep.subr.mxu0 %v9526_v54  ;;  %2939 = vmatprep.subr.mxu1 %v9527_v62  ;;  %v9582_v54 = vld [vmem:[#allocation13_spill] sm:$0xff] }
 0x819   :  { %2869 = vmatpush2.msra.mxu0 %v9528_v5  ;;  %2940 = vmatpush2.msra.mxu1 %v9529_v3 }
 0x81a   :  { %2870 = vmatprep.subr.mxu0 %v9530_v4  ;;  %2941 = vmatprep.subr.mxu1 %v9531_v6  ;;  %v9583_v6 = vld [vmem:[#allocation8_spill] sm:$0xff] }
 0x81b   :  { %2871 = vmatpush2.msra.mxu0 %v9532_v7  ;;  %2942 = vmatpush2.msra.mxu1 %v9533_v8 }
 0x81c   :  { %2872 = vmatprep.subr.mxu0 %v9534_v10  ;;  %2943 = vmatprep.subr.mxu1 %v9535_v11  ;;  %v9584_v11 = vld [vmem:[#allocation15_spill] sm:$0xff] }
 0x81d   :  { %2873 = vmatpush2.msra.mxu0 %v9536_v13  ;;  %2944 = vmatpush2.msra.mxu1 %v9537_v14 }
 0x81e   :  { %2874 = vmatprep.subr.mxu0 %v9538_v15  ;;  %2945 = vmatprep.subr.mxu1 %v9539_v17 }
 0x81f   :  { %2875 = vmatpush2.msra.mxu0 %v9540_v19  ;;  %2946 = vmatpush2.msra.mxu1 %v9541_v23  ;;  %v3264_v19 = vld [vmem:[%s7792_s0 + $0xe0] sm:$0xff] }
 0x820   :  { %2876 = vmatprep.subr.mxu0 %v9542_v41  ;;  %2947 = vmatprep.subr.mxu1 %v9543_v28  ;;  %v3265_v28 = vld [vmem:[%s7792_s0 + $0xe8] sm:$0xff] }
 0x821   :  { %2877 = vmatpush2.msra.mxu0 %v9544_v31  ;;  %2948 = vmatpush2.msra.mxu1 %v9545_v18 }
 0x822   :  { %2878 = vmatprep.subr.mxu0 %v9546_v24  ;;  %2949 = vmatprep.subr.mxu1 %v9547_v46 }
 0x823   :  { %2879 = vmatpush2.msra.mxu0 %v9548_v25  ;;  %2950 = vmatpush2.msra.mxu1 %v9549_v42 }
 0x824   :  { %2880 = vmatprep.subr.mxu0 %v9550_v35  ;;  %2951 = vmatprep.subr.mxu1 %v9551_v26 }
 0x825   :  { %2881 = vmatpush2.msra.mxu0 %v9552_v47  ;;  %2952 = vmatpush2.msra.mxu1 %v9553_v21 }
 0x826   :  { %2882 = vmatprep.subr.mxu0 %v9554_v34  ;;  %2953 = vmatprep.subr.mxu1 %v9555_v20 }
 0x827   :  { %2883 = vmatpush2.msra.mxu0 %v9556_v29  ;;  %2954 = vmatpush2.msra.mxu1 %v9557_v22  ;;  %v3267_v22 = vld [vmem:[%s7792_s0 + $0xf8] sm:$0xff] }
 0x828   :  { %2884 = vmatprep.subr.mxu0 %v9558_v27  ;;  %2955 = vmatprep.subr.mxu1 %v9559_v37 }
 0x829   :  { %2885 = vmatpush2.msra.mxu0 %v9560_v30  ;;  %2956 = vmatpush2.msra.mxu1 %v9561_v36 }
 0x82a   :  { %2886 = vmatprep.subr.mxu0 %v9562_v38  ;;  %2957 = vmatprep.subr.mxu1 %v9563_v39 }
 0x82b   :  { %2887 = vmatpush2.msra.mxu0 %v9564_v33  ;;  %2958 = vmatpush2.msra.mxu1 %v9565_v40 }
 0x82c   :  { %2888 = vmatprep.subr.mxu0 %v9566_v43  ;;  %2959 = vmatprep.subr.mxu1 %v9567_v44 }
 0x82d   :  { %2889 = vmatpush2.msra.mxu0 %v9568_v45  ;;  %2960 = vmatpush2.msra.mxu1 %v9569_v49 }
 0x82e   :  { %2890 = vmatprep.subr.mxu0 %v9570_v51  ;;  %2961 = vmatprep.subr.mxu1 %v9571_v58 }
 0x82f   :  { %2891 = vmatpush2.msra.mxu0 %v9572_v59  ;;  %2962 = vmatpush2.msra.mxu1 %v9573_v60 }
 0x830   :  { %2892 = vmatprep.subr.mxu0 %v9574_v57  ;;  %2963 = vmatprep.subr.mxu1 %v9575_v55 }
 0x831   :  { %2893 = vmatpush2.msra.mxu0 %v9576_v61  ;;  %2964 = vmatpush2.msra.mxu1 %v9577_v0 }
 0x832   :  { %2894 = vmatprep.subr.mxu0 %v9578_v52  ;;  %2965 = vmatprep.subr.mxu1 %v9579_v1 }
 0x833   :  { %2895 = vmatpush2.msra.mxu0 %v9580_v9  ;;  %2966 = vmatpush2.msra.mxu1 %v9581_v50  ;;  %v3013_v9 = vld [vmem:[%s7796_s4 + $0x78] sm:$0xff]  ;;  %v3012_v50 = vld [vmem:[%s7796_s4 + $0x70] sm:$0xff] }
 0x834   :  { %3311 = vmatprep.subr.mxu0 %v9452_v12  ;;  %3346 = vmatprep.subr.mxu1 %v9452_v12 }
 0x892   :  { %v2557_v16 = vpop.f32.mrf.mxu0  ;;  %v2628_v5 = vpop.f32.mrf.mxu1 }
 0x893   :  { %v2558_v48 = vadd.f32 %v2557_v16, %v5130_v32  ;;  %v2629_v13 = vadd.f32 %v2628_v5, %v9584_v11  ;;  %v3010_v16 = vld [vmem:[%s7796_s4 + $0x60] sm:$0xff]  ;;  %v3005_v5 = vld [vmem:[%s7796_s4 + $0x38] sm:$0xff] }
 0x894   :  { %v2559_v63 = vpop.f32.mrf.mxu0  ;;  %v2630_v4 = vpop.f32.mrf.mxu1 }
 0x895   :  { %v3261_v56 = vmul.f32 -1.442695, %v2558_v48  ;;  %v2560_v62 = vadd.f32 %v2559_v63, %v9582_v54  ;;  %v2631_v7 = vadd.f32 %v2630_v4, %v9583_v6  ;;  %v3009_v48 = vld [vmem:[%s7796_s4 + $0x58] sm:$0xff]  ;;  %v3008_v63 = vld [vmem:[%s7796_s4 + $0x50] sm:$0xff]  ;;  %v3003_v4 = vld [vmem:[%s7796_s4 + $0x28] sm:$0xff] }
 0x897   :  { %3595 = vpow2.f32 %v3261_v56  ;;  %v3262_v3 = vmul.f32 -1.442695, %v2560_v62  ;;  %v3263_v8 = vmul.f32 -1.442695, %v2631_v7  ;;  %v3007_v56 = vld [vmem:[%s7796_s4 + $0x48] sm:$0xff]  ;;  %v3006_v62 = vld [vmem:[%s7796_s4 + $0x40] sm:$0xff] }
 0x898   :  { %v3002_v7 = vld [vmem:[%s7796_s4 + $0x20] sm:$0xff] }
 0x899   :  { %3597 = vpow2.f32 %v3262_v3  ;;  %v3004_v3 = vld [vmem:[%s7796_s4 + $0x30] sm:$0xff] }
 0x89a   :  { %3599 = vpow2.f32 %v3263_v8  ;;  %v3001_v8 = vld [vmem:[%s7796_s4 + $0x18] sm:$0xff] }
 0x8a4   :  { %v3596_v10 = vpop.eup %3595 }
 0x8a5   :  { %v2636_v14 = vadd.f32 1.0, %v3596_v10  ;;  %v3000_v10 = vld [vmem:[%s7796_s4 + $0x10] sm:$0xff] }
 0x8a6   :  { %v3598_v15 = vpop.eup %3597 }
 0x8a7   :  { %3601 = vrcp.f32 %v2636_v14  ;;  %v2642_v17 = vadd.f32 1.0, %v3598_v15  ;;  %v3600_v23 = vpop.eup %3599  ;;  %v2998_v14 = vld [vmem:[%s7796_s4] sm:$0xff]  ;;  %v3107_v15 = vld [vmem:[%s7798_s6 + $0x78] sm:$0xff] }
 0x8a8   :  { %3603 = vtanh.f32 %v2629_v13  ;;  %v2649_v21 = vadd.f32 1.0, %v3600_v23  ;;  %v2999_v13 = vld [vmem:[%s7796_s4 + $0x8] sm:$0xff]  ;;  %v3104_v23 = vld [vmem:[%s7798_s6 + $0x60] sm:$0xff] }
 0x8a9   :  { %3605 = vrcp.f32 %v2642_v17  ;;  %v3106_v17 = vld [vmem:[%s7798_s6 + $0x70] sm:$0xff] }
 0x8b3   :  { %v2728_v41 = vpop.f32.mrf.mxu0  ;;  %v2799_v34 = vpop.f32.mrf.mxu1 }
 0x8b4   :  { %v3602_v31 = vpop.eup %3601  ;;  %v2804_v18 = vadd.f32 %v3264_v19, %v2728_v41  ;;  %v3105_v19 = vld [vmem:[%s7798_s6 + $0x68] sm:$0xff]  ;;  %v3103_v41 = vld [vmem:[%s7798_s6 + $0x58] sm:$0xff] }
 0x8b5   :  { %v3604_v24 = vpop.eup %3603  ;;  %v2730_v46 = vpop.f32.mrf.mxu0 }
 0x8b6   :  { %v3606_v25 = vpop.eup %3605  ;;  %v3268_v42 = vmul.f32 -1.442695, %v2804_v18  ;;  %v2805_v35 = vadd.f32 %v3265_v28, %v2730_v46  ;;  %v2653_v26 = vmul.f32 %v3604_v24, %v3602_v31  ;;  %v2801_v27 = vpop.f32.mrf.mxu1  ;;  %v3102_v28 = vld [vmem:[%s7798_s6 + $0x50] sm:$0xff]  ;;  %v3101_v31 = vld [vmem:[%s7798_s6 + $0x48] sm:$0xff]  ;;  %v3100_v18 = vld [vmem:[%s7798_s6 + $0x40] sm:$0xff] }
 0x8b7   :  { %v2652_v47 = vmul.f32 %v3606_v25, %v7416_v53  ;;  %v2807_v37 = vadd.f32 %v3267_v22, %v2801_v27  ;;  %v3266_v53 = vld [vmem:[%s7792_s0 + $0xf0] sm:$0xff]  ;;  %v3099_v24 = vld [vmem:[%s7798_s6 + $0x38] sm:$0xff]  ;;  %v3097_v25 = vld [vmem:[%s7798_s6 + $0x28] sm:$0xff] }
 0x8b8   :  { %3607 = vpow2.f32 %v3268_v42  ;;  %v3269_v20 = vmul.f32 -1.442695, %v2805_v35  ;;  %v2806_v38 = vadd.f32 %v3266_v53, %v2799_v34  ;;  %v3098_v46 = vld [vmem:[%s7798_s6 + $0x30] sm:$0xff]  ;;  %v3096_v42 = vld [vmem:[%s7798_s6 + $0x20] sm:$0xff]  ;;  %v3095_v35 = vld [vmem:[%s7798_s6 + $0x18] sm:$0xff] }
 0x8b9   :  { %v7640_v29 = vadd.f32 %v2653_v26, %v2652_v47  ;;  %v3270_v30 = vmul.f32 -1.442695, %v2807_v37 }
 0x8ba   :  { %3609 = vpow2.f32 %v3269_v20 }
 0x8bb   :  { %3611 = vrcp.f32 %v2649_v21 }
 0x8bc   :  { %3613 = vtanh.f32 %v7640_v29 }
 0x8bd   :  { %3615 = vpow2.f32 %v3270_v30 }
 0x8c5   :  { %v3608_v36 = vpop.eup %3607 }
 0x8c6   :  { %v2811_v39 = vadd.f32 1.0, %v3608_v36 }
 0x8c7   :  { %v3610_v33 = vpop.eup %3609 }
 0x8c8   :  { %v3612_v40 = vpop.eup %3611  ;;  %3617 = vrcp.f32 %v2811_v39  ;;  %v2817_v43 = vadd.f32 1.0, %v3610_v33 }
 0x8c9   :  { %v3614_v44 = vpop.eup %3613  ;;  %3619 = vtanh.f32 %v2806_v38 }
 0x8ca   :  { %3621 = vrcp.f32 %v2817_v43  ;;  %v2656_v45 = vmul.f32 %v3614_v44, %v3612_v40  ;;  %v3616_v49 = vpop.eup %3615 }
 0x8cb   :  { %v2824_v60 = vadd.f32 1.0, %v3616_v49 }
 0x8cc   :  { %2896 = vmatprep.mubr.f32.mxu0 %v2656_v45  ;;  %2967 = vmatprep.mubr.f32.mxu1 %v2656_v45 }
 0x8cd   :  { %3623 = vrcp.f32 %v2824_v60  ;;  %v3094_v60 = vld [vmem:[%s7798_s6 + $0x10] sm:$0xff] }
 0x8d5   :  { %v3618_v51 = vpop.eup %3617 }
 0x8d6   :  { %v3620_v58 = vpop.eup %3619 }
 0x8d7   :  { %v3622_v59 = vpop.eup %3621  ;;  %v2828_v57 = vmul.f32 %v3620_v58, %v3618_v51 }
 0x8d8   :  { %v2827_v55 = vmul.f32 %v3622_v59, %v7426_v2  ;;  %v3011_v2 = vld [vmem:[%s7796_s4 + $0x68] sm:$0xff] }
 0x8da   :  { %v2829_v61 = vadd.f32 %v2828_v57, %v2827_v55  ;;  %v3624_v0 = vpop.eup %3623  ;;  %v3093_v57 = vld [vmem:[%s7798_s6 + $0x8] sm:$0xff]  ;;  %v3274_v55 = vld [vmem:[%s7797_s5] ss:$0 sm:$0xff] }
 0x8dc   :  { %3625 = vtanh.f32 %v2829_v61 }
 0x8e9   :  { %v3626_v52 = vpop.eup %3625 }
 0x8ea   :  { %v2831_v1 = vmul.f32 %v3626_v52, %v3624_v0 }
 0x8ec   :  { %2897 = vmatmul.mubr.f32.vlgmr.msra.gmra.mxu0 %v2831_v1  ;;  %2968 = vmatmul.mubr.f32.vlgmr.msra.gmra.mxu1 %v2831_v1 }
 0x8ed   :  { %3312 = vmatpush3.msra.mxu0 %v3013_v9  ;;  %3343 = vmatprep.mubr.msk.f32.mxu0 %vm4272_vm0, %v9452_v12  ;;  %v3275_v9 = vld [vmem:[%s7799_s7] ss:$0 sm:$0xff] }
 0x8ee   :  { %3313 = vmatprep.subr.mxu0 %v9452_v12  ;;  %3378 = vmatprep.mubr.msk.f32.mxu1 %vm4272_vm0, %v9452_v12 }
 0x8ef   :  { %3314 = vmatpush3.msra.mxu0 %v3012_v50  ;;  %3347 = vmatpush3.msra.mxu1 %v3107_v15 }
 0x8f0   :  { %3315 = vmatprep.subr.mxu0 %v9452_v12  ;;  %3348 = vmatprep.subr.mxu1 %v9452_v12 }
 0x8f1   :  { %3316 = vmatpush3.msra.mxu0 %v3011_v2  ;;  %3349 = vmatpush3.msra.mxu1 %v3106_v17 }
 0x8f2   :  { %3317 = vmatprep.subr.mxu0 %v9452_v12  ;;  %3350 = vmatprep.subr.mxu1 %v9452_v12 }
 0x8f3   :  { %3318 = vmatpush3.msra.mxu0 %v3010_v16  ;;  %3351 = vmatpush3.msra.mxu1 %v3105_v19 }
 0x8f4   :  { %3319 = vmatprep.subr.mxu0 %v9452_v12  ;;  %3352 = vmatprep.subr.mxu1 %v9452_v12 }
 0x8f5   :  { %3320 = vmatpush3.msra.mxu0 %v3009_v48  ;;  %3353 = vmatpush3.msra.mxu1 %v3104_v23 }
 0x8f6   :  { %3321 = vmatprep.subr.mxu0 %v9452_v12  ;;  %3354 = vmatprep.subr.mxu1 %v9452_v12 }
 0x8f7   :  { %3322 = vmatpush3.msra.mxu0 %v3008_v63  ;;  %3355 = vmatpush3.msra.mxu1 %v3103_v41 }
 0x8f8   :  { %3323 = vmatprep.subr.mxu0 %v9452_v12  ;;  %3356 = vmatprep.subr.mxu1 %v9452_v12 }
 0x8f9   :  { %3324 = vmatpush3.msra.mxu0 %v3007_v56  ;;  %3357 = vmatpush3.msra.mxu1 %v3102_v28 }
 0x8fa   :  { %3325 = vmatprep.subr.mxu0 %v9452_v12  ;;  %3358 = vmatprep.subr.mxu1 %v9452_v12 }
 0x8fb   :  { %3326 = vmatpush3.msra.mxu0 %v3006_v62  ;;  %3359 = vmatpush3.msra.mxu1 %v3101_v31 }
 0x8fc   :  { %3327 = vmatprep.subr.mxu0 %v9452_v12  ;;  %3360 = vmatprep.subr.mxu1 %v9452_v12 }
 0x8fd   :  { %3328 = vmatpush3.msra.mxu0 %v3005_v5  ;;  %3361 = vmatpush3.msra.mxu1 %v3100_v18 }
 0x8fe   :  { %3329 = vmatprep.subr.mxu0 %v9452_v12  ;;  %3362 = vmatprep.subr.mxu1 %v9452_v12 }
 0x8ff   :  { %3330 = vmatpush3.msra.mxu0 %v3004_v3  ;;  %3363 = vmatpush3.msra.mxu1 %v3099_v24 }
 0x900   :  { %3331 = vmatprep.subr.mxu0 %v9452_v12  ;;  %3364 = vmatprep.subr.mxu1 %v9452_v12 }
 0x901   :  { %3332 = vmatpush3.msra.mxu0 %v3003_v4  ;;  %3365 = vmatpush3.msra.mxu1 %v3098_v46 }
 0x902   :  { %3333 = vmatprep.subr.mxu0 %v9452_v12  ;;  %3366 = vmatprep.subr.mxu1 %v9452_v12 }
 0x903   :  { %3334 = vmatpush3.msra.mxu0 %v3002_v7  ;;  %3367 = vmatpush3.msra.mxu1 %v3097_v25 }
 0x904   :  { %3335 = vmatprep.subr.mxu0 %v9452_v12  ;;  %3368 = vmatprep.subr.mxu1 %v9452_v12 }
 0x905   :  { %3336 = vmatpush3.msra.mxu0 %v3001_v8  ;;  %3369 = vmatpush3.msra.mxu1 %v3096_v42 }
 0x906   :  { %3337 = vmatprep.subr.mxu0 %v9452_v12  ;;  %3370 = vmatprep.subr.mxu1 %v9452_v12 }
 0x907   :  { %3338 = vmatpush3.msra.mxu0 %v3000_v10  ;;  %3371 = vmatpush3.msra.mxu1 %v3095_v35 }
 0x908   :  { %3339 = vmatprep.subr.mxu0 %v9452_v12  ;;  %3372 = vmatprep.subr.mxu1 %v9452_v12 }
 0x909   :  { %3340 = vmatpush3.msra.mxu0 %v2999_v13  ;;  %3373 = vmatpush3.msra.mxu1 %v3094_v60 }
 0x90a   :  { %3341 = vmatprep.subr.mxu0 %v9452_v12  ;;  %3374 = vmatprep.subr.mxu1 %v9452_v12 }
 0x90b   :  { %3342 = vmatpush3.msra.mxu0 %v2998_v14  ;;  %3375 = vmatpush3.msra.mxu1 %v3093_v57 }
 0x90c   :  { %3376 = vmatprep.subr.mxu1 %v9452_v12 }
 0x9ac   :  { %v2898_v26 = vpop.f32.mrf.mxu0  ;;  %v2969_v22 = vpop.f32.mrf.mxu1 }
 0x9ad   :  { %v2899_v47 = vadd.f32 %v2898_v26, %v5130_v32  ;;  %v2970_v38 = vadd.f32 %v2969_v22, %v9584_v11 }
 0x9ae   :  { %v2900_v21 = vpop.f32.mrf.mxu0  ;;  %v2971_v37 = vpop.f32.mrf.mxu1 }
 0x9af   :  { %v3271_v34 = vmul.f32 -1.442695, %v2899_v47  ;;  %v2901_v20 = vadd.f32 %v2900_v21, %v9582_v54  ;;  %v2972_v53 = vadd.f32 %v2971_v37, %v9583_v6 }
 0x9b1   :  { %3627 = vpow2.f32 %v3271_v34  ;;  %v3272_v27 = vmul.f32 -1.442695, %v2901_v20  ;;  %v3273_v30 = vmul.f32 -1.442695, %v2972_v53 }
 0x9b3   :  { %3629 = vpow2.f32 %v3272_v27 }
 0x9b4   :  { %3631 = vpow2.f32 %v3273_v30 }
 0x9be   :  { %v3628_v36 = vpop.eup %3627 }
 0x9bf   :  { %v2977_v39 = vadd.f32 1.0, %v3628_v36 }
 0x9c0   :  { %v3630_v33 = vpop.eup %3629 }
 0x9c1   :  { %3633 = vrcp.f32 %v2977_v39  ;;  %v2983_v32 = vadd.f32 1.0, %v3630_v33  ;;  %v3632_v40 = vpop.eup %3631 }
 0x9c2   :  { %3635 = vtanh.f32 %v2970_v38  ;;  %v2990_v45 = vadd.f32 1.0, %v3632_v40 }
 0x9c3   :  { %3637 = vrcp.f32 %v2983_v32 }
 0x9c4   :  { %3639 = vrcp.f32 %v2990_v45 }
 0x9ce   :  { %v3634_v54 = vpop.eup %3633 }
 0x9cf   :  { %v3636_v43 = vpop.eup %3635 }
 0x9d0   :  { %v3638_v44 = vpop.eup %3637  ;;  %v2994_v49 = vmul.f32 %v3636_v43, %v3634_v54 }
 0x9d1   :  { %v2993_v51 = vmul.f32 %v3638_v44, %v7640_v29  ;;  %v3640_v58 = vpop.eup %3639  ;;  %v3092_v29 = vld [vmem:[%s7798_s6] sm:$0xff] }
 0x9d2   :  { %3377 = vmatpush3.msra.mxu1 %v3092_v29 }
 0x9d3   :  { %v2995_v6 = vadd.f32 %v2994_v49, %v2993_v51 }
 0x9d5   :  { %3641 = vtanh.f32 %v2995_v6 }
 0x9e2   :  { %v3642_v11 = vpop.eup %3641 }
 0x9e3   :  { %v2997_v59 = vmul.f32 %v3642_v11, %v3640_v58 }
 0x9e5   :  { %3344 = vmatmul.mubr.f32.vlgmr.msra.gmra.mxu0 %v2997_v59 }
 0xaa5   :  { %v3087_v61 = vpop.f32.mrf.mxu0 }
 0xaa6   :  { %v3088_v0 = vadd.f32 %v3274_v55, %v3087_v61 }
 0xaa7   :  { %v3345_v52 = vpop.f32.mrf.mxu0 }
 0xaa8   :  { %v3091_v1 = vmax.f32 %v3088_v0, 0.0 }
 0xaaa   :  { %3379 = vmatmul.mubr.f32.vlgmr.msra.gmra.mxu1 %v3091_v1 }
 0xb6a   :  { %v3181_v50 = vpop.f32.mrf.mxu1 }
 0xb6b   :  { %v3182_v2 = vadd.f32 %v3275_v9, %v3181_v50 }
 0xb6c   :  { %v3380_v16 = vpop.f32.mrf.mxu1 }
 0xb6d   :  { %v3276_v48 = vmul.f32 -1.442695, %v3182_v2 }
 0xb6f   :  { %3643 = vpow2.f32 %v3276_v48 }
 0xb7c   :  { %v3644_v12 = vpop.eup %3643 }
 0xb7d   :  { %v3188_v63 = vadd.f32 1.0, %v3644_v12 }
 0xb7f   :  { %3645 = vrcp.f32 %v3188_v63 }
 0xb8c   :  { %v3646_v56 = vpop.eup %3645 }
 0xb8d   :  { %3191 = vst [vmem:[%s7800_s8] sm:$0xff] %v3646_v56 }
 0xb8e   :  { %3196 = vsyncpa [#allocation3], 1 }
 0xb8f   :  { %3197 = vsyncpa [#allocation5], 1 }

</bundles_post_ra>
